<compile_context>
chip_gen: v7x
topology: tpu7x:2x2x1
jax: 0.10.0
libtpu: 0.0.40
codegen_flags: <defaults>
</compile_context>

<pallas_src>
import functools

import jax
import jax.numpy as jnp
from jax import lax
from jax.experimental import pallas as pl
from jax.experimental.pallas import tpu as pltpu

_SUBLANE = 8
_LANE = 128


def _round_up(v, m):
    return (v + m - 1) // m * m


# ----------------------------------------------------------------------------
# Fused Pallas kernel: num_layers LSTM + MLP head, chunked over time
# ----------------------------------------------------------------------------
def _bwlstm1_fused_kernel(
    x_ref, w_ih0_ref, w_ihr_ref, w_hh_ref, b_ref,
    w1_ref, b1_ref, w2_ref, b2_ref, h0_ref, c0_ref,
    z_ref, hT_ref, cT_ref,
    h_state, c_state, gx_buf, seq_buf,
    *, seq_len, needs_mask,
):
    """One time-chunk of the whole model.

    x_ref:    (TC*BP, D_in)     time-major-flattened input chunk
    w_ih0_ref:(D_in, 4*HP)      layer-0 input weights (pre-transposed, padded)
    w_ihr_ref:(max(L-1,1), HP, 4*HP)  layer 1..L-1 input weights
    w_hh_ref: (L, HP, 4*HP)     recurrent weights (pre-transposed, padded)
    b_ref:    (L, 1, 4*HP)      b_ih + b_hh per layer (f32)
    w1/b1/w2/b2:                MLP head (pre-transposed, padded)
    h0/c0:    (L, BP, HP)       initial state
    z_ref:    (TC*BP, OUT_P)    padded MLP output chunk
    hT/cT:    (L, BP, HP)       final state
    scratch:  h_state/c_state carried across chunks; gx_buf = hoisted input
              projection; seq_buf = current layer's hidden sequence.
    seq_len:  true (unpadded) sequence length; needs_mask: whether the last
              chunk contains padded timesteps whose state updates are frozen.
    """
    L = w_hh_ref.shape[0]
    HP = w_hh_ref.shape[1]            # padded hidden size (multiple of 128)
    N = x_ref.shape[0]                # TC * BP rows in this chunk
    BP = h0_ref.shape[1]              # padded batch (multiple of 8 sublanes)
    TC = N // BP
    cdt = w_hh_ref.dtype              # MXU operand dtype (f32, or bf16 opt-in)
    f32 = jnp.float32

    chunk = pl.program_id(0)

    @pl.when(chunk == 0)
    def _init_state():
        h_state[...] = h0_ref[...]
        c_state[...] = c0_ref[...]

    for l in range(L):
        # ---- input projection + bias for the whole chunk (hoisted) ----------
        if l == 0:
            din = x_ref.shape[1]
            if din <= 4:
                # tiny K: outer-product broadcast MAC on the VPU instead of a
                # K=1 MXU matmul (1/128 K-utilization + full systolic latency).
                xv = x_ref[...].astype(f32)                 # (N, din)
                w0 = w_ih0_ref[...].astype(f32)             # (din, 4*HP)
                gx = b_ref[l].astype(f32) + xv[:, 0:1] * w0[0:1, :]
                for k in range(1, din):
                    gx = gx + xv[:, k:k + 1] * w0[k:k + 1, :]
                gx_buf[...] = gx
            else:
                gx_buf[...] = (
                    jnp.dot(x_ref[...].astype(cdt), w_ih0_ref[...],
                            preferred_element_type=f32) + b_ref[l]
                )
        else:
            gx_buf[...] = (
                jnp.dot(seq_buf[...].astype(cdt), w_ihr_ref[l - 1],
                        preferred_element_type=f32) + b_ref[l]
            )

        # ---- serial recurrence: h/c live in vregs across the loop -----------
        def step(t, carry, l=l):
            h, c = carry
            row = pl.multiple_of(t * BP, BP)
            # W_hh read from VMEM inside the loop (3 vld slots/cycle) instead
            # of a 64-vreg value live across the unrolled body.
            gates = (
                jnp.dot(h.astype(cdt), w_hh_ref[l], preferred_element_type=f32)
                + gx_buf[pl.ds(row, BP), :]
            )                                               # (BP, 4*HP) i,f,g,o
            i_g = jax.nn.sigmoid(gates[:, 0 * HP:1 * HP])
            f_g = jax.nn.sigmoid(gates[:, 1 * HP:2 * HP])
            g_g = jnp.tanh(gates[:, 2 * HP:3 * HP])
            o_g = jax.nn.sigmoid(gates[:, 3 * HP:4 * HP])
            c_new = f_g * c + i_g * g_g
            h_new = o_g * jnp.tanh(c_new)
            if needs_mask:
                keep = (chunk * TC + t) < seq_len           # scalar predicate
                h_new = jnp.where(keep, h_new, h)
                c_new = jnp.where(keep, c_new, c)
            seq_buf[pl.ds(row, BP), :] = h_new              # lane-dense store
            return (h_new, c_new)

        h_fin, c_fin = lax.fori_loop(
            0, TC, step, (h_state[l], c_state[l]), unroll=min(TC, 8))
        h_state[l] = h_fin                                  # once per layer
        c_state[l] = c_fin

    # ---- fused MLP head on the whole (time-major flattened) chunk -----------
    h1 = (
        jnp.dot(seq_buf[...].astype(cdt), w1_ref[...],
                preferred_element_type=f32)
        + b1_ref[...]
    )
    h1 = jnp.where(h1 >= 0.0, h1, 0.01 * h1)                # LeakyReLU(0.01)
    z = (
        jnp.dot(h1.astype(cdt), w2_ref[...], preferred_element_type=f32)
        + b2_ref[...]
    )
    z_ref[...] = z.astype(z_ref.dtype)                      # lane-dense store

    @pl.when(chunk == pl.num_programs(0) - 1)
    def _write_final_state():
        hT_ref[...] = h_state[...]
        cT_ref[...] = c_state[...]


# ----------------------------------------------------------------------------
# Wrapper: pad / transpose / stack params, build the grid, call the kernel
# ----------------------------------------------------------------------------
def bwlstm1_forward(params, x, hx=None, *, return_states=False,
                    matmul_dtype=jnp.float32, t_chunk_cap=128):
    """x: (batch, seq, n_features) -> {'z': (batch, seq, 3)} [, (h_n, c_n)].

    matmul_dtype=jnp.bfloat16 feeds bf16 operands to the MXU (recommended on
    v6e/v7x) while keeping f32 accumulation and f32 gate math (v5e-safe).
    Default f32 matches the PyTorch reference numerics.
    """
    lstm = params["lstm"]
    fc = params["fc"]
    L = len(lstm)
    H = lstm[0]["w_hh"].shape[1]
    F = fc["w1"].shape[0]
    B, T, DIN = x.shape

    BP = _round_up(B, _SUBLANE)
    HP = _round_up(H, _LANE)
    FCP = _round_up(F, _LANE)
    OUTP = _LANE            # MLP out dim (3) padded for lane-dense stores
    f32 = jnp.float32
    mm_bytes = jnp.dtype(matmul_dtype).itemsize

    # ---- VMEM budgeting (v7x: 64 MiB physical): fixed-resident bytes,
    # per-timestep chunk bytes, cap TC so everything fits ~48 MiB ------------
    fixed_bytes = (
        2 * ((DIN * 4 * HP + max(L - 1, 1) * HP * 4 * HP + L * HP * 4 * HP
              + HP * FCP + FCP * OUTP) * mm_bytes
             + (L * 4 * HP + FCP + OUTP) * 4
             + 2 * L * BP * HP * 4)              # weights/biases/h0/c0 (x2 buf)
        + 2 * 2 * L * BP * HP * 4                # hT/cT output blocks
        + 2 * L * BP * HP * 4                    # h/c scratch
    )
    per_t_bytes = (BP * (4 * HP + HP) * 4        # gx_buf + seq_buf
                   + 2 * BP * DIN * 4            # x chunk (double-buffered)
                   + 2 * BP * OUTP * 4)          # z chunk (double-buffered)
    tc_vmem_cap = max(1, ((48 << 20) - fixed_bytes) // per_t_bytes)
    cap = max(1, min(int(t_chunk_cap), int(tc_vmem_cap)))

    # chunking: n_chunks = ceil(T/cap); TC minimal so padding <= n_chunks - 1
    n_chunks = -(-T // cap)
    TC = -(-T // n_chunks)
    T_pad = TC * n_chunks
    needs_mask = T_pad != T

    vmem_limit = int(1.3 * (fixed_bytes + TC * per_t_bytes)) + (2 << 20)
    vmem_limit = max(32 << 20, min(vmem_limit, 100 << 20))
    try:
        phys = int(pltpu.get_tpu_info().vmem_capacity_bytes)
        vmem_limit = min(vmem_limit, int(phys * 0.9))
    except Exception:
        vmem_limit = min(vmem_limit, 64 << 20)   # v7x-safe fallback

    # ---- parameter packing ---------------------------------------------------
    def pad_gate_mat(w, in_dim, in_pad):
        # torch layout (4H, in_dim), gate order i,f,g,o -> per-gate zero-pad to
        # HP and transpose so 4*HP lands on the lane axis: (in_pad, 4*HP).
        w4 = w.reshape(4, H, in_dim).astype(f32)
        w4 = jnp.pad(w4, ((0, 0), (0, HP - H), (0, in_pad - in_dim)))
        return w4.reshape(4 * HP, in_pad).T.astype(matmul_dtype)

    def pad_gate_bias(b):
        b4 = jnp.pad(b.reshape(4, H).astype(f32), ((0, 0), (0, HP - H)))
        return b4.reshape(1, 4 * HP)

    w_ih0_t = pad_gate_mat(lstm[0]["w_ih"], DIN, DIN)                     # (DIN, 4*HP)
    if L > 1:
        w_ihr_t = jnp.stack(
            [pad_gate_mat(lstm[l]["w_ih"], H, HP) for l in range(1, L)])  # (L-1, HP, 4*HP)
    else:
        w_ihr_t = jnp.zeros((1, HP, 4 * HP), matmul_dtype)                # unused dummy
    w_hh_t = jnp.stack([pad_gate_mat(lstm[l]["w_hh"], H, HP) for l in range(L)])
    b_all = jnp.stack([pad_gate_bias(lstm[l]["b_ih"] + lstm[l]["b_hh"])
                       for l in range(L)])                                # (L, 1, 4*HP)

    w1_t = jnp.pad(fc["w1"].astype(f32),
                   ((0, FCP - F), (0, HP - H))).T.astype(matmul_dtype)    # (HP, FCP)
    b1 = jnp.pad(fc["b1"].astype(f32), (0, FCP - F)).reshape(1, FCP)
    w2_t = jnp.pad(fc["w2"].astype(f32),
                   ((0, OUTP - 3), (0, FCP - F))).T.astype(matmul_dtype)  # (FCP, OUTP)
    b2 = jnp.pad(fc["b2"].astype(f32), (0, OUTP - 3)).reshape(1, OUTP)

    # time-major, batch padded to BP sublanes, time padded to T_pad, flattened
    x_tm = jnp.transpose(x.astype(f32), (1, 0, 2))
    x_tm = jnp.pad(x_tm, ((0, T_pad - T), (0, BP - B), (0, 0)))
    x_flat = x_tm.reshape(T_pad * BP, DIN)

    if hx is None:
        h0 = jnp.zeros((L, BP, HP), f32)
        c0 = jnp.zeros((L, BP, HP), f32)
    else:
        h0 = jnp.pad(hx[0].astype(f32), ((0, 0), (0, BP - B), (0, HP - H)))
        c0 = jnp.pad(hx[1].astype(f32), ((0, 0), (0, BP - B), (0, HP - H)))

    def full2(shape):
        return pl.BlockSpec(shape, lambda n: (0, 0))

    def full3(shape):
        return pl.BlockSpec(shape, lambda n: (0, 0, 0))

    grid_spec = pltpu.PrefetchScalarGridSpec(
        num_scalar_prefetch=0,
        grid=(n_chunks,),
        in_specs=[
            pl.BlockSpec((TC * BP, DIN), lambda n: (n, 0)),   # x, streamed per chunk
            full2((DIN, 4 * HP)),                             # W_ih layer 0
            full3((max(L - 1, 1), HP, 4 * HP)),               # W_ih layers 1..L-1
            full3((L, HP, 4 * HP)),                           # W_hh all layers
            full3((L, 1, 4 * HP)),                            # b_ih + b_hh all layers
            full2((HP, FCP)), full2((1, FCP)),                # fc1
            full2((FCP, OUTP)), full2((1, OUTP)),             # fc2
            full3((L, BP, HP)), full3((L, BP, HP)),           # h0, c0
        ],
        out_specs=(
            pl.BlockSpec((TC * BP, OUTP), lambda n: (n, 0)),  # z, streamed per chunk
            full3((L, BP, HP)), full3((L, BP, HP)),           # h_n, c_n
        ),
        scratch_shapes=[
            pltpu.VMEM((L, BP, HP), f32),         # carried h state
            pltpu.VMEM((L, BP, HP), f32),         # carried c state
            pltpu.VMEM((TC * BP, 4 * HP), f32),   # hoisted input projection
            pltpu.VMEM((TC * BP, HP), f32),       # inter-layer hidden sequence
        ],
    )

    kernel = functools.partial(_bwlstm1_fused_kernel,
                               seq_len=T, needs_mask=needs_mask)

    z_flat, hT, cT = pl.pallas_call(
        kernel,
        out_shape=(
            jax.ShapeDtypeStruct((T_pad * BP, OUTP), f32),
            jax.ShapeDtypeStruct((L, BP, HP), f32),
            jax.ShapeDtypeStruct((L, BP, HP), f32),
        ),
        grid_spec=grid_spec,
        compiler_params=pltpu.CompilerParams(
            # state is carried across time chunks -> serial grid axis
            dimension_semantics=("arbitrary",),
            vmem_limit_bytes=vmem_limit,
        ),
    )(x_flat, w_ih0_t, w_ihr_t, w_hh_t, b_all, w1_t, b1, w2_t, b2, h0, c0)

    z = jnp.transpose(z_flat.reshape(T_pad, BP, OUTP)[:T, :B, :3], (1, 0, 2))
    output = {"z": z}
    if return_states:
        return output, (hT[:, :B, :H], cT[:, :B, :H])
    return output


# ----------------------------------------------------------------------------
# Parameter init (mirrors BWLSTM1Model.__init__ / weights_init)
# ----------------------------------------------------------------------------
def init_params(key, *, n_features=1, num_layers=3, n_dim_model=32, n_dim_fc=None):
    n_dim_fc = n_dim_fc or n_dim_model // 2
    H = n_dim_model
    params = {"lstm": [], "fc": {}}

    for layer in range(num_layers):
        d_in = n_features if layer == 0 else H
        key, k1, k2, k3, k4 = jax.random.split(key, 5)
        # xavier_normal_ over the full (4H, d_in) weight_ih
        std_ih = (2.0 / (d_in + 4 * H)) ** 0.5
        w_ih = std_ih * jax.random.normal(k1, (4 * H, d_in), jnp.float32)
        # xavier_normal_ per (H, H) gate block of weight_hh
        std_hh = (2.0 / (2 * H)) ** 0.5
        w_hh = std_hh * jax.random.normal(k2, (4 * H, H), jnp.float32)
        # biases keep the PyTorch LSTM default U(-1/sqrt(H), 1/sqrt(H))
        bound = 1.0 / (H ** 0.5)
        b_ih = jax.random.uniform(k3, (4 * H,), jnp.float32, -bound, bound)
        b_hh = jax.random.uniform(k4, (4 * H,), jnp.float32, -bound, bound)
        params["lstm"].append({"w_ih": w_ih, "w_hh": w_hh, "b_ih": b_ih, "b_hh": b_hh})

    # MLP: orthogonal init with leaky_relu(0.01) gain; default Linear bias init
    gain = (2.0 / (1.0 + 0.01 ** 2)) ** 0.5
    orth = jax.nn.initializers.orthogonal(scale=gain)
    key, k1, k2, k3, k4 = jax.random.split(key, 5)
    params["fc"]["w1"] = orth(k1, (n_dim_fc, n_dim_model), jnp.float32)
    params["fc"]["w2"] = orth(k2, (3, n_dim_fc), jnp.float32)
    b1_bound = 1.0 / (n_dim_model ** 0.5)
    b2_bound = 1.0 / (n_dim_fc ** 0.5)
    params["fc"]["b1"] = jax.random.uniform(k3, (n_dim_fc,), jnp.float32,
                                            -b1_bound, b1_bound)
    params["fc"]["b2"] = jax.random.uniform(k4, (3,), jnp.float32,
                                            -b2_bound, b2_bound)
    return params


# ----------------------------------------------------------------------------
# Pure-JAX reference (for the built-in correctness check)
# ----------------------------------------------------------------------------
def _reference_forward(params, x, hx=None):
    lstm = params["lstm"]
    fc = params["fc"]
    L = len(lstm)
    H = lstm[0]["w_hh"].shape[1]
    B, T, _ = x.shape
    hi = lax.Precision.HIGHEST
    if hx is None:
        hs = [jnp.zeros((B, H), jnp.float32) for _ in range(L)]
        cs = [jnp.zeros((B, H), jnp.float32) for _ in range(L)]
    else:
        hs = [hx[0][l] for l in range(L)]
        cs = [hx[1][l] for l in range(L)]
    seq = x.astype(jnp.float32)
    for l, p in enumerate(lstm):
        b = p["b_ih"] + p["b_hh"]
        h, c = hs[l], cs[l]
        outs = []
        for t in range(T):
            g = (jnp.dot(seq[:, t], p["w_ih"].T, precision=hi)
                 + jnp.dot(h, p["w_hh"].T, precision=hi) + b)
            i = jax.nn.sigmoid(g[:, :H])
            f = jax.nn.sigmoid(g[:, H:2 * H])
            gg = jnp.tanh(g[:, 2 * H:3 * H])
            o = jax.nn.sigmoid(g[:, 3 * H:])
            c = f * c + i * gg
            h = o * jnp.tanh(c)
            outs.append(h)
        seq = jnp.stack(outs, axis=1)
        hs[l], cs[l] = h, c
    h1 = jnp.dot(seq, fc["w1"].T, precision=hi) + fc["b1"]
    h1 = jnp.where(h1 >= 0.0, h1, 0.01 * h1)
    z = jnp.dot(h1, fc["w2"].T, precision=hi) + fc["b2"]
    return {"z": z}, (jnp.stack(hs), jnp.stack(cs))


# ----------------------------------------------------------------------------
if __name__ == "__main__":
    key = jax.random.PRNGKey(0)
    key, pkey, xkey = jax.random.split(key, 3)

    BATCH, SEQ, N_FEATURES = 2, 8, 1
    NUM_LAYERS, N_DIM_MODEL, N_DIM_FC = 3, 32, 16

    params = init_params(pkey, n_features=N_FEATURES, num_layers=NUM_LAYERS,
                         n_dim_model=N_DIM_MODEL, n_dim_fc=N_DIM_FC)
    x = jax.random.normal(xkey, (BATCH, SEQ, N_FEATURES), jnp.float32)

    # ---- f32 MXU operands: matches the PyTorch reference numerics ----------
    fwd = jax.jit(functools.partial(bwlstm1_forward, return_states=True))
    out, (h_n, c_n) = fwd(params, x)
    z = jax.block_until_ready(out["z"])
    h_n = jax.block_until_ready(h_n)
    c_n = jax.block_until_ready(c_n)

    assert z.shape == (BATCH, SEQ, 3), z.shape
    assert h_n.shape == (NUM_LAYERS, BATCH, N_DIM_MODEL), h_n.shape
    assert c_n.shape == (NUM_LAYERS, BATCH, N_DIM_MODEL), c_n.shape
    assert bool(jnp.all(jnp.isfinite(z)))

    ref_out, (h_ref, c_ref) = _reference_forward(params, x)
    assert bool(jnp.allclose(z, ref_out["z"], atol=2e-2, rtol=2e-2)), (
        float(jnp.max(jnp.abs(z - ref_out["z"]))))
    assert bool(jnp.allclose(h_n, h_ref, atol=2e-2, rtol=2e-2))
    assert bool(jnp.allclose(c_n, c_ref, atol=2e-2, rtol=2e-2))

    # ---- exercise the padded-tail path (T not a multiple of the chunk) -----
    fwd_tail = jax.jit(functools.partial(bwlstm1_forward, return_states=True,
                                         t_chunk_cap=3))
    out_t, (h_t, c_t) = fwd_tail(params, x)
    z_t = jax.block_until_ready(out_t["z"])
    assert bool(jnp.allclose(z_t, ref_out["z"], atol=2e-2, rtol=2e-2))
    assert bool(jnp.allclose(h_t, h_ref, atol=2e-2, rtol=2e-2))
    assert bool(jnp.allclose(c_t, c_ref, atol=2e-2, rtol=2e-2))

    # ---- bf16 MXU-operand path (recommended on v6e/v7x; f32 accumulation) --
    fwd_bf16 = jax.jit(functools.partial(bwlstm1_forward,
                                         matmul_dtype=jnp.bfloat16))
    z_bf16 = jax.block_until_ready(fwd_bf16(params, x)["z"])
    assert z_bf16.shape == (BATCH, SEQ, 3)
    assert bool(jnp.all(jnp.isfinite(z_bf16)))
    assert bool(jnp.allclose(z_bf16, ref_out["z"], atol=0.25, rtol=0.25))

    print("KERNEL_OK")
</pallas_src>

<mosaic_0001>
module attributes {stable_mosaic.version = 11 : i64} {
  func.func @_bwlstm1_fused_kernel(%arg0: i32, %arg1: memref<64x1xf32, #tpu.memory_space<vmem>>, %arg2: memref<1x512xf32, #tpu.memory_space<vmem>>, %arg3: memref<2x128x512xf32, #tpu.memory_space<vmem>>, %arg4: memref<3x128x512xf32, #tpu.memory_space<vmem>>, %arg5: memref<3x1x512xf32, #tpu.memory_space<vmem>>, %arg6: memref<128x128xf32, #tpu.memory_space<vmem>>, %arg7: memref<1x128xf32, #tpu.memory_space<vmem>>, %arg8: memref<128x128xf32, #tpu.memory_space<vmem>>, %arg9: memref<1x128xf32, #tpu.memory_space<vmem>>, %arg10: memref<3x8x128xf32, #tpu.memory_space<vmem>>, %arg11: memref<3x8x128xf32, #tpu.memory_space<vmem>>, %arg12: memref<64x128xf32, #tpu.memory_space<vmem>>, %arg13: memref<3x8x128xf32, #tpu.memory_space<vmem>>, %arg14: memref<3x8x128xf32, #tpu.memory_space<vmem>>, %arg15: memref<3x8x128xf32, #tpu.memory_space<vmem>>, %arg16: memref<3x8x128xf32, #tpu.memory_space<vmem>>, %arg17: memref<64x512xf32, #tpu.memory_space<vmem>>, %arg18: memref<64x128xf32, #tpu.memory_space<vmem>>) attributes {dimension_semantics = [#tpu.dimension_semantics<arbitrary>], iteration_bounds = array<i64: 1>, scalar_prefetch = 0 : i64, scratch_operands = 4 : i64, tpu.core_type = #tpu.core_type<tc>, window_params = [{transform_indices = @transform_0, window_bounds = array<i64: 64, 1>}, {pipeline_mode = #tpu.pipeline_mode<synchronous>, transform_indices = @transform_1, window_bounds = array<i64: 1, 512>}, {pipeline_mode = #tpu.pipeline_mode<synchronous>, transform_indices = @transform_2, window_bounds = array<i64: 2, 128, 512>}, {pipeline_mode = #tpu.pipeline_mode<synchronous>, transform_indices = @transform_3, window_bounds = array<i64: 3, 128, 512>}, {pipeline_mode = #tpu.pipeline_mode<synchronous>, transform_indices = @transform_4, window_bounds = array<i64: 3, 1, 512>}, {pipeline_mode = #tpu.pipeline_mode<synchronous>, transform_indices = @transform_5, window_bounds = array<i64: 128, 128>}, {pipeline_mode = #tpu.pipeline_mode<synchronous>, transform_indices = @transform_6, window_bounds = array<i64: 1, 128>}, {pipeline_mode = #tpu.pipeline_mode<synchronous>, transform_indices = @transform_7, window_bounds = array<i64: 128, 128>}, {pipeline_mode = #tpu.pipeline_mode<synchronous>, transform_indices = @transform_8, window_bounds = array<i64: 1, 128>}, {pipeline_mode = #tpu.pipeline_mode<synchronous>, transform_indices = @transform_9, window_bounds = array<i64: 3, 8, 128>}, {pipeline_mode = #tpu.pipeline_mode<synchronous>, transform_indices = @transform_10, window_bounds = array<i64: 3, 8, 128>}, {transform_indices = @transform_11, window_bounds = array<i64: 64, 128>}, {pipeline_mode = #tpu.pipeline_mode<synchronous>, transform_indices = @transform_12, window_bounds = array<i64: 3, 8, 128>}, {pipeline_mode = #tpu.pipeline_mode<synchronous>, transform_indices = @transform_13, window_bounds = array<i64: 3, 8, 128>}]} {
    %c0_i32 = arith.constant 0 : i32
    %0 = arith.cmpi eq, %arg0, %c0_i32 : i32
    %1 = arith.extui %0 : i1 to i32
    %c0_i32_0 = arith.constant 0 : i32
    %2 = arith.cmpi ne, %1, %c0_i32_0 : i32
    scf.if %2 {
      %c0_341 = arith.constant 0 : index
      %c0_342 = arith.constant 0 : index
      %c0_343 = arith.constant 0 : index
      %921 = vector.load %arg10[%c0_341, %c0_342, %c0_343] : memref<3x8x128xf32, #tpu.memory_space<vmem>>, vector<3x8x128xf32>
      %c0_344 = arith.constant 0 : index
      %c0_345 = arith.constant 0 : index
      %c0_346 = arith.constant 0 : index
      %922 = vector.load %arg15[%c0_344, %c0_345, %c0_346] : memref<3x8x128xf32, #tpu.memory_space<vmem>>, vector<3x8x128xf32>
      tpu.vector_store %arg15[%c0_344, %c0_345, %c0_346], %921 {strides = array<i32>} : memref<3x8x128xf32, #tpu.memory_space<vmem>>, vector<3x8x128xf32>,
      %c0_347 = arith.constant 0 : index
      %c0_348 = arith.constant 0 : index
      %c0_349 = arith.constant 0 : index
      %923 = vector.load %arg11[%c0_347, %c0_348, %c0_349] : memref<3x8x128xf32, #tpu.memory_space<vmem>>, vector<3x8x128xf32>
      %c0_350 = arith.constant 0 : index
      %c0_351 = arith.constant 0 : index
      %c0_352 = arith.constant 0 : index
      %924 = vector.load %arg16[%c0_350, %c0_351, %c0_352] : memref<3x8x128xf32, #tpu.memory_space<vmem>>, vector<3x8x128xf32>
      tpu.vector_store %arg16[%c0_350, %c0_351, %c0_352], %923 {strides = array<i32>} : memref<3x8x128xf32, #tpu.memory_space<vmem>>, vector<3x8x128xf32>,
    } else {
    }
    %c0 = arith.constant 0 : index
    %c0_1 = arith.constant 0 : index
    %3 = vector.load %arg1[%c0, %c0_1] : memref<64x1xf32, #tpu.memory_space<vmem>>, vector<64x1xf32>
    %c0_2 = arith.constant 0 : index
    %c0_3 = arith.constant 0 : index
    %4 = vector.load %arg2[%c0_2, %c0_3] : memref<1x512xf32, #tpu.memory_space<vmem>>, vector<1x512xf32>
    %c0_4 = arith.constant 0 : index
    %c0_5 = arith.constant 0 : index
    %c0_6 = arith.constant 0 : index
    %5 = vector.load %arg5[%c0_4, %c0_5, %c0_6] : memref<3x1x512xf32, #tpu.memory_space<vmem>>, vector<1x1x512xf32>
    %6 = vector.shape_cast %5 : vector<1x1x512xf32> to vector<1x512xf32>
    %7 = vector.broadcast %3 : vector<64x1xf32> to vector<64x512xf32>
    %8 = vector.broadcast %4 : vector<1x512xf32> to vector<64x512xf32>
    %9 = arith.mulf %7, %8 : vector<64x512xf32>
    %10 = vector.broadcast %6 : vector<1x512xf32> to vector<64x512xf32>
    %11 = arith.addf %10, %9 : vector<64x512xf32>
    %c0_7 = arith.constant 0 : index
    %c0_8 = arith.constant 0 : index
    %12 = vector.load %arg17[%c0_7, %c0_8] : memref<64x512xf32, #tpu.memory_space<vmem>>, vector<64x512xf32>
    tpu.vector_store %arg17[%c0_7, %c0_8], %11 {strides = array<i32>} : memref<64x512xf32, #tpu.memory_space<vmem>>, vector<64x512xf32>,
    %c0_9 = arith.constant 0 : index
    %c0_10 = arith.constant 0 : index
    %c0_11 = arith.constant 0 : index
    %13 = vector.load %arg15[%c0_9, %c0_10, %c0_11] : memref<3x8x128xf32, #tpu.memory_space<vmem>>, vector<1x8x128xf32>
    %14 = vector.shape_cast %13 : vector<1x8x128xf32> to vector<8x128xf32>
    %c0_12 = arith.constant 0 : index
    %c0_13 = arith.constant 0 : index
    %c0_14 = arith.constant 0 : index
    %15 = vector.load %arg16[%c0_12, %c0_13, %c0_14] : memref<3x8x128xf32, #tpu.memory_space<vmem>>, vector<1x8x128xf32>
    %16 = vector.shape_cast %15 : vector<1x8x128xf32> to vector<8x128xf32>
    %c0_i32_15 = arith.constant 0 : i32
    %c8_i32 = arith.constant 8 : i32
    %17 = arith.muli %c0_i32_15, %c8_i32 : i32
    %18 = tpu.assume_multiple %17, 8 : i32
    %c0_16 = arith.constant 0 : index
    %c0_17 = arith.constant 0 : index
    %c0_18 = arith.constant 0 : index
    %19 = vector.load %arg4[%c0_16, %c0_17, %c0_18] : memref<3x128x512xf32, #tpu.memory_space<vmem>>, vector<1x128x512xf32>
    %20 = vector.shape_cast %19 : vector<1x128x512xf32> to vector<128x512xf32>
    %cst = arith.constant dense<0.000000e+00> : vector<8x512xf32>
    %21 = tpu.matmul %14, %20, %cst {dimension_numbers = #tpu.dot_dimension_numbers<[1], [0], [0], [1], [0, 0, 1, 1], [], []>} : vector<8x128xf32>, vector<128x512xf32>, vector<8x512xf32> -> vector<8x512xf32>
    %22 = arith.index_cast %18 : i32 to index
    %c0_19 = arith.constant 0 : index
    %23 = vector.load %arg17[%22, %c0_19] : memref<64x512xf32, #tpu.memory_space<vmem>>, vector<8x512xf32>
    %24 = arith.addf %21, %23 : vector<8x512xf32>
    %25 = vector.extract_strided_slice %24 {offsets = [0, 0], sizes = [8, 128], strides = [1, 1]} : vector<8x512xf32> to vector<8x128xf32>
    %26 = arith.negf %25 : vector<8x128xf32>
    %27 = math.exp %26 : vector<8x128xf32>
    %cst_20 = arith.constant 1.000000e+00 : f32
    %28 = vector.broadcast %cst_20 : f32 to vector<8x128xf32>
    %29 = arith.addf %28, %27 : vector<8x128xf32>
    %30 = arith.divf %28, %29 : vector<8x128xf32>
    %31 = vector.extract_strided_slice %24 {offsets = [0, 128], sizes = [8, 128], strides = [1, 1]} : vector<8x512xf32> to vector<8x128xf32>
    %32 = arith.negf %31 : vector<8x128xf32>
    %33 = math.exp %32 : vector<8x128xf32>
    %cst_21 = arith.constant 1.000000e+00 : f32
    %34 = vector.broadcast %cst_21 : f32 to vector<8x128xf32>
    %35 = arith.addf %34, %33 : vector<8x128xf32>
    %36 = arith.divf %34, %35 : vector<8x128xf32>
    %37 = vector.extract_strided_slice %24 {offsets = [0, 256], sizes = [8, 128], strides = [1, 1]} : vector<8x512xf32> to vector<8x128xf32>
    %38 = math.tanh %37 : vector<8x128xf32>
    %39 = vector.extract_strided_slice %24 {offsets = [0, 384], sizes = [8, 128], strides = [1, 1]} : vector<8x512xf32> to vector<8x128xf32>
    %40 = arith.negf %39 : vector<8x128xf32>
    %41 = math.exp %40 : vector<8x128xf32>
    %cst_22 = arith.constant 1.000000e+00 : f32
    %42 = vector.broadcast %cst_22 : f32 to vector<8x128xf32>
    %43 = arith.addf %42, %41 : vector<8x128xf32>
    %44 = arith.divf %42, %43 : vector<8x128xf32>
    %45 = arith.mulf %36, %16 : vector<8x128xf32>
    %46 = arith.mulf %30, %38 : vector<8x128xf32>
    %47 = arith.addf %45, %46 : vector<8x128xf32>
    %48 = math.tanh %47 : vector<8x128xf32>
    %49 = arith.mulf %44, %48 : vector<8x128xf32>
    %50 = arith.index_cast %18 : i32 to index
    %c0_23 = arith.constant 0 : index
    %51 = vector.load %arg18[%50, %c0_23] : memref<64x128xf32, #tpu.memory_space<vmem>>, vector<8x128xf32>
    tpu.vector_store %arg18[%50, %c0_23], %49 {strides = array<i32>} : memref<64x128xf32, #tpu.memory_space<vmem>>, vector<8x128xf32>,
    %c1_i32 = arith.constant 1 : i32
    %c8_i32_24 = arith.constant 8 : i32
    %52 = arith.muli %c1_i32, %c8_i32_24 : i32
    %53 = tpu.assume_multiple %52, 8 : i32
    %c0_25 = arith.constant 0 : index
    %c0_26 = arith.constant 0 : index
    %c0_27 = arith.constant 0 : index
    %54 = vector.load %arg4[%c0_25, %c0_26, %c0_27] : memref<3x128x512xf32, #tpu.memory_space<vmem>>, vector<1x128x512xf32>
    %55 = vector.shape_cast %54 : vector<1x128x512xf32> to vector<128x512xf32>
    %cst_28 = arith.constant dense<0.000000e+00> : vector<8x512xf32>
    %56 = tpu.matmul %49, %55, %cst_28 {dimension_numbers = #tpu.dot_dimension_numbers<[1], [0], [0], [1], [0, 0, 1, 1], [], []>} : vector<8x128xf32>, vector<128x512xf32>, vector<8x512xf32> -> vector<8x512xf32>
    %57 = arith.index_cast %53 : i32 to index
    %c0_29 = arith.constant 0 : index
    %58 = vector.load %arg17[%57, %c0_29] : memref<64x512xf32, #tpu.memory_space<vmem>>, vector<8x512xf32>
    %59 = arith.addf %56, %58 : vector<8x512xf32>
    %60 = vector.extract_strided_slice %59 {offsets = [0, 0], sizes = [8, 128], strides = [1, 1]} : vector<8x512xf32> to vector<8x128xf32>
    %61 = arith.negf %60 : vector<8x128xf32>
    %62 = math.exp %61 : vector<8x128xf32>
    %cst_30 = arith.constant 1.000000e+00 : f32
    %63 = vector.broadcast %cst_30 : f32 to vector<8x128xf32>
    %64 = arith.addf %63, %62 : vector<8x128xf32>
    %65 = arith.divf %63, %64 : vector<8x128xf32>
    %66 = vector.extract_strided_slice %59 {offsets = [0, 128], sizes = [8, 128], strides = [1, 1]} : vector<8x512xf32> to vector<8x128xf32>
    %67 = arith.negf %66 : vector<8x128xf32>
    %68 = math.exp %67 : vector<8x128xf32>
    %cst_31 = arith.constant 1.000000e+00 : f32
    %69 = vector.broadcast %cst_31 : f32 to vector<8x128xf32>
    %70 = arith.addf %69, %68 : vector<8x128xf32>
    %71 = arith.divf %69, %70 : vector<8x128xf32>
    %72 = vector.extract_strided_slice %59 {offsets = [0, 256], sizes = [8, 128], strides = [1, 1]} : vector<8x512xf32> to vector<8x128xf32>
    %73 = math.tanh %72 : vector<8x128xf32>
    %74 = vector.extract_strided_slice %59 {offsets = [0, 384], sizes = [8, 128], strides = [1, 1]} : vector<8x512xf32> to vector<8x128xf32>
    %75 = arith.negf %74 : vector<8x128xf32>
    %76 = math.exp %75 : vector<8x128xf32>
    %cst_32 = arith.constant 1.000000e+00 : f32
    %77 = vector.broadcast %cst_32 : f32 to vector<8x128xf32>
    %78 = arith.addf %77, %76 : vector<8x128xf32>
    %79 = arith.divf %77, %78 : vector<8x128xf32>
    %80 = arith.mulf %71, %47 : vector<8x128xf32>
    %81 = arith.mulf %65, %73 : vector<8x128xf32>
    %82 = arith.addf %80, %81 : vector<8x128xf32>
    %83 = math.tanh %82 : vector<8x128xf32>
    %84 = arith.mulf %79, %83 : vector<8x128xf32>
    %85 = arith.index_cast %53 : i32 to index
    %c0_33 = arith.constant 0 : index
    %86 = vector.load %arg18[%85, %c0_33] : memref<64x128xf32, #tpu.memory_space<vmem>>, vector<8x128xf32>
    tpu.vector_store %arg18[%85, %c0_33], %84 {strides = array<i32>} : memref<64x128xf32, #tpu.memory_space<vmem>>, vector<8x128xf32>,
    %c2_i32 = arith.constant 2 : i32
    %c8_i32_34 = arith.constant 8 : i32
    %87 = arith.muli %c2_i32, %c8_i32_34 : i32
    %88 = tpu.assume_multiple %87, 8 : i32
    %c0_35 = arith.constant 0 : index
    %c0_36 = arith.constant 0 : index
    %c0_37 = arith.constant 0 : index
    %89 = vector.load %arg4[%c0_35, %c0_36, %c0_37] : memref<3x128x512xf32, #tpu.memory_space<vmem>>, vector<1x128x512xf32>
    %90 = vector.shape_cast %89 : vector<1x128x512xf32> to vector<128x512xf32>
    %cst_38 = arith.constant dense<0.000000e+00> : vector<8x512xf32>
    %91 = tpu.matmul %84, %90, %cst_38 {dimension_numbers = #tpu.dot_dimension_numbers<[1], [0], [0], [1], [0, 0, 1, 1], [], []>} : vector<8x128xf32>, vector<128x512xf32>, vector<8x512xf32> -> vector<8x512xf32>
    %92 = arith.index_cast %88 : i32 to index
    %c0_39 = arith.constant 0 : index
    %93 = vector.load %arg17[%92, %c0_39] : memref<64x512xf32, #tpu.memory_space<vmem>>, vector<8x512xf32>
    %94 = arith.addf %91, %93 : vector<8x512xf32>
    %95 = vector.extract_strided_slice %94 {offsets = [0, 0], sizes = [8, 128], strides = [1, 1]} : vector<8x512xf32> to vector<8x128xf32>
    %96 = arith.negf %95 : vector<8x128xf32>
    %97 = math.exp %96 : vector<8x128xf32>
    %cst_40 = arith.constant 1.000000e+00 : f32
    %98 = vector.broadcast %cst_40 : f32 to vector<8x128xf32>
    %99 = arith.addf %98, %97 : vector<8x128xf32>
    %100 = arith.divf %98, %99 : vector<8x128xf32>
    %101 = vector.extract_strided_slice %94 {offsets = [0, 128], sizes = [8, 128], strides = [1, 1]} : vector<8x512xf32> to vector<8x128xf32>
    %102 = arith.negf %101 : vector<8x128xf32>
    %103 = math.exp %102 : vector<8x128xf32>
    %cst_41 = arith.constant 1.000000e+00 : f32
    %104 = vector.broadcast %cst_41 : f32 to vector<8x128xf32>
    %105 = arith.addf %104, %103 : vector<8x128xf32>
    %106 = arith.divf %104, %105 : vector<8x128xf32>
    %107 = vector.extract_strided_slice %94 {offsets = [0, 256], sizes = [8, 128], strides = [1, 1]} : vector<8x512xf32> to vector<8x128xf32>
    %108 = math.tanh %107 : vector<8x128xf32>
    %109 = vector.extract_strided_slice %94 {offsets = [0, 384], sizes = [8, 128], strides = [1, 1]} : vector<8x512xf32> to vector<8x128xf32>
    %110 = arith.negf %109 : vector<8x128xf32>
    %111 = math.exp %110 : vector<8x128xf32>
    %cst_42 = arith.constant 1.000000e+00 : f32
    %112 = vector.broadcast %cst_42 : f32 to vector<8x128xf32>
    %113 = arith.addf %112, %111 : vector<8x128xf32>
    %114 = arith.divf %112, %113 : vector<8x128xf32>
    %115 = arith.mulf %106, %82 : vector<8x128xf32>
    %116 = arith.mulf %100, %108 : vector<8x128xf32>
    %117 = arith.addf %115, %116 : vector<8x128xf32>
    %118 = math.tanh %117 : vector<8x128xf32>
    %119 = arith.mulf %114, %118 : vector<8x128xf32>
    %120 = arith.index_cast %88 : i32 to index
    %c0_43 = arith.constant 0 : index
    %121 = vector.load %arg18[%120, %c0_43] : memref<64x128xf32, #tpu.memory_space<vmem>>, vector<8x128xf32>
    tpu.vector_store %arg18[%120, %c0_43], %119 {strides = array<i32>} : memref<64x128xf32, #tpu.memory_space<vmem>>, vector<8x128xf32>,
    %c3_i32 = arith.constant 3 : i32
    %c8_i32_44 = arith.constant 8 : i32
    %122 = arith.muli %c3_i32, %c8_i32_44 : i32
    %123 = tpu.assume_multiple %122, 8 : i32
    %c0_45 = arith.constant 0 : index
    %c0_46 = arith.constant 0 : index
    %c0_47 = arith.constant 0 : index
    %124 = vector.load %arg4[%c0_45, %c0_46, %c0_47] : memref<3x128x512xf32, #tpu.memory_space<vmem>>, vector<1x128x512xf32>
    %125 = vector.shape_cast %124 : vector<1x128x512xf32> to vector<128x512xf32>
    %cst_48 = arith.constant dense<0.000000e+00> : vector<8x512xf32>
    %126 = tpu.matmul %119, %125, %cst_48 {dimension_numbers = #tpu.dot_dimension_numbers<[1], [0], [0], [1], [0, 0, 1, 1], [], []>} : vector<8x128xf32>, vector<128x512xf32>, vector<8x512xf32> -> vector<8x512xf32>
    %127 = arith.index_cast %123 : i32 to index
    %c0_49 = arith.constant 0 : index
    %128 = vector.load %arg17[%127, %c0_49] : memref<64x512xf32, #tpu.memory_space<vmem>>, vector<8x512xf32>
    %129 = arith.addf %126, %128 : vector<8x512xf32>
    %130 = vector.extract_strided_slice %129 {offsets = [0, 0], sizes = [8, 128], strides = [1, 1]} : vector<8x512xf32> to vector<8x128xf32>
    %131 = arith.negf %130 : vector<8x128xf32>
    %132 = math.exp %131 : vector<8x128xf32>
    %cst_50 = arith.constant 1.000000e+00 : f32
    %133 = vector.broadcast %cst_50 : f32 to vector<8x128xf32>
    %134 = arith.addf %133, %132 : vector<8x128xf32>
    %135 = arith.divf %133, %134 : vector<8x128xf32>
    %136 = vector.extract_strided_slice %129 {offsets = [0, 128], sizes = [8, 128], strides = [1, 1]} : vector<8x512xf32> to vector<8x128xf32>
    %137 = arith.negf %136 : vector<8x128xf32>
    %138 = math.exp %137 : vector<8x128xf32>
    %cst_51 = arith.constant 1.000000e+00 : f32
    %139 = vector.broadcast %cst_51 : f32 to vector<8x128xf32>
    %140 = arith.addf %139, %138 : vector<8x128xf32>
    %141 = arith.divf %139, %140 : vector<8x128xf32>
    %142 = vector.extract_strided_slice %129 {offsets = [0, 256], sizes = [8, 128], strides = [1, 1]} : vector<8x512xf32> to vector<8x128xf32>
    %143 = math.tanh %142 : vector<8x128xf32>
    %144 = vector.extract_strided_slice %129 {offsets = [0, 384], sizes = [8, 128], strides = [1, 1]} : vector<8x512xf32> to vector<8x128xf32>
    %145 = arith.negf %144 : vector<8x128xf32>
    %146 = math.exp %145 : vector<8x128xf32>
    %cst_52 = arith.constant 1.000000e+00 : f32
    %147 = vector.broadcast %cst_52 : f32 to vector<8x128xf32>
    %148 = arith.addf %147, %146 : vector<8x128xf32>
    %149 = arith.divf %147, %148 : vector<8x128xf32>
    %150 = arith.mulf %141, %117 : vector<8x128xf32>
    %151 = arith.mulf %135, %143 : vector<8x128xf32>
    %152 = arith.addf %150, %151 : vector<8x128xf32>
    %153 = math.tanh %152 : vector<8x128xf32>
    %154 = arith.mulf %149, %153 : vector<8x128xf32>
    %155 = arith.index_cast %123 : i32 to index
    %c0_53 = arith.constant 0 : index
    %156 = vector.load %arg18[%155, %c0_53] : memref<64x128xf32, #tpu.memory_space<vmem>>, vector<8x128xf32>
    tpu.vector_store %arg18[%155, %c0_53], %154 {strides = array<i32>} : memref<64x128xf32, #tpu.memory_space<vmem>>, vector<8x128xf32>,
    %c4_i32 = arith.constant 4 : i32
    %c8_i32_54 = arith.constant 8 : i32
    %157 = arith.muli %c4_i32, %c8_i32_54 : i32
    %158 = tpu.assume_multiple %157, 8 : i32
    %c0_55 = arith.constant 0 : index
    %c0_56 = arith.constant 0 : index
    %c0_57 = arith.constant 0 : index
    %159 = vector.load %arg4[%c0_55, %c0_56, %c0_57] : memref<3x128x512xf32, #tpu.memory_space<vmem>>, vector<1x128x512xf32>
    %160 = vector.shape_cast %159 : vector<1x128x512xf32> to vector<128x512xf32>
    %cst_58 = arith.constant dense<0.000000e+00> : vector<8x512xf32>
    %161 = tpu.matmul %154, %160, %cst_58 {dimension_numbers = #tpu.dot_dimension_numbers<[1], [0], [0], [1], [0, 0, 1, 1], [], []>} : vector<8x128xf32>, vector<128x512xf32>, vector<8x512xf32> -> vector<8x512xf32>
    %162 = arith.index_cast %158 : i32 to index
    %c0_59 = arith.constant 0 : index
    %163 = vector.load %arg17[%162, %c0_59] : memref<64x512xf32, #tpu.memory_space<vmem>>, vector<8x512xf32>
    %164 = arith.addf %161, %163 : vector<8x512xf32>
    %165 = vector.extract_strided_slice %164 {offsets = [0, 0], sizes = [8, 128], strides = [1, 1]} : vector<8x512xf32> to vector<8x128xf32>
    %166 = arith.negf %165 : vector<8x128xf32>
    %167 = math.exp %166 : vector<8x128xf32>
    %cst_60 = arith.constant 1.000000e+00 : f32
    %168 = vector.broadcast %cst_60 : f32 to vector<8x128xf32>
    %169 = arith.addf %168, %167 : vector<8x128xf32>
    %170 = arith.divf %168, %169 : vector<8x128xf32>
    %171 = vector.extract_strided_slice %164 {offsets = [0, 128], sizes = [8, 128], strides = [1, 1]} : vector<8x512xf32> to vector<8x128xf32>
    %172 = arith.negf %171 : vector<8x128xf32>
    %173 = math.exp %172 : vector<8x128xf32>
    %cst_61 = arith.constant 1.000000e+00 : f32
    %174 = vector.broadcast %cst_61 : f32 to vector<8x128xf32>
    %175 = arith.addf %174, %173 : vector<8x128xf32>
    %176 = arith.divf %174, %175 : vector<8x128xf32>
    %177 = vector.extract_strided_slice %164 {offsets = [0, 256], sizes = [8, 128], strides = [1, 1]} : vector<8x512xf32> to vector<8x128xf32>
    %178 = math.tanh %177 : vector<8x128xf32>
    %179 = vector.extract_strided_slice %164 {offsets = [0, 384], sizes = [8, 128], strides = [1, 1]} : vector<8x512xf32> to vector<8x128xf32>
    %180 = arith.negf %179 : vector<8x128xf32>
    %181 = math.exp %180 : vector<8x128xf32>
    %cst_62 = arith.constant 1.000000e+00 : f32
    %182 = vector.broadcast %cst_62 : f32 to vector<8x128xf32>
    %183 = arith.addf %182, %181 : vector<8x128xf32>
    %184 = arith.divf %182, %183 : vector<8x128xf32>
    %185 = arith.mulf %176, %152 : vector<8x128xf32>
    %186 = arith.mulf %170, %178 : vector<8x128xf32>
    %187 = arith.addf %185, %186 : vector<8x128xf32>
    %188 = math.tanh %187 : vector<8x128xf32>
    %189 = arith.mulf %184, %188 : vector<8x128xf32>
    %190 = arith.index_cast %158 : i32 to index
    %c0_63 = arith.constant 0 : index
    %191 = vector.load %arg18[%190, %c0_63] : memref<64x128xf32, #tpu.memory_space<vmem>>, vector<8x128xf32>
    tpu.vector_store %arg18[%190, %c0_63], %189 {strides = array<i32>} : memref<64x128xf32, #tpu.memory_space<vmem>>, vector<8x128xf32>,
    %c5_i32 = arith.constant 5 : i32
    %c8_i32_64 = arith.constant 8 : i32
    %192 = arith.muli %c5_i32, %c8_i32_64 : i32
    %193 = tpu.assume_multiple %192, 8 : i32
    %c0_65 = arith.constant 0 : index
    %c0_66 = arith.constant 0 : index
    %c0_67 = arith.constant 0 : index
    %194 = vector.load %arg4[%c0_65, %c0_66, %c0_67] : memref<3x128x512xf32, #tpu.memory_space<vmem>>, vector<1x128x512xf32>
    %195 = vector.shape_cast %194 : vector<1x128x512xf32> to vector<128x512xf32>
    %cst_68 = arith.constant dense<0.000000e+00> : vector<8x512xf32>
    %196 = tpu.matmul %189, %195, %cst_68 {dimension_numbers = #tpu.dot_dimension_numbers<[1], [0], [0], [1], [0, 0, 1, 1], [], []>} : vector<8x128xf32>, vector<128x512xf32>, vector<8x512xf32> -> vector<8x512xf32>
    %197 = arith.index_cast %193 : i32 to index
    %c0_69 = arith.constant 0 : index
    %198 = vector.load %arg17[%197, %c0_69] : memref<64x512xf32, #tpu.memory_space<vmem>>, vector<8x512xf32>
    %199 = arith.addf %196, %198 : vector<8x512xf32>
    %200 = vector.extract_strided_slice %199 {offsets = [0, 0], sizes = [8, 128], strides = [1, 1]} : vector<8x512xf32> to vector<8x128xf32>
    %201 = arith.negf %200 : vector<8x128xf32>
    %202 = math.exp %201 : vector<8x128xf32>
    %cst_70 = arith.constant 1.000000e+00 : f32
    %203 = vector.broadcast %cst_70 : f32 to vector<8x128xf32>
    %204 = arith.addf %203, %202 : vector<8x128xf32>
    %205 = arith.divf %203, %204 : vector<8x128xf32>
    %206 = vector.extract_strided_slice %199 {offsets = [0, 128], sizes = [8, 128], strides = [1, 1]} : vector<8x512xf32> to vector<8x128xf32>
    %207 = arith.negf %206 : vector<8x128xf32>
    %208 = math.exp %207 : vector<8x128xf32>
    %cst_71 = arith.constant 1.000000e+00 : f32
    %209 = vector.broadcast %cst_71 : f32 to vector<8x128xf32>
    %210 = arith.addf %209, %208 : vector<8x128xf32>
    %211 = arith.divf %209, %210 : vector<8x128xf32>
    %212 = vector.extract_strided_slice %199 {offsets = [0, 256], sizes = [8, 128], strides = [1, 1]} : vector<8x512xf32> to vector<8x128xf32>
    %213 = math.tanh %212 : vector<8x128xf32>
    %214 = vector.extract_strided_slice %199 {offsets = [0, 384], sizes = [8, 128], strides = [1, 1]} : vector<8x512xf32> to vector<8x128xf32>
    %215 = arith.negf %214 : vector<8x128xf32>
    %216 = math.exp %215 : vector<8x128xf32>
    %cst_72 = arith.constant 1.000000e+00 : f32
    %217 = vector.broadcast %cst_72 : f32 to vector<8x128xf32>
    %218 = arith.addf %217, %216 : vector<8x128xf32>
    %219 = arith.divf %217, %218 : vector<8x128xf32>
    %220 = arith.mulf %211, %187 : vector<8x128xf32>
    %221 = arith.mulf %205, %213 : vector<8x128xf32>
    %222 = arith.addf %220, %221 : vector<8x128xf32>
    %223 = math.tanh %222 : vector<8x128xf32>
    %224 = arith.mulf %219, %223 : vector<8x128xf32>
    %225 = arith.index_cast %193 : i32 to index
    %c0_73 = arith.constant 0 : index
    %226 = vector.load %arg18[%225, %c0_73] : memref<64x128xf32, #tpu.memory_space<vmem>>, vector<8x128xf32>
    tpu.vector_store %arg18[%225, %c0_73], %224 {strides = array<i32>} : memref<64x128xf32, #tpu.memory_space<vmem>>, vector<8x128xf32>,
    %c6_i32 = arith.constant 6 : i32
    %c8_i32_74 = arith.constant 8 : i32
    %227 = arith.muli %c6_i32, %c8_i32_74 : i32
    %228 = tpu.assume_multiple %227, 8 : i32
    %c0_75 = arith.constant 0 : index
    %c0_76 = arith.constant 0 : index
    %c0_77 = arith.constant 0 : index
    %229 = vector.load %arg4[%c0_75, %c0_76, %c0_77] : memref<3x128x512xf32, #tpu.memory_space<vmem>>, vector<1x128x512xf32>
    %230 = vector.shape_cast %229 : vector<1x128x512xf32> to vector<128x512xf32>
    %cst_78 = arith.constant dense<0.000000e+00> : vector<8x512xf32>
    %231 = tpu.matmul %224, %230, %cst_78 {dimension_numbers = #tpu.dot_dimension_numbers<[1], [0], [0], [1], [0, 0, 1, 1], [], []>} : vector<8x128xf32>, vector<128x512xf32>, vector<8x512xf32> -> vector<8x512xf32>
    %232 = arith.index_cast %228 : i32 to index
    %c0_79 = arith.constant 0 : index
    %233 = vector.load %arg17[%232, %c0_79] : memref<64x512xf32, #tpu.memory_space<vmem>>, vector<8x512xf32>
    %234 = arith.addf %231, %233 : vector<8x512xf32>
    %235 = vector.extract_strided_slice %234 {offsets = [0, 0], sizes = [8, 128], strides = [1, 1]} : vector<8x512xf32> to vector<8x128xf32>
    %236 = arith.negf %235 : vector<8x128xf32>
    %237 = math.exp %236 : vector<8x128xf32>
    %cst_80 = arith.constant 1.000000e+00 : f32
    %238 = vector.broadcast %cst_80 : f32 to vector<8x128xf32>
    %239 = arith.addf %238, %237 : vector<8x128xf32>
    %240 = arith.divf %238, %239 : vector<8x128xf32>
    %241 = vector.extract_strided_slice %234 {offsets = [0, 128], sizes = [8, 128], strides = [1, 1]} : vector<8x512xf32> to vector<8x128xf32>
    %242 = arith.negf %241 : vector<8x128xf32>
    %243 = math.exp %242 : vector<8x128xf32>
    %cst_81 = arith.constant 1.000000e+00 : f32
    %244 = vector.broadcast %cst_81 : f32 to vector<8x128xf32>
    %245 = arith.addf %244, %243 : vector<8x128xf32>
    %246 = arith.divf %244, %245 : vector<8x128xf32>
    %247 = vector.extract_strided_slice %234 {offsets = [0, 256], sizes = [8, 128], strides = [1, 1]} : vector<8x512xf32> to vector<8x128xf32>
    %248 = math.tanh %247 : vector<8x128xf32>
    %249 = vector.extract_strided_slice %234 {offsets = [0, 384], sizes = [8, 128], strides = [1, 1]} : vector<8x512xf32> to vector<8x128xf32>
    %250 = arith.negf %249 : vector<8x128xf32>
    %251 = math.exp %250 : vector<8x128xf32>
    %cst_82 = arith.constant 1.000000e+00 : f32
    %252 = vector.broadcast %cst_82 : f32 to vector<8x128xf32>
    %253 = arith.addf %252, %251 : vector<8x128xf32>
    %254 = arith.divf %252, %253 : vector<8x128xf32>
    %255 = arith.mulf %246, %222 : vector<8x128xf32>
    %256 = arith.mulf %240, %248 : vector<8x128xf32>
    %257 = arith.addf %255, %256 : vector<8x128xf32>
    %258 = math.tanh %257 : vector<8x128xf32>
    %259 = arith.mulf %254, %258 : vector<8x128xf32>
    %260 = arith.index_cast %228 : i32 to index
    %c0_83 = arith.constant 0 : index
    %261 = vector.load %arg18[%260, %c0_83] : memref<64x128xf32, #tpu.memory_space<vmem>>, vector<8x128xf32>
    tpu.vector_store %arg18[%260, %c0_83], %259 {strides = array<i32>} : memref<64x128xf32, #tpu.memory_space<vmem>>, vector<8x128xf32>,
    %c7_i32 = arith.constant 7 : i32
    %c8_i32_84 = arith.constant 8 : i32
    %262 = arith.muli %c7_i32, %c8_i32_84 : i32
    %263 = tpu.assume_multiple %262, 8 : i32
    %c0_85 = arith.constant 0 : index
    %c0_86 = arith.constant 0 : index
    %c0_87 = arith.constant 0 : index
    %264 = vector.load %arg4[%c0_85, %c0_86, %c0_87] : memref<3x128x512xf32, #tpu.memory_space<vmem>>, vector<1x128x512xf32>
    %265 = vector.shape_cast %264 : vector<1x128x512xf32> to vector<128x512xf32>
    %cst_88 = arith.constant dense<0.000000e+00> : vector<8x512xf32>
    %266 = tpu.matmul %259, %265, %cst_88 {dimension_numbers = #tpu.dot_dimension_numbers<[1], [0], [0], [1], [0, 0, 1, 1], [], []>} : vector<8x128xf32>, vector<128x512xf32>, vector<8x512xf32> -> vector<8x512xf32>
    %267 = arith.index_cast %263 : i32 to index
    %c0_89 = arith.constant 0 : index
    %268 = vector.load %arg17[%267, %c0_89] : memref<64x512xf32, #tpu.memory_space<vmem>>, vector<8x512xf32>
    %269 = arith.addf %266, %268 : vector<8x512xf32>
    %270 = vector.extract_strided_slice %269 {offsets = [0, 0], sizes = [8, 128], strides = [1, 1]} : vector<8x512xf32> to vector<8x128xf32>
    %271 = arith.negf %270 : vector<8x128xf32>
    %272 = math.exp %271 : vector<8x128xf32>
    %cst_90 = arith.constant 1.000000e+00 : f32
    %273 = vector.broadcast %cst_90 : f32 to vector<8x128xf32>
    %274 = arith.addf %273, %272 : vector<8x128xf32>
    %275 = arith.divf %273, %274 : vector<8x128xf32>
    %276 = vector.extract_strided_slice %269 {offsets = [0, 128], sizes = [8, 128], strides = [1, 1]} : vector<8x512xf32> to vector<8x128xf32>
    %277 = arith.negf %276 : vector<8x128xf32>
    %278 = math.exp %277 : vector<8x128xf32>
    %cst_91 = arith.constant 1.000000e+00 : f32
    %279 = vector.broadcast %cst_91 : f32 to vector<8x128xf32>
    %280 = arith.addf %279, %278 : vector<8x128xf32>
    %281 = arith.divf %279, %280 : vector<8x128xf32>
    %282 = vector.extract_strided_slice %269 {offsets = [0, 256], sizes = [8, 128], strides = [1, 1]} : vector<8x512xf32> to vector<8x128xf32>
    %283 = math.tanh %282 : vector<8x128xf32>
    %284 = vector.extract_strided_slice %269 {offsets = [0, 384], sizes = [8, 128], strides = [1, 1]} : vector<8x512xf32> to vector<8x128xf32>
    %285 = arith.negf %284 : vector<8x128xf32>
    %286 = math.exp %285 : vector<8x128xf32>
    %cst_92 = arith.constant 1.000000e+00 : f32
    %287 = vector.broadcast %cst_92 : f32 to vector<8x128xf32>
    %288 = arith.addf %287, %286 : vector<8x128xf32>
    %289 = arith.divf %287, %288 : vector<8x128xf32>
    %290 = arith.mulf %281, %257 : vector<8x128xf32>
    %291 = arith.mulf %275, %283 : vector<8x128xf32>
    %292 = arith.addf %290, %291 : vector<8x128xf32>
    %293 = math.tanh %292 : vector<8x128xf32>
    %294 = arith.mulf %289, %293 : vector<8x128xf32>
    %295 = arith.index_cast %263 : i32 to index
    %c0_93 = arith.constant 0 : index
    %296 = vector.load %arg18[%295, %c0_93] : memref<64x128xf32, #tpu.memory_space<vmem>>, vector<8x128xf32>
    tpu.vector_store %arg18[%295, %c0_93], %294 {strides = array<i32>} : memref<64x128xf32, #tpu.memory_space<vmem>>, vector<8x128xf32>,
    %c8_i32_94 = arith.constant 8 : i32
    %c0_95 = arith.constant 0 : index
    %c0_96 = arith.constant 0 : index
    %c0_97 = arith.constant 0 : index
    %297 = vector.load %arg15[%c0_95, %c0_96, %c0_97] : memref<3x8x128xf32, #tpu.memory_space<vmem>>, vector<1x8x128xf32>
    %298 = vector.shape_cast %297 : vector<1x8x128xf32> to vector<8x128xf32>
    %299 = vector.shape_cast %294 : vector<8x128xf32> to vector<1x8x128xf32>
    tpu.vector_store %arg15[%c0_95, %c0_96, %c0_97], %299 {strides = array<i32>} : memref<3x8x128xf32, #tpu.memory_space<vmem>>, vector<1x8x128xf32>,
    %c0_98 = arith.constant 0 : index
    %c0_99 = arith.constant 0 : index
    %c0_100 = arith.constant 0 : index
    %300 = vector.load %arg16[%c0_98, %c0_99, %c0_100] : memref<3x8x128xf32, #tpu.memory_space<vmem>>, vector<1x8x128xf32>
    %301 = vector.shape_cast %300 : vector<1x8x128xf32> to vector<8x128xf32>
    %302 = vector.shape_cast %292 : vector<8x128xf32> to vector<1x8x128xf32>
    tpu.vector_store %arg16[%c0_98, %c0_99, %c0_100], %302 {strides = array<i32>} : memref<3x8x128xf32, #tpu.memory_space<vmem>>, vector<1x8x128xf32>,
    %c0_101 = arith.constant 0 : index
    %c0_102 = arith.constant 0 : index
    %303 = vector.load %arg18[%c0_101, %c0_102] : memref<64x128xf32, #tpu.memory_space<vmem>>, vector<64x128xf32>
    %c0_103 = arith.constant 0 : index
    %c0_104 = arith.constant 0 : index
    %c0_105 = arith.constant 0 : index
    %304 = vector.load %arg3[%c0_103, %c0_104, %c0_105] : memref<2x128x512xf32, #tpu.memory_space<vmem>>, vector<1x128x512xf32>
    %305 = vector.shape_cast %304 : vector<1x128x512xf32> to vector<128x512xf32>
    %cst_106 = arith.constant dense<0.000000e+00> : vector<64x512xf32>
    %306 = tpu.matmul %303, %305, %cst_106 {dimension_numbers = #tpu.dot_dimension_numbers<[1], [0], [0], [1], [0, 0, 1, 1], [], []>} : vector<64x128xf32>, vector<128x512xf32>, vector<64x512xf32> -> vector<64x512xf32>
    %c1 = arith.constant 1 : index
    %c0_107 = arith.constant 0 : index
    %c0_108 = arith.constant 0 : index
    %307 = vector.load %arg5[%c1, %c0_107, %c0_108] : memref<3x1x512xf32, #tpu.memory_space<vmem>>, vector<1x1x512xf32>
    %308 = vector.shape_cast %307 : vector<1x1x512xf32> to vector<1x512xf32>
    %309 = vector.broadcast %308 : vector<1x512xf32> to vector<64x512xf32>
    %310 = arith.addf %306, %309 : vector<64x512xf32>
    %c0_109 = arith.constant 0 : index
    %c0_110 = arith.constant 0 : index
    %311 = vector.load %arg17[%c0_109, %c0_110] : memref<64x512xf32, #tpu.memory_space<vmem>>, vector<64x512xf32>
    tpu.vector_store %arg17[%c0_109, %c0_110], %310 {strides = array<i32>} : memref<64x512xf32, #tpu.memory_space<vmem>>, vector<64x512xf32>,
    %c1_111 = arith.constant 1 : index
    %c0_112 = arith.constant 0 : index
    %c0_113 = arith.constant 0 : index
    %312 = vector.load %arg15[%c1_111, %c0_112, %c0_113] : memref<3x8x128xf32, #tpu.memory_space<vmem>>, vector<1x8x128xf32>
    %313 = vector.shape_cast %312 : vector<1x8x128xf32> to vector<8x128xf32>
    %c1_114 = arith.constant 1 : index
    %c0_115 = arith.constant 0 : index
    %c0_116 = arith.constant 0 : index
    %314 = vector.load %arg16[%c1_114, %c0_115, %c0_116] : memref<3x8x128xf32, #tpu.memory_space<vmem>>, vector<1x8x128xf32>
    %315 = vector.shape_cast %314 : vector<1x8x128xf32> to vector<8x128xf32>
    %c0_i32_117 = arith.constant 0 : i32
    %c8_i32_118 = arith.constant 8 : i32
    %316 = arith.muli %c0_i32_117, %c8_i32_118 : i32
    %317 = tpu.assume_multiple %316, 8 : i32
    %c1_119 = arith.constant 1 : index
    %c0_120 = arith.constant 0 : index
    %c0_121 = arith.constant 0 : index
    %318 = vector.load %arg4[%c1_119, %c0_120, %c0_121] : memref<3x128x512xf32, #tpu.memory_space<vmem>>, vector<1x128x512xf32>
    %319 = vector.shape_cast %318 : vector<1x128x512xf32> to vector<128x512xf32>
    %cst_122 = arith.constant dense<0.000000e+00> : vector<8x512xf32>
    %320 = tpu.matmul %313, %319, %cst_122 {dimension_numbers = #tpu.dot_dimension_numbers<[1], [0], [0], [1], [0, 0, 1, 1], [], []>} : vector<8x128xf32>, vector<128x512xf32>, vector<8x512xf32> -> vector<8x512xf32>
    %321 = arith.index_cast %317 : i32 to index
    %c0_123 = arith.constant 0 : index
    %322 = vector.load %arg17[%321, %c0_123] : memref<64x512xf32, #tpu.memory_space<vmem>>, vector<8x512xf32>
    %323 = arith.addf %320, %322 : vector<8x512xf32>
    %324 = vector.extract_strided_slice %323 {offsets = [0, 0], sizes = [8, 128], strides = [1, 1]} : vector<8x512xf32> to vector<8x128xf32>
    %325 = arith.negf %324 : vector<8x128xf32>
    %326 = math.exp %325 : vector<8x128xf32>
    %cst_124 = arith.constant 1.000000e+00 : f32
    %327 = vector.broadcast %cst_124 : f32 to vector<8x128xf32>
    %328 = arith.addf %327, %326 : vector<8x128xf32>
    %329 = arith.divf %327, %328 : vector<8x128xf32>
    %330 = vector.extract_strided_slice %323 {offsets = [0, 128], sizes = [8, 128], strides = [1, 1]} : vector<8x512xf32> to vector<8x128xf32>
    %331 = arith.negf %330 : vector<8x128xf32>
    %332 = math.exp %331 : vector<8x128xf32>
    %cst_125 = arith.constant 1.000000e+00 : f32
    %333 = vector.broadcast %cst_125 : f32 to vector<8x128xf32>
    %334 = arith.addf %333, %332 : vector<8x128xf32>
    %335 = arith.divf %333, %334 : vector<8x128xf32>
    %336 = vector.extract_strided_slice %323 {offsets = [0, 256], sizes = [8, 128], strides = [1, 1]} : vector<8x512xf32> to vector<8x128xf32>
    %337 = math.tanh %336 : vector<8x128xf32>
    %338 = vector.extract_strided_slice %323 {offsets = [0, 384], sizes = [8, 128], strides = [1, 1]} : vector<8x512xf32> to vector<8x128xf32>
    %339 = arith.negf %338 : vector<8x128xf32>
    %340 = math.exp %339 : vector<8x128xf32>
    %cst_126 = arith.constant 1.000000e+00 : f32
    %341 = vector.broadcast %cst_126 : f32 to vector<8x128xf32>
    %342 = arith.addf %341, %340 : vector<8x128xf32>
    %343 = arith.divf %341, %342 : vector<8x128xf32>
    %344 = arith.mulf %335, %315 : vector<8x128xf32>
    %345 = arith.mulf %329, %337 : vector<8x128xf32>
    %346 = arith.addf %344, %345 : vector<8x128xf32>
    %347 = math.tanh %346 : vector<8x128xf32>
    %348 = arith.mulf %343, %347 : vector<8x128xf32>
    %349 = arith.index_cast %317 : i32 to index
    %c0_127 = arith.constant 0 : index
    %350 = vector.load %arg18[%349, %c0_127] : memref<64x128xf32, #tpu.memory_space<vmem>>, vector<8x128xf32>
    tpu.vector_store %arg18[%349, %c0_127], %348 {strides = array<i32>} : memref<64x128xf32, #tpu.memory_space<vmem>>, vector<8x128xf32>,
    %c1_i32_128 = arith.constant 1 : i32
    %c8_i32_129 = arith.constant 8 : i32
    %351 = arith.muli %c1_i32_128, %c8_i32_129 : i32
    %352 = tpu.assume_multiple %351, 8 : i32
    %c1_130 = arith.constant 1 : index
    %c0_131 = arith.constant 0 : index
    %c0_132 = arith.constant 0 : index
    %353 = vector.load %arg4[%c1_130, %c0_131, %c0_132] : memref<3x128x512xf32, #tpu.memory_space<vmem>>, vector<1x128x512xf32>
    %354 = vector.shape_cast %353 : vector<1x128x512xf32> to vector<128x512xf32>
    %cst_133 = arith.constant dense<0.000000e+00> : vector<8x512xf32>
    %355 = tpu.matmul %348, %354, %cst_133 {dimension_numbers = #tpu.dot_dimension_numbers<[1], [0], [0], [1], [0, 0, 1, 1], [], []>} : vector<8x128xf32>, vector<128x512xf32>, vector<8x512xf32> -> vector<8x512xf32>
    %356 = arith.index_cast %352 : i32 to index
    %c0_134 = arith.constant 0 : index
    %357 = vector.load %arg17[%356, %c0_134] : memref<64x512xf32, #tpu.memory_space<vmem>>, vector<8x512xf32>
    %358 = arith.addf %355, %357 : vector<8x512xf32>
    %359 = vector.extract_strided_slice %358 {offsets = [0, 0], sizes = [8, 128], strides = [1, 1]} : vector<8x512xf32> to vector<8x128xf32>
    %360 = arith.negf %359 : vector<8x128xf32>
    %361 = math.exp %360 : vector<8x128xf32>
    %cst_135 = arith.constant 1.000000e+00 : f32
    %362 = vector.broadcast %cst_135 : f32 to vector<8x128xf32>
    %363 = arith.addf %362, %361 : vector<8x128xf32>
    %364 = arith.divf %362, %363 : vector<8x128xf32>
    %365 = vector.extract_strided_slice %358 {offsets = [0, 128], sizes = [8, 128], strides = [1, 1]} : vector<8x512xf32> to vector<8x128xf32>
    %366 = arith.negf %365 : vector<8x128xf32>
    %367 = math.exp %366 : vector<8x128xf32>
    %cst_136 = arith.constant 1.000000e+00 : f32
    %368 = vector.broadcast %cst_136 : f32 to vector<8x128xf32>
    %369 = arith.addf %368, %367 : vector<8x128xf32>
    %370 = arith.divf %368, %369 : vector<8x128xf32>
    %371 = vector.extract_strided_slice %358 {offsets = [0, 256], sizes = [8, 128], strides = [1, 1]} : vector<8x512xf32> to vector<8x128xf32>
    %372 = math.tanh %371 : vector<8x128xf32>
    %373 = vector.extract_strided_slice %358 {offsets = [0, 384], sizes = [8, 128], strides = [1, 1]} : vector<8x512xf32> to vector<8x128xf32>
    %374 = arith.negf %373 : vector<8x128xf32>
    %375 = math.exp %374 : vector<8x128xf32>
    %cst_137 = arith.constant 1.000000e+00 : f32
    %376 = vector.broadcast %cst_137 : f32 to vector<8x128xf32>
    %377 = arith.addf %376, %375 : vector<8x128xf32>
    %378 = arith.divf %376, %377 : vector<8x128xf32>
    %379 = arith.mulf %370, %346 : vector<8x128xf32>
    %380 = arith.mulf %364, %372 : vector<8x128xf32>
    %381 = arith.addf %379, %380 : vector<8x128xf32>
    %382 = math.tanh %381 : vector<8x128xf32>
    %383 = arith.mulf %378, %382 : vector<8x128xf32>
    %384 = arith.index_cast %352 : i32 to index
    %c0_138 = arith.constant 0 : index
    %385 = vector.load %arg18[%384, %c0_138] : memref<64x128xf32, #tpu.memory_space<vmem>>, vector<8x128xf32>
    tpu.vector_store %arg18[%384, %c0_138], %383 {strides = array<i32>} : memref<64x128xf32, #tpu.memory_space<vmem>>, vector<8x128xf32>,
    %c2_i32_139 = arith.constant 2 : i32
    %c8_i32_140 = arith.constant 8 : i32
    %386 = arith.muli %c2_i32_139, %c8_i32_140 : i32
    %387 = tpu.assume_multiple %386, 8 : i32
    %c1_141 = arith.constant 1 : index
    %c0_142 = arith.constant 0 : index
    %c0_143 = arith.constant 0 : index
    %388 = vector.load %arg4[%c1_141, %c0_142, %c0_143] : memref<3x128x512xf32, #tpu.memory_space<vmem>>, vector<1x128x512xf32>
    %389 = vector.shape_cast %388 : vector<1x128x512xf32> to vector<128x512xf32>
    %cst_144 = arith.constant dense<0.000000e+00> : vector<8x512xf32>
    %390 = tpu.matmul %383, %389, %cst_144 {dimension_numbers = #tpu.dot_dimension_numbers<[1], [0], [0], [1], [0, 0, 1, 1], [], []>} : vector<8x128xf32>, vector<128x512xf32>, vector<8x512xf32> -> vector<8x512xf32>
    %391 = arith.index_cast %387 : i32 to index
    %c0_145 = arith.constant 0 : index
    %392 = vector.load %arg17[%391, %c0_145] : memref<64x512xf32, #tpu.memory_space<vmem>>, vector<8x512xf32>
    %393 = arith.addf %390, %392 : vector<8x512xf32>
    %394 = vector.extract_strided_slice %393 {offsets = [0, 0], sizes = [8, 128], strides = [1, 1]} : vector<8x512xf32> to vector<8x128xf32>
    %395 = arith.negf %394 : vector<8x128xf32>
    %396 = math.exp %395 : vector<8x128xf32>
    %cst_146 = arith.constant 1.000000e+00 : f32
    %397 = vector.broadcast %cst_146 : f32 to vector<8x128xf32>
    %398 = arith.addf %397, %396 : vector<8x128xf32>
    %399 = arith.divf %397, %398 : vector<8x128xf32>
    %400 = vector.extract_strided_slice %393 {offsets = [0, 128], sizes = [8, 128], strides = [1, 1]} : vector<8x512xf32> to vector<8x128xf32>
    %401 = arith.negf %400 : vector<8x128xf32>
    %402 = math.exp %401 : vector<8x128xf32>
    %cst_147 = arith.constant 1.000000e+00 : f32
    %403 = vector.broadcast %cst_147 : f32 to vector<8x128xf32>
    %404 = arith.addf %403, %402 : vector<8x128xf32>
    %405 = arith.divf %403, %404 : vector<8x128xf32>
    %406 = vector.extract_strided_slice %393 {offsets = [0, 256], sizes = [8, 128], strides = [1, 1]} : vector<8x512xf32> to vector<8x128xf32>
    %407 = math.tanh %406 : vector<8x128xf32>
    %408 = vector.extract_strided_slice %393 {offsets = [0, 384], sizes = [8, 128], strides = [1, 1]} : vector<8x512xf32> to vector<8x128xf32>
    %409 = arith.negf %408 : vector<8x128xf32>
    %410 = math.exp %409 : vector<8x128xf32>
    %cst_148 = arith.constant 1.000000e+00 : f32
    %411 = vector.broadcast %cst_148 : f32 to vector<8x128xf32>
    %412 = arith.addf %411, %410 : vector<8x128xf32>
    %413 = arith.divf %411, %412 : vector<8x128xf32>
    %414 = arith.mulf %405, %381 : vector<8x128xf32>
    %415 = arith.mulf %399, %407 : vector<8x128xf32>
    %416 = arith.addf %414, %415 : vector<8x128xf32>
    %417 = math.tanh %416 : vector<8x128xf32>
    %418 = arith.mulf %413, %417 : vector<8x128xf32>
    %419 = arith.index_cast %387 : i32 to index
    %c0_149 = arith.constant 0 : index
    %420 = vector.load %arg18[%419, %c0_149] : memref<64x128xf32, #tpu.memory_space<vmem>>, vector<8x128xf32>
    tpu.vector_store %arg18[%419, %c0_149], %418 {strides = array<i32>} : memref<64x128xf32, #tpu.memory_space<vmem>>, vector<8x128xf32>,
    %c3_i32_150 = arith.constant 3 : i32
    %c8_i32_151 = arith.constant 8 : i32
    %421 = arith.muli %c3_i32_150, %c8_i32_151 : i32
    %422 = tpu.assume_multiple %421, 8 : i32
    %c1_152 = arith.constant 1 : index
    %c0_153 = arith.constant 0 : index
    %c0_154 = arith.constant 0 : index
    %423 = vector.load %arg4[%c1_152, %c0_153, %c0_154] : memref<3x128x512xf32, #tpu.memory_space<vmem>>, vector<1x128x512xf32>
    %424 = vector.shape_cast %423 : vector<1x128x512xf32> to vector<128x512xf32>
    %cst_155 = arith.constant dense<0.000000e+00> : vector<8x512xf32>
    %425 = tpu.matmul %418, %424, %cst_155 {dimension_numbers = #tpu.dot_dimension_numbers<[1], [0], [0], [1], [0, 0, 1, 1], [], []>} : vector<8x128xf32>, vector<128x512xf32>, vector<8x512xf32> -> vector<8x512xf32>
    %426 = arith.index_cast %422 : i32 to index
    %c0_156 = arith.constant 0 : index
    %427 = vector.load %arg17[%426, %c0_156] : memref<64x512xf32, #tpu.memory_space<vmem>>, vector<8x512xf32>
    %428 = arith.addf %425, %427 : vector<8x512xf32>
    %429 = vector.extract_strided_slice %428 {offsets = [0, 0], sizes = [8, 128], strides = [1, 1]} : vector<8x512xf32> to vector<8x128xf32>
    %430 = arith.negf %429 : vector<8x128xf32>
    %431 = math.exp %430 : vector<8x128xf32>
    %cst_157 = arith.constant 1.000000e+00 : f32
    %432 = vector.broadcast %cst_157 : f32 to vector<8x128xf32>
    %433 = arith.addf %432, %431 : vector<8x128xf32>
    %434 = arith.divf %432, %433 : vector<8x128xf32>
    %435 = vector.extract_strided_slice %428 {offsets = [0, 128], sizes = [8, 128], strides = [1, 1]} : vector<8x512xf32> to vector<8x128xf32>
    %436 = arith.negf %435 : vector<8x128xf32>
    %437 = math.exp %436 : vector<8x128xf32>
    %cst_158 = arith.constant 1.000000e+00 : f32
    %438 = vector.broadcast %cst_158 : f32 to vector<8x128xf32>
    %439 = arith.addf %438, %437 : vector<8x128xf32>
    %440 = arith.divf %438, %439 : vector<8x128xf32>
    %441 = vector.extract_strided_slice %428 {offsets = [0, 256], sizes = [8, 128], strides = [1, 1]} : vector<8x512xf32> to vector<8x128xf32>
    %442 = math.tanh %441 : vector<8x128xf32>
    %443 = vector.extract_strided_slice %428 {offsets = [0, 384], sizes = [8, 128], strides = [1, 1]} : vector<8x512xf32> to vector<8x128xf32>
    %444 = arith.negf %443 : vector<8x128xf32>
    %445 = math.exp %444 : vector<8x128xf32>
    %cst_159 = arith.constant 1.000000e+00 : f32
    %446 = vector.broadcast %cst_159 : f32 to vector<8x128xf32>
    %447 = arith.addf %446, %445 : vector<8x128xf32>
    %448 = arith.divf %446, %447 : vector<8x128xf32>
    %449 = arith.mulf %440, %416 : vector<8x128xf32>
    %450 = arith.mulf %434, %442 : vector<8x128xf32>
    %451 = arith.addf %449, %450 : vector<8x128xf32>
    %452 = math.tanh %451 : vector<8x128xf32>
    %453 = arith.mulf %448, %452 : vector<8x128xf32>
    %454 = arith.index_cast %422 : i32 to index
    %c0_160 = arith.constant 0 : index
    %455 = vector.load %arg18[%454, %c0_160] : memref<64x128xf32, #tpu.memory_space<vmem>>, vector<8x128xf32>
    tpu.vector_store %arg18[%454, %c0_160], %453 {strides = array<i32>} : memref<64x128xf32, #tpu.memory_space<vmem>>, vector<8x128xf32>,
    %c4_i32_161 = arith.constant 4 : i32
    %c8_i32_162 = arith.constant 8 : i32
    %456 = arith.muli %c4_i32_161, %c8_i32_162 : i32
    %457 = tpu.assume_multiple %456, 8 : i32
    %c1_163 = arith.constant 1 : index
    %c0_164 = arith.constant 0 : index
    %c0_165 = arith.constant 0 : index
    %458 = vector.load %arg4[%c1_163, %c0_164, %c0_165] : memref<3x128x512xf32, #tpu.memory_space<vmem>>, vector<1x128x512xf32>
    %459 = vector.shape_cast %458 : vector<1x128x512xf32> to vector<128x512xf32>
    %cst_166 = arith.constant dense<0.000000e+00> : vector<8x512xf32>
    %460 = tpu.matmul %453, %459, %cst_166 {dimension_numbers = #tpu.dot_dimension_numbers<[1], [0], [0], [1], [0, 0, 1, 1], [], []>} : vector<8x128xf32>, vector<128x512xf32>, vector<8x512xf32> -> vector<8x512xf32>
    %461 = arith.index_cast %457 : i32 to index
    %c0_167 = arith.constant 0 : index
    %462 = vector.load %arg17[%461, %c0_167] : memref<64x512xf32, #tpu.memory_space<vmem>>, vector<8x512xf32>
    %463 = arith.addf %460, %462 : vector<8x512xf32>
    %464 = vector.extract_strided_slice %463 {offsets = [0, 0], sizes = [8, 128], strides = [1, 1]} : vector<8x512xf32> to vector<8x128xf32>
    %465 = arith.negf %464 : vector<8x128xf32>
    %466 = math.exp %465 : vector<8x128xf32>
    %cst_168 = arith.constant 1.000000e+00 : f32
    %467 = vector.broadcast %cst_168 : f32 to vector<8x128xf32>
    %468 = arith.addf %467, %466 : vector<8x128xf32>
    %469 = arith.divf %467, %468 : vector<8x128xf32>
    %470 = vector.extract_strided_slice %463 {offsets = [0, 128], sizes = [8, 128], strides = [1, 1]} : vector<8x512xf32> to vector<8x128xf32>
    %471 = arith.negf %470 : vector<8x128xf32>
    %472 = math.exp %471 : vector<8x128xf32>
    %cst_169 = arith.constant 1.000000e+00 : f32
    %473 = vector.broadcast %cst_169 : f32 to vector<8x128xf32>
    %474 = arith.addf %473, %472 : vector<8x128xf32>
    %475 = arith.divf %473, %474 : vector<8x128xf32>
    %476 = vector.extract_strided_slice %463 {offsets = [0, 256], sizes = [8, 128], strides = [1, 1]} : vector<8x512xf32> to vector<8x128xf32>
    %477 = math.tanh %476 : vector<8x128xf32>
    %478 = vector.extract_strided_slice %463 {offsets = [0, 384], sizes = [8, 128], strides = [1, 1]} : vector<8x512xf32> to vector<8x128xf32>
    %479 = arith.negf %478 : vector<8x128xf32>
    %480 = math.exp %479 : vector<8x128xf32>
    %cst_170 = arith.constant 1.000000e+00 : f32
    %481 = vector.broadcast %cst_170 : f32 to vector<8x128xf32>
    %482 = arith.addf %481, %480 : vector<8x128xf32>
    %483 = arith.divf %481, %482 : vector<8x128xf32>
    %484 = arith.mulf %475, %451 : vector<8x128xf32>
    %485 = arith.mulf %469, %477 : vector<8x128xf32>
    %486 = arith.addf %484, %485 : vector<8x128xf32>
    %487 = math.tanh %486 : vector<8x128xf32>
    %488 = arith.mulf %483, %487 : vector<8x128xf32>
    %489 = arith.index_cast %457 : i32 to index
    %c0_171 = arith.constant 0 : index
    %490 = vector.load %arg18[%489, %c0_171] : memref<64x128xf32, #tpu.memory_space<vmem>>, vector<8x128xf32>
    tpu.vector_store %arg18[%489, %c0_171], %488 {strides = array<i32>} : memref<64x128xf32, #tpu.memory_space<vmem>>, vector<8x128xf32>,
    %c5_i32_172 = arith.constant 5 : i32
    %c8_i32_173 = arith.constant 8 : i32
    %491 = arith.muli %c5_i32_172, %c8_i32_173 : i32
    %492 = tpu.assume_multiple %491, 8 : i32
    %c1_174 = arith.constant 1 : index
    %c0_175 = arith.constant 0 : index
    %c0_176 = arith.constant 0 : index
    %493 = vector.load %arg4[%c1_174, %c0_175, %c0_176] : memref<3x128x512xf32, #tpu.memory_space<vmem>>, vector<1x128x512xf32>
    %494 = vector.shape_cast %493 : vector<1x128x512xf32> to vector<128x512xf32>
    %cst_177 = arith.constant dense<0.000000e+00> : vector<8x512xf32>
    %495 = tpu.matmul %488, %494, %cst_177 {dimension_numbers = #tpu.dot_dimension_numbers<[1], [0], [0], [1], [0, 0, 1, 1], [], []>} : vector<8x128xf32>, vector<128x512xf32>, vector<8x512xf32> -> vector<8x512xf32>
    %496 = arith.index_cast %492 : i32 to index
    %c0_178 = arith.constant 0 : index
    %497 = vector.load %arg17[%496, %c0_178] : memref<64x512xf32, #tpu.memory_space<vmem>>, vector<8x512xf32>
    %498 = arith.addf %495, %497 : vector<8x512xf32>
    %499 = vector.extract_strided_slice %498 {offsets = [0, 0], sizes = [8, 128], strides = [1, 1]} : vector<8x512xf32> to vector<8x128xf32>
    %500 = arith.negf %499 : vector<8x128xf32>
    %501 = math.exp %500 : vector<8x128xf32>
    %cst_179 = arith.constant 1.000000e+00 : f32
    %502 = vector.broadcast %cst_179 : f32 to vector<8x128xf32>
    %503 = arith.addf %502, %501 : vector<8x128xf32>
    %504 = arith.divf %502, %503 : vector<8x128xf32>
    %505 = vector.extract_strided_slice %498 {offsets = [0, 128], sizes = [8, 128], strides = [1, 1]} : vector<8x512xf32> to vector<8x128xf32>
    %506 = arith.negf %505 : vector<8x128xf32>
    %507 = math.exp %506 : vector<8x128xf32>
    %cst_180 = arith.constant 1.000000e+00 : f32
    %508 = vector.broadcast %cst_180 : f32 to vector<8x128xf32>
    %509 = arith.addf %508, %507 : vector<8x128xf32>
    %510 = arith.divf %508, %509 : vector<8x128xf32>
    %511 = vector.extract_strided_slice %498 {offsets = [0, 256], sizes = [8, 128], strides = [1, 1]} : vector<8x512xf32> to vector<8x128xf32>
    %512 = math.tanh %511 : vector<8x128xf32>
    %513 = vector.extract_strided_slice %498 {offsets = [0, 384], sizes = [8, 128], strides = [1, 1]} : vector<8x512xf32> to vector<8x128xf32>
    %514 = arith.negf %513 : vector<8x128xf32>
    %515 = math.exp %514 : vector<8x128xf32>
    %cst_181 = arith.constant 1.000000e+00 : f32
    %516 = vector.broadcast %cst_181 : f32 to vector<8x128xf32>
    %517 = arith.addf %516, %515 : vector<8x128xf32>
    %518 = arith.divf %516, %517 : vector<8x128xf32>
    %519 = arith.mulf %510, %486 : vector<8x128xf32>
    %520 = arith.mulf %504, %512 : vector<8x128xf32>
    %521 = arith.addf %519, %520 : vector<8x128xf32>
    %522 = math.tanh %521 : vector<8x128xf32>
    %523 = arith.mulf %518, %522 : vector<8x128xf32>
    %524 = arith.index_cast %492 : i32 to index
    %c0_182 = arith.constant 0 : index
    %525 = vector.load %arg18[%524, %c0_182] : memref<64x128xf32, #tpu.memory_space<vmem>>, vector<8x128xf32>
    tpu.vector_store %arg18[%524, %c0_182], %523 {strides = array<i32>} : memref<64x128xf32, #tpu.memory_space<vmem>>, vector<8x128xf32>,
    %c6_i32_183 = arith.constant 6 : i32
    %c8_i32_184 = arith.constant 8 : i32
    %526 = arith.muli %c6_i32_183, %c8_i32_184 : i32
    %527 = tpu.assume_multiple %526, 8 : i32
    %c1_185 = arith.constant 1 : index
    %c0_186 = arith.constant 0 : index
    %c0_187 = arith.constant 0 : index
    %528 = vector.load %arg4[%c1_185, %c0_186, %c0_187] : memref<3x128x512xf32, #tpu.memory_space<vmem>>, vector<1x128x512xf32>
    %529 = vector.shape_cast %528 : vector<1x128x512xf32> to vector<128x512xf32>
    %cst_188 = arith.constant dense<0.000000e+00> : vector<8x512xf32>
    %530 = tpu.matmul %523, %529, %cst_188 {dimension_numbers = #tpu.dot_dimension_numbers<[1], [0], [0], [1], [0, 0, 1, 1], [], []>} : vector<8x128xf32>, vector<128x512xf32>, vector<8x512xf32> -> vector<8x512xf32>
    %531 = arith.index_cast %527 : i32 to index
    %c0_189 = arith.constant 0 : index
    %532 = vector.load %arg17[%531, %c0_189] : memref<64x512xf32, #tpu.memory_space<vmem>>, vector<8x512xf32>
    %533 = arith.addf %530, %532 : vector<8x512xf32>
    %534 = vector.extract_strided_slice %533 {offsets = [0, 0], sizes = [8, 128], strides = [1, 1]} : vector<8x512xf32> to vector<8x128xf32>
    %535 = arith.negf %534 : vector<8x128xf32>
    %536 = math.exp %535 : vector<8x128xf32>
    %cst_190 = arith.constant 1.000000e+00 : f32
    %537 = vector.broadcast %cst_190 : f32 to vector<8x128xf32>
    %538 = arith.addf %537, %536 : vector<8x128xf32>
    %539 = arith.divf %537, %538 : vector<8x128xf32>
    %540 = vector.extract_strided_slice %533 {offsets = [0, 128], sizes = [8, 128], strides = [1, 1]} : vector<8x512xf32> to vector<8x128xf32>
    %541 = arith.negf %540 : vector<8x128xf32>
    %542 = math.exp %541 : vector<8x128xf32>
    %cst_191 = arith.constant 1.000000e+00 : f32
    %543 = vector.broadcast %cst_191 : f32 to vector<8x128xf32>
    %544 = arith.addf %543, %542 : vector<8x128xf32>
    %545 = arith.divf %543, %544 : vector<8x128xf32>
    %546 = vector.extract_strided_slice %533 {offsets = [0, 256], sizes = [8, 128], strides = [1, 1]} : vector<8x512xf32> to vector<8x128xf32>
    %547 = math.tanh %546 : vector<8x128xf32>
    %548 = vector.extract_strided_slice %533 {offsets = [0, 384], sizes = [8, 128], strides = [1, 1]} : vector<8x512xf32> to vector<8x128xf32>
    %549 = arith.negf %548 : vector<8x128xf32>
    %550 = math.exp %549 : vector<8x128xf32>
    %cst_192 = arith.constant 1.000000e+00 : f32
    %551 = vector.broadcast %cst_192 : f32 to vector<8x128xf32>
    %552 = arith.addf %551, %550 : vector<8x128xf32>
    %553 = arith.divf %551, %552 : vector<8x128xf32>
    %554 = arith.mulf %545, %521 : vector<8x128xf32>
    %555 = arith.mulf %539, %547 : vector<8x128xf32>
    %556 = arith.addf %554, %555 : vector<8x128xf32>
    %557 = math.tanh %556 : vector<8x128xf32>
    %558 = arith.mulf %553, %557 : vector<8x128xf32>
    %559 = arith.index_cast %527 : i32 to index
    %c0_193 = arith.constant 0 : index
    %560 = vector.load %arg18[%559, %c0_193] : memref<64x128xf32, #tpu.memory_space<vmem>>, vector<8x128xf32>
    tpu.vector_store %arg18[%559, %c0_193], %558 {strides = array<i32>} : memref<64x128xf32, #tpu.memory_space<vmem>>, vector<8x128xf32>,
    %c7_i32_194 = arith.constant 7 : i32
    %c8_i32_195 = arith.constant 8 : i32
    %561 = arith.muli %c7_i32_194, %c8_i32_195 : i32
    %562 = tpu.assume_multiple %561, 8 : i32
    %c1_196 = arith.constant 1 : index
    %c0_197 = arith.constant 0 : index
    %c0_198 = arith.constant 0 : index
    %563 = vector.load %arg4[%c1_196, %c0_197, %c0_198] : memref<3x128x512xf32, #tpu.memory_space<vmem>>, vector<1x128x512xf32>
    %564 = vector.shape_cast %563 : vector<1x128x512xf32> to vector<128x512xf32>
    %cst_199 = arith.constant dense<0.000000e+00> : vector<8x512xf32>
    %565 = tpu.matmul %558, %564, %cst_199 {dimension_numbers = #tpu.dot_dimension_numbers<[1], [0], [0], [1], [0, 0, 1, 1], [], []>} : vector<8x128xf32>, vector<128x512xf32>, vector<8x512xf32> -> vector<8x512xf32>
    %566 = arith.index_cast %562 : i32 to index
    %c0_200 = arith.constant 0 : index
    %567 = vector.load %arg17[%566, %c0_200] : memref<64x512xf32, #tpu.memory_space<vmem>>, vector<8x512xf32>
    %568 = arith.addf %565, %567 : vector<8x512xf32>
    %569 = vector.extract_strided_slice %568 {offsets = [0, 0], sizes = [8, 128], strides = [1, 1]} : vector<8x512xf32> to vector<8x128xf32>
    %570 = arith.negf %569 : vector<8x128xf32>
    %571 = math.exp %570 : vector<8x128xf32>
    %cst_201 = arith.constant 1.000000e+00 : f32
    %572 = vector.broadcast %cst_201 : f32 to vector<8x128xf32>
    %573 = arith.addf %572, %571 : vector<8x128xf32>
    %574 = arith.divf %572, %573 : vector<8x128xf32>
    %575 = vector.extract_strided_slice %568 {offsets = [0, 128], sizes = [8, 128], strides = [1, 1]} : vector<8x512xf32> to vector<8x128xf32>
    %576 = arith.negf %575 : vector<8x128xf32>
    %577 = math.exp %576 : vector<8x128xf32>
    %cst_202 = arith.constant 1.000000e+00 : f32
    %578 = vector.broadcast %cst_202 : f32 to vector<8x128xf32>
    %579 = arith.addf %578, %577 : vector<8x128xf32>
    %580 = arith.divf %578, %579 : vector<8x128xf32>
    %581 = vector.extract_strided_slice %568 {offsets = [0, 256], sizes = [8, 128], strides = [1, 1]} : vector<8x512xf32> to vector<8x128xf32>
    %582 = math.tanh %581 : vector<8x128xf32>
    %583 = vector.extract_strided_slice %568 {offsets = [0, 384], sizes = [8, 128], strides = [1, 1]} : vector<8x512xf32> to vector<8x128xf32>
    %584 = arith.negf %583 : vector<8x128xf32>
    %585 = math.exp %584 : vector<8x128xf32>
    %cst_203 = arith.constant 1.000000e+00 : f32
    %586 = vector.broadcast %cst_203 : f32 to vector<8x128xf32>
    %587 = arith.addf %586, %585 : vector<8x128xf32>
    %588 = arith.divf %586, %587 : vector<8x128xf32>
    %589 = arith.mulf %580, %556 : vector<8x128xf32>
    %590 = arith.mulf %574, %582 : vector<8x128xf32>
    %591 = arith.addf %589, %590 : vector<8x128xf32>
    %592 = math.tanh %591 : vector<8x128xf32>
    %593 = arith.mulf %588, %592 : vector<8x128xf32>
    %594 = arith.index_cast %562 : i32 to index
    %c0_204 = arith.constant 0 : index
    %595 = vector.load %arg18[%594, %c0_204] : memref<64x128xf32, #tpu.memory_space<vmem>>, vector<8x128xf32>
    tpu.vector_store %arg18[%594, %c0_204], %593 {strides = array<i32>} : memref<64x128xf32, #tpu.memory_space<vmem>>, vector<8x128xf32>,
    %c8_i32_205 = arith.constant 8 : i32
    %c1_206 = arith.constant 1 : index
    %c0_207 = arith.constant 0 : index
    %c0_208 = arith.constant 0 : index
    %596 = vector.load %arg15[%c1_206, %c0_207, %c0_208] : memref<3x8x128xf32, #tpu.memory_space<vmem>>, vector<1x8x128xf32>
    %597 = vector.shape_cast %596 : vector<1x8x128xf32> to vector<8x128xf32>
    %598 = vector.shape_cast %593 : vector<8x128xf32> to vector<1x8x128xf32>
    tpu.vector_store %arg15[%c1_206, %c0_207, %c0_208], %598 {strides = array<i32>} : memref<3x8x128xf32, #tpu.memory_space<vmem>>, vector<1x8x128xf32>,
    %c1_209 = arith.constant 1 : index
    %c0_210 = arith.constant 0 : index
    %c0_211 = arith.constant 0 : index
    %599 = vector.load %arg16[%c1_209, %c0_210, %c0_211] : memref<3x8x128xf32, #tpu.memory_space<vmem>>, vector<1x8x128xf32>
    %600 = vector.shape_cast %599 : vector<1x8x128xf32> to vector<8x128xf32>
    %601 = vector.shape_cast %591 : vector<8x128xf32> to vector<1x8x128xf32>
    tpu.vector_store %arg16[%c1_209, %c0_210, %c0_211], %601 {strides = array<i32>} : memref<3x8x128xf32, #tpu.memory_space<vmem>>, vector<1x8x128xf32>,
    %c0_212 = arith.constant 0 : index
    %c0_213 = arith.constant 0 : index
    %602 = vector.load %arg18[%c0_212, %c0_213] : memref<64x128xf32, #tpu.memory_space<vmem>>, vector<64x128xf32>
    %c1_214 = arith.constant 1 : index
    %c0_215 = arith.constant 0 : index
    %c0_216 = arith.constant 0 : index
    %603 = vector.load %arg3[%c1_214, %c0_215, %c0_216] : memref<2x128x512xf32, #tpu.memory_space<vmem>>, vector<1x128x512xf32>
    %604 = vector.shape_cast %603 : vector<1x128x512xf32> to vector<128x512xf32>
    %cst_217 = arith.constant dense<0.000000e+00> : vector<64x512xf32>
    %605 = tpu.matmul %602, %604, %cst_217 {dimension_numbers = #tpu.dot_dimension_numbers<[1], [0], [0], [1], [0, 0, 1, 1], [], []>} : vector<64x128xf32>, vector<128x512xf32>, vector<64x512xf32> -> vector<64x512xf32>
    %c2 = arith.constant 2 : index
    %c0_218 = arith.constant 0 : index
    %c0_219 = arith.constant 0 : index
    %606 = vector.load %arg5[%c2, %c0_218, %c0_219] : memref<3x1x512xf32, #tpu.memory_space<vmem>>, vector<1x1x512xf32>
    %607 = vector.shape_cast %606 : vector<1x1x512xf32> to vector<1x512xf32>
    %608 = vector.broadcast %607 : vector<1x512xf32> to vector<64x512xf32>
    %609 = arith.addf %605, %608 : vector<64x512xf32>
    %c0_220 = arith.constant 0 : index
    %c0_221 = arith.constant 0 : index
    %610 = vector.load %arg17[%c0_220, %c0_221] : memref<64x512xf32, #tpu.memory_space<vmem>>, vector<64x512xf32>
    tpu.vector_store %arg17[%c0_220, %c0_221], %609 {strides = array<i32>} : memref<64x512xf32, #tpu.memory_space<vmem>>, vector<64x512xf32>,
    %c2_222 = arith.constant 2 : index
    %c0_223 = arith.constant 0 : index
    %c0_224 = arith.constant 0 : index
    %611 = vector.load %arg15[%c2_222, %c0_223, %c0_224] : memref<3x8x128xf32, #tpu.memory_space<vmem>>, vector<1x8x128xf32>
    %612 = vector.shape_cast %611 : vector<1x8x128xf32> to vector<8x128xf32>
    %c2_225 = arith.constant 2 : index
    %c0_226 = arith.constant 0 : index
    %c0_227 = arith.constant 0 : index
    %613 = vector.load %arg16[%c2_225, %c0_226, %c0_227] : memref<3x8x128xf32, #tpu.memory_space<vmem>>, vector<1x8x128xf32>
    %614 = vector.shape_cast %613 : vector<1x8x128xf32> to vector<8x128xf32>
    %c0_i32_228 = arith.constant 0 : i32
    %c8_i32_229 = arith.constant 8 : i32
    %615 = arith.muli %c0_i32_228, %c8_i32_229 : i32
    %616 = tpu.assume_multiple %615, 8 : i32
    %c2_230 = arith.constant 2 : index
    %c0_231 = arith.constant 0 : index
    %c0_232 = arith.constant 0 : index
    %617 = vector.load %arg4[%c2_230, %c0_231, %c0_232] : memref<3x128x512xf32, #tpu.memory_space<vmem>>, vector<1x128x512xf32>
    %618 = vector.shape_cast %617 : vector<1x128x512xf32> to vector<128x512xf32>
    %cst_233 = arith.constant dense<0.000000e+00> : vector<8x512xf32>
    %619 = tpu.matmul %612, %618, %cst_233 {dimension_numbers = #tpu.dot_dimension_numbers<[1], [0], [0], [1], [0, 0, 1, 1], [], []>} : vector<8x128xf32>, vector<128x512xf32>, vector<8x512xf32> -> vector<8x512xf32>
    %620 = arith.index_cast %616 : i32 to index
    %c0_234 = arith.constant 0 : index
    %621 = vector.load %arg17[%620, %c0_234] : memref<64x512xf32, #tpu.memory_space<vmem>>, vector<8x512xf32>
    %622 = arith.addf %619, %621 : vector<8x512xf32>
    %623 = vector.extract_strided_slice %622 {offsets = [0, 0], sizes = [8, 128], strides = [1, 1]} : vector<8x512xf32> to vector<8x128xf32>
    %624 = arith.negf %623 : vector<8x128xf32>
    %625 = math.exp %624 : vector<8x128xf32>
    %cst_235 = arith.constant 1.000000e+00 : f32
    %626 = vector.broadcast %cst_235 : f32 to vector<8x128xf32>
    %627 = arith.addf %626, %625 : vector<8x128xf32>
    %628 = arith.divf %626, %627 : vector<8x128xf32>
    %629 = vector.extract_strided_slice %622 {offsets = [0, 128], sizes = [8, 128], strides = [1, 1]} : vector<8x512xf32> to vector<8x128xf32>
    %630 = arith.negf %629 : vector<8x128xf32>
    %631 = math.exp %630 : vector<8x128xf32>
    %cst_236 = arith.constant 1.000000e+00 : f32
    %632 = vector.broadcast %cst_236 : f32 to vector<8x128xf32>
    %633 = arith.addf %632, %631 : vector<8x128xf32>
    %634 = arith.divf %632, %633 : vector<8x128xf32>
    %635 = vector.extract_strided_slice %622 {offsets = [0, 256], sizes = [8, 128], strides = [1, 1]} : vector<8x512xf32> to vector<8x128xf32>
    %636 = math.tanh %635 : vector<8x128xf32>
    %637 = vector.extract_strided_slice %622 {offsets = [0, 384], sizes = [8, 128], strides = [1, 1]} : vector<8x512xf32> to vector<8x128xf32>
    %638 = arith.negf %637 : vector<8x128xf32>
    %639 = math.exp %638 : vector<8x128xf32>
    %cst_237 = arith.constant 1.000000e+00 : f32
    %640 = vector.broadcast %cst_237 : f32 to vector<8x128xf32>
    %641 = arith.addf %640, %639 : vector<8x128xf32>
    %642 = arith.divf %640, %641 : vector<8x128xf32>
    %643 = arith.mulf %634, %614 : vector<8x128xf32>
    %644 = arith.mulf %628, %636 : vector<8x128xf32>
    %645 = arith.addf %643, %644 : vector<8x128xf32>
    %646 = math.tanh %645 : vector<8x128xf32>
    %647 = arith.mulf %642, %646 : vector<8x128xf32>
    %648 = arith.index_cast %616 : i32 to index
    %c0_238 = arith.constant 0 : index
    %649 = vector.load %arg18[%648, %c0_238] : memref<64x128xf32, #tpu.memory_space<vmem>>, vector<8x128xf32>
    tpu.vector_store %arg18[%648, %c0_238], %647 {strides = array<i32>} : memref<64x128xf32, #tpu.memory_space<vmem>>, vector<8x128xf32>,
    %c1_i32_239 = arith.constant 1 : i32
    %c8_i32_240 = arith.constant 8 : i32
    %650 = arith.muli %c1_i32_239, %c8_i32_240 : i32
    %651 = tpu.assume_multiple %650, 8 : i32
    %c2_241 = arith.constant 2 : index
    %c0_242 = arith.constant 0 : index
    %c0_243 = arith.constant 0 : index
    %652 = vector.load %arg4[%c2_241, %c0_242, %c0_243] : memref<3x128x512xf32, #tpu.memory_space<vmem>>, vector<1x128x512xf32>
    %653 = vector.shape_cast %652 : vector<1x128x512xf32> to vector<128x512xf32>
    %cst_244 = arith.constant dense<0.000000e+00> : vector<8x512xf32>
    %654 = tpu.matmul %647, %653, %cst_244 {dimension_numbers = #tpu.dot_dimension_numbers<[1], [0], [0], [1], [0, 0, 1, 1], [], []>} : vector<8x128xf32>, vector<128x512xf32>, vector<8x512xf32> -> vector<8x512xf32>
    %655 = arith.index_cast %651 : i32 to index
    %c0_245 = arith.constant 0 : index
    %656 = vector.load %arg17[%655, %c0_245] : memref<64x512xf32, #tpu.memory_space<vmem>>, vector<8x512xf32>
    %657 = arith.addf %654, %656 : vector<8x512xf32>
    %658 = vector.extract_strided_slice %657 {offsets = [0, 0], sizes = [8, 128], strides = [1, 1]} : vector<8x512xf32> to vector<8x128xf32>
    %659 = arith.negf %658 : vector<8x128xf32>
    %660 = math.exp %659 : vector<8x128xf32>
    %cst_246 = arith.constant 1.000000e+00 : f32
    %661 = vector.broadcast %cst_246 : f32 to vector<8x128xf32>
    %662 = arith.addf %661, %660 : vector<8x128xf32>
    %663 = arith.divf %661, %662 : vector<8x128xf32>
    %664 = vector.extract_strided_slice %657 {offsets = [0, 128], sizes = [8, 128], strides = [1, 1]} : vector<8x512xf32> to vector<8x128xf32>
    %665 = arith.negf %664 : vector<8x128xf32>
    %666 = math.exp %665 : vector<8x128xf32>
    %cst_247 = arith.constant 1.000000e+00 : f32
    %667 = vector.broadcast %cst_247 : f32 to vector<8x128xf32>
    %668 = arith.addf %667, %666 : vector<8x128xf32>
    %669 = arith.divf %667, %668 : vector<8x128xf32>
    %670 = vector.extract_strided_slice %657 {offsets = [0, 256], sizes = [8, 128], strides = [1, 1]} : vector<8x512xf32> to vector<8x128xf32>
    %671 = math.tanh %670 : vector<8x128xf32>
    %672 = vector.extract_strided_slice %657 {offsets = [0, 384], sizes = [8, 128], strides = [1, 1]} : vector<8x512xf32> to vector<8x128xf32>
    %673 = arith.negf %672 : vector<8x128xf32>
    %674 = math.exp %673 : vector<8x128xf32>
    %cst_248 = arith.constant 1.000000e+00 : f32
    %675 = vector.broadcast %cst_248 : f32 to vector<8x128xf32>
    %676 = arith.addf %675, %674 : vector<8x128xf32>
    %677 = arith.divf %675, %676 : vector<8x128xf32>
    %678 = arith.mulf %669, %645 : vector<8x128xf32>
    %679 = arith.mulf %663, %671 : vector<8x128xf32>
    %680 = arith.addf %678, %679 : vector<8x128xf32>
    %681 = math.tanh %680 : vector<8x128xf32>
    %682 = arith.mulf %677, %681 : vector<8x128xf32>
    %683 = arith.index_cast %651 : i32 to index
    %c0_249 = arith.constant 0 : index
    %684 = vector.load %arg18[%683, %c0_249] : memref<64x128xf32, #tpu.memory_space<vmem>>, vector<8x128xf32>
    tpu.vector_store %arg18[%683, %c0_249], %682 {strides = array<i32>} : memref<64x128xf32, #tpu.memory_space<vmem>>, vector<8x128xf32>,
    %c2_i32_250 = arith.constant 2 : i32
    %c8_i32_251 = arith.constant 8 : i32
    %685 = arith.muli %c2_i32_250, %c8_i32_251 : i32
    %686 = tpu.assume_multiple %685, 8 : i32
    %c2_252 = arith.constant 2 : index
    %c0_253 = arith.constant 0 : index
    %c0_254 = arith.constant 0 : index
    %687 = vector.load %arg4[%c2_252, %c0_253, %c0_254] : memref<3x128x512xf32, #tpu.memory_space<vmem>>, vector<1x128x512xf32>
    %688 = vector.shape_cast %687 : vector<1x128x512xf32> to vector<128x512xf32>
    %cst_255 = arith.constant dense<0.000000e+00> : vector<8x512xf32>
    %689 = tpu.matmul %682, %688, %cst_255 {dimension_numbers = #tpu.dot_dimension_numbers<[1], [0], [0], [1], [0, 0, 1, 1], [], []>} : vector<8x128xf32>, vector<128x512xf32>, vector<8x512xf32> -> vector<8x512xf32>
    %690 = arith.index_cast %686 : i32 to index
    %c0_256 = arith.constant 0 : index
    %691 = vector.load %arg17[%690, %c0_256] : memref<64x512xf32, #tpu.memory_space<vmem>>, vector<8x512xf32>
    %692 = arith.addf %689, %691 : vector<8x512xf32>
    %693 = vector.extract_strided_slice %692 {offsets = [0, 0], sizes = [8, 128], strides = [1, 1]} : vector<8x512xf32> to vector<8x128xf32>
    %694 = arith.negf %693 : vector<8x128xf32>
    %695 = math.exp %694 : vector<8x128xf32>
    %cst_257 = arith.constant 1.000000e+00 : f32
    %696 = vector.broadcast %cst_257 : f32 to vector<8x128xf32>
    %697 = arith.addf %696, %695 : vector<8x128xf32>
    %698 = arith.divf %696, %697 : vector<8x128xf32>
    %699 = vector.extract_strided_slice %692 {offsets = [0, 128], sizes = [8, 128], strides = [1, 1]} : vector<8x512xf32> to vector<8x128xf32>
    %700 = arith.negf %699 : vector<8x128xf32>
    %701 = math.exp %700 : vector<8x128xf32>
    %cst_258 = arith.constant 1.000000e+00 : f32
    %702 = vector.broadcast %cst_258 : f32 to vector<8x128xf32>
    %703 = arith.addf %702, %701 : vector<8x128xf32>
    %704 = arith.divf %702, %703 : vector<8x128xf32>
    %705 = vector.extract_strided_slice %692 {offsets = [0, 256], sizes = [8, 128], strides = [1, 1]} : vector<8x512xf32> to vector<8x128xf32>
    %706 = math.tanh %705 : vector<8x128xf32>
    %707 = vector.extract_strided_slice %692 {offsets = [0, 384], sizes = [8, 128], strides = [1, 1]} : vector<8x512xf32> to vector<8x128xf32>
    %708 = arith.negf %707 : vector<8x128xf32>
    %709 = math.exp %708 : vector<8x128xf32>
    %cst_259 = arith.constant 1.000000e+00 : f32
    %710 = vector.broadcast %cst_259 : f32 to vector<8x128xf32>
    %711 = arith.addf %710, %709 : vector<8x128xf32>
    %712 = arith.divf %710, %711 : vector<8x128xf32>
    %713 = arith.mulf %704, %680 : vector<8x128xf32>
    %714 = arith.mulf %698, %706 : vector<8x128xf32>
    %715 = arith.addf %713, %714 : vector<8x128xf32>
    %716 = math.tanh %715 : vector<8x128xf32>
    %717 = arith.mulf %712, %716 : vector<8x128xf32>
    %718 = arith.index_cast %686 : i32 to index
    %c0_260 = arith.constant 0 : index
    %719 = vector.load %arg18[%718, %c0_260] : memref<64x128xf32, #tpu.memory_space<vmem>>, vector<8x128xf32>
    tpu.vector_store %arg18[%718, %c0_260], %717 {strides = array<i32>} : memref<64x128xf32, #tpu.memory_space<vmem>>, vector<8x128xf32>,
    %c3_i32_261 = arith.constant 3 : i32
    %c8_i32_262 = arith.constant 8 : i32
    %720 = arith.muli %c3_i32_261, %c8_i32_262 : i32
    %721 = tpu.assume_multiple %720, 8 : i32
    %c2_263 = arith.constant 2 : index
    %c0_264 = arith.constant 0 : index
    %c0_265 = arith.constant 0 : index
    %722 = vector.load %arg4[%c2_263, %c0_264, %c0_265] : memref<3x128x512xf32, #tpu.memory_space<vmem>>, vector<1x128x512xf32>
    %723 = vector.shape_cast %722 : vector<1x128x512xf32> to vector<128x512xf32>
    %cst_266 = arith.constant dense<0.000000e+00> : vector<8x512xf32>
    %724 = tpu.matmul %717, %723, %cst_266 {dimension_numbers = #tpu.dot_dimension_numbers<[1], [0], [0], [1], [0, 0, 1, 1], [], []>} : vector<8x128xf32>, vector<128x512xf32>, vector<8x512xf32> -> vector<8x512xf32>
    %725 = arith.index_cast %721 : i32 to index
    %c0_267 = arith.constant 0 : index
    %726 = vector.load %arg17[%725, %c0_267] : memref<64x512xf32, #tpu.memory_space<vmem>>, vector<8x512xf32>
    %727 = arith.addf %724, %726 : vector<8x512xf32>
    %728 = vector.extract_strided_slice %727 {offsets = [0, 0], sizes = [8, 128], strides = [1, 1]} : vector<8x512xf32> to vector<8x128xf32>
    %729 = arith.negf %728 : vector<8x128xf32>
    %730 = math.exp %729 : vector<8x128xf32>
    %cst_268 = arith.constant 1.000000e+00 : f32
    %731 = vector.broadcast %cst_268 : f32 to vector<8x128xf32>
    %732 = arith.addf %731, %730 : vector<8x128xf32>
    %733 = arith.divf %731, %732 : vector<8x128xf32>
    %734 = vector.extract_strided_slice %727 {offsets = [0, 128], sizes = [8, 128], strides = [1, 1]} : vector<8x512xf32> to vector<8x128xf32>
    %735 = arith.negf %734 : vector<8x128xf32>
    %736 = math.exp %735 : vector<8x128xf32>
    %cst_269 = arith.constant 1.000000e+00 : f32
    %737 = vector.broadcast %cst_269 : f32 to vector<8x128xf32>
    %738 = arith.addf %737, %736 : vector<8x128xf32>
    %739 = arith.divf %737, %738 : vector<8x128xf32>
    %740 = vector.extract_strided_slice %727 {offsets = [0, 256], sizes = [8, 128], strides = [1, 1]} : vector<8x512xf32> to vector<8x128xf32>
    %741 = math.tanh %740 : vector<8x128xf32>
    %742 = vector.extract_strided_slice %727 {offsets = [0, 384], sizes = [8, 128], strides = [1, 1]} : vector<8x512xf32> to vector<8x128xf32>
    %743 = arith.negf %742 : vector<8x128xf32>
    %744 = math.exp %743 : vector<8x128xf32>
    %cst_270 = arith.constant 1.000000e+00 : f32
    %745 = vector.broadcast %cst_270 : f32 to vector<8x128xf32>
    %746 = arith.addf %745, %744 : vector<8x128xf32>
    %747 = arith.divf %745, %746 : vector<8x128xf32>
    %748 = arith.mulf %739, %715 : vector<8x128xf32>
    %749 = arith.mulf %733, %741 : vector<8x128xf32>
    %750 = arith.addf %748, %749 : vector<8x128xf32>
    %751 = math.tanh %750 : vector<8x128xf32>
    %752 = arith.mulf %747, %751 : vector<8x128xf32>
    %753 = arith.index_cast %721 : i32 to index
    %c0_271 = arith.constant 0 : index
    %754 = vector.load %arg18[%753, %c0_271] : memref<64x128xf32, #tpu.memory_space<vmem>>, vector<8x128xf32>
    tpu.vector_store %arg18[%753, %c0_271], %752 {strides = array<i32>} : memref<64x128xf32, #tpu.memory_space<vmem>>, vector<8x128xf32>,
    %c4_i32_272 = arith.constant 4 : i32
    %c8_i32_273 = arith.constant 8 : i32
    %755 = arith.muli %c4_i32_272, %c8_i32_273 : i32
    %756 = tpu.assume_multiple %755, 8 : i32
    %c2_274 = arith.constant 2 : index
    %c0_275 = arith.constant 0 : index
    %c0_276 = arith.constant 0 : index
    %757 = vector.load %arg4[%c2_274, %c0_275, %c0_276] : memref<3x128x512xf32, #tpu.memory_space<vmem>>, vector<1x128x512xf32>
    %758 = vector.shape_cast %757 : vector<1x128x512xf32> to vector<128x512xf32>
    %cst_277 = arith.constant dense<0.000000e+00> : vector<8x512xf32>
    %759 = tpu.matmul %752, %758, %cst_277 {dimension_numbers = #tpu.dot_dimension_numbers<[1], [0], [0], [1], [0, 0, 1, 1], [], []>} : vector<8x128xf32>, vector<128x512xf32>, vector<8x512xf32> -> vector<8x512xf32>
    %760 = arith.index_cast %756 : i32 to index
    %c0_278 = arith.constant 0 : index
    %761 = vector.load %arg17[%760, %c0_278] : memref<64x512xf32, #tpu.memory_space<vmem>>, vector<8x512xf32>
    %762 = arith.addf %759, %761 : vector<8x512xf32>
    %763 = vector.extract_strided_slice %762 {offsets = [0, 0], sizes = [8, 128], strides = [1, 1]} : vector<8x512xf32> to vector<8x128xf32>
    %764 = arith.negf %763 : vector<8x128xf32>
    %765 = math.exp %764 : vector<8x128xf32>
    %cst_279 = arith.constant 1.000000e+00 : f32
    %766 = vector.broadcast %cst_279 : f32 to vector<8x128xf32>
    %767 = arith.addf %766, %765 : vector<8x128xf32>
    %768 = arith.divf %766, %767 : vector<8x128xf32>
    %769 = vector.extract_strided_slice %762 {offsets = [0, 128], sizes = [8, 128], strides = [1, 1]} : vector<8x512xf32> to vector<8x128xf32>
    %770 = arith.negf %769 : vector<8x128xf32>
    %771 = math.exp %770 : vector<8x128xf32>
    %cst_280 = arith.constant 1.000000e+00 : f32
    %772 = vector.broadcast %cst_280 : f32 to vector<8x128xf32>
    %773 = arith.addf %772, %771 : vector<8x128xf32>
    %774 = arith.divf %772, %773 : vector<8x128xf32>
    %775 = vector.extract_strided_slice %762 {offsets = [0, 256], sizes = [8, 128], strides = [1, 1]} : vector<8x512xf32> to vector<8x128xf32>
    %776 = math.tanh %775 : vector<8x128xf32>
    %777 = vector.extract_strided_slice %762 {offsets = [0, 384], sizes = [8, 128], strides = [1, 1]} : vector<8x512xf32> to vector<8x128xf32>
    %778 = arith.negf %777 : vector<8x128xf32>
    %779 = math.exp %778 : vector<8x128xf32>
    %cst_281 = arith.constant 1.000000e+00 : f32
    %780 = vector.broadcast %cst_281 : f32 to vector<8x128xf32>
    %781 = arith.addf %780, %779 : vector<8x128xf32>
    %782 = arith.divf %780, %781 : vector<8x128xf32>
    %783 = arith.mulf %774, %750 : vector<8x128xf32>
    %784 = arith.mulf %768, %776 : vector<8x128xf32>
    %785 = arith.addf %783, %784 : vector<8x128xf32>
    %786 = math.tanh %785 : vector<8x128xf32>
    %787 = arith.mulf %782, %786 : vector<8x128xf32>
    %788 = arith.index_cast %756 : i32 to index
    %c0_282 = arith.constant 0 : index
    %789 = vector.load %arg18[%788, %c0_282] : memref<64x128xf32, #tpu.memory_space<vmem>>, vector<8x128xf32>
    tpu.vector_store %arg18[%788, %c0_282], %787 {strides = array<i32>} : memref<64x128xf32, #tpu.memory_space<vmem>>, vector<8x128xf32>,
    %c5_i32_283 = arith.constant 5 : i32
    %c8_i32_284 = arith.constant 8 : i32
    %790 = arith.muli %c5_i32_283, %c8_i32_284 : i32
    %791 = tpu.assume_multiple %790, 8 : i32
    %c2_285 = arith.constant 2 : index
    %c0_286 = arith.constant 0 : index
    %c0_287 = arith.constant 0 : index
    %792 = vector.load %arg4[%c2_285, %c0_286, %c0_287] : memref<3x128x512xf32, #tpu.memory_space<vmem>>, vector<1x128x512xf32>
    %793 = vector.shape_cast %792 : vector<1x128x512xf32> to vector<128x512xf32>
    %cst_288 = arith.constant dense<0.000000e+00> : vector<8x512xf32>
    %794 = tpu.matmul %787, %793, %cst_288 {dimension_numbers = #tpu.dot_dimension_numbers<[1], [0], [0], [1], [0, 0, 1, 1], [], []>} : vector<8x128xf32>, vector<128x512xf32>, vector<8x512xf32> -> vector<8x512xf32>
    %795 = arith.index_cast %791 : i32 to index
    %c0_289 = arith.constant 0 : index
    %796 = vector.load %arg17[%795, %c0_289] : memref<64x512xf32, #tpu.memory_space<vmem>>, vector<8x512xf32>
    %797 = arith.addf %794, %796 : vector<8x512xf32>
    %798 = vector.extract_strided_slice %797 {offsets = [0, 0], sizes = [8, 128], strides = [1, 1]} : vector<8x512xf32> to vector<8x128xf32>
    %799 = arith.negf %798 : vector<8x128xf32>
    %800 = math.exp %799 : vector<8x128xf32>
    %cst_290 = arith.constant 1.000000e+00 : f32
    %801 = vector.broadcast %cst_290 : f32 to vector<8x128xf32>
    %802 = arith.addf %801, %800 : vector<8x128xf32>
    %803 = arith.divf %801, %802 : vector<8x128xf32>
    %804 = vector.extract_strided_slice %797 {offsets = [0, 128], sizes = [8, 128], strides = [1, 1]} : vector<8x512xf32> to vector<8x128xf32>
    %805 = arith.negf %804 : vector<8x128xf32>
    %806 = math.exp %805 : vector<8x128xf32>
    %cst_291 = arith.constant 1.000000e+00 : f32
    %807 = vector.broadcast %cst_291 : f32 to vector<8x128xf32>
    %808 = arith.addf %807, %806 : vector<8x128xf32>
    %809 = arith.divf %807, %808 : vector<8x128xf32>
    %810 = vector.extract_strided_slice %797 {offsets = [0, 256], sizes = [8, 128], strides = [1, 1]} : vector<8x512xf32> to vector<8x128xf32>
    %811 = math.tanh %810 : vector<8x128xf32>
    %812 = vector.extract_strided_slice %797 {offsets = [0, 384], sizes = [8, 128], strides = [1, 1]} : vector<8x512xf32> to vector<8x128xf32>
    %813 = arith.negf %812 : vector<8x128xf32>
    %814 = math.exp %813 : vector<8x128xf32>
    %cst_292 = arith.constant 1.000000e+00 : f32
    %815 = vector.broadcast %cst_292 : f32 to vector<8x128xf32>
    %816 = arith.addf %815, %814 : vector<8x128xf32>
    %817 = arith.divf %815, %816 : vector<8x128xf32>
    %818 = arith.mulf %809, %785 : vector<8x128xf32>
    %819 = arith.mulf %803, %811 : vector<8x128xf32>
    %820 = arith.addf %818, %819 : vector<8x128xf32>
    %821 = math.tanh %820 : vector<8x128xf32>
    %822 = arith.mulf %817, %821 : vector<8x128xf32>
    %823 = arith.index_cast %791 : i32 to index
    %c0_293 = arith.constant 0 : index
    %824 = vector.load %arg18[%823, %c0_293] : memref<64x128xf32, #tpu.memory_space<vmem>>, vector<8x128xf32>
    tpu.vector_store %arg18[%823, %c0_293], %822 {strides = array<i32>} : memref<64x128xf32, #tpu.memory_space<vmem>>, vector<8x128xf32>,
    %c6_i32_294 = arith.constant 6 : i32
    %c8_i32_295 = arith.constant 8 : i32
    %825 = arith.muli %c6_i32_294, %c8_i32_295 : i32
    %826 = tpu.assume_multiple %825, 8 : i32
    %c2_296 = arith.constant 2 : index
    %c0_297 = arith.constant 0 : index
    %c0_298 = arith.constant 0 : index
    %827 = vector.load %arg4[%c2_296, %c0_297, %c0_298] : memref<3x128x512xf32, #tpu.memory_space<vmem>>, vector<1x128x512xf32>
    %828 = vector.shape_cast %827 : vector<1x128x512xf32> to vector<128x512xf32>
    %cst_299 = arith.constant dense<0.000000e+00> : vector<8x512xf32>
    %829 = tpu.matmul %822, %828, %cst_299 {dimension_numbers = #tpu.dot_dimension_numbers<[1], [0], [0], [1], [0, 0, 1, 1], [], []>} : vector<8x128xf32>, vector<128x512xf32>, vector<8x512xf32> -> vector<8x512xf32>
    %830 = arith.index_cast %826 : i32 to index
    %c0_300 = arith.constant 0 : index
    %831 = vector.load %arg17[%830, %c0_300] : memref<64x512xf32, #tpu.memory_space<vmem>>, vector<8x512xf32>
    %832 = arith.addf %829, %831 : vector<8x512xf32>
    %833 = vector.extract_strided_slice %832 {offsets = [0, 0], sizes = [8, 128], strides = [1, 1]} : vector<8x512xf32> to vector<8x128xf32>
    %834 = arith.negf %833 : vector<8x128xf32>
    %835 = math.exp %834 : vector<8x128xf32>
    %cst_301 = arith.constant 1.000000e+00 : f32
    %836 = vector.broadcast %cst_301 : f32 to vector<8x128xf32>
    %837 = arith.addf %836, %835 : vector<8x128xf32>
    %838 = arith.divf %836, %837 : vector<8x128xf32>
    %839 = vector.extract_strided_slice %832 {offsets = [0, 128], sizes = [8, 128], strides = [1, 1]} : vector<8x512xf32> to vector<8x128xf32>
    %840 = arith.negf %839 : vector<8x128xf32>
    %841 = math.exp %840 : vector<8x128xf32>
    %cst_302 = arith.constant 1.000000e+00 : f32
    %842 = vector.broadcast %cst_302 : f32 to vector<8x128xf32>
    %843 = arith.addf %842, %841 : vector<8x128xf32>
    %844 = arith.divf %842, %843 : vector<8x128xf32>
    %845 = vector.extract_strided_slice %832 {offsets = [0, 256], sizes = [8, 128], strides = [1, 1]} : vector<8x512xf32> to vector<8x128xf32>
    %846 = math.tanh %845 : vector<8x128xf32>
    %847 = vector.extract_strided_slice %832 {offsets = [0, 384], sizes = [8, 128], strides = [1, 1]} : vector<8x512xf32> to vector<8x128xf32>
    %848 = arith.negf %847 : vector<8x128xf32>
    %849 = math.exp %848 : vector<8x128xf32>
    %cst_303 = arith.constant 1.000000e+00 : f32
    %850 = vector.broadcast %cst_303 : f32 to vector<8x128xf32>
    %851 = arith.addf %850, %849 : vector<8x128xf32>
    %852 = arith.divf %850, %851 : vector<8x128xf32>
    %853 = arith.mulf %844, %820 : vector<8x128xf32>
    %854 = arith.mulf %838, %846 : vector<8x128xf32>
    %855 = arith.addf %853, %854 : vector<8x128xf32>
    %856 = math.tanh %855 : vector<8x128xf32>
    %857 = arith.mulf %852, %856 : vector<8x128xf32>
    %858 = arith.index_cast %826 : i32 to index
    %c0_304 = arith.constant 0 : index
    %859 = vector.load %arg18[%858, %c0_304] : memref<64x128xf32, #tpu.memory_space<vmem>>, vector<8x128xf32>
    tpu.vector_store %arg18[%858, %c0_304], %857 {strides = array<i32>} : memref<64x128xf32, #tpu.memory_space<vmem>>, vector<8x128xf32>,
    %c7_i32_305 = arith.constant 7 : i32
    %c8_i32_306 = arith.constant 8 : i32
    %860 = arith.muli %c7_i32_305, %c8_i32_306 : i32
    %861 = tpu.assume_multiple %860, 8 : i32
    %c2_307 = arith.constant 2 : index
    %c0_308 = arith.constant 0 : index
    %c0_309 = arith.constant 0 : index
    %862 = vector.load %arg4[%c2_307, %c0_308, %c0_309] : memref<3x128x512xf32, #tpu.memory_space<vmem>>, vector<1x128x512xf32>
    %863 = vector.shape_cast %862 : vector<1x128x512xf32> to vector<128x512xf32>
    %cst_310 = arith.constant dense<0.000000e+00> : vector<8x512xf32>
    %864 = tpu.matmul %857, %863, %cst_310 {dimension_numbers = #tpu.dot_dimension_numbers<[1], [0], [0], [1], [0, 0, 1, 1], [], []>} : vector<8x128xf32>, vector<128x512xf32>, vector<8x512xf32> -> vector<8x512xf32>
    %865 = arith.index_cast %861 : i32 to index
    %c0_311 = arith.constant 0 : index
    %866 = vector.load %arg17[%865, %c0_311] : memref<64x512xf32, #tpu.memory_space<vmem>>, vector<8x512xf32>
    %867 = arith.addf %864, %866 : vector<8x512xf32>
    %868 = vector.extract_strided_slice %867 {offsets = [0, 0], sizes = [8, 128], strides = [1, 1]} : vector<8x512xf32> to vector<8x128xf32>
    %869 = arith.negf %868 : vector<8x128xf32>
    %870 = math.exp %869 : vector<8x128xf32>
    %cst_312 = arith.constant 1.000000e+00 : f32
    %871 = vector.broadcast %cst_312 : f32 to vector<8x128xf32>
    %872 = arith.addf %871, %870 : vector<8x128xf32>
    %873 = arith.divf %871, %872 : vector<8x128xf32>
    %874 = vector.extract_strided_slice %867 {offsets = [0, 128], sizes = [8, 128], strides = [1, 1]} : vector<8x512xf32> to vector<8x128xf32>
    %875 = arith.negf %874 : vector<8x128xf32>
    %876 = math.exp %875 : vector<8x128xf32>
    %cst_313 = arith.constant 1.000000e+00 : f32
    %877 = vector.broadcast %cst_313 : f32 to vector<8x128xf32>
    %878 = arith.addf %877, %876 : vector<8x128xf32>
    %879 = arith.divf %877, %878 : vector<8x128xf32>
    %880 = vector.extract_strided_slice %867 {offsets = [0, 256], sizes = [8, 128], strides = [1, 1]} : vector<8x512xf32> to vector<8x128xf32>
    %881 = math.tanh %880 : vector<8x128xf32>
    %882 = vector.extract_strided_slice %867 {offsets = [0, 384], sizes = [8, 128], strides = [1, 1]} : vector<8x512xf32> to vector<8x128xf32>
    %883 = arith.negf %882 : vector<8x128xf32>
    %884 = math.exp %883 : vector<8x128xf32>
    %cst_314 = arith.constant 1.000000e+00 : f32
    %885 = vector.broadcast %cst_314 : f32 to vector<8x128xf32>
    %886 = arith.addf %885, %884 : vector<8x128xf32>
    %887 = arith.divf %885, %886 : vector<8x128xf32>
    %888 = arith.mulf %879, %855 : vector<8x128xf32>
    %889 = arith.mulf %873, %881 : vector<8x128xf32>
    %890 = arith.addf %888, %889 : vector<8x128xf32>
    %891 = math.tanh %890 : vector<8x128xf32>
    %892 = arith.mulf %887, %891 : vector<8x128xf32>
    %893 = arith.index_cast %861 : i32 to index
    %c0_315 = arith.constant 0 : index
    %894 = vector.load %arg18[%893, %c0_315] : memref<64x128xf32, #tpu.memory_space<vmem>>, vector<8x128xf32>
    tpu.vector_store %arg18[%893, %c0_315], %892 {strides = array<i32>} : memref<64x128xf32, #tpu.memory_space<vmem>>, vector<8x128xf32>,
    %c8_i32_316 = arith.constant 8 : i32
    %c2_317 = arith.constant 2 : index
    %c0_318 = arith.constant 0 : index
    %c0_319 = arith.constant 0 : index
    %895 = vector.load %arg15[%c2_317, %c0_318, %c0_319] : memref<3x8x128xf32, #tpu.memory_space<vmem>>, vector<1x8x128xf32>
    %896 = vector.shape_cast %895 : vector<1x8x128xf32> to vector<8x128xf32>
    %897 = vector.shape_cast %892 : vector<8x128xf32> to vector<1x8x128xf32>
    tpu.vector_store %arg15[%c2_317, %c0_318, %c0_319], %897 {strides = array<i32>} : memref<3x8x128xf32, #tpu.memory_space<vmem>>, vector<1x8x128xf32>,
    %c2_320 = arith.constant 2 : index
    %c0_321 = arith.constant 0 : index
    %c0_322 = arith.constant 0 : index
    %898 = vector.load %arg16[%c2_320, %c0_321, %c0_322] : memref<3x8x128xf32, #tpu.memory_space<vmem>>, vector<1x8x128xf32>
    %899 = vector.shape_cast %898 : vector<1x8x128xf32> to vector<8x128xf32>
    %900 = vector.shape_cast %890 : vector<8x128xf32> to vector<1x8x128xf32>
    tpu.vector_store %arg16[%c2_320, %c0_321, %c0_322], %900 {strides = array<i32>} : memref<3x8x128xf32, #tpu.memory_space<vmem>>, vector<1x8x128xf32>,
    %c0_323 = arith.constant 0 : index
    %c0_324 = arith.constant 0 : index
    %901 = vector.load %arg18[%c0_323, %c0_324] : memref<64x128xf32, #tpu.memory_space<vmem>>, vector<64x128xf32>
    %c0_325 = arith.constant 0 : index
    %c0_326 = arith.constant 0 : index
    %902 = vector.load %arg6[%c0_325, %c0_326] : memref<128x128xf32, #tpu.memory_space<vmem>>, vector<128x128xf32>
    %cst_327 = arith.constant dense<0.000000e+00> : vector<64x128xf32>
    %903 = tpu.matmul %901, %902, %cst_327 {dimension_numbers = #tpu.dot_dimension_numbers<[1], [0], [0], [1], [0, 0, 1, 1], [], []>} : vector<64x128xf32>, vector<128x128xf32>, vector<64x128xf32> -> vector<64x128xf32>
    %c0_328 = arith.constant 0 : index
    %c0_329 = arith.constant 0 : index
    %904 = vector.load %arg7[%c0_328, %c0_329] : memref<1x128xf32, #tpu.memory_space<vmem>>, vector<1x128xf32>
    %905 = vector.broadcast %904 : vector<1x128xf32> to vector<64x128xf32>
    %906 = arith.addf %903, %905 : vector<64x128xf32>
    %cst_330 = arith.constant 0.000000e+00 : f32
    %907 = vector.broadcast %cst_330 : f32 to vector<64x128xf32>
    %908 = arith.cmpf oge, %906, %907 : vector<64x128xf32>
    %cst_331 = arith.constant 0.00999999977 : f32
    %909 = vector.broadcast %cst_331 : f32 to vector<64x128xf32>
    %910 = arith.mulf %909, %906 : vector<64x128xf32>
    %911 = arith.select %908, %906, %910 : vector<64x128xi1>, vector<64x128xf32>
    %c0_332 = arith.constant 0 : index
    %c0_333 = arith.constant 0 : index
    %912 = vector.load %arg8[%c0_332, %c0_333] : memref<128x128xf32, #tpu.memory_space<vmem>>, vector<128x128xf32>
    %cst_334 = arith.constant dense<0.000000e+00> : vector<64x128xf32>
    %913 = tpu.matmul %911, %912, %cst_334 {dimension_numbers = #tpu.dot_dimension_numbers<[1], [0], [0], [1], [0, 0, 1, 1], [], []>} : vector<64x128xf32>, vector<128x128xf32>, vector<64x128xf32> -> vector<64x128xf32>
    %c0_335 = arith.constant 0 : index
    %c0_336 = arith.constant 0 : index
    %914 = vector.load %arg9[%c0_335, %c0_336] : memref<1x128xf32, #tpu.memory_space<vmem>>, vector<1x128xf32>
    %915 = vector.broadcast %914 : vector<1x128xf32> to vector<64x128xf32>
    %916 = arith.addf %913, %915 : vector<64x128xf32>
    %c0_337 = arith.constant 0 : index
    %c0_338 = arith.constant 0 : index
    %917 = vector.load %arg12[%c0_337, %c0_338] : memref<64x128xf32, #tpu.memory_space<vmem>>, vector<64x128xf32>
    tpu.vector_store %arg12[%c0_337, %c0_338], %916 {strides = array<i32>} : memref<64x128xf32, #tpu.memory_space<vmem>>, vector<64x128xf32>,
    %c0_i32_339 = arith.constant 0 : i32
    %918 = arith.cmpi eq, %arg0, %c0_i32_339 : i32
    %919 = arith.extui %918 : i1 to i32
    %c0_i32_340 = arith.constant 0 : i32
    %920 = arith.cmpi ne, %919, %c0_i32_340 : i32
    scf.if %920 {
      %c0_341 = arith.constant 0 : index
      %c0_342 = arith.constant 0 : index
      %c0_343 = arith.constant 0 : index
      %921 = vector.load %arg15[%c0_341, %c0_342, %c0_343] : memref<3x8x128xf32, #tpu.memory_space<vmem>>, vector<3x8x128xf32>
      %c0_344 = arith.constant 0 : index
      %c0_345 = arith.constant 0 : index
      %c0_346 = arith.constant 0 : index
      %922 = vector.load %arg13[%c0_344, %c0_345, %c0_346] : memref<3x8x128xf32, #tpu.memory_space<vmem>>, vector<3x8x128xf32>
      tpu.vector_store %arg13[%c0_344, %c0_345, %c0_346], %921 {strides = array<i32>} : memref<3x8x128xf32, #tpu.memory_space<vmem>>, vector<3x8x128xf32>,
      %c0_347 = arith.constant 0 : index
      %c0_348 = arith.constant 0 : index
      %c0_349 = arith.constant 0 : index
      %923 = vector.load %arg16[%c0_347, %c0_348, %c0_349] : memref<3x8x128xf32, #tpu.memory_space<vmem>>, vector<3x8x128xf32>
      %c0_350 = arith.constant 0 : index
      %c0_351 = arith.constant 0 : index
      %c0_352 = arith.constant 0 : index
      %924 = vector.load %arg14[%c0_350, %c0_351, %c0_352] : memref<3x8x128xf32, #tpu.memory_space<vmem>>, vector<3x8x128xf32>
      tpu.vector_store %arg14[%c0_350, %c0_351, %c0_352], %923 {strides = array<i32>} : memref<3x8x128xf32, #tpu.memory_space<vmem>>, vector<3x8x128xf32>,
    } else {
    }
    return
  }
  func.func @transform_0(%arg0: i32) -> (i32, i32) {
    %c0_i32 = arith.constant 0 : i32
    %c0_i32_0 = arith.constant 0 : i32
    return %arg0, %c0_i32 : i32, i32
  }
  func.func @transform_1(%arg0: i32) -> (i32, i32) {
    %c0_i32 = arith.constant 0 : i32
    %c0_i32_0 = arith.constant 0 : i32
    %c0_i32_1 = arith.constant 0 : i32
    return %c0_i32, %c0_i32_0 : i32, i32
  }
  func.func @transform_2(%arg0: i32) -> (i32, i32, i32) {
    %c0_i32 = arith.constant 0 : i32
    %c0_i32_0 = arith.constant 0 : i32
    %c0_i32_1 = arith.constant 0 : i32
    %c0_i32_2 = arith.constant 0 : i32
    return %c0_i32, %c0_i32_0, %c0_i32_1 : i32, i32, i32
  }
  func.func @transform_3(%arg0: i32) -> (i32, i32, i32) {
    %c0_i32 = arith.constant 0 : i32
    %c0_i32_0 = arith.constant 0 : i32
    %c0_i32_1 = arith.constant 0 : i32
    %c0_i32_2 = arith.constant 0 : i32
    return %c0_i32, %c0_i32_0, %c0_i32_1 : i32, i32, i32
  }
  func.func @transform_4(%arg0: i32) -> (i32, i32, i32) {
    %c0_i32 = arith.constant 0 : i32
    %c0_i32_0 = arith.constant 0 : i32
    %c0_i32_1 = arith.constant 0 : i32
    %c0_i32_2 = arith.constant 0 : i32
    return %c0_i32, %c0_i32_0, %c0_i32_1 : i32, i32, i32
  }
  func.func @transform_5(%arg0: i32) -> (i32, i32) {
    %c0_i32 = arith.constant 0 : i32
    %c0_i32_0 = arith.constant 0 : i32
    %c0_i32_1 = arith.constant 0 : i32
    return %c0_i32, %c0_i32_0 : i32, i32
  }
  func.func @transform_6(%arg0: i32) -> (i32, i32) {
    %c0_i32 = arith.constant 0 : i32
    %c0_i32_0 = arith.constant 0 : i32
    %c0_i32_1 = arith.constant 0 : i32
    return %c0_i32, %c0_i32_0 : i32, i32
  }
  func.func @transform_7(%arg0: i32) -> (i32, i32) {
    %c0_i32 = arith.constant 0 : i32
    %c0_i32_0 = arith.constant 0 : i32
    %c0_i32_1 = arith.constant 0 : i32
    return %c0_i32, %c0_i32_0 : i32, i32
  }
  func.func @transform_8(%arg0: i32) -> (i32, i32) {
    %c0_i32 = arith.constant 0 : i32
    %c0_i32_0 = arith.constant 0 : i32
    %c0_i32_1 = arith.constant 0 : i32
    return %c0_i32, %c0_i32_0 : i32, i32
  }
  func.func @transform_9(%arg0: i32) -> (i32, i32, i32) {
    %c0_i32 = arith.constant 0 : i32
    %c0_i32_0 = arith.constant 0 : i32
    %c0_i32_1 = arith.constant 0 : i32
    %c0_i32_2 = arith.constant 0 : i32
    return %c0_i32, %c0_i32_0, %c0_i32_1 : i32, i32, i32
  }
  func.func @transform_10(%arg0: i32) -> (i32, i32, i32) {
    %c0_i32 = arith.constant 0 : i32
    %c0_i32_0 = arith.constant 0 : i32
    %c0_i32_1 = arith.constant 0 : i32
    %c0_i32_2 = arith.constant 0 : i32
    return %c0_i32, %c0_i32_0, %c0_i32_1 : i32, i32, i32
  }
  func.func @transform_11(%arg0: i32) -> (i32, i32) {
    %c0_i32 = arith.constant 0 : i32
    %c0_i32_0 = arith.constant 0 : i32
    return %arg0, %c0_i32 : i32, i32
  }
  func.func @transform_12(%arg0: i32) -> (i32, i32, i32) {
    %c0_i32 = arith.constant 0 : i32
    %c0_i32_0 = arith.constant 0 : i32
    %c0_i32_1 = arith.constant 0 : i32
    %c0_i32_2 = arith.constant 0 : i32
    return %c0_i32, %c0_i32_0, %c0_i32_1 : i32, i32, i32
  }
  func.func @transform_13(%arg0: i32) -> (i32, i32, i32) {
    %c0_i32 = arith.constant 0 : i32
    %c0_i32_0 = arith.constant 0 : i32
    %c0_i32_1 = arith.constant 0 : i32
    %c0_i32_2 = arith.constant 0 : i32
    return %c0_i32, %c0_i32_0, %c0_i32_1 : i32, i32, i32
  }
}

</mosaic_0001>

<bundles_post_ra>
// kernel: bwlstm1_forward.1
= control target key start
LH: loop header
LB: loop body
LE: loop exit
PB: predicated region body
PF: predicated region fallthrough
CT: control target
= control target key end

     0   :  { %v14119_v3 = vmov 0.0   ;;  %v10516_v8 = vmov 0   ;;  %s14105_s3 = inlined_call_operand.vmem [shape: f32[3,128,512], index: 3, kind: input, shape index: {}]   ;;  %s14106_s0 = inlined_call_operand.vmem [shape: f32[64,1], index: 0, kind: input, shape index: {}]   ;;  %s14107_s9 = inlined_call_operand.vmem [shape: f32[3,8,128], index: 9, kind: input, shape index: {}, may-alias: {9,10}]   ;;  %s14108_s1 = inlined_call_operand.vmem [shape: f32[1,512], index: 1, kind: input, shape index: {}]   ;;  %s14109_s4 = inlined_call_operand.vmem [shape: f32[3,1,512], index: 4, kind: input, shape index: {}]   ;;  %s14110_s10 = inlined_call_operand.vmem [shape: f32[3,8,128], index: 10, kind: input, shape index: {}, may-alias: {9,10}]   ;;  %s14111_s2 = inlined_call_operand.vmem [shape: f32[2,128,512], index: 2, kind: input, shape index: {}]   ;;  %s14112_s13 = inlined_call_operand.vmem [shape: f32[3,8,128], index: 13, kind: output, shape index: {2}]   ;;  %s14113_s12 = inlined_call_operand.vmem [shape: f32[3,8,128], index: 12, kind: output, shape index: {1}]   ;;  %s14114_s5 = inlined_call_operand.vmem [shape: f32[128,128], index: 5, kind: input, shape index: {}]   ;;  %s14115_s7 = inlined_call_operand.vmem [shape: f32[128,128], index: 7, kind: input, shape index: {}]   ;;  %s14116_s6 = inlined_call_operand.vmem [shape: f32[1,128], index: 6, kind: input, shape index: {}]   ;;  %s14117_s8 = inlined_call_operand.vmem [shape: f32[1,128], index: 8, kind: input, shape index: {}]   ;;  %s14118_s11 = inlined_call_operand.vmem [shape: f32[64,128], index: 11, kind: output, shape index: {0}]  }
   0x1   :  { %v248_v0 = vld [vmem:[%s14105_s3 + $0x8] sm:$0xff]  ;;  %v250_v2 = vld [vmem:[%s14105_s3 + $0x18] sm:$0xff]  ;;  %382 = vmatprep.mubr.f32.mxu0 %v14119_v3  ;;  %453 = vmatprep.mubr.f32.mxu1 %v14119_v3  ;;  %v247_v6 = vld [vmem:[%s14105_s3] sm:$0xff] }
   0x2   :  { %v252_v1 = vld [vmem:[%s14105_s3 + $0x28] sm:$0xff]  ;;  %v254_v5 = vld [vmem:[%s14105_s3 + $0x38] sm:$0xff]  ;;  %v251_v7 = vld [vmem:[%s14105_s3 + $0x20] sm:$0xff]  ;;  %10129 = vset.pattern.permute.xlu0 %v10516_v8  ;;  %10130 = vset.pattern.permute.xlu1 %v10516_v8 }
   0x3   :  { %v10598_v4 = vpack.c.bf16 %v252_v1, %v248_v0  ;;  %v10609_v9 = vpack.c.bf16 %v254_v5, %v250_v2  ;;  %v10611_v10 = vpack.c.bf16 %v251_v7, %v247_v6  ;;  %v249_v11 = vld [vmem:[%s14105_s3 + $0x10] sm:$0xff]  ;;  %v256_v13 = vld [vmem:[%s14105_s3 + $0x48] sm:$0xff]  ;;  %v258_v16 = vld [vmem:[%s14105_s3 + $0x58] sm:$0xff] }
   0x4   :  { %v253_v12 = vld [vmem:[%s14105_s3 + $0x30] sm:$0xff]  ;;  %v260_v15 = vld [vmem:[%s14105_s3 + $0x68] sm:$0xff]  ;;  %v262_v17 = vld [vmem:[%s14105_s3 + $0x78] sm:$0xff] }
   0x5   :  { %8272 = vmatprep.subr.bf16.mxu0 %v10598_v4  ;;  %v10623_v14 = vpack.c.bf16 %v253_v12, %v249_v11  ;;  %8304 = vmatprep.subr.bf16.mxu1 %v10609_v9  ;;  %v10636_v18 = vpack.c.bf16 %v260_v15, %v256_v13  ;;  %v10638_v19 = vpack.c.bf16 %v262_v17, %v258_v16  ;;  %v255_v20 = vld [vmem:[%s14105_s3 + $0x40] sm:$0xff]  ;;  %v257_v22 = vld [vmem:[%s14105_s3 + $0x50] sm:$0xff]  ;;  %v264_v25 = vld [vmem:[%s14105_s3 + $0x88] sm:$0xff] }
   0x6   :  { %8274 = vmatpush1.bf16.msra.mxu0 %v10611_v10  ;;  %v259_v21 = vld [vmem:[%s14105_s3 + $0x60] sm:$0xff]  ;;  %v261_v24 = vld [vmem:[%s14105_s3 + $0x70] sm:$0xff]  ;;  %v268_v26 = vld [vmem:[%s14105_s3 + $0xa8] sm:$0xff] }
   0x7   :  { %8306 = vmatpush1.bf16.msra.mxu1 %v10623_v14  ;;  %v10650_v23 = vpack.c.bf16 %v259_v21, %v255_v20  ;;  %8276 = vmatprep.subr.bf16.mxu0 %v10636_v18  ;;  %v10663_v27 = vpack.c.bf16 %v261_v24, %v257_v22  ;;  %v10665_v28 = vpack.c.bf16 %v268_v26, %v264_v25  ;;  %v266_v29 = vld [vmem:[%s14105_s3 + $0x98] sm:$0xff]  ;;  %v263_v31 = vld [vmem:[%s14105_s3 + $0x80] sm:$0xff]  ;;  %v265_v34 = vld [vmem:[%s14105_s3 + $0x90] sm:$0xff] }
   0x8   :  { %8308 = vmatprep.subr.bf16.mxu1 %v10638_v19  ;;  %v270_v30 = vld [vmem:[%s14105_s3 + $0xb8] sm:$0xff]  ;;  %v267_v33 = vld [vmem:[%s14105_s3 + $0xa0] sm:$0xff]  ;;  %v269_v35 = vld [vmem:[%s14105_s3 + $0xb0] sm:$0xff] }
   0x9   :  { %v10676_v32 = vpack.c.bf16 %v270_v30, %v266_v29  ;;  %v10688_v36 = vpack.c.bf16 %v267_v33, %v263_v31  ;;  %v272_v37 = vld [vmem:[%s14105_s3 + $0xc8] sm:$0xff]  ;;  %v274_v39 = vld [vmem:[%s14105_s3 + $0xd8] sm:$0xff]  ;;  %v10701_v40 = vpack.c.bf16 %v269_v35, %v265_v34  ;;  %v271_v43 = vld [vmem:[%s14105_s3 + $0xc0] sm:$0xff] }
   0xa   :  { %8278 = vmatpush1.bf16.msra.mxu0 %v10650_v23  ;;  %v276_v38 = vld [vmem:[%s14105_s3 + $0xe8] sm:$0xff]  ;;  %v278_v42 = vld [vmem:[%s14105_s3 + $0xf8] sm:$0xff]  ;;  %v275_v44 = vld [vmem:[%s14105_s3 + $0xe0] sm:$0xff] }
   0xb   :  { %8310 = vmatpush1.bf16.msra.mxu1 %v10663_v27  ;;  %8280 = vmatprep.subr.bf16.mxu0 %v10665_v28  ;;  %v10703_v41 = vpack.c.bf16 %v276_v38, %v272_v37  ;;  %v10715_v45 = vpack.c.bf16 %v278_v42, %v274_v39  ;;  %v273_v46 = vld [vmem:[%s14105_s3 + $0xd0] sm:$0xff]  ;;  %v280_v48 = vld [vmem:[%s14105_s3 + $0x108] sm:$0xff]  ;;  %v282_v50 = vld [vmem:[%s14105_s3 + $0x118] sm:$0xff]  ;;  %v10736_v52 = vpack.c.bf16 %v275_v44, %v271_v43 }
   0xc   :  { %8312 = vmatprep.subr.bf16.mxu1 %v10676_v32  ;;  %v277_v47 = vld [vmem:[%s14105_s3 + $0xf0] sm:$0xff]  ;;  %v284_v49 = vld [vmem:[%s14105_s3 + $0x128] sm:$0xff]  ;;  %v286_v51 = vld [vmem:[%s14105_s3 + $0x138] sm:$0xff] }
   0xd   :  { %v10740_v53 = vpack.c.bf16 %v277_v47, %v273_v46  ;;  %v10742_v54 = vpack.c.bf16 %v284_v49, %v280_v48  ;;  %v279_v55 = vld [vmem:[%s14105_s3 + $0x100] sm:$0xff]  ;;  %v281_v57 = vld [vmem:[%s14105_s3 + $0x110] sm:$0xff]  ;;  %v10754_v58 = vpack.c.bf16 %v286_v51, %v282_v50  ;;  %v288_v60 = vld [vmem:[%s14105_s3 + $0x148] sm:$0xff] }
   0xe   :  { %8282 = vmatpush1.bf16.msra.mxu0 %v10688_v36  ;;  %v283_v56 = vld [vmem:[%s14105_s3 + $0x120] sm:$0xff]  ;;  %v285_v59 = vld [vmem:[%s14105_s3 + $0x130] sm:$0xff]  ;;  %v292_v61 = vld [vmem:[%s14105_s3 + $0x168] sm:$0xff] }
   0xf   :  { %8314 = vmatpush1.bf16.msra.mxu1 %v10701_v40  ;;  %8284 = vmatprep.subr.bf16.mxu0 %v10703_v41  ;;  %v290_v62 = vld [vmem:[%s14105_s3 + $0x158] sm:$0xff]  ;;  %v10772_v0 = vpack.c.bf16 %v283_v56, %v279_v55  ;;  %v10776_v1 = vpack.c.bf16 %v285_v59, %v281_v57  ;;  %v10778_v2 = vpack.c.bf16 %v292_v61, %v288_v60  ;;  %v287_v5 = vld [vmem:[%s14105_s3 + $0x140] sm:$0xff]  ;;  %v289_v7 = vld [vmem:[%s14105_s3 + $0x150] sm:$0xff]  ;;  %v108_v57 = vlaneseq }
  0x10   :  { %8316 = vmatprep.subr.bf16.mxu1 %v10715_v45  ;;  %v294_v63 = vld [vmem:[%s14105_s3 + $0x178] sm:$0xff]  ;;  %v291_v6 = vld [vmem:[%s14105_s3 + $0x160] sm:$0xff]  ;;  %v293_v11 = vld [vmem:[%s14105_s3 + $0x170] sm:$0xff] }
  0x11   :  { %v10790_v8 = vpack.c.bf16 %v294_v63, %v290_v62  ;;  %v296_v12 = vld [vmem:[%s14105_s3 + $0x188] sm:$0xff]  ;;  %v298_v15 = vld [vmem:[%s14105_s3 + $0x198] sm:$0xff]  ;;  %v10808_v17 = vpack.c.bf16 %v291_v6, %v287_v5  ;;  %v295_v20 = vld [vmem:[%s14105_s3 + $0x180] sm:$0xff]  ;;  %v10815_v21 = vpack.c.bf16 %v293_v11, %v289_v7  ;;  %v109_v59 = vshrl.u32 %v108_v57, 7 }
  0x12   :  { %8286 = vmatpush1.bf16.msra.mxu0 %v10736_v52  ;;  %v300_v13 = vld [vmem:[%s14105_s3 + $0x1a8] sm:$0xff]  ;;  %v302_v16 = vld [vmem:[%s14105_s3 + $0x1b8] sm:$0xff]  ;;  %v299_v24 = vld [vmem:[%s14105_s3 + $0x1a0] sm:$0xff] }
  0x13   :  { %8318 = vmatpush1.bf16.msra.mxu1 %v10740_v53  ;;  %8288 = vmatprep.subr.bf16.mxu0 %v10742_v54  ;;  %v10817_v22 = vpack.c.bf16 %v300_v13, %v296_v12  ;;  %v297_v25 = vld [vmem:[%s14105_s3 + $0x190] sm:$0xff]  ;;  %v57_v26 = vld [vmem:[%s14106_s0] sm:$0xff]  ;;  %v10829_v29 = vpack.c.bf16 %v302_v16, %v298_v15  ;;  %v304_v31 = vld [vmem:[%s14105_s3 + $0x1c8] sm:$0xff]  ;;  %v10850_v38 = vpack.c.bf16 %v299_v24, %v295_v20  ;;  %v10928_v60 = vsub.s32 0, %v109_v59 }
  0x14   :  { %8320 = vmatprep.subr.bf16.mxu1 %v10754_v58  ;;  %v301_v30 = vld [vmem:[%s14105_s3 + $0x1b0] sm:$0xff]  ;;  %v308_v33 = vld [vmem:[%s14105_s3 + $0x1e8] sm:$0xff]  ;;  %69 = vperm.xlu0 %10129, %v57_v26   ;;  %v306_v34 = vld [vmem:[%s14105_s3 + $0x1d8] sm:$0xff]  ;;  %v10933_v62 = vsub.s32 1, %v109_v59  ;;  %v10944_v6 = vsub.s32 3, %v109_v59  ;;  %v10957_v16 = vsub.s32 2, %v109_v59 }
  0x15   :  { %v310_v35 = vld [vmem:[%s14105_s3 + $0x1f8] sm:$0xff]  ;;  %v58_v37 = vld [vmem:[%s14106_s0 + $0x8] sm:$0xff]  ;;  %v10854_v39 = vpack.c.bf16 %v301_v30, %v297_v25  ;;  %v10856_v42 = vpack.c.bf16 %v308_v33, %v304_v31  ;;  %v303_v43 = vld [vmem:[%s14105_s3 + $0x1c0] sm:$0xff]  ;;  %14129 = vst [vmem:[#allocation6_spill] sm:$0xff] %v10928_v60 }
  0x16   :  { %8290 = vmatpush1.bf16.msra.mxu0 %v10772_v0  ;;  %v307_v44 = vld [vmem:[%s14105_s3 + $0x1e0] sm:$0xff]  ;;  %v10865_v46 = vpack.c.bf16 %v310_v35, %v306_v34  ;;  %v305_v47 = vld [vmem:[%s14105_s3 + $0x1d0] sm:$0xff]  ;;  %14130 = vst [vmem:[#allocation7_spill] sm:$0xff] %v10933_v62  ;;  %14131 = vst [vmem:[#allocation8_spill] sm:$0xff] %v10944_v6 }
  0x17   :  { %8322 = vmatpush1.bf16.msra.mxu1 %v10776_v1  ;;  %8292 = vmatprep.subr.bf16.mxu0 %v10778_v2  ;;  %v309_v48 = vld [vmem:[%s14105_s3 + $0x1f0] sm:$0xff]  ;;  %v61_v49 = vld [vmem:[%s14106_s0 + $0x20] sm:$0xff]  ;;  %v10877_v50 = vpack.c.bf16 %v307_v44, %v303_v43  ;;  %14132 = vst [vmem:[#allocation9_spill] sm:$0xff] %v10957_v16 }
  0x18   :  { %8324 = vmatprep.subr.bf16.mxu1 %v10790_v8  ;;  %74 = vperm.xlu0 %10129, %v58_v37   ;;  %v10881_v51 = vpack.c.bf16 %v309_v48, %v305_v47  ;;  %v63_v55 = vld [vmem:[%s14106_s0 + $0x30] sm:$0xff]  ;;  %v45_v56 = vld [vmem:[%s14107_s9] sm:$0xff] }
  0x19   :  { %v65_v61 = vld [vmem:[%s14108_s1] sm:$0xf] }
  0x1a   :  { %8294 = vmatpush1.bf16.msra.mxu0 %v10808_v17  ;;  %v10936_v63 = vrot.slane %v65_v61, %v10928_v60  ;;  %v10939_v5 = vrot.slane %v65_v61, %v10933_v62  ;;  %v10955_v15 = vrot.slane %v65_v61, %v10944_v6  ;;  %v10966_v31 = vrot.slane %v65_v61, %v10957_v16 }
  0x1b   :  { %8326 = vmatpush1.bf16.msra.mxu1 %v10815_v21  ;;  %8296 = vmatprep.subr.bf16.mxu0 %v10817_v22 }
  0x1c   :  { %8328 = vmatprep.subr.bf16.mxu1 %v10829_v29  ;;  %89 = vperm.xlu0 %10129, %v61_v49  }
  0x1e   :  { %8298 = vmatpush1.bf16.msra.mxu0 %v10850_v38 }
  0x1f   :  { %8330 = vmatpush1.bf16.msra.mxu1 %v10854_v39  ;;  %8300 = vmatprep.subr.bf16.mxu0 %v10856_v42 }
  0x20   :  { %8332 = vmatprep.subr.bf16.mxu1 %v10865_v46  ;;  %99 = vperm.xlu0 %10129, %v63_v55  }
  0x22   :  { %8302 = vmatpush1.bf16.msra.mxu0 %v10877_v50 }
  0x23   :  { %8334 = vmatpush1.bf16.msra.mxu1 %v10881_v51  ;;  %8336 = vmatprep.subr.bf16.mxu0 %v10598_v4 }
  0x24   :  { %8368 = vmatprep.subr.bf16.mxu1 %v10609_v9 }
  0x25   :  { %383 = vmatmul.mubr.f32.vlgmr.msra.gmra.mrb[0].mxu0 %v45_v56 }
  0x26   :  { %454 = vmatmul.mubr.f32.vlgmr.msra.gmra.mrb[0].mxu1 %v45_v56  ;;  %8338 = vmatpush1.bf16.msra.mxu0 %v10611_v10 }
  0x27   :  { %8370 = vmatpush1.bf16.msra.mxu1 %v10623_v14  ;;  %8340 = vmatprep.subr.bf16.mxu0 %v10636_v18 }
  0x28   :  { %8372 = vmatprep.subr.bf16.mxu1 %v10638_v19  ;;  %620 = vmatprep.mubr.f32.mxu0 %v14119_v3 }
  0x29   :  { %691 = vmatprep.mubr.f32.mxu1 %v14119_v3 }
  0x2a   :  { %8342 = vmatpush1.bf16.msra.mxu0 %v10650_v23 }
  0x2b   :  { %8374 = vmatpush1.bf16.msra.mxu1 %v10663_v27  ;;  %8344 = vmatprep.subr.bf16.mxu0 %v10665_v28 }
  0x2c   :  { %8376 = vmatprep.subr.bf16.mxu1 %v10676_v32 }
  0x2e   :  { %8346 = vmatpush1.bf16.msra.mxu0 %v10688_v36 }
  0x2f   :  { %8378 = vmatpush1.bf16.msra.mxu1 %v10701_v40  ;;  %8348 = vmatprep.subr.bf16.mxu0 %v10703_v41 }
  0x30   :  { %8380 = vmatprep.subr.bf16.mxu1 %v10715_v45 }
  0x32   :  { %8350 = vmatpush1.bf16.msra.mxu0 %v10736_v52 }
  0x33   :  { %8382 = vmatpush1.bf16.msra.mxu1 %v10740_v53  ;;  %8352 = vmatprep.subr.bf16.mxu0 %v10742_v54 }
  0x34   :  { %8384 = vmatprep.subr.bf16.mxu1 %v10754_v58 }
  0x36   :  { %8354 = vmatpush1.bf16.msra.mxu0 %v10772_v0 }
  0x37   :  { %8386 = vmatpush1.bf16.msra.mxu1 %v10776_v1  ;;  %8356 = vmatprep.subr.bf16.mxu0 %v10778_v2 }
  0x38   :  { %8388 = vmatprep.subr.bf16.mxu1 %v10790_v8 }
  0x3a   :  { %8358 = vmatpush1.bf16.msra.mxu0 %v10808_v17 }
  0x3b   :  { %8390 = vmatpush1.bf16.msra.mxu1 %v10815_v21  ;;  %8360 = vmatprep.subr.bf16.mxu0 %v10817_v22 }
  0x3c   :  { %8392 = vmatprep.subr.bf16.mxu1 %v10829_v29 }
  0x3e   :  { %8362 = vmatpush1.bf16.msra.mxu0 %v10850_v38 }
  0x3f   :  { %8394 = vmatpush1.bf16.msra.mxu1 %v10854_v39  ;;  %8364 = vmatprep.subr.bf16.mxu0 %v10856_v42 }
  0x40   :  { %8396 = vmatprep.subr.bf16.mxu1 %v10865_v46 }
  0x42   :  { %8366 = vmatpush1.bf16.msra.mxu0 %v10877_v50 }
  0x43   :  { %8398 = vmatpush1.bf16.msra.mxu1 %v10881_v51  ;;  %8400 = vmatprep.subr.bf16.mxu0 %v10598_v4  ;;  %v66_v4 = vld [vmem:[%s14109_s4] sm:$0xf] }
  0x44   :  { %8432 = vmatprep.subr.bf16.mxu1 %v10609_v9  ;;  %v10948_v11 = vrot.slane %v66_v4, %v10928_v60  ;;  %v10952_v13 = vrot.slane %v66_v4, %v10933_v62  ;;  %v10963_v30 = vrot.slane %v66_v4, %v10944_v6  ;;  %v10971_v55 = vrot.slane %v66_v4, %v10957_v16  ;;  %v51_v4 = vld [vmem:[%s14110_s10] sm:$0xff] }
  0x93   :  { %v70_v9 = vpop.permute.xlu0 %69 }
  0x94   :  { %v128_v7 = vmul.f32 %v10936_v63, %v70_v9  ;;  %v129_v12 = vmul.f32 %v10939_v5, %v70_v9  ;;  %v131_v26 = vmul.f32 %v10955_v15, %v70_v9  ;;  %v130_v49 = vmul.f32 %v10966_v31, %v70_v9 }
  0x96   :  { %v181_v20 = vadd.f32 %v10948_v11, %v128_v7  ;;  %v182_v24 = vadd.f32 %v10952_v13, %v129_v12  ;;  %v184_v48 = vadd.f32 %v10963_v30, %v131_v26  ;;  %v183_v57 = vadd.f32 %v10971_v55, %v130_v49 }
  0xf8   :  { %v384_v25 = vpop.f32.mrb[0].mxu0 }
  0xf9   :  { %v385_v33 = vadd.f32 %v384_v25, %v181_v20  ;;  %v455_v34 = vpop.f32.mrb[0].mxu1  ;;  %v386_v35 = vpop.f32.mrb[1].mxu0 }
  0xfa   :  { %v387_v37 = vadd.f32 %v386_v35, %v182_v24  ;;  %v457_v43 = vpop.f32.mrb[1].mxu1  ;;  %v456_v61 = vadd.f32 %v455_v34, %v183_v57 }
  0xfb   :  { %v6971_v44 = vmul.f32 -1.442695, %v385_v33  ;;  %v458_v56 = vadd.f32 %v457_v43, %v184_v48 }
  0xfc   :  { %v6972_v47 = vmul.f32 -1.442695, %v387_v37 }
  0xfd   :  { %10131 = vpow2.f32 %v6971_v44  ;;  %v6973_v59 = vmul.f32 -1.442695, %v458_v56 }
  0xfe   :  { %10133 = vpow2.f32 %v6972_v47 }
  0xff   :  { %10135 = vpow2.f32 %v6973_v59 }
 0x100   :  { %10137 = vtanh.f32 %v456_v61 }
 0x107   :  { %v10132_v7 = vpop.eup %10131 }
 0x108   :  { %v10134_v12 = vpop.eup %10133  ;;  %v463_v20 = vadd.f32 1.0, %v10132_v7 }
 0x109   :  { %v469_v24 = vadd.f32 1.0, %v10134_v12  ;;  %v10136_v25 = vpop.eup %10135 }
 0x10a   :  { %10139 = vrcp.f32 %v463_v20  ;;  %v10138_v26 = vpop.eup %10137  ;;  %v476_v37 = vadd.f32 1.0, %v10136_v25  ;;  %v964_v25 = vld [vmem:[%s14105_s3 + $0x8] sm:$0xff] }
 0x10b   :  { %10141 = vrcp.f32 %v469_v24 }
 0x10c   :  { %10143 = vrcp.f32 %v476_v37  ;;  %v967_v37 = vld [vmem:[%s14105_s3 + $0x20] sm:$0xff] }
 0x114   :  { %v10140_v9 = vpop.eup %10139 }
 0x115   :  { %v10142_v33 = vpop.eup %10141  ;;  %v480_v35 = vmul.f32 %v10140_v9, %v10138_v26  ;;  %v968_v26 = vld [vmem:[%s14105_s3 + $0x28] sm:$0xff] }
 0x116   :  { %v479_v43 = vmul.f32 %v10142_v33, %v51_v4  ;;  %v10144_v44 = vpop.eup %10143  ;;  %v966_v4 = vld [vmem:[%s14105_s3 + $0x18] sm:$0xff]  ;;  %v11055_v9 = vpack.c.bf16 %v968_v26, %v964_v25  ;;  %v996_v25 = vld [vmem:[%s14105_s3 + $0x108] sm:$0xff] }
 0x117   :  { %v970_v33 = vld [vmem:[%s14105_s3 + $0x38] sm:$0xff]  ;;  %v1000_v26 = vld [vmem:[%s14105_s3 + $0x128] sm:$0xff] }
 0x118   :  { %v10977_v34 = vadd.f32 %v480_v35, %v479_v43  ;;  %v963_v35 = vld [vmem:[%s14105_s3] sm:$0xff]  ;;  %v11066_v43 = vpack.c.bf16 %v970_v33, %v966_v4  ;;  %v998_v4 = vld [vmem:[%s14105_s3 + $0x118] sm:$0xff]  ;;  %v11199_v33 = vpack.c.bf16 %v1000_v26, %v996_v25  ;;  %v1013_v25 = vld [vmem:[%s14105_s3 + $0x190] sm:$0xff] }
 0x11a   :  { %10145 = vtanh.f32 %v10977_v34 }
 0x124   :  { %v10146_v47 = vpop.eup %10145 }
 0x125   :  { %v10980_v48 = vmul.f32 %v10146_v47, %v10144_v44  ;;  %v965_v44 = vld [vmem:[%s14105_s3 + $0x10] sm:$0xff] }
 0x126   :  { %v969_v47 = vld [vmem:[%s14105_s3 + $0x30] sm:$0xff] }
 0x127   :  { %621 = vmatmul.mubr.f32.vlgmr.msra.gmra.mrb[2].mxu0 %v10980_v48  ;;  %692 = vmatmul.mubr.f32.vlgmr.msra.gmra.mrb[2].mxu1 %v10980_v48 }
 0x128   :  { %8402 = vmatpush1.bf16.msra.mxu0 %v10611_v10  ;;  %8434 = vmatpush1.bf16.msra.mxu1 %v10623_v14  ;;  %v59_v10 = vld [vmem:[%s14106_s0 + $0x10] sm:$0xff]  ;;  %v60_v14 = vld [vmem:[%s14106_s0 + $0x18] sm:$0xff] }
 0x129   :  { %8404 = vmatprep.subr.bf16.mxu0 %v10636_v18  ;;  %8436 = vmatprep.subr.bf16.mxu1 %v10638_v19  ;;  %v62_v18 = vld [vmem:[%s14106_s0 + $0x28] sm:$0xff]  ;;  %v64_v19 = vld [vmem:[%s14106_s0 + $0x38] sm:$0xff] }
 0x12a   :  { %859 = vmatprep.mubr.f32.mxu0 %v14119_v3  ;;  %930 = vmatprep.mubr.f32.mxu1 %v14119_v3 }
 0x12b   :  { %79 = vperm.xlu1 %10130, %v59_v10   ;;  %v11077_v10 = vpack.c.bf16 %v969_v47, %v965_v44  ;;  %v999_v44 = vld [vmem:[%s14105_s3 + $0x120] sm:$0xff] }
 0x12c   :  { %8406 = vmatpush1.bf16.msra.mxu0 %v10650_v23  ;;  %8438 = vmatpush1.bf16.msra.mxu1 %v10663_v27  ;;  %v75_v23 = vpop.permute.xlu0 %74 }
 0x12d   :  { %8408 = vmatprep.subr.bf16.mxu0 %v10665_v28  ;;  %8440 = vmatprep.subr.bf16.mxu1 %v10676_v32  ;;  %v132_v27 = vmul.f32 %v10936_v63, %v75_v23  ;;  %v133_v28 = vmul.f32 %v10939_v5, %v75_v23 }
 0x12f   :  { %84 = vperm.xlu1 %10130, %v60_v14   ;;  %v185_v32 = vadd.f32 %v10948_v11, %v132_v27  ;;  %v972_v14 = vld [vmem:[%s14105_s3 + $0x48] sm:$0xff]  ;;  %v978_v27 = vld [vmem:[%s14105_s3 + $0x78] sm:$0xff] }
 0x130   :  { %8410 = vmatpush1.bf16.msra.mxu0 %v10688_v36  ;;  %8442 = vmatpush1.bf16.msra.mxu1 %v10701_v40 }
 0x131   :  { %8412 = vmatprep.subr.bf16.mxu0 %v10703_v41  ;;  %8444 = vmatprep.subr.bf16.mxu1 %v10715_v45  ;;  %v186_v41 = vadd.f32 %v10952_v13, %v133_v28  ;;  %v971_v28 = vld [vmem:[%s14105_s3 + $0x40] sm:$0xff] }
 0x133   :  { %94 = vperm.xlu1 %10130, %v62_v18   ;;  %v976_v18 = vld [vmem:[%s14105_s3 + $0x68] sm:$0xff] }
 0x134   :  { %8414 = vmatpush1.bf16.msra.mxu0 %v10736_v52  ;;  %8446 = vmatpush1.bf16.msra.mxu1 %v10740_v53 }
 0x135   :  { %8416 = vmatprep.subr.bf16.mxu0 %v10742_v54  ;;  %8448 = vmatprep.subr.bf16.mxu1 %v10754_v58  ;;  %v135_v58 = vmul.f32 %v10955_v15, %v75_v23 }
 0x137   :  { %104 = vperm.xlu1 %10130, %v64_v19   ;;  %v974_v19 = vld [vmem:[%s14105_s3 + $0x58] sm:$0xff] }
 0x138   :  { %8418 = vmatpush1.bf16.msra.mxu0 %v10772_v0  ;;  %8450 = vmatpush1.bf16.msra.mxu1 %v10776_v1 }
 0x139   :  { %8420 = vmatprep.subr.bf16.mxu0 %v10778_v2  ;;  %8452 = vmatprep.subr.bf16.mxu1 %v10790_v8  ;;  %v188_v2 = vadd.f32 %v10963_v30, %v135_v58  ;;  %v134_v8 = vmul.f32 %v10966_v31, %v75_v23  ;;  %v11091_v23 = vpack.c.bf16 %v976_v18, %v972_v14  ;;  %v982_v58 = vld [vmem:[%s14105_s3 + $0x98] sm:$0xff]  ;;  %v997_v18 = vld [vmem:[%s14105_s3 + $0x110] sm:$0xff] }
 0x13c   :  { %8422 = vmatpush1.bf16.msra.mxu0 %v10808_v17  ;;  %8454 = vmatpush1.bf16.msra.mxu1 %v10815_v21  ;;  %v187_v21 = vadd.f32 %v10971_v55, %v134_v8  ;;  %v983_v8 = vld [vmem:[%s14105_s3 + $0xa0] sm:$0xff] }
 0x13d   :  { %8424 = vmatprep.subr.bf16.mxu0 %v10817_v22  ;;  %8456 = vmatprep.subr.bf16.mxu1 %v10829_v29 }
 0x140   :  { %8426 = vmatpush1.bf16.msra.mxu0 %v10850_v38  ;;  %8458 = vmatpush1.bf16.msra.mxu1 %v10854_v39 }
 0x141   :  { %8428 = vmatprep.subr.bf16.mxu0 %v10856_v42  ;;  %8460 = vmatprep.subr.bf16.mxu1 %v10865_v46 }
 0x144   :  { %8430 = vmatpush1.bf16.msra.mxu0 %v10877_v50  ;;  %8462 = vmatpush1.bf16.msra.mxu1 %v10881_v51 }
 0x145   :  { %8464 = vmatprep.subr.bf16.mxu0 %v11055_v9  ;;  %8496 = vmatprep.subr.bf16.mxu1 %v11066_v43 }
 0x1fa   :  { %v622_v36 = vpop.f32.mrb[2].mxu0  ;;  %v693_v40 = vpop.f32.mrb[2].mxu1 }
 0x1fb   :  { %v623_v45 = vadd.f32 %v622_v36, %v185_v32  ;;  %v624_v52 = vpop.f32.mrb[3].mxu0  ;;  %v695_v53 = vpop.f32.mrb[3].mxu1  ;;  %v694_v29 = vadd.f32 %v693_v40, %v187_v21  ;;  %v975_v32 = vld [vmem:[%s14105_s3 + $0x60] sm:$0xff]  ;;  %v11102_v36 = vpack.c.bf16 %v978_v27, %v974_v19  ;;  %v1001_v19 = vld [vmem:[%s14105_s3 + $0x130] sm:$0xff] }
 0x1fc   :  { %v625_v54 = vadd.f32 %v624_v52, %v186_v41  ;;  %v696_v17 = vadd.f32 %v695_v53, %v188_v2  ;;  %v11104_v40 = vpack.c.bf16 %v975_v32, %v971_v28  ;;  %v973_v41 = vld [vmem:[%s14105_s3 + $0x50] sm:$0xff]  ;;  %v980_v53 = vld [vmem:[%s14105_s3 + $0x88] sm:$0xff]  ;;  %v979_v2 = vld [vmem:[%s14105_s3 + $0x80] sm:$0xff]  ;;  %v11221_v27 = vpack.c.bf16 %v1001_v19, %v997_v18 }
 0x1fd   :  { %v6974_v0 = vmul.f32 -1.442695, %v623_v45  ;;  %v977_v45 = vld [vmem:[%s14105_s3 + $0x70] sm:$0xff]  ;;  %v11140_v21 = vpack.c.bf16 %v983_v8, %v979_v2  ;;  %v1004_v28 = vld [vmem:[%s14105_s3 + $0x148] sm:$0xff]  ;;  %v1022_v19 = vld [vmem:[%s14105_s3 + $0x1d8] sm:$0xff] }
 0x1fe   :  { %v6975_v1 = vmul.f32 -1.442695, %v625_v54  ;;  %v6976_v22 = vmul.f32 -1.442695, %v696_v17  ;;  %v11113_v52 = vpack.c.bf16 %v977_v45, %v973_v41  ;;  %v984_v54 = vld [vmem:[%s14105_s3 + $0xa8] sm:$0xff]  ;;  %v1006_v41 = vld [vmem:[%s14105_s3 + $0x158] sm:$0xff] }
 0x1ff   :  { %10147 = vpow2.f32 %v6974_v0  ;;  %v11127_v0 = vpack.c.bf16 %v984_v54, %v980_v53  ;;  %v1008_v32 = vld [vmem:[%s14105_s3 + $0x168] sm:$0xff]  ;;  %v1010_v53 = vld [vmem:[%s14105_s3 + $0x178] sm:$0xff]  ;;  %v1003_v54 = vld [vmem:[%s14105_s3 + $0x140] sm:$0xff] }
 0x200   :  { %10149 = vpow2.f32 %v6975_v1  ;;  %v986_v1 = vld [vmem:[%s14105_s3 + $0xb8] sm:$0xff]  ;;  %v11234_v45 = vpack.c.bf16 %v1008_v32, %v1004_v28  ;;  %v1005_v8 = vld [vmem:[%s14105_s3 + $0x150] sm:$0xff]  ;;  %v1019_v32 = vld [vmem:[%s14105_s3 + $0x1c0] sm:$0xff] }
 0x201   :  { %10151 = vpow2.f32 %v6976_v22  ;;  %v11138_v17 = vpack.c.bf16 %v986_v1, %v982_v58  ;;  %v981_v22 = vld [vmem:[%s14105_s3 + $0x90] sm:$0xff]  ;;  %v1007_v58 = vld [vmem:[%s14105_s3 + $0x160] sm:$0xff]  ;;  %v11246_v1 = vpack.c.bf16 %v1010_v53, %v1006_v41  ;;  %v1026_v28 = vld [vmem:[%s14105_s3 + $0x1f8] sm:$0xff] }
 0x202   :  { %10153 = vtanh.f32 %v694_v29  ;;  %v985_v29 = vld [vmem:[%s14105_s3 + $0xb0] sm:$0xff]  ;;  %v11248_v2 = vpack.c.bf16 %v1007_v58, %v1003_v54  ;;  %v11313_v41 = vpack.c.bf16 %v1026_v28, %v1022_v19  ;;  %v1023_v53 = vld [vmem:[%s14105_s3 + $0x1e0] sm:$0xff] }
 0x203   :  { %v1021_v54 = vld [vmem:[%s14105_s3 + $0x1d0] sm:$0xff] }
 0x204   :  { %v1025_v58 = vld [vmem:[%s14105_s3 + $0x1f0] sm:$0xff] }
 0x209   :  { %v10148_v38 = vpop.eup %10147 }
 0x20a   :  { %v10150_v39 = vpop.eup %10149  ;;  %v701_v42 = vadd.f32 1.0, %v10148_v38  ;;  %v11149_v38 = vpack.c.bf16 %v985_v29, %v981_v22  ;;  %v1009_v22 = vld [vmem:[%s14105_s3 + $0x170] sm:$0xff]  ;;  %v1012_v29 = vld [vmem:[%s14105_s3 + $0x188] sm:$0xff] }
 0x20b   :  { %v707_v46 = vadd.f32 1.0, %v10150_v39  ;;  %v10152_v50 = vpop.eup %10151  ;;  %v988_v39 = vld [vmem:[%s14105_s3 + $0xc8] sm:$0xff] }
 0x20c   :  { %10155 = vrcp.f32 %v701_v42  ;;  %v10154_v51 = vpop.eup %10153  ;;  %v714_v59 = vadd.f32 1.0, %v10152_v50  ;;  %v992_v42 = vld [vmem:[%s14105_s3 + $0xe8] sm:$0xff] }
 0x20d   :  { %10157 = vrcp.f32 %v707_v46  ;;  %v990_v46 = vld [vmem:[%s14105_s3 + $0xd8] sm:$0xff]  ;;  %v11163_v50 = vpack.c.bf16 %v992_v42, %v988_v39  ;;  %v11260_v39 = vpack.c.bf16 %v1009_v22, %v1005_v8  ;;  %v1016_v42 = vld [vmem:[%s14105_s3 + $0x1a8] sm:$0xff]  ;;  %v11325_v8 = vpack.c.bf16 %v1023_v53, %v1019_v32 }
 0x20e   :  { %10159 = vrcp.f32 %v714_v59  ;;  %v11329_v22 = vpack.c.bf16 %v1025_v58, %v1021_v54 }
 0x216   :  { %v10156_v49 = vpop.eup %10155 }
 0x217   :  { %v10158_v56 = vpop.eup %10157  ;;  %v718_v57 = vmul.f32 %v10156_v49, %v10154_v51  ;;  %v994_v51 = vld [vmem:[%s14105_s3 + $0xf8] sm:$0xff]  ;;  %v987_v49 = vld [vmem:[%s14105_s3 + $0xc0] sm:$0xff] }
 0x218   :  { %v717_v61 = vmul.f32 %v10158_v56, %v10977_v34  ;;  %v10160_v12 = vpop.eup %10159  ;;  %v11068_v34 = vpack.c.bf16 %v967_v37, %v963_v35  ;;  %v991_v56 = vld [vmem:[%s14105_s3 + $0xe0] sm:$0xff]  ;;  %v1002_v35 = vld [vmem:[%s14105_s3 + $0x138] sm:$0xff] }
 0x219   :  { %v11176_v59 = vpack.c.bf16 %v991_v56, %v987_v49  ;;  %v995_v37 = vld [vmem:[%s14105_s3 + $0x100] sm:$0xff]  ;;  %v11210_v47 = vpack.c.bf16 %v1002_v35, %v998_v4  ;;  %v11272_v49 = vpack.c.bf16 %v1016_v42, %v1012_v29  ;;  %v1017_v4 = vld [vmem:[%s14105_s3 + $0x1b0] sm:$0xff]  ;;  %v1020_v35 = vld [vmem:[%s14105_s3 + $0x1c8] sm:$0xff]  ;;  %v80_v29 = vpop.permute.xlu1 %79 }
 0x21a   :  { %v11037_v7 = vadd.f32 %v718_v57, %v717_v61  ;;  %v11174_v57 = vpack.c.bf16 %v994_v51, %v990_v46  ;;  %v989_v61 = vld [vmem:[%s14105_s3 + $0xd0] sm:$0xff]  ;;  %v11212_v14 = vpack.c.bf16 %v999_v44, %v995_v37  ;;  %v1014_v46 = vld [vmem:[%s14105_s3 + $0x198] sm:$0xff]  ;;  %v1024_v37 = vld [vmem:[%s14105_s3 + $0x1e8] sm:$0xff]  ;;  %v11299_v44 = vpack.c.bf16 %v1017_v4, %v1013_v25 }
 0x21b   :  { %v1018_v51 = vld [vmem:[%s14105_s3 + $0x1b8] sm:$0xff]  ;;  %v11301_v18 = vpack.c.bf16 %v1024_v37, %v1020_v35  ;;  %v136_v42 = vmul.f32 %v10936_v63, %v80_v29  ;;  %v139_v4 = vmul.f32 %v10955_v15, %v80_v29  ;;  %v138_v58 = vmul.f32 %v10966_v31, %v80_v29 }
 0x21c   :  { %10161 = vtanh.f32 %v11037_v7  ;;  %v11274_v56 = vpack.c.bf16 %v1018_v51, %v1014_v46  ;;  %v137_v46 = vmul.f32 %v10939_v5, %v80_v29 }
 0x21d   :  { %v189_v51 = vadd.f32 %v10948_v11, %v136_v42  ;;  %v192_v54 = vadd.f32 %v10963_v30, %v139_v4  ;;  %v191_v42 = vadd.f32 %v10971_v55, %v138_v58 }
 0x226   :  { %v10162_v20 = vpop.eup %10161 }
 0x227   :  { %v11040_v24 = vmul.f32 %v10162_v20, %v10160_v12  ;;  %v993_v12 = vld [vmem:[%s14105_s3 + $0xf0] sm:$0xff] }
 0x228   :  { %v11185_v20 = vpack.c.bf16 %v993_v12, %v989_v61  ;;  %v1011_v61 = vld [vmem:[%s14105_s3 + $0x180] sm:$0xff] }
 0x229   :  { %860 = vmatmul.mubr.f32.vlgmr.msra.gmra.mrb[4].mxu0 %v11040_v24  ;;  %931 = vmatmul.mubr.f32.vlgmr.msra.gmra.mrb[4].mxu1 %v11040_v24  ;;  %v1015_v12 = vld [vmem:[%s14105_s3 + $0x1a0] sm:$0xff] }
 0x22a   :  { %1098 = vmatprep.mubr.f32.mxu0 %v14119_v3  ;;  %1169 = vmatprep.mubr.f32.mxu1 %v14119_v3  ;;  %v11286_v26 = vpack.c.bf16 %v1015_v12, %v1011_v61  ;;  %v190_v61 = vadd.f32 %v10952_v13, %v137_v46 }
 0x22b   :  { %8466 = vmatpush1.bf16.msra.mxu0 %v11068_v34  ;;  %8498 = vmatpush1.bf16.msra.mxu1 %v11077_v10 }
 0x22c   :  { %8468 = vmatprep.subr.bf16.mxu0 %v11091_v23  ;;  %8500 = vmatprep.subr.bf16.mxu1 %v11102_v36 }
 0x22f   :  { %8470 = vmatpush1.bf16.msra.mxu0 %v11104_v40  ;;  %8502 = vmatpush1.bf16.msra.mxu1 %v11113_v52 }
 0x230   :  { %8472 = vmatprep.subr.bf16.mxu0 %v11127_v0  ;;  %8504 = vmatprep.subr.bf16.mxu1 %v11138_v17 }
 0x233   :  { %8474 = vmatpush1.bf16.msra.mxu0 %v11140_v21  ;;  %8506 = vmatpush1.bf16.msra.mxu1 %v11149_v38 }
 0x234   :  { %8476 = vmatprep.subr.bf16.mxu0 %v11163_v50  ;;  %8508 = vmatprep.subr.bf16.mxu1 %v11174_v57 }
 0x237   :  { %8478 = vmatpush1.bf16.msra.mxu0 %v11176_v59  ;;  %8510 = vmatpush1.bf16.msra.mxu1 %v11185_v20 }
 0x238   :  { %8480 = vmatprep.subr.bf16.mxu0 %v11199_v33  ;;  %8512 = vmatprep.subr.bf16.mxu1 %v11210_v47 }
 0x23b   :  { %8482 = vmatpush1.bf16.msra.mxu0 %v11212_v14  ;;  %8514 = vmatpush1.bf16.msra.mxu1 %v11221_v27 }
 0x23c   :  { %8484 = vmatprep.subr.bf16.mxu0 %v11234_v45  ;;  %8516 = vmatprep.subr.bf16.mxu1 %v11246_v1 }
 0x23f   :  { %8486 = vmatpush1.bf16.msra.mxu0 %v11248_v2  ;;  %8518 = vmatpush1.bf16.msra.mxu1 %v11260_v39 }
 0x240   :  { %8488 = vmatprep.subr.bf16.mxu0 %v11272_v49  ;;  %8520 = vmatprep.subr.bf16.mxu1 %v11274_v56 }
 0x243   :  { %8490 = vmatpush1.bf16.msra.mxu0 %v11286_v26  ;;  %8522 = vmatpush1.bf16.msra.mxu1 %v11299_v44 }
 0x244   :  { %8492 = vmatprep.subr.bf16.mxu0 %v11301_v18  ;;  %8524 = vmatprep.subr.bf16.mxu1 %v11313_v41 }
 0x247   :  { %8494 = vmatpush1.bf16.msra.mxu0 %v11325_v8  ;;  %8526 = vmatpush1.bf16.msra.mxu1 %v11329_v22 }
 0x248   :  { %8528 = vmatprep.subr.bf16.mxu0 %v11055_v9  ;;  %8560 = vmatprep.subr.bf16.mxu1 %v11066_v43 }
 0x2fc   :  { %v861_v12 = vpop.f32.mrb[4].mxu0  ;;  %v932_v25 = vpop.f32.mrb[4].mxu1 }
 0x2fd   :  { %v862_v35 = vadd.f32 %v861_v12, %v189_v51  ;;  %v863_v37 = vpop.f32.mrb[5].mxu0  ;;  %v934_v19 = vpop.f32.mrb[5].mxu1  ;;  %v933_v16 = vadd.f32 %v932_v25, %v191_v42 }
 0x2fe   :  { %v864_v28 = vadd.f32 %v863_v37, %v190_v61  ;;  %v935_v3 = vadd.f32 %v934_v19, %v192_v54 }
 0x2ff   :  { %v6977_v32 = vmul.f32 -1.442695, %v862_v35 }
 0x300   :  { %v6978_v53 = vmul.f32 -1.442695, %v864_v28  ;;  %v6979_v46 = vmul.f32 -1.442695, %v935_v3 }
 0x301   :  { %10163 = vpow2.f32 %v6977_v32 }
 0x302   :  { %10165 = vpow2.f32 %v6978_v53 }
 0x303   :  { %10167 = vpow2.f32 %v6979_v46 }
 0x304   :  { %10169 = vtanh.f32 %v933_v16 }
 0x30b   :  { %v10164_v6 = vpop.eup %10163 }
 0x30c   :  { %v10166_v62 = vpop.eup %10165  ;;  %v940_v60 = vadd.f32 1.0, %v10164_v6 }
 0x30d   :  { %v946_v51 = vadd.f32 1.0, %v10166_v62  ;;  %v10168_v61 = vpop.eup %10167  ;;  %v85_v62 = vpop.permute.xlu1 %84 }
 0x30e   :  { %10171 = vrcp.f32 %v940_v60  ;;  %v10170_v12 = vpop.eup %10169  ;;  %v953_v29 = vadd.f32 1.0, %v10168_v61  ;;  %v14133_v60 = vmov 0.0   ;;  %v140_v16 = vmul.f32 %v10936_v63, %v85_v62 }
 0x30f   :  { %10173 = vrcp.f32 %v946_v51 }
 0x310   :  { %10175 = vrcp.f32 %v953_v29  ;;  %v193_v32 = vadd.f32 %v10948_v11, %v140_v16  ;;  %v142_v29 = vmul.f32 %v10966_v31, %v85_v62 }
 0x318   :  { %v10172_v4 = vpop.eup %10171 }
 0x319   :  { %v10174_v35 = vpop.eup %10173  ;;  %v957_v37 = vmul.f32 %v10172_v4, %v10170_v12  ;;  %v143_v12 = vmul.f32 %v10955_v15, %v85_v62 }
 0x31a   :  { %v956_v19 = vmul.f32 %v10174_v35, %v11037_v7  ;;  %v10176_v3 = vpop.eup %10175  ;;  %v141_v7 = vmul.f32 %v10939_v5, %v85_v62 }
 0x31c   :  { %v11345_v28 = vadd.f32 %v957_v37, %v956_v19  ;;  %v194_v58 = vadd.f32 %v10952_v13, %v141_v7  ;;  %v196_v37 = vadd.f32 %v10963_v30, %v143_v12 }
 0x31e   :  { %10177 = vtanh.f32 %v11345_v28 }
 0x328   :  { %v10178_v6 = vpop.eup %10177 }
 0x329   :  { %v11348_v25 = vmul.f32 %v10178_v6, %v10176_v3  ;;  %v195_v3 = vadd.f32 %v10971_v55, %v142_v29 }
 0x32b   :  { %1099 = vmatmul.mubr.f32.vlgmr.msra.gmra.mrb[6].mxu0 %v11348_v25  ;;  %1170 = vmatmul.mubr.f32.vlgmr.msra.gmra.mrb[6].mxu1 %v11348_v25 }
 0x32c   :  { %8530 = vmatpush1.bf16.msra.mxu0 %v11068_v34  ;;  %8562 = vmatpush1.bf16.msra.mxu1 %v11077_v10 }
 0x32d   :  { %8532 = vmatprep.subr.bf16.mxu0 %v11091_v23  ;;  %8564 = vmatprep.subr.bf16.mxu1 %v11102_v36 }
 0x32e   :  { %1337 = vmatprep.mubr.f32.mxu0 %v14133_v60  ;;  %1408 = vmatprep.mubr.f32.mxu1 %v14133_v60 }
 0x330   :  { %8534 = vmatpush1.bf16.msra.mxu0 %v11104_v40  ;;  %8566 = vmatpush1.bf16.msra.mxu1 %v11113_v52 }
 0x331   :  { %8536 = vmatprep.subr.bf16.mxu0 %v11127_v0  ;;  %8568 = vmatprep.subr.bf16.mxu1 %v11138_v17 }
 0x334   :  { %8538 = vmatpush1.bf16.msra.mxu0 %v11140_v21  ;;  %8570 = vmatpush1.bf16.msra.mxu1 %v11149_v38 }
 0x335   :  { %8540 = vmatprep.subr.bf16.mxu0 %v11163_v50  ;;  %8572 = vmatprep.subr.bf16.mxu1 %v11174_v57 }
 0x338   :  { %8542 = vmatpush1.bf16.msra.mxu0 %v11176_v59  ;;  %8574 = vmatpush1.bf16.msra.mxu1 %v11185_v20 }
 0x339   :  { %8544 = vmatprep.subr.bf16.mxu0 %v11199_v33  ;;  %8576 = vmatprep.subr.bf16.mxu1 %v11210_v47 }
 0x33c   :  { %8546 = vmatpush1.bf16.msra.mxu0 %v11212_v14  ;;  %8578 = vmatpush1.bf16.msra.mxu1 %v11221_v27 }
 0x33d   :  { %8548 = vmatprep.subr.bf16.mxu0 %v11234_v45  ;;  %8580 = vmatprep.subr.bf16.mxu1 %v11246_v1 }
 0x340   :  { %8550 = vmatpush1.bf16.msra.mxu0 %v11248_v2  ;;  %8582 = vmatpush1.bf16.msra.mxu1 %v11260_v39 }
 0x341   :  { %8552 = vmatprep.subr.bf16.mxu0 %v11272_v49  ;;  %8584 = vmatprep.subr.bf16.mxu1 %v11274_v56 }
 0x344   :  { %8554 = vmatpush1.bf16.msra.mxu0 %v11286_v26  ;;  %8586 = vmatpush1.bf16.msra.mxu1 %v11299_v44 }
 0x345   :  { %8556 = vmatprep.subr.bf16.mxu0 %v11301_v18  ;;  %8588 = vmatprep.subr.bf16.mxu1 %v11313_v41 }
 0x348   :  { %8558 = vmatpush1.bf16.msra.mxu0 %v11325_v8  ;;  %8590 = vmatpush1.bf16.msra.mxu1 %v11329_v22 }
 0x349   :  { %8592 = vmatprep.subr.bf16.mxu0 %v11055_v9  ;;  %8624 = vmatprep.subr.bf16.mxu1 %v11066_v43 }
 0x3fe   :  { %v1100_v53 = vpop.f32.mrb[6].mxu0  ;;  %v1171_v54 = vpop.f32.mrb[6].mxu1 }
 0x3ff   :  { %v1101_v42 = vadd.f32 %v1100_v53, %v193_v32  ;;  %v1102_v46 = vpop.f32.mrb[7].mxu0  ;;  %v1173_v51 = vpop.f32.mrb[7].mxu1  ;;  %v1172_v16 = vadd.f32 %v1171_v54, %v195_v3 }
 0x400   :  { %v1103_v61 = vadd.f32 %v1102_v46, %v194_v58  ;;  %v1174_v19 = vadd.f32 %v1173_v51, %v196_v37 }
 0x401   :  { %v6980_v4 = vmul.f32 -1.442695, %v1101_v42 }
 0x402   :  { %v6981_v35 = vmul.f32 -1.442695, %v1103_v61  ;;  %v6982_v6 = vmul.f32 -1.442695, %v1174_v19 }
 0x403   :  { %10179 = vpow2.f32 %v6980_v4 }
 0x404   :  { %10181 = vpow2.f32 %v6981_v35 }
 0x405   :  { %10183 = vpow2.f32 %v6982_v6 }
 0x406   :  { %10185 = vtanh.f32 %v1172_v16 }
 0x40d   :  { %v10180_v7 = vpop.eup %10179 }
 0x40e   :  { %v10182_v32 = vpop.eup %10181  ;;  %v1179_v53 = vadd.f32 1.0, %v10180_v7 }
 0x40f   :  { %v1185_v58 = vadd.f32 1.0, %v10182_v32  ;;  %v10184_v42 = vpop.eup %10183 }
 0x410   :  { %10187 = vrcp.f32 %v1179_v53  ;;  %v10186_v46 = vpop.eup %10185  ;;  %v1192_v35 = vadd.f32 1.0, %v10184_v42 }
 0x411   :  { %10189 = vrcp.f32 %v1185_v58 }
 0x412   :  { %10191 = vrcp.f32 %v1192_v35 }
 0x41a   :  { %v10188_v61 = vpop.eup %10187 }
 0x41b   :  { %v10190_v4 = vpop.eup %10189  ;;  %v1196_v12 = vmul.f32 %v10188_v61, %v10186_v46 }
 0x41c   :  { %v1195_v62 = vmul.f32 %v10190_v4, %v11345_v28  ;;  %v10192_v54 = vpop.eup %10191  ;;  %v90_v28 = vpop.permute.xlu0 %89 }
 0x41d   :  { %v144_v19 = vmul.f32 %v10936_v63, %v90_v28  ;;  %v145_v3 = vmul.f32 %v10939_v5, %v90_v28  ;;  %v147_v61 = vmul.f32 %v10955_v15, %v90_v28 }
 0x41e   :  { %v11395_v51 = vadd.f32 %v1196_v12, %v1195_v62  ;;  %v146_v12 = vmul.f32 %v10966_v31, %v90_v28 }
 0x41f   :  { %v197_v6 = vadd.f32 %v10948_v11, %v144_v19  ;;  %v198_v32 = vadd.f32 %v10952_v13, %v145_v3 }
 0x420   :  { %10193 = vtanh.f32 %v11395_v51  ;;  %v199_v62 = vadd.f32 %v10971_v55, %v146_v12 }
 0x42a   :  { %v10194_v37 = vpop.eup %10193 }
 0x42b   :  { %v11398_v29 = vmul.f32 %v10194_v37, %v10192_v54 }
 0x42d   :  { %1338 = vmatmul.mubr.f32.vlgmr.msra.gmra.mrb[8].mxu0 %v11398_v29  ;;  %1409 = vmatmul.mubr.f32.vlgmr.msra.gmra.mrb[8].mxu1 %v11398_v29 }
 0x42e   :  { %8594 = vmatpush1.bf16.msra.mxu0 %v11068_v34  ;;  %8626 = vmatpush1.bf16.msra.mxu1 %v11077_v10 }
 0x42f   :  { %8596 = vmatprep.subr.bf16.mxu0 %v11091_v23  ;;  %8628 = vmatprep.subr.bf16.mxu1 %v11102_v36 }
 0x430   :  { %1576 = vmatprep.mubr.f32.mxu0 %v14133_v60  ;;  %1647 = vmatprep.mubr.f32.mxu1 %v14133_v60 }
 0x432   :  { %8598 = vmatpush1.bf16.msra.mxu0 %v11104_v40  ;;  %8630 = vmatpush1.bf16.msra.mxu1 %v11113_v52 }
 0x433   :  { %8600 = vmatprep.subr.bf16.mxu0 %v11127_v0  ;;  %8632 = vmatprep.subr.bf16.mxu1 %v11138_v17 }
 0x436   :  { %8602 = vmatpush1.bf16.msra.mxu0 %v11140_v21  ;;  %8634 = vmatpush1.bf16.msra.mxu1 %v11149_v38 }
 0x437   :  { %8604 = vmatprep.subr.bf16.mxu0 %v11163_v50  ;;  %8636 = vmatprep.subr.bf16.mxu1 %v11174_v57 }
 0x43a   :  { %8606 = vmatpush1.bf16.msra.mxu0 %v11176_v59  ;;  %8638 = vmatpush1.bf16.msra.mxu1 %v11185_v20 }
 0x43b   :  { %8608 = vmatprep.subr.bf16.mxu0 %v11199_v33  ;;  %8640 = vmatprep.subr.bf16.mxu1 %v11210_v47 }
 0x43e   :  { %8610 = vmatpush1.bf16.msra.mxu0 %v11212_v14  ;;  %8642 = vmatpush1.bf16.msra.mxu1 %v11221_v27 }
 0x43f   :  { %8612 = vmatprep.subr.bf16.mxu0 %v11234_v45  ;;  %8644 = vmatprep.subr.bf16.mxu1 %v11246_v1 }
 0x442   :  { %8614 = vmatpush1.bf16.msra.mxu0 %v11248_v2  ;;  %8646 = vmatpush1.bf16.msra.mxu1 %v11260_v39 }
 0x443   :  { %8616 = vmatprep.subr.bf16.mxu0 %v11272_v49  ;;  %8648 = vmatprep.subr.bf16.mxu1 %v11274_v56 }
 0x446   :  { %8618 = vmatpush1.bf16.msra.mxu0 %v11286_v26  ;;  %8650 = vmatpush1.bf16.msra.mxu1 %v11299_v44 }
 0x447   :  { %8620 = vmatprep.subr.bf16.mxu0 %v11301_v18  ;;  %8652 = vmatprep.subr.bf16.mxu1 %v11313_v41 }
 0x44a   :  { %8622 = vmatpush1.bf16.msra.mxu0 %v11325_v8  ;;  %8654 = vmatpush1.bf16.msra.mxu1 %v11329_v22 }
 0x44b   :  { %8656 = vmatprep.subr.bf16.mxu0 %v11055_v9  ;;  %8688 = vmatprep.subr.bf16.mxu1 %v11066_v43  ;;  %v200_v43 = vadd.f32 %v10963_v30, %v147_v61 }
 0x500   :  { %v1339_v16 = vpop.f32.mrb[8].mxu0  ;;  %v1410_v7 = vpop.f32.mrb[8].mxu1 }
 0x501   :  { %v1340_v53 = vadd.f32 %v1339_v16, %v197_v6  ;;  %v1341_v58 = vpop.f32.mrb[9].mxu0  ;;  %v1412_v42 = vpop.f32.mrb[9].mxu1  ;;  %v1411_v37 = vadd.f32 %v1410_v7, %v199_v62 }
 0x502   :  { %v1342_v46 = vadd.f32 %v1341_v58, %v198_v32  ;;  %v1413_v35 = vadd.f32 %v1412_v42, %v200_v43 }
 0x503   :  { %v6983_v9 = vmul.f32 -1.442695, %v1340_v53 }
 0x504   :  { %v6984_v4 = vmul.f32 -1.442695, %v1342_v46  ;;  %v6985_v54 = vmul.f32 -1.442695, %v1413_v35 }
 0x505   :  { %10195 = vpow2.f32 %v6983_v9 }
 0x506   :  { %10197 = vpow2.f32 %v6984_v4 }
 0x507   :  { %10199 = vpow2.f32 %v6985_v54 }
 0x508   :  { %10201 = vtanh.f32 %v1411_v37  ;;  %v1920_v37 = vld [vmem:[%s14105_s3 + $0x8] sm:$0xff] }
 0x50f   :  { %v10196_v19 = vpop.eup %10195 }
 0x510   :  { %v10198_v3 = vpop.eup %10197  ;;  %v1418_v6 = vadd.f32 1.0, %v10196_v19  ;;  %v1924_v19 = vld [vmem:[%s14105_s3 + $0x28] sm:$0xff] }
 0x511   :  { %v1424_v16 = vadd.f32 1.0, %v10198_v3  ;;  %v10200_v32 = vpop.eup %10199  ;;  %v1922_v3 = vld [vmem:[%s14105_s3 + $0x18] sm:$0xff] }
 0x512   :  { %10203 = vrcp.f32 %v1418_v6  ;;  %v10202_v53 = vpop.eup %10201  ;;  %v1431_v9 = vadd.f32 1.0, %v10200_v32  ;;  %v8719_v6 = vpack.c.bf16 %v1924_v19, %v1920_v37  ;;  %v1919_v32 = vld [vmem:[%s14105_s3] sm:$0xff]  ;;  %v1952_v37 = vld [vmem:[%s14105_s3 + $0x108] sm:$0xff] }
 0x513   :  { %10205 = vrcp.f32 %v1424_v16  ;;  %v1926_v16 = vld [vmem:[%s14105_s3 + $0x38] sm:$0xff]  ;;  %v1956_v19 = vld [vmem:[%s14105_s3 + $0x128] sm:$0xff] }
 0x514   :  { %10207 = vrcp.f32 %v1431_v9  ;;  %v1925_v9 = vld [vmem:[%s14105_s3 + $0x30] sm:$0xff] }
 0x51c   :  { %v10204_v58 = vpop.eup %10203 }
 0x51d   :  { %v10206_v46 = vpop.eup %10205  ;;  %v1435_v61 = vmul.f32 %v10204_v58, %v10202_v53  ;;  %v1923_v53 = vld [vmem:[%s14105_s3 + $0x20] sm:$0xff]  ;;  %v8751_v58 = vpack.c.bf16 %v1926_v16, %v1922_v3  ;;  %v1954_v3 = vld [vmem:[%s14105_s3 + $0x118] sm:$0xff] }
 0x51e   :  { %v1434_v28 = vmul.f32 %v10206_v46, %v11395_v51  ;;  %v10208_v7 = vpop.eup %10207  ;;  %v8721_v46 = vpack.c.bf16 %v1923_v53, %v1919_v32  ;;  %v1958_v16 = vld [vmem:[%s14105_s3 + $0x138] sm:$0xff]  ;;  %v1951_v32 = vld [vmem:[%s14105_s3 + $0x100] sm:$0xff] }
 0x51f   :  { %v1955_v53 = vld [vmem:[%s14105_s3 + $0x120] sm:$0xff] }
 0x520   :  { %v11445_v42 = vadd.f32 %v1435_v61, %v1434_v28  ;;  %v1921_v61 = vld [vmem:[%s14105_s3 + $0x10] sm:$0xff] }
 0x521   :  { %v8753_v28 = vpack.c.bf16 %v1925_v9, %v1921_v61  ;;  %v1953_v61 = vld [vmem:[%s14105_s3 + $0x110] sm:$0xff] }
 0x522   :  { %10209 = vtanh.f32 %v11445_v42  ;;  %v1957_v9 = vld [vmem:[%s14105_s3 + $0x130] sm:$0xff] }
 0x52c   :  { %v10210_v4 = vpop.eup %10209 }
 0x52d   :  { %v11448_v43 = vmul.f32 %v10210_v4, %v10208_v7  ;;  %v1932_v7 = vld [vmem:[%s14105_s3 + $0x68] sm:$0xff]  ;;  %v1930_v4 = vld [vmem:[%s14105_s3 + $0x58] sm:$0xff] }
 0x52f   :  { %1577 = vmatmul.mubr.f32.vlgmr.msra.gmra.mrb[10].mxu0 %v11448_v43  ;;  %1648 = vmatmul.mubr.f32.vlgmr.msra.gmra.mrb[10].mxu1 %v11448_v43 }
 0x530   :  { %8658 = vmatpush1.bf16.msra.mxu0 %v11068_v34  ;;  %8690 = vmatpush1.bf16.msra.mxu1 %v11077_v10  ;;  %v95_v34 = vpop.permute.xlu1 %94 }
 0x531   :  { %8660 = vmatprep.subr.bf16.mxu0 %v11091_v23  ;;  %8692 = vmatprep.subr.bf16.mxu1 %v11102_v36  ;;  %v148_v10 = vmul.f32 %v10936_v63, %v95_v34  ;;  %v149_v23 = vmul.f32 %v10939_v5, %v95_v34 }
 0x532   :  { %1815 = vmatprep.mubr.f32.mxu0 %v14133_v60  ;;  %1886 = vmatprep.mubr.f32.mxu1 %v14133_v60 }
 0x533   :  { %v201_v36 = vadd.f32 %v10948_v11, %v148_v10  ;;  %v1934_v10 = vld [vmem:[%s14105_s3 + $0x78] sm:$0xff] }
 0x534   :  { %8662 = vmatpush1.bf16.msra.mxu0 %v11104_v40  ;;  %8694 = vmatpush1.bf16.msra.mxu1 %v11113_v52 }
 0x535   :  { %8664 = vmatprep.subr.bf16.mxu0 %v11127_v0  ;;  %8696 = vmatprep.subr.bf16.mxu1 %v11138_v17  ;;  %v202_v0 = vadd.f32 %v10952_v13, %v149_v23  ;;  %v1927_v23 = vld [vmem:[%s14105_s3 + $0x40] sm:$0xff] }
 0x538   :  { %8666 = vmatpush1.bf16.msra.mxu0 %v11140_v21  ;;  %8698 = vmatpush1.bf16.msra.mxu1 %v11149_v38 }
 0x539   :  { %8668 = vmatprep.subr.bf16.mxu0 %v11163_v50  ;;  %8700 = vmatprep.subr.bf16.mxu1 %v11174_v57  ;;  %v151_v57 = vmul.f32 %v10955_v15, %v95_v34 }
 0x53c   :  { %8670 = vmatpush1.bf16.msra.mxu0 %v11176_v59  ;;  %8702 = vmatpush1.bf16.msra.mxu1 %v11185_v20 }
 0x53d   :  { %8672 = vmatprep.subr.bf16.mxu0 %v11199_v33  ;;  %8704 = vmatprep.subr.bf16.mxu1 %v11210_v47  ;;  %v204_v33 = vadd.f32 %v10963_v30, %v151_v57  ;;  %v150_v47 = vmul.f32 %v10966_v31, %v95_v34  ;;  %v1938_v57 = vld [vmem:[%s14105_s3 + $0x98] sm:$0xff] }
 0x540   :  { %8674 = vmatpush1.bf16.msra.mxu0 %v11212_v14  ;;  %8706 = vmatpush1.bf16.msra.mxu1 %v11221_v27  ;;  %v203_v27 = vadd.f32 %v10971_v55, %v150_v47  ;;  %v1939_v47 = vld [vmem:[%s14105_s3 + $0xa0] sm:$0xff] }
 0x541   :  { %8676 = vmatprep.subr.bf16.mxu0 %v11234_v45  ;;  %8708 = vmatprep.subr.bf16.mxu1 %v11246_v1 }
 0x544   :  { %8678 = vmatpush1.bf16.msra.mxu0 %v11248_v2  ;;  %8710 = vmatpush1.bf16.msra.mxu1 %v11260_v39 }
 0x545   :  { %8680 = vmatprep.subr.bf16.mxu0 %v11272_v49  ;;  %8712 = vmatprep.subr.bf16.mxu1 %v11274_v56 }
 0x548   :  { %8682 = vmatpush1.bf16.msra.mxu0 %v11286_v26  ;;  %8714 = vmatpush1.bf16.msra.mxu1 %v11299_v44 }
 0x549   :  { %8684 = vmatprep.subr.bf16.mxu0 %v11301_v18  ;;  %8716 = vmatprep.subr.bf16.mxu1 %v11313_v41 }
 0x54c   :  { %8686 = vmatpush1.bf16.msra.mxu0 %v11325_v8  ;;  %8718 = vmatpush1.bf16.msra.mxu1 %v11329_v22 }
 0x54d   :  { %8720 = vmatprep.subr.bf16.mxu0 %v8719_v6  ;;  %8752 = vmatprep.subr.bf16.mxu1 %v8751_v58  ;;  %v8735_v6 = vpack.c.bf16 %v1956_v19, %v1952_v37  ;;  %v8767_v58 = vpack.c.bf16 %v1958_v16, %v1954_v3  ;;  %v2173_v37 = vld [vmem:[%s14111_s2 + $0x28] sm:$0xff]  ;;  %v2171_v19 = vld [vmem:[%s14111_s2 + $0x18] sm:$0xff] }
 0x54e   :  { %v2175_v16 = vld [vmem:[%s14111_s2 + $0x38] sm:$0xff] }
 0x602   :  { %v1578_v40 = vpop.f32.mrb[10].mxu0  ;;  %v1649_v52 = vpop.f32.mrb[10].mxu1 }
 0x603   :  { %v1579_v17 = vadd.f32 %v1578_v40, %v201_v36  ;;  %v1580_v21 = vpop.f32.mrb[11].mxu0  ;;  %v1651_v38 = vpop.f32.mrb[11].mxu1  ;;  %v1650_v1 = vadd.f32 %v1649_v52, %v203_v27  ;;  %v1931_v36 = vld [vmem:[%s14105_s3 + $0x60] sm:$0xff]  ;;  %v8755_v40 = vpack.c.bf16 %v1934_v10, %v1930_v4  ;;  %v1962_v4 = vld [vmem:[%s14105_s3 + $0x158] sm:$0xff] }
 0x604   :  { %v1581_v50 = vadd.f32 %v1580_v21, %v202_v0  ;;  %v1652_v14 = vadd.f32 %v1651_v38, %v204_v33  ;;  %v8725_v52 = vpack.c.bf16 %v1931_v36, %v1927_v23  ;;  %v1929_v0 = vld [vmem:[%s14105_s3 + $0x50] sm:$0xff]  ;;  %v1936_v38 = vld [vmem:[%s14105_s3 + $0x88] sm:$0xff]  ;;  %v1935_v33 = vld [vmem:[%s14105_s3 + $0x80] sm:$0xff] }
 0x605   :  { %v6986_v59 = vmul.f32 -1.442695, %v1579_v17  ;;  %v1933_v17 = vld [vmem:[%s14105_s3 + $0x70] sm:$0xff]  ;;  %v8729_v27 = vpack.c.bf16 %v1939_v47, %v1935_v33  ;;  %v1966_v10 = vld [vmem:[%s14105_s3 + $0x178] sm:$0xff]  ;;  %v1959_v23 = vld [vmem:[%s14105_s3 + $0x140] sm:$0xff] }
 0x606   :  { %v6987_v20 = vmul.f32 -1.442695, %v1581_v50  ;;  %v6988_v45 = vmul.f32 -1.442695, %v1652_v14  ;;  %v8757_v21 = vpack.c.bf16 %v1933_v17, %v1929_v0  ;;  %v1940_v50 = vld [vmem:[%s14105_s3 + $0xa8] sm:$0xff]  ;;  %v1963_v36 = vld [vmem:[%s14105_s3 + $0x160] sm:$0xff] }
 0x607   :  { %10211 = vpow2.f32 %v6986_v59  ;;  %v8727_v59 = vpack.c.bf16 %v1940_v50, %v1936_v38  ;;  %v1961_v0 = vld [vmem:[%s14105_s3 + $0x150] sm:$0xff]  ;;  %v1972_v50 = vld [vmem:[%s14105_s3 + $0x1a8] sm:$0xff]  ;;  %v1967_v47 = vld [vmem:[%s14105_s3 + $0x180] sm:$0xff] }
 0x608   :  { %10213 = vpow2.f32 %v6987_v20  ;;  %v1942_v20 = vld [vmem:[%s14105_s3 + $0xb8] sm:$0xff]  ;;  %v1965_v17 = vld [vmem:[%s14105_s3 + $0x170] sm:$0xff] }
 0x609   :  { %10215 = vpow2.f32 %v6988_v45  ;;  %v8759_v14 = vpack.c.bf16 %v1942_v20, %v1938_v57  ;;  %v1937_v45 = vld [vmem:[%s14105_s3 + $0x90] sm:$0xff]  ;;  %v8773_v38 = vpack.c.bf16 %v1965_v17, %v1961_v0  ;;  %v1970_v57 = vld [vmem:[%s14105_s3 + $0x198] sm:$0xff] }
 0x60a   :  { %10217 = vtanh.f32 %v1650_v1  ;;  %v1941_v1 = vld [vmem:[%s14105_s3 + $0xb0] sm:$0xff] }
 0x611   :  { %v10212_v2 = vpop.eup %10211 }
 0x612   :  { %v10214_v39 = vpop.eup %10213  ;;  %v1657_v49 = vadd.f32 1.0, %v10212_v2  ;;  %v8761_v2 = vpack.c.bf16 %v1941_v1, %v1937_v45  ;;  %v1973_v1 = vld [vmem:[%s14105_s3 + $0x1b0] sm:$0xff] }
 0x613   :  { %v1663_v56 = vadd.f32 1.0, %v10214_v39  ;;  %v10216_v26 = vpop.eup %10215  ;;  %v1944_v39 = vld [vmem:[%s14105_s3 + $0xc8] sm:$0xff] }
 0x614   :  { %10219 = vrcp.f32 %v1657_v49  ;;  %v10218_v44 = vpop.eup %10217  ;;  %v1670_v22 = vadd.f32 1.0, %v10216_v26  ;;  %v1948_v49 = vld [vmem:[%s14105_s3 + $0xe8] sm:$0xff] }
 0x615   :  { %10221 = vrcp.f32 %v1663_v56  ;;  %v1946_v56 = vld [vmem:[%s14105_s3 + $0xd8] sm:$0xff]  ;;  %v8731_v26 = vpack.c.bf16 %v1948_v49, %v1944_v39  ;;  %v1980_v39 = vld [vmem:[%s14105_s3 + $0x1e8] sm:$0xff] }
 0x616   :  { %10223 = vrcp.f32 %v1670_v22 }
 0x61e   :  { %v10220_v18 = vpop.eup %10219 }
 0x61f   :  { %v10222_v41 = vpop.eup %10221  ;;  %v1674_v8 = vmul.f32 %v10220_v18, %v10218_v44  ;;  %v1950_v44 = vld [vmem:[%s14105_s3 + $0xf8] sm:$0xff]  ;;  %v1943_v18 = vld [vmem:[%s14105_s3 + $0xc0] sm:$0xff] }
 0x620   :  { %v1673_v51 = vmul.f32 %v10222_v41, %v11445_v42  ;;  %v10224_v35 = vpop.eup %10223  ;;  %v1928_v42 = vld [vmem:[%s14105_s3 + $0x48] sm:$0xff]  ;;  %v1947_v41 = vld [vmem:[%s14105_s3 + $0xe0] sm:$0xff] }
 0x621   :  { %v8723_v34 = vpack.c.bf16 %v1932_v7, %v1928_v42  ;;  %v8733_v22 = vpack.c.bf16 %v1947_v41, %v1943_v18  ;;  %v1960_v42 = vld [vmem:[%s14105_s3 + $0x148] sm:$0xff]  ;;  %v1975_v18 = vld [vmem:[%s14105_s3 + $0x1c0] sm:$0xff] }
 0x622   :  { %v11493_v12 = vadd.f32 %v1674_v8, %v1673_v51  ;;  %v8763_v8 = vpack.c.bf16 %v1950_v44, %v1946_v56  ;;  %v1945_v51 = vld [vmem:[%s14105_s3 + $0xd0] sm:$0xff]  ;;  %v1964_v7 = vld [vmem:[%s14105_s3 + $0x168] sm:$0xff]  ;;  %v1982_v44 = vld [vmem:[%s14105_s3 + $0x1f8] sm:$0xff] }
 0x624   :  { %10225 = vtanh.f32 %v11493_v12 }
 0x62e   :  { %v10226_v62 = vpop.eup %10225 }
 0x62f   :  { %v11496_v54 = vmul.f32 %v10226_v62, %v10224_v35  ;;  %v1949_v35 = vld [vmem:[%s14105_s3 + $0xf0] sm:$0xff] }
 0x630   :  { %v8765_v62 = vpack.c.bf16 %v1949_v35, %v1945_v51  ;;  %v1981_v51 = vld [vmem:[%s14105_s3 + $0x1f0] sm:$0xff] }
 0x631   :  { %1816 = vmatmul.mubr.f32.vlgmr.msra.gmra.mrb[12].mxu0 %v11496_v54  ;;  %1887 = vmatmul.mubr.f32.vlgmr.msra.gmra.mrb[12].mxu1 %v11496_v54 }
 0x632   :  { %2054 = vmatprep.mubr.f32.mxu0 %v14133_v60  ;;  %2125 = vmatprep.mubr.f32.mxu1 %v14133_v60 }
 0x633   :  { %8722 = vmatpush1.bf16.msra.mxu0 %v8721_v46  ;;  %8754 = vmatpush1.bf16.msra.mxu1 %v8753_v28  ;;  %v8737_v46 = vpack.c.bf16 %v1955_v53, %v1951_v32  ;;  %v8769_v28 = vpack.c.bf16 %v1957_v9, %v1953_v61  ;;  %v8815_v32 = vpack.c.bf16 %v2175_v16, %v2171_v19  ;;  %v100_v53 = vpop.permute.xlu0 %99  ;;  %v2176_v19 = vld [vmem:[%s14111_s2 + $0x40] sm:$0xff] }
 0x634   :  { %8724 = vmatprep.subr.bf16.mxu0 %v8723_v34  ;;  %8756 = vmatprep.subr.bf16.mxu1 %v8755_v40  ;;  %v8739_v34 = vpack.c.bf16 %v1964_v7, %v1960_v42  ;;  %v8771_v40 = vpack.c.bf16 %v1966_v10, %v1962_v4  ;;  %v155_v10 = vmul.f32 %v10955_v15, %v100_v53 }
 0x635   :  { %v154_v0 = vmul.f32 %v10966_v31, %v100_v53 }
 0x637   :  { %8726 = vmatpush1.bf16.msra.mxu0 %v8725_v52  ;;  %8758 = vmatpush1.bf16.msra.mxu1 %v8757_v21  ;;  %v8741_v52 = vpack.c.bf16 %v1963_v36, %v1959_v23  ;;  %v1968_v21 = vld [vmem:[%s14105_s3 + $0x188] sm:$0xff] }
 0x638   :  { %8728 = vmatprep.subr.bf16.mxu0 %v8727_v59  ;;  %8760 = vmatprep.subr.bf16.mxu1 %v8759_v14  ;;  %v1974_v59 = vld [vmem:[%s14105_s3 + $0x1b8] sm:$0xff]  ;;  %v8743_v20 = vpack.c.bf16 %v1972_v50, %v1968_v21  ;;  %v1971_v14 = vld [vmem:[%s14105_s3 + $0x1a0] sm:$0xff]  ;;  %v207_v21 = vadd.f32 %v10971_v55, %v154_v0  ;;  %v2197_v0 = vld [vmem:[%s14111_s2 + $0xe8] sm:$0xff] }
 0x639   :  { %v8775_v33 = vpack.c.bf16 %v1974_v59, %v1970_v57  ;;  %v8745_v45 = vpack.c.bf16 %v1971_v14, %v1967_v47 }
 0x63b   :  { %8730 = vmatpush1.bf16.msra.mxu0 %v8729_v27  ;;  %8762 = vmatpush1.bf16.msra.mxu1 %v8761_v2  ;;  %v1969_v27 = vld [vmem:[%s14105_s3 + $0x190] sm:$0xff]  ;;  %v1976_v2 = vld [vmem:[%s14105_s3 + $0x1c8] sm:$0xff] }
 0x63c   :  { %8732 = vmatprep.subr.bf16.mxu0 %v8731_v26  ;;  %8764 = vmatprep.subr.bf16.mxu1 %v8763_v8  ;;  %v8777_v49 = vpack.c.bf16 %v1973_v1, %v1969_v27  ;;  %v8747_v56 = vpack.c.bf16 %v1980_v39, %v1976_v2  ;;  %v1978_v26 = vld [vmem:[%s14105_s3 + $0x1d8] sm:$0xff]  ;;  %v1979_v8 = vld [vmem:[%s14105_s3 + $0x1e0] sm:$0xff] }
 0x63d   :  { %v8779_v41 = vpack.c.bf16 %v1982_v44, %v1978_v26  ;;  %v8749_v35 = vpack.c.bf16 %v1979_v8, %v1975_v18  ;;  %v2172_v26 = vld [vmem:[%s14111_s2 + $0x20] sm:$0xff]  ;;  %v2170_v44 = vld [vmem:[%s14111_s2 + $0x10] sm:$0xff]  ;;  %v2177_v18 = vld [vmem:[%s14111_s2 + $0x48] sm:$0xff] }
 0x63e   :  { %v2179_v8 = vld [vmem:[%s14111_s2 + $0x58] sm:$0xff] }
 0x63f   :  { %8734 = vmatpush1.bf16.msra.mxu0 %v8733_v22  ;;  %8766 = vmatpush1.bf16.msra.mxu1 %v8765_v62  ;;  %v1977_v22 = vld [vmem:[%s14105_s3 + $0x1d0] sm:$0xff]  ;;  %v2169_v62 = vld [vmem:[%s14111_s2 + $0x8] sm:$0xff] }
 0x640   :  { %8736 = vmatprep.subr.bf16.mxu0 %v8735_v6  ;;  %8768 = vmatprep.subr.bf16.mxu1 %v8767_v58  ;;  %v8781_v3 = vpack.c.bf16 %v1981_v51, %v1977_v22  ;;  %v8783_v6 = vpack.c.bf16 %v2173_v37, %v2169_v62  ;;  %v152_v58 = vmul.f32 %v10936_v63, %v100_v53  ;;  %v2183_v22 = vld [vmem:[%s14111_s2 + $0x78] sm:$0xff] }
 0x642   :  { %v205_v61 = vadd.f32 %v10948_v11, %v152_v58  ;;  %v2182_v58 = vld [vmem:[%s14111_s2 + $0x70] sm:$0xff] }
 0x643   :  { %8738 = vmatpush1.bf16.msra.mxu0 %v8737_v46  ;;  %8770 = vmatpush1.bf16.msra.mxu1 %v8769_v28  ;;  %v153_v46 = vmul.f32 %v10939_v5, %v100_v53  ;;  %v2178_v53 = vld [vmem:[%s14111_s2 + $0x50] sm:$0xff] }
 0x644   :  { %8740 = vmatprep.subr.bf16.mxu0 %v8739_v34  ;;  %8772 = vmatprep.subr.bf16.mxu1 %v8771_v40 }
 0x645   :  { %v206_v42 = vadd.f32 %v10952_v13, %v153_v46  ;;  %v2185_v46 = vld [vmem:[%s14111_s2 + $0x88] sm:$0xff] }
 0x647   :  { %8742 = vmatpush1.bf16.msra.mxu0 %v8741_v52  ;;  %8774 = vmatpush1.bf16.msra.mxu1 %v8773_v38  ;;  %v208_v52 = vadd.f32 %v10963_v30, %v155_v10 }
 0x648   :  { %8744 = vmatprep.subr.bf16.mxu0 %v8743_v20  ;;  %8776 = vmatprep.subr.bf16.mxu1 %v8775_v33 }
 0x64b   :  { %8746 = vmatpush1.bf16.msra.mxu0 %v8745_v45  ;;  %8778 = vmatpush1.bf16.msra.mxu1 %v8777_v49 }
 0x64c   :  { %8748 = vmatprep.subr.bf16.mxu0 %v8747_v56  ;;  %8780 = vmatprep.subr.bf16.mxu1 %v8779_v41  ;;  %v2168_v56 = vld [vmem:[%s14111_s2] sm:$0xff]  ;;  %v2181_v41 = vld [vmem:[%s14111_s2 + $0x68] sm:$0xff] }
 0x64d   :  { %v8785_v62 = vpack.c.bf16 %v2172_v26, %v2168_v56  ;;  %v8787_v16 = vpack.c.bf16 %v2181_v41, %v2177_v18  ;;  %v2200_v26 = vld [vmem:[%s14111_s2 + $0x100] sm:$0xff]  ;;  %v2202_v41 = vld [vmem:[%s14111_s2 + $0x110] sm:$0xff] }
 0x64f   :  { %8750 = vmatpush1.bf16.msra.mxu0 %v8749_v35  ;;  %8782 = vmatpush1.bf16.msra.mxu1 %v8781_v3  ;;  %v2180_v3 = vld [vmem:[%s14111_s2 + $0x60] sm:$0xff] }
 0x650   :  { %8784 = vmatprep.subr.bf16.mxu0 %v8783_v6  ;;  %8816 = vmatprep.subr.bf16.mxu1 %v8815_v32  ;;  %v8819_v32 = vpack.c.bf16 %v2183_v22, %v2179_v8  ;;  %v2206_v8 = vld [vmem:[%s14111_s2 + $0x130] sm:$0xff]  ;;  %v2209_v22 = vld [vmem:[%s14111_s2 + $0x148] sm:$0xff] }
 0x704   :  { %v1817_v9 = vpop.f32.mrb[12].mxu0  ;;  %v1888_v28 = vpop.f32.mrb[12].mxu1 }
 0x705   :  { %v1818_v7 = vadd.f32 %v1817_v9, %v205_v61  ;;  %v1819_v4 = vpop.f32.mrb[13].mxu0  ;;  %v1890_v34 = vpop.f32.mrb[13].mxu1  ;;  %v1889_v50 = vadd.f32 %v1888_v28, %v207_v21  ;;  %v2189_v61 = vld [vmem:[%s14111_s2 + $0xa8] sm:$0xff]  ;;  %v2187_v9 = vld [vmem:[%s14111_s2 + $0x98] sm:$0xff] }
 0x706   :  { %v1820_v23 = vadd.f32 %v1819_v4, %v206_v42  ;;  %v1891_v17 = vadd.f32 %v1890_v34, %v208_v52  ;;  %v2191_v28 = vld [vmem:[%s14111_s2 + $0xb8] sm:$0xff]  ;;  %v8789_v42 = vpack.c.bf16 %v2180_v3, %v2176_v19  ;;  %v2184_v4 = vld [vmem:[%s14111_s2 + $0x80] sm:$0xff]  ;;  %v8791_v10 = vpack.c.bf16 %v2189_v61, %v2185_v46  ;;  %v2193_v52 = vld [vmem:[%s14111_s2 + $0xc8] sm:$0xff] }
 0x707   :  { %v6989_v36 = vmul.f32 -1.442695, %v1818_v7  ;;  %v8821_v7 = vpack.c.bf16 %v2182_v58, %v2178_v53  ;;  %v2188_v34 = vld [vmem:[%s14111_s2 + $0xa0] sm:$0xff]  ;;  %v2199_v21 = vld [vmem:[%s14111_s2 + $0xf8] sm:$0xff]  ;;  %v8833_v19 = vpack.c.bf16 %v2206_v8, %v2202_v41  ;;  %v2210_v58 = vld [vmem:[%s14111_s2 + $0x150] sm:$0xff] }
 0x708   :  { %v6990_v40 = vmul.f32 -1.442695, %v1820_v23  ;;  %v6991_v38 = vmul.f32 -1.442695, %v1891_v17  ;;  %v8823_v23 = vpack.c.bf16 %v2191_v28, %v2187_v9  ;;  %v2195_v17 = vld [vmem:[%s14111_s2 + $0xd8] sm:$0xff]  ;;  %v2208_v3 = vld [vmem:[%s14111_s2 + $0x140] sm:$0xff] }
 0x709   :  { %10227 = vpow2.f32 %v6989_v36  ;;  %v2186_v36 = vld [vmem:[%s14111_s2 + $0x90] sm:$0xff]  ;;  %v2217_v61 = vld [vmem:[%s14111_s2 + $0x188] sm:$0xff]  ;;  %v2219_v28 = vld [vmem:[%s14111_s2 + $0x198] sm:$0xff] }
 0x70a   :  { %10229 = vpow2.f32 %v6990_v40  ;;  %v2190_v40 = vld [vmem:[%s14111_s2 + $0xb0] sm:$0xff]  ;;  %v2221_v9 = vld [vmem:[%s14111_s2 + $0x1a8] sm:$0xff]  ;;  %v7007_v41 = vld [vmem:[%s14105_s3 + $0x258] sm:$0xff] }
 0x70b   :  { %10231 = vpow2.f32 %v6991_v38  ;;  %v8793_v38 = vpack.c.bf16 %v2188_v34, %v2184_v4  ;;  %v2214_v46 = vld [vmem:[%s14111_s2 + $0x170] sm:$0xff]  ;;  %v2216_v34 = vld [vmem:[%s14111_s2 + $0x180] sm:$0xff] }
 0x70c   :  { %10233 = vtanh.f32 %v1889_v50  ;;  %v8825_v50 = vpack.c.bf16 %v2190_v40, %v2186_v36  ;;  %v8837_v4 = vpack.c.bf16 %v2214_v46, %v2210_v58  ;;  %v2218_v40 = vld [vmem:[%s14111_s2 + $0x190] sm:$0xff]  ;;  %v7015_v58 = vld [vmem:[%s14105_s3 + $0x298] sm:$0xff] }
 0x713   :  { %v10228_v57 = vpop.eup %10227 }
 0x714   :  { %v10230_v59 = vpop.eup %10229  ;;  %v1896_v20 = vadd.f32 1.0, %v10228_v57  ;;  %v2192_v57 = vld [vmem:[%s14111_s2 + $0xc0] sm:$0xff] }
 0x715   :  { %v1902_v33 = vadd.f32 1.0, %v10230_v59  ;;  %v10232_v47 = vpop.eup %10231  ;;  %v2196_v59 = vld [vmem:[%s14111_s2 + $0xe0] sm:$0xff] }
 0x716   :  { %10235 = vrcp.f32 %v1896_v20  ;;  %v10234_v14 = vpop.eup %10233  ;;  %v1909_v2 = vadd.f32 1.0, %v10232_v47  ;;  %v8795_v20 = vpack.c.bf16 %v2197_v0, %v2193_v52  ;;  %v2194_v47 = vld [vmem:[%s14111_s2 + $0xd0] sm:$0xff]  ;;  %v2225_v0 = vld [vmem:[%s14111_s2 + $0x1c8] sm:$0xff] }
 0x717   :  { %10237 = vrcp.f32 %v1902_v33  ;;  %v8827_v33 = vpack.c.bf16 %v2199_v21, %v2195_v17  ;;  %v2222_v52 = vld [vmem:[%s14111_s2 + $0x1b0] sm:$0xff]  ;;  %v2229_v17 = vld [vmem:[%s14111_s2 + $0x1e8] sm:$0xff]  ;;  %v2227_v21 = vld [vmem:[%s14111_s2 + $0x1d8] sm:$0xff] }
 0x718   :  { %10239 = vrcp.f32 %v1909_v2  ;;  %v2207_v2 = vld [vmem:[%s14111_s2 + $0x138] sm:$0xff] }
 0x720   :  { %v10236_v27 = vpop.eup %10235 }
 0x721   :  { %v10238_v45 = vpop.eup %10237  ;;  %v1913_v1 = vmul.f32 %v10236_v27, %v10234_v14  ;;  %v2198_v14 = vld [vmem:[%s14111_s2 + $0xf0] sm:$0xff]  ;;  %v2201_v27 = vld [vmem:[%s14111_s2 + $0x108] sm:$0xff] }
 0x722   :  { %v1912_v39 = vmul.f32 %v10238_v45, %v11493_v12  ;;  %v2174_v12 = vld [vmem:[%s14111_s2 + $0x30] sm:$0xff]  ;;  %v10240_v51 = vpop.eup %10239  ;;  %v2205_v45 = vld [vmem:[%s14111_s2 + $0x128] sm:$0xff]  ;;  %v8829_v56 = vpack.c.bf16 %v2198_v14, %v2194_v47  ;;  %v2228_v47 = vld [vmem:[%s14111_s2 + $0x1e0] sm:$0xff] }
 0x723   :  { %v8817_v37 = vpack.c.bf16 %v2174_v12, %v2170_v44  ;;  %v2204_v44 = vld [vmem:[%s14111_s2 + $0x120] sm:$0xff]  ;;  %v8799_v12 = vpack.c.bf16 %v2205_v45, %v2201_v27  ;;  %v2226_v14 = vld [vmem:[%s14111_s2 + $0x1d0] sm:$0xff] }
 0x724   :  { %v11715_v49 = vadd.f32 %v1913_v1, %v1912_v39  ;;  %v2203_v1 = vld [vmem:[%s14111_s2 + $0x118] sm:$0xff]  ;;  %v8797_v39 = vpack.c.bf16 %v2196_v59, %v2192_v57  ;;  %v8841_v57 = vpack.c.bf16 %v2222_v52, %v2218_v40  ;;  %v2224_v59 = vld [vmem:[%s14111_s2 + $0x1c0] sm:$0xff]  ;;  %v2230_v27 = vld [vmem:[%s14111_s2 + $0x1f0] sm:$0xff] }
 0x725   :  { %v8831_v18 = vpack.c.bf16 %v2207_v2, %v2203_v1  ;;  %v8813_v45 = vpack.c.bf16 %v2228_v47, %v2224_v59  ;;  %v8845_v1 = vpack.c.bf16 %v2230_v27, %v2226_v14  ;;  %v7023_v40 = vld [vmem:[%s14105_s3 + $0x2d8] sm:$0xff]  ;;  %v7026_v59 = vld [vmem:[%s14105_s3 + $0x2f0] sm:$0xff]  ;;  %v7033_v47 = vld [vmem:[%s14105_s3 + $0x328] sm:$0xff] }
 0x726   :  { %10241 = vtanh.f32 %v11715_v49  ;;  %v7028_v14 = vld [vmem:[%s14105_s3 + $0x300] sm:$0xff] }
 0x727   :  { %v7032_v27 = vld [vmem:[%s14105_s3 + $0x320] sm:$0xff] }
 0x730   :  { %v10242_v35 = vpop.eup %10241 }
 0x731   :  { %v11748_v6 = vmul.f32 %v10242_v35, %v10240_v51  ;;  %v2213_v51 = vld [vmem:[%s14111_s2 + $0x168] sm:$0xff]  ;;  %v2211_v35 = vld [vmem:[%s14111_s2 + $0x158] sm:$0xff] }
 0x733   :  { %2055 = vmatmul.mubr.f32.vlgmr.msra.gmra.mrb[14].mxu0 %v11748_v6  ;;  %2126 = vmatmul.mubr.f32.vlgmr.msra.gmra.mrb[14].mxu1 %v11748_v6 }
 0x734   :  { %8786 = vmatpush1.bf16.msra.mxu0 %v8785_v62  ;;  %8818 = vmatpush1.bf16.msra.mxu1 %v8817_v37  ;;  %v2215_v62 = vld [vmem:[%s14111_s2 + $0x178] sm:$0xff]  ;;  %v8801_v37 = vpack.c.bf16 %v2204_v44, %v2200_v26  ;;  %v7002_v26 = vld [vmem:[%s14105_s3 + $0x230] sm:$0xff] }
 0x735   :  { %8788 = vmatprep.subr.bf16.mxu0 %v8787_v16  ;;  %8820 = vmatprep.subr.bf16.mxu1 %v8819_v32  ;;  %v2212_v16 = vld [vmem:[%s14111_s2 + $0x160] sm:$0xff]  ;;  %v8803_v32 = vpack.c.bf16 %v2213_v51, %v2209_v22  ;;  %v8835_v53 = vpack.c.bf16 %v2215_v62, %v2211_v35  ;;  %v7011_v35 = vld [vmem:[%s14105_s3 + $0x278] sm:$0xff] }
 0x736   :  { %2319 = vmatprep.mubr.f32.mxu0 %v14133_v60  ;;  %2432 = vmatprep.mubr.f32.mxu1 %v14133_v60  ;;  %v7004_v22 = vld [vmem:[%s14105_s3 + $0x240] sm:$0xff] }
 0x737   :  { %v7008_v51 = vld [vmem:[%s14105_s3 + $0x260] sm:$0xff] }
 0x738   :  { %8790 = vmatpush1.bf16.msra.mxu0 %v8789_v42  ;;  %8822 = vmatpush1.bf16.msra.mxu1 %v8821_v7  ;;  %v2223_v42 = vld [vmem:[%s14111_s2 + $0x1b8] sm:$0xff]  ;;  %v8805_v7 = vpack.c.bf16 %v2212_v16, %v2208_v3  ;;  %v11988_v62 = vpack.c.bf16 %v7008_v51, %v7004_v22  ;;  %v7010_v3 = vld [vmem:[%s14105_s3 + $0x270] sm:$0xff] }
 0x739   :  { %8792 = vmatprep.subr.bf16.mxu0 %v8791_v10  ;;  %8824 = vmatprep.subr.bf16.mxu1 %v8823_v23  ;;  %v2220_v10 = vld [vmem:[%s14111_s2 + $0x1a0] sm:$0xff]  ;;  %v8807_v23 = vpack.c.bf16 %v2221_v9, %v2217_v61  ;;  %v8839_v36 = vpack.c.bf16 %v2223_v42, %v2219_v28  ;;  %v7019_v28 = vld [vmem:[%s14105_s3 + $0x2b8] sm:$0xff] }
 0x73a   :  { %v7012_v61 = vld [vmem:[%s14105_s3 + $0x280] sm:$0xff]  ;;  %v7039_v22 = vld [vmem:[%s14105_s3 + $0x358] sm:$0xff] }
 0x73b   :  { %v7016_v9 = vld [vmem:[%s14105_s3 + $0x2a0] sm:$0xff]  ;;  %v7043_v51 = vld [vmem:[%s14105_s3 + $0x378] sm:$0xff] }
 0x73c   :  { %8794 = vmatpush1.bf16.msra.mxu0 %v8793_v38  ;;  %8826 = vmatpush1.bf16.msra.mxu1 %v8825_v50  ;;  %v2231_v38 = vld [vmem:[%s14111_s2 + $0x1f8] sm:$0xff]  ;;  %v8809_v50 = vpack.c.bf16 %v2220_v10, %v2216_v34  ;;  %v12024_v42 = vpack.c.bf16 %v7016_v9, %v7012_v61  ;;  %v7018_v34 = vld [vmem:[%s14105_s3 + $0x2b0] sm:$0xff]  ;;  %v7044_v61 = vld [vmem:[%s14105_s3 + $0x380] sm:$0xff] }
 0x73d   :  { %8796 = vmatprep.subr.bf16.mxu0 %v8795_v20  ;;  %8828 = vmatprep.subr.bf16.mxu1 %v8827_v33  ;;  %v8811_v20 = vpack.c.bf16 %v2229_v17, %v2225_v0  ;;  %v8843_v33 = vpack.c.bf16 %v2231_v38, %v2227_v21  ;;  %v7020_v0 = vld [vmem:[%s14105_s3 + $0x2c0] sm:$0xff]  ;;  %v7027_v21 = vld [vmem:[%s14105_s3 + $0x2f8] sm:$0xff] }
 0x73e   :  { %v7024_v17 = vld [vmem:[%s14105_s3 + $0x2e0] sm:$0xff] }
 0x73f   :  { %v12060_v38 = vpack.c.bf16 %v7024_v17, %v7020_v0  ;;  %v7050_v0 = vld [vmem:[%s14105_s3 + $0x3b0] sm:$0xff]  ;;  %v7053_v17 = vld [vmem:[%s14105_s3 + $0x3c8] sm:$0xff] }
 0x740   :  { %8798 = vmatpush1.bf16.msra.mxu0 %v8797_v39  ;;  %8830 = vmatpush1.bf16.msra.mxu1 %v8829_v56  ;;  %v6998_v56 = vld [vmem:[%s14105_s3 + $0x210] sm:$0xff] }
 0x741   :  { %8800 = vmatprep.subr.bf16.mxu0 %v8799_v12  ;;  %8832 = vmatprep.subr.bf16.mxu1 %v8831_v18  ;;  %v11963_v44 = vpack.c.bf16 %v7002_v26, %v6998_v56  ;;  %v7005_v12 = vld [vmem:[%s14105_s3 + $0x248] sm:$0xff] }
 0x742   :  { %v7009_v18 = vld [vmem:[%s14105_s3 + $0x268] sm:$0xff] }
 0x743   :  { %v11977_v8 = vpack.c.bf16 %v7009_v18, %v7005_v12  ;;  %v7041_v56 = vld [vmem:[%s14105_s3 + $0x368] sm:$0xff]  ;;  %v7036_v18 = vld [vmem:[%s14105_s3 + $0x340] sm:$0xff] }
 0x744   :  { %8802 = vmatpush1.bf16.msra.mxu0 %v8801_v37  ;;  %8834 = vmatpush1.bf16.msra.mxu1 %v8833_v19  ;;  %v11990_v37 = vpack.c.bf16 %v7011_v35, %v7007_v41  ;;  %v7006_v19 = vld [vmem:[%s14105_s3 + $0x250] sm:$0xff]  ;;  %v7040_v41 = vld [vmem:[%s14105_s3 + $0x360] sm:$0xff] }
 0x745   :  { %8804 = vmatprep.subr.bf16.mxu0 %v8803_v32  ;;  %8836 = vmatprep.subr.bf16.mxu1 %v8835_v53  ;;  %v11999_v16 = vpack.c.bf16 %v7010_v3, %v7006_v19  ;;  %v7013_v32 = vld [vmem:[%s14105_s3 + $0x288] sm:$0xff]  ;;  %v7038_v35 = vld [vmem:[%s14105_s3 + $0x350] sm:$0xff]  ;;  %v12137_v3 = vpack.c.bf16 %v7040_v41, %v7036_v18  ;;  %v105_v18 = vpop.permute.xlu1 %104 }
 0x746   :  { %v7017_v53 = vld [vmem:[%s14105_s3 + $0x2a8] sm:$0xff]  ;;  %v7042_v19 = vld [vmem:[%s14105_s3 + $0x370] sm:$0xff]  ;;  %v156_v41 = vmul.f32 %v10936_v63, %v105_v18 }
 0x747   :  { %v12013_v46 = vpack.c.bf16 %v7017_v53, %v7013_v32  ;;  %v12139_v32 = vpack.c.bf16 %v7043_v51, %v7039_v22  ;;  %v7045_v53 = vld [vmem:[%s14105_s3 + $0x388] sm:$0xff]  ;;  %v12152_v9 = vpack.c.bf16 %v7042_v19, %v7038_v35  ;;  %v157_v22 = vmul.f32 %v10939_v5, %v105_v18 }
 0x748   :  { %8806 = vmatpush1.bf16.msra.mxu0 %v8805_v7  ;;  %8838 = vmatpush1.bf16.msra.mxu1 %v8837_v4  ;;  %v12026_v7 = vpack.c.bf16 %v7019_v28, %v7015_v58  ;;  %v7014_v4 = vld [vmem:[%s14105_s3 + $0x290] sm:$0xff]  ;;  %v7049_v58 = vld [vmem:[%s14105_s3 + $0x3a8] sm:$0xff]  ;;  %v209_v51 = vadd.f32 %v10948_v11, %v156_v41  ;;  %v158_v5 = vmul.f32 %v10966_v31, %v105_v18 }
 0x749   :  { %8808 = vmatprep.subr.bf16.mxu0 %v8807_v23  ;;  %8840 = vmatprep.subr.bf16.mxu1 %v8839_v36  ;;  %v12035_v10 = vpack.c.bf16 %v7018_v34, %v7014_v4  ;;  %v7021_v23 = vld [vmem:[%s14105_s3 + $0x2c8] sm:$0xff]  ;;  %v12154_v28 = vpack.c.bf16 %v7049_v58, %v7045_v53  ;;  %v7048_v4 = vld [vmem:[%s14105_s3 + $0x3a0] sm:$0xff]  ;;  %v7047_v34 = vld [vmem:[%s14105_s3 + $0x398] sm:$0xff]  ;;  %v210_v53 = vadd.f32 %v10952_v13, %v157_v22 }
 0x74a   :  { %v7025_v36 = vld [vmem:[%s14105_s3 + $0x2e8] sm:$0xff]  ;;  %v211_v11 = vadd.f32 %v10971_v55, %v158_v5 }
 0x74b   :  { %v12049_v52 = vpack.c.bf16 %v7025_v36, %v7021_v23  ;;  %v7051_v23 = vld [vmem:[%s14105_s3 + $0x3b8] sm:$0xff] }
 0x74c   :  { %8810 = vmatpush1.bf16.msra.mxu0 %v8809_v50  ;;  %8842 = vmatpush1.bf16.msra.mxu1 %v8841_v57  ;;  %v12062_v50 = vpack.c.bf16 %v7027_v21, %v7023_v40  ;;  %v7022_v57 = vld [vmem:[%s14105_s3 + $0x2d0] sm:$0xff]  ;;  %v12166_v36 = vpack.c.bf16 %v7051_v23, %v7047_v34  ;;  %v7057_v21 = vld [vmem:[%s14105_s3 + $0x3e8] sm:$0xff]  ;;  %v159_v34 = vmul.f32 %v10955_v15, %v105_v18 }
 0x74d   :  { %8812 = vmatprep.subr.bf16.mxu0 %v8811_v20  ;;  %8844 = vmatprep.subr.bf16.mxu1 %v8843_v33  ;;  %v7029_v20 = vld [vmem:[%s14105_s3 + $0x308] sm:$0xff]  ;;  %v12074_v33 = vpack.c.bf16 %v7026_v59, %v7022_v57  ;;  %v7046_v40 = vld [vmem:[%s14105_s3 + $0x390] sm:$0xff]  ;;  %v12181_v57 = vpack.c.bf16 %v7048_v4, %v7044_v61 }
 0x74e   :  { %v12185_v59 = vpack.c.bf16 %v7050_v0, %v7046_v40  ;;  %v212_v63 = vadd.f32 %v10963_v30, %v159_v34 }
 0x750   :  { %8814 = vmatpush1.bf16.msra.mxu0 %v8813_v45  ;;  %8846 = vmatpush1.bf16.msra.mxu1 %v8845_v1  ;;  %v12087_v45 = vpack.c.bf16 %v7033_v47, %v7029_v20  ;;  %v12089_v1 = vpack.c.bf16 %v7032_v27, %v7028_v14  ;;  %v12187_v20 = vpack.c.bf16 %v7057_v21, %v7053_v17  ;;  %v7055_v47 = vld [vmem:[%s14105_s3 + $0x3d8] sm:$0xff]  ;;  %v7052_v27 = vld [vmem:[%s14105_s3 + $0x3c0] sm:$0xff] }
 0x751   :  { %v7059_v14 = vld [vmem:[%s14105_s3 + $0x3f8] sm:$0xff] }
 0x753   :  { %2320 = vmatmul.mubr.f32.vlgmr.msra.gmra.mrb[16].mxu0 %v10980_v48  ;;  %2433 = vmatmul.mubr.f32.vlgmr.msra.gmra.mrb[16].mxu1 %v10980_v48  ;;  %v6997_v48 = vld [vmem:[%s14105_s3 + $0x208] sm:$0xff] }
 0x754   :  { %2325 = vmatprep.mubr.f32.mxu0 %v14133_v60  ;;  %2438 = vmatprep.mubr.f32.mxu1 %v14133_v60 }
 0x757   :  { %2326 = vmatmul.mubr.f32.gmra.mrb[18].mxu0 %v11040_v24  ;;  %2439 = vmatmul.mubr.f32.gmra.mrb[18].mxu1 %v11040_v24  ;;  %v7001_v24 = vld [vmem:[%s14105_s3 + $0x228] sm:$0xff] }
 0x758   :  { %2331 = vmatprep.mubr.f32.mxu0 %v14133_v60  ;;  %2444 = vmatprep.mubr.f32.mxu1 %v14133_v60 }
 0x75b   :  { %2332 = vmatmul.mubr.f32.gmra.mrb[20].mxu0 %v11348_v25  ;;  %2445 = vmatmul.mubr.f32.gmra.mrb[20].mxu1 %v11348_v25  ;;  %v6999_v25 = vld [vmem:[%s14105_s3 + $0x218] sm:$0xff] }
 0x75c   :  { %2337 = vmatprep.mubr.f32.mxu0 %v14133_v60  ;;  %2450 = vmatprep.mubr.f32.mxu1 %v14133_v60 }
 0x75f   :  { %2338 = vmatmul.mubr.f32.gmra.mrb[22].mxu0 %v11398_v29  ;;  %2451 = vmatmul.mubr.f32.gmra.mrb[22].mxu1 %v11398_v29  ;;  %v11941_v29 = vpack.c.bf16 %v7001_v24, %v6997_v48  ;;  %v7031_v48 = vld [vmem:[%s14105_s3 + $0x318] sm:$0xff] }
 0x760   :  { %2343 = vmatprep.mubr.f32.mxu0 %v14133_v60  ;;  %2456 = vmatprep.mubr.f32.mxu1 %v14133_v60  ;;  %v7035_v24 = vld [vmem:[%s14105_s3 + $0x338] sm:$0xff] }
 0x761   :  { %8848 = vmatprep.subr.bf16.mxu0 %v11941_v29 }
 0x763   :  { %2344 = vmatmul.mubr.f32.gmra.mrb[24].mxu0 %v11448_v43  ;;  %2457 = vmatmul.mubr.f32.gmra.mrb[24].mxu1 %v11448_v43  ;;  %v6996_v43 = vld [vmem:[%s14105_s3 + $0x200] sm:$0xff] }
 0x764   :  { %2349 = vmatprep.mubr.f32.mxu0 %v14133_v60  ;;  %2462 = vmatprep.mubr.f32.mxu1 %v14133_v60 }
 0x767   :  { %2350 = vmatmul.mubr.f32.gmra.mrb[26].mxu0 %v11496_v54  ;;  %2463 = vmatmul.mubr.f32.gmra.mrb[26].mxu1 %v11496_v54  ;;  %v7000_v54 = vld [vmem:[%s14105_s3 + $0x220] sm:$0xff] }
 0x768   :  { %2355 = vmatprep.mubr.f32.mxu0 %v14133_v60  ;;  %2468 = vmatprep.mubr.f32.mxu1 %v14133_v60  ;;  %v11952_v2 = vpack.c.bf16 %v7000_v54, %v6996_v43  ;;  %v12101_v43 = vpack.c.bf16 %v7035_v24, %v7031_v48  ;;  %v7034_v54 = vld [vmem:[%s14105_s3 + $0x330] sm:$0xff]  ;;  %v7056_v48 = vld [vmem:[%s14105_s3 + $0x3e0] sm:$0xff]  ;;  %v12205_v24 = vpack.c.bf16 %v7059_v14, %v7055_v47 }
 0x76a   :  { %8850 = vmatpush1.bf16.msra.mxu0 %v11952_v2 }
 0x76b   :  { %2356 = vmatmul.mubr.f32.gmra.mrb[28].mxu0 %v11748_v6  ;;  %2469 = vmatmul.mubr.f32.gmra.mrb[28].mxu1 %v11748_v6  ;;  %v7003_v6 = vld [vmem:[%s14105_s3 + $0x238] sm:$0xff] }
 0x76c   :  { %2361 = vmatprep.mubr.f32.mxu0 %v14133_v60  ;;  %2474 = vmatprep.mubr.f32.mxu1 %v14133_v60  ;;  %v11954_v39 = vpack.c.bf16 %v7003_v6, %v6999_v25  ;;  %v7030_v25 = vld [vmem:[%s14105_s3 + $0x310] sm:$0xff]  ;;  %v7037_v6 = vld [vmem:[%s14105_s3 + $0x348] sm:$0xff] }
 0x76d   :  { %8852 = vmatprep.subr.bf16.mxu0 %v11977_v8  ;;  %v12113_v26 = vpack.c.bf16 %v7034_v54, %v7030_v25  ;;  %v12115_v12 = vpack.c.bf16 %v7041_v56, %v7037_v6  ;;  %v7054_v25 = vld [vmem:[%s14105_s3 + $0x3d0] sm:$0xff]  ;;  %v12210_v54 = vpack.c.bf16 %v7056_v48, %v7052_v27 }
 0x76e   :  { %8880 = vmatprep.subr.bf16.mxu1 %v11954_v39  ;;  %8854 = vmatpush1.bf16.msra.mxu0 %v11988_v62  ;;  %v7058_v6 = vld [vmem:[%s14105_s3 + $0x3f0] sm:$0xff] }
 0x76f   :  { %8882 = vmatpush1.bf16.msra.mxu1 %v11963_v44  ;;  %8856 = vmatprep.subr.bf16.mxu0 %v12013_v46  ;;  %v12216_v56 = vpack.c.bf16 %v7058_v6, %v7054_v25 }
 0x770   :  { %8884 = vmatprep.subr.bf16.mxu1 %v11990_v37 }
 0x772   :  { %8858 = vmatpush1.bf16.msra.mxu0 %v12024_v42 }
 0x773   :  { %8886 = vmatpush1.bf16.msra.mxu1 %v11999_v16  ;;  %8860 = vmatprep.subr.bf16.mxu0 %v12049_v52 }
 0x774   :  { %8888 = vmatprep.subr.bf16.mxu1 %v12026_v7 }
 0x776   :  { %8862 = vmatpush1.bf16.msra.mxu0 %v12060_v38 }
 0x777   :  { %8890 = vmatpush1.bf16.msra.mxu1 %v12035_v10  ;;  %8864 = vmatprep.subr.bf16.mxu0 %v12087_v45 }
 0x778   :  { %8892 = vmatprep.subr.bf16.mxu1 %v12062_v50 }
 0x77a   :  { %8866 = vmatpush1.bf16.msra.mxu0 %v12089_v1 }
 0x77b   :  { %8894 = vmatpush1.bf16.msra.mxu1 %v12074_v33  ;;  %8868 = vmatprep.subr.bf16.mxu0 %v12115_v12 }
 0x77c   :  { %8896 = vmatprep.subr.bf16.mxu1 %v12101_v43 }
 0x77e   :  { %8870 = vmatpush1.bf16.msra.mxu0 %v12137_v3 }
 0x77f   :  { %8898 = vmatpush1.bf16.msra.mxu1 %v12113_v26  ;;  %8872 = vmatprep.subr.bf16.mxu0 %v12154_v28 }
 0x780   :  { %8900 = vmatprep.subr.bf16.mxu1 %v12139_v32 }
 0x782   :  { %8874 = vmatpush1.bf16.msra.mxu0 %v12181_v57 }
 0x783   :  { %8902 = vmatpush1.bf16.msra.mxu1 %v12152_v9  ;;  %8876 = vmatprep.subr.bf16.mxu0 %v12187_v20 }
 0x784   :  { %8904 = vmatprep.subr.bf16.mxu1 %v12166_v36 }
 0x786   :  { %8878 = vmatpush1.bf16.msra.mxu0 %v12210_v54 }
 0x787   :  { %8906 = vmatpush1.bf16.msra.mxu1 %v12185_v59  ;;  %8912 = vmatprep.subr.bf16.mxu0 %v11941_v29 }
 0x788   :  { %8908 = vmatprep.subr.bf16.mxu1 %v12205_v24 }
 0x78b   :  { %8910 = vmatpush1.bf16.msra.mxu1 %v12216_v56 }
 0x78c   :  { %8944 = vmatprep.subr.bf16.mxu1 %v11954_v39 }
 0x806   :  { %v2056_v35 = vpop.f32.mrb[14].mxu0  ;;  %v2127_v19 = vpop.f32.mrb[14].mxu1 }
 0x807   :  { %v2057_v58 = vadd.f32 %v2056_v35, %v209_v51  ;;  %v2058_v61 = vpop.f32.mrb[15].mxu0  ;;  %v2129_v4 = vpop.f32.mrb[15].mxu1  ;;  %v2128_v47 = vadd.f32 %v2127_v19, %v211_v11  ;;  %v6995_v19 = vld [vmem:[%s14109_s4 + $0x4] sm:$0xf] }
 0x808   :  { %v2059_v23 = vadd.f32 %v2058_v61, %v210_v53  ;;  %v2130_v17 = vadd.f32 %v2129_v4, %v212_v63  ;;  %v14134_v53 = vld [vmem:[#allocation6_spill] sm:$0xff]  ;;  %v14135_v61 = vld [vmem:[#allocation7_spill] sm:$0xff] }
 0x809   :  { %v6992_v40 = vmul.f32 -1.442695, %v2057_v58  ;;  %v12280_v58 = vrot.slane %v6995_v19, %v14134_v53  ;;  %v12283_v4 = vrot.slane %v6995_v19, %v14135_v61 }
 0x80a   :  { %v6993_v0 = vmul.f32 -1.442695, %v2059_v23  ;;  %v6994_v21 = vmul.f32 -1.442695, %v2130_v17 }
 0x80b   :  { %10243 = vpow2.f32 %v6992_v40 }
 0x80c   :  { %10245 = vpow2.f32 %v6993_v0 }
 0x80d   :  { %10247 = vpow2.f32 %v6994_v21  ;;  %v14136_v21 = vld [vmem:[#allocation8_spill] sm:$0xff] }
 0x80e   :  { %10249 = vtanh.f32 %v2128_v47  ;;  %v12288_v47 = vrot.slane %v6995_v19, %v14136_v21 }
 0x815   :  { %v10244_v13 = vpop.eup %10243 }
 0x816   :  { %v10246_v14 = vpop.eup %10245  ;;  %v2135_v27 = vadd.f32 1.0, %v10244_v13 }
 0x817   :  { %v2141_v15 = vadd.f32 1.0, %v10246_v14  ;;  %v10248_v48 = vpop.eup %10247  ;;  %v14137_v14 = vld [vmem:[#allocation9_spill] sm:$0xff] }
 0x818   :  { %10251 = vrcp.f32 %v2135_v27  ;;  %v10250_v25 = vpop.eup %10249  ;;  %v2148_v22 = vadd.f32 1.0, %v10248_v48  ;;  %v12292_v27 = vrot.slane %v6995_v19, %v14137_v14 }
 0x819   :  { %10253 = vrcp.f32 %v2141_v15 }
 0x81a   :  { %10255 = vrcp.f32 %v2148_v22 }
 0x822   :  { %v10252_v6 = vpop.eup %10251 }
 0x823   :  { %v10254_v41 = vpop.eup %10253  ;;  %v2152_v30 = vmul.f32 %v10252_v6, %v10250_v25 }
 0x824   :  { %v2151_v31 = vmul.f32 %v10254_v41, %v11715_v49  ;;  %v10256_v55 = vpop.eup %10255  ;;  %v46_v49 = vld [vmem:[%s14107_s9 + $0x8] sm:$0xff] }
 0x826   :  { %v2153_v18 = vadd.f32 %v2152_v30, %v2151_v31 }
 0x828   :  { %10257 = vtanh.f32 %v2153_v18  ;;  %6949 = vst [vmem:[%s14112_s13] sm:$0xff] %v2153_v18  ;;  %v52_v18 = vld [vmem:[%s14110_s10 + $0x8] sm:$0xff] }
 0x832   :  { %v10258_v51 = vpop.eup %10257 }
 0x833   :  { %v2155_v35 = vmul.f32 %v10258_v51, %v10256_v55 }
 0x835   :  { %2362 = vmatmul.mubr.f32.gmra.mrb[30].mxu0 %v2155_v35  ;;  %2475 = vmatmul.mubr.f32.gmra.mrb[30].mxu1 %v2155_v35  ;;  %6943 = vst [vmem:[%s14113_s12] sm:$0xff] %v2155_v35 }
 0x836   :  { %2650 = vmatprep.mubr.f32.mxu0 %v14133_v60  ;;  %2721 = vmatprep.mubr.f32.mxu1 %v14133_v60 }
 0x839   :  { %2651 = vmatmul.mubr.f32.vlgmr.msra.gmra.mrb[16].mxu0 %v46_v49  ;;  %2722 = vmatmul.mubr.f32.vlgmr.msra.gmra.mrb[16].mxu1 %v46_v49 }
 0x83a   :  { %8914 = vmatpush1.bf16.msra.mxu0 %v11952_v2  ;;  %8946 = vmatpush1.bf16.msra.mxu1 %v11963_v44 }
 0x83b   :  { %8916 = vmatprep.subr.bf16.mxu0 %v11977_v8  ;;  %8948 = vmatprep.subr.bf16.mxu1 %v11990_v37 }
 0x83c   :  { %2885 = vmatprep.mubr.f32.mxu0 %v14133_v60  ;;  %2956 = vmatprep.mubr.f32.mxu1 %v14133_v60 }
 0x83e   :  { %8918 = vmatpush1.bf16.msra.mxu0 %v11988_v62  ;;  %8950 = vmatpush1.bf16.msra.mxu1 %v11999_v16 }
 0x83f   :  { %8920 = vmatprep.subr.bf16.mxu0 %v12013_v46  ;;  %8952 = vmatprep.subr.bf16.mxu1 %v12026_v7 }
 0x842   :  { %8922 = vmatpush1.bf16.msra.mxu0 %v12024_v42  ;;  %8954 = vmatpush1.bf16.msra.mxu1 %v12035_v10 }
 0x843   :  { %8924 = vmatprep.subr.bf16.mxu0 %v12049_v52  ;;  %8956 = vmatprep.subr.bf16.mxu1 %v12062_v50 }
 0x846   :  { %8926 = vmatpush1.bf16.msra.mxu0 %v12060_v38  ;;  %8958 = vmatpush1.bf16.msra.mxu1 %v12074_v33 }
 0x847   :  { %8928 = vmatprep.subr.bf16.mxu0 %v12087_v45  ;;  %8960 = vmatprep.subr.bf16.mxu1 %v12101_v43 }
 0x84a   :  { %8930 = vmatpush1.bf16.msra.mxu0 %v12089_v1  ;;  %8962 = vmatpush1.bf16.msra.mxu1 %v12113_v26 }
 0x84b   :  { %8932 = vmatprep.subr.bf16.mxu0 %v12115_v12  ;;  %8964 = vmatprep.subr.bf16.mxu1 %v12139_v32 }
 0x84e   :  { %8934 = vmatpush1.bf16.msra.mxu0 %v12137_v3  ;;  %8966 = vmatpush1.bf16.msra.mxu1 %v12152_v9 }
 0x84f   :  { %8936 = vmatprep.subr.bf16.mxu0 %v12154_v28  ;;  %8968 = vmatprep.subr.bf16.mxu1 %v12166_v36 }
 0x852   :  { %8938 = vmatpush1.bf16.msra.mxu0 %v12181_v57  ;;  %8970 = vmatpush1.bf16.msra.mxu1 %v12185_v59 }
 0x853   :  { %8940 = vmatprep.subr.bf16.mxu0 %v12187_v20  ;;  %8972 = vmatprep.subr.bf16.mxu1 %v12205_v24 }
 0x856   :  { %8942 = vmatpush1.bf16.msra.mxu0 %v12210_v54  ;;  %8974 = vmatpush1.bf16.msra.mxu1 %v12216_v56 }
 0x857   :  { %8976 = vmatprep.subr.bf16.mxu0 %v11941_v29  ;;  %9008 = vmatprep.subr.bf16.mxu1 %v11954_v39 }
 0x90c   :  { %v2652_v34 = vpop.f32.mrb[16].mxu0  ;;  %v2723_v23 = vpop.f32.mrb[16].mxu1 }
 0x90d   :  { %v9999_v40 = vadd.f32 %v2652_v34, %v12280_v58  ;;  %v2654_v0 = vpop.f32.mrb[17].mxu0  ;;  %v2725_v63 = vpop.f32.mrb[17].mxu1  ;;  %v10015_v48 = vadd.f32 %v2723_v23, %v12292_v27 }
 0x90e   :  { %v10000_v5 = vadd.f32 %v2654_v0, %v12283_v4  ;;  %v10016_v13 = vadd.f32 %v2725_v63, %v12288_v47 }
 0x90f   :  { %v7060_v17 = vmul.f32 -1.442695, %v9999_v40 }
 0x910   :  { %v7061_v11 = vmul.f32 -1.442695, %v10000_v5  ;;  %v7062_v15 = vmul.f32 -1.442695, %v10016_v13 }
 0x911   :  { %10259 = vpow2.f32 %v7060_v17 }
 0x912   :  { %10261 = vpow2.f32 %v7061_v11 }
 0x913   :  { %10263 = vpow2.f32 %v7062_v15 }
 0x914   :  { %10265 = vtanh.f32 %v10015_v48 }
 0x91b   :  { %v10260_v25 = vpop.eup %10259 }
 0x91c   :  { %v10262_v6 = vpop.eup %10261  ;;  %v2731_v41 = vadd.f32 1.0, %v10260_v25 }
 0x91d   :  { %v2737_v30 = vadd.f32 1.0, %v10262_v6  ;;  %v10264_v22 = vpop.eup %10263 }
 0x91e   :  { %10267 = vrcp.f32 %v2731_v41  ;;  %v10266_v31 = vpop.eup %10265  ;;  %v2744_v49 = vadd.f32 1.0, %v10264_v22 }
 0x91f   :  { %10269 = vrcp.f32 %v2737_v30 }
 0x920   :  { %10271 = vrcp.f32 %v2744_v49 }
 0x928   :  { %v10268_v55 = vpop.eup %10267 }
 0x929   :  { %v10270_v51 = vpop.eup %10269  ;;  %v2748_v35 = vmul.f32 %v10268_v55, %v10266_v31 }
 0x92a   :  { %v2747_v19 = vmul.f32 %v10270_v51, %v52_v18  ;;  %v10272_v23 = vpop.eup %10271 }
 0x92c   :  { %v12298_v34 = vadd.f32 %v2748_v35, %v2747_v19 }
 0x92e   :  { %10273 = vtanh.f32 %v12298_v34 }
 0x938   :  { %v10274_v40 = vpop.eup %10273 }
 0x939   :  { %v12301_v0 = vmul.f32 %v10274_v40, %v10272_v23 }
 0x93b   :  { %2886 = vmatmul.mubr.f32.vlgmr.msra.gmra.mrb[18].mxu0 %v12301_v0  ;;  %2957 = vmatmul.mubr.f32.vlgmr.msra.gmra.mrb[18].mxu1 %v12301_v0 }
 0x93c   :  { %8978 = vmatpush1.bf16.msra.mxu0 %v11952_v2  ;;  %9010 = vmatpush1.bf16.msra.mxu1 %v11963_v44 }
 0x93d   :  { %8980 = vmatprep.subr.bf16.mxu0 %v11977_v8  ;;  %9012 = vmatprep.subr.bf16.mxu1 %v11990_v37 }
 0x93e   :  { %3120 = vmatprep.mubr.f32.mxu0 %v14133_v60  ;;  %3191 = vmatprep.mubr.f32.mxu1 %v14133_v60 }
 0x940   :  { %8982 = vmatpush1.bf16.msra.mxu0 %v11988_v62  ;;  %9014 = vmatpush1.bf16.msra.mxu1 %v11999_v16 }
 0x941   :  { %8984 = vmatprep.subr.bf16.mxu0 %v12013_v46  ;;  %9016 = vmatprep.subr.bf16.mxu1 %v12026_v7 }
 0x944   :  { %8986 = vmatpush1.bf16.msra.mxu0 %v12024_v42  ;;  %9018 = vmatpush1.bf16.msra.mxu1 %v12035_v10 }
 0x945   :  { %8988 = vmatprep.subr.bf16.mxu0 %v12049_v52  ;;  %9020 = vmatprep.subr.bf16.mxu1 %v12062_v50 }
 0x948   :  { %8990 = vmatpush1.bf16.msra.mxu0 %v12060_v38  ;;  %9022 = vmatpush1.bf16.msra.mxu1 %v12074_v33 }
 0x949   :  { %8992 = vmatprep.subr.bf16.mxu0 %v12087_v45  ;;  %9024 = vmatprep.subr.bf16.mxu1 %v12101_v43 }
 0x94c   :  { %8994 = vmatpush1.bf16.msra.mxu0 %v12089_v1  ;;  %9026 = vmatpush1.bf16.msra.mxu1 %v12113_v26 }
 0x94d   :  { %8996 = vmatprep.subr.bf16.mxu0 %v12115_v12  ;;  %9028 = vmatprep.subr.bf16.mxu1 %v12139_v32 }
 0x950   :  { %8998 = vmatpush1.bf16.msra.mxu0 %v12137_v3  ;;  %9030 = vmatpush1.bf16.msra.mxu1 %v12152_v9 }
 0x951   :  { %9000 = vmatprep.subr.bf16.mxu0 %v12154_v28  ;;  %9032 = vmatprep.subr.bf16.mxu1 %v12166_v36 }
 0x954   :  { %9002 = vmatpush1.bf16.msra.mxu0 %v12181_v57  ;;  %9034 = vmatpush1.bf16.msra.mxu1 %v12185_v59 }
 0x955   :  { %9004 = vmatprep.subr.bf16.mxu0 %v12187_v20  ;;  %9036 = vmatprep.subr.bf16.mxu1 %v12205_v24 }
 0x958   :  { %9006 = vmatpush1.bf16.msra.mxu0 %v12210_v54  ;;  %9038 = vmatpush1.bf16.msra.mxu1 %v12216_v56 }
 0x959   :  { %9040 = vmatprep.subr.bf16.mxu0 %v11941_v29  ;;  %9072 = vmatprep.subr.bf16.mxu1 %v11954_v39 }
 0xa0e   :  { %v2887_v63 = vpop.f32.mrb[18].mxu0  ;;  %v2958_v5 = vpop.f32.mrb[18].mxu1 }
 0xa0f   :  { %v10001_v17 = vadd.f32 %v2887_v63, %v12280_v58  ;;  %v2889_v11 = vpop.f32.mrb[19].mxu0  ;;  %v2960_v13 = vpop.f32.mrb[19].mxu1  ;;  %v10017_v30 = vadd.f32 %v2958_v5, %v12292_v27 }
 0xa10   :  { %v10002_v15 = vadd.f32 %v2889_v11, %v12283_v4  ;;  %v10018_v6 = vadd.f32 %v2960_v13, %v12288_v47  ;;  %v7264_v11 = vld [vmem:[%s14105_s3 + $0x200] sm:$0xff] }
 0xa11   :  { %v7127_v48 = vmul.f32 -1.442695, %v10001_v17  ;;  %v7268_v13 = vld [vmem:[%s14105_s3 + $0x220] sm:$0xff] }
 0xa12   :  { %v7128_v25 = vmul.f32 -1.442695, %v10002_v15  ;;  %v7129_v41 = vmul.f32 -1.442695, %v10018_v6  ;;  %v7270_v6 = vld [vmem:[%s14105_s3 + $0x230] sm:$0xff] }
 0xa13   :  { %10275 = vpow2.f32 %v7127_v48  ;;  %v12419_v48 = vpack.c.bf16 %v7268_v13, %v7264_v11 }
 0xa14   :  { %10277 = vpow2.f32 %v7128_v25  ;;  %v7266_v25 = vld [vmem:[%s14105_s3 + $0x210] sm:$0xff] }
 0xa15   :  { %10279 = vpow2.f32 %v7129_v41  ;;  %v12428_v41 = vpack.c.bf16 %v7270_v6, %v7266_v25  ;;  %v7298_v25 = vld [vmem:[%s14105_s3 + $0x310] sm:$0xff] }
 0xa16   :  { %10281 = vtanh.f32 %v10017_v30  ;;  %v7273_v30 = vld [vmem:[%s14105_s3 + $0x248] sm:$0xff]  ;;  %v7302_v6 = vld [vmem:[%s14105_s3 + $0x330] sm:$0xff] }
 0xa1d   :  { %v10276_v29 = vpop.eup %10275 }
 0xa1e   :  { %v10278_v22 = vpop.eup %10277  ;;  %v2966_v39 = vadd.f32 1.0, %v10276_v29  ;;  %v7277_v29 = vld [vmem:[%s14105_s3 + $0x268] sm:$0xff] }
 0xa1f   :  { %v2972_v31 = vadd.f32 1.0, %v10278_v22  ;;  %v10280_v18 = vpop.eup %10279  ;;  %v7275_v22 = vld [vmem:[%s14105_s3 + $0x258] sm:$0xff] }
 0xa20   :  { %10283 = vrcp.f32 %v2966_v39  ;;  %v10282_v55 = vpop.eup %10281  ;;  %v2979_v19 = vadd.f32 1.0, %v10280_v18  ;;  %v12442_v39 = vpack.c.bf16 %v7277_v29, %v7273_v30  ;;  %v7272_v18 = vld [vmem:[%s14105_s3 + $0x240] sm:$0xff]  ;;  %v12572_v30 = vpack.c.bf16 %v7302_v6, %v7298_v25  ;;  %v7305_v29 = vld [vmem:[%s14105_s3 + $0x348] sm:$0xff] }
 0xa21   :  { %10285 = vrcp.f32 %v2972_v31  ;;  %v7279_v31 = vld [vmem:[%s14105_s3 + $0x278] sm:$0xff]  ;;  %v7320_v25 = vld [vmem:[%s14105_s3 + $0x3c0] sm:$0xff] }
 0xa22   :  { %10287 = vrcp.f32 %v2979_v19  ;;  %v7278_v19 = vld [vmem:[%s14105_s3 + $0x270] sm:$0xff] }
 0xa2a   :  { %v10284_v51 = vpop.eup %10283 }
 0xa2b   :  { %v10286_v35 = vpop.eup %10285  ;;  %v2983_v49 = vmul.f32 %v10284_v51, %v10282_v55  ;;  %v7276_v55 = vld [vmem:[%s14105_s3 + $0x260] sm:$0xff]  ;;  %v12453_v51 = vpack.c.bf16 %v7279_v31, %v7275_v22  ;;  %v7309_v22 = vld [vmem:[%s14105_s3 + $0x368] sm:$0xff]  ;;  %v7307_v31 = vld [vmem:[%s14105_s3 + $0x358] sm:$0xff] }
 0xa2c   :  { %v2982_v23 = vmul.f32 %v10286_v35, %v12298_v34  ;;  %v10288_v63 = vpop.eup %10287  ;;  %v7271_v34 = vld [vmem:[%s14105_s3 + $0x238] sm:$0xff]  ;;  %v12455_v35 = vpack.c.bf16 %v7276_v55, %v7272_v18  ;;  %v12585_v18 = vpack.c.bf16 %v7309_v22, %v7305_v29  ;;  %v7324_v29 = vld [vmem:[%s14105_s3 + $0x3e0] sm:$0xff]  ;;  %v7322_v22 = vld [vmem:[%s14105_s3 + $0x3d0] sm:$0xff] }
 0xa2d   :  { %v7311_v55 = vld [vmem:[%s14105_s3 + $0x378] sm:$0xff] }
 0xa2e   :  { %v12344_v40 = vadd.f32 %v2983_v49, %v2982_v23  ;;  %v7274_v49 = vld [vmem:[%s14105_s3 + $0x250] sm:$0xff] }
 0xa2f   :  { %v12464_v23 = vpack.c.bf16 %v7278_v19, %v7274_v49  ;;  %v7304_v49 = vld [vmem:[%s14105_s3 + $0x340] sm:$0xff] }
 0xa30   :  { %10289 = vtanh.f32 %v12344_v40  ;;  %v7308_v19 = vld [vmem:[%s14105_s3 + $0x360] sm:$0xff] }
 0xa3a   :  { %v10290_v5 = vpop.eup %10289 }
 0xa3b   :  { %v12347_v17 = vmul.f32 %v10290_v5, %v10288_v63  ;;  %v7285_v63 = vld [vmem:[%s14105_s3 + $0x2a8] sm:$0xff]  ;;  %v7283_v5 = vld [vmem:[%s14105_s3 + $0x298] sm:$0xff] }
 0xa3d   :  { %3121 = vmatmul.mubr.f32.vlgmr.msra.gmra.mrb[20].mxu0 %v12347_v17  ;;  %3192 = vmatmul.mubr.f32.vlgmr.msra.gmra.mrb[20].mxu1 %v12347_v17 }
 0xa3e   :  { %9042 = vmatpush1.bf16.msra.mxu0 %v11952_v2  ;;  %9074 = vmatpush1.bf16.msra.mxu1 %v11963_v44 }
 0xa3f   :  { %9044 = vmatprep.subr.bf16.mxu0 %v11977_v8  ;;  %9076 = vmatprep.subr.bf16.mxu1 %v11990_v37 }
 0xa40   :  { %3355 = vmatprep.mubr.f32.mxu0 %v14133_v60  ;;  %3426 = vmatprep.mubr.f32.mxu1 %v14133_v60 }
 0xa42   :  { %9046 = vmatpush1.bf16.msra.mxu0 %v11988_v62  ;;  %9078 = vmatpush1.bf16.msra.mxu1 %v11999_v16 }
 0xa43   :  { %9048 = vmatprep.subr.bf16.mxu0 %v12013_v46  ;;  %9080 = vmatprep.subr.bf16.mxu1 %v12026_v7 }
 0xa46   :  { %9050 = vmatpush1.bf16.msra.mxu0 %v12024_v42  ;;  %9082 = vmatpush1.bf16.msra.mxu1 %v12035_v10 }
 0xa47   :  { %9052 = vmatprep.subr.bf16.mxu0 %v12049_v52  ;;  %9084 = vmatprep.subr.bf16.mxu1 %v12062_v50 }
 0xa4a   :  { %9054 = vmatpush1.bf16.msra.mxu0 %v12060_v38  ;;  %9086 = vmatpush1.bf16.msra.mxu1 %v12074_v33 }
 0xa4b   :  { %9056 = vmatprep.subr.bf16.mxu0 %v12087_v45  ;;  %9088 = vmatprep.subr.bf16.mxu1 %v12101_v43 }
 0xa4e   :  { %9058 = vmatpush1.bf16.msra.mxu0 %v12089_v1  ;;  %9090 = vmatpush1.bf16.msra.mxu1 %v12113_v26 }
 0xa4f   :  { %9060 = vmatprep.subr.bf16.mxu0 %v12115_v12  ;;  %9092 = vmatprep.subr.bf16.mxu1 %v12139_v32 }
 0xa52   :  { %9062 = vmatpush1.bf16.msra.mxu0 %v12137_v3  ;;  %9094 = vmatpush1.bf16.msra.mxu1 %v12152_v9 }
 0xa53   :  { %9064 = vmatprep.subr.bf16.mxu0 %v12154_v28  ;;  %9096 = vmatprep.subr.bf16.mxu1 %v12166_v36 }
 0xa56   :  { %9066 = vmatpush1.bf16.msra.mxu0 %v12181_v57  ;;  %9098 = vmatpush1.bf16.msra.mxu1 %v12185_v59 }
 0xa57   :  { %9068 = vmatprep.subr.bf16.mxu0 %v12187_v20  ;;  %9100 = vmatprep.subr.bf16.mxu1 %v12205_v24  ;;  %v7265_v20 = vld [vmem:[%s14105_s3 + $0x208] sm:$0xff] }
 0xa58   :  { %v7269_v24 = vld [vmem:[%s14105_s3 + $0x228] sm:$0xff] }
 0xa5a   :  { %9070 = vmatpush1.bf16.msra.mxu0 %v12210_v54  ;;  %9102 = vmatpush1.bf16.msra.mxu1 %v12216_v56  ;;  %v7267_v54 = vld [vmem:[%s14105_s3 + $0x218] sm:$0xff]  ;;  %v12406_v56 = vpack.c.bf16 %v7269_v24, %v7265_v20 }
 0xa5b   :  { %v12417_v15 = vpack.c.bf16 %v7271_v34, %v7267_v54  ;;  %v7303_v24 = vld [vmem:[%s14105_s3 + $0x338] sm:$0xff]  ;;  %v7296_v54 = vld [vmem:[%s14105_s3 + $0x300] sm:$0xff] }
 0xa5c   :  { %9104 = vmatprep.subr.bf16.mxu0 %v12406_v56  ;;  %v7300_v34 = vld [vmem:[%s14105_s3 + $0x320] sm:$0xff] }
 0xa5d   :  { %9136 = vmatprep.subr.bf16.mxu1 %v12417_v15  ;;  %v12563_v13 = vpack.c.bf16 %v7300_v34, %v7296_v54  ;;  %v7323_v54 = vld [vmem:[%s14105_s3 + $0x3d8] sm:$0xff] }
 0xa5e   :  { %v7327_v34 = vld [vmem:[%s14105_s3 + $0x3f8] sm:$0xff] }
 0xa5f   :  { %v12664_v6 = vpack.c.bf16 %v7327_v34, %v7323_v54 }
 0xb10   :  { %v3122_v2 = vpop.f32.mrb[20].mxu0  ;;  %v3193_v44 = vpop.f32.mrb[20].mxu1 }
 0xb11   :  { %v10003_v8 = vadd.f32 %v3122_v2, %v12280_v58  ;;  %v3124_v62 = vpop.f32.mrb[21].mxu0  ;;  %v3195_v37 = vpop.f32.mrb[21].mxu1  ;;  %v10019_v52 = vadd.f32 %v3193_v44, %v12292_v27  ;;  %v7287_v44 = vld [vmem:[%s14105_s3 + $0x2b8] sm:$0xff] }
 0xb12   :  { %v10004_v16 = vadd.f32 %v3124_v62, %v12283_v4  ;;  %v10020_v7 = vadd.f32 %v3195_v37, %v12288_v47  ;;  %v7284_v62 = vld [vmem:[%s14105_s3 + $0x2a0] sm:$0xff]  ;;  %v12489_v37 = vpack.c.bf16 %v7287_v44, %v7283_v5  ;;  %v7306_v5 = vld [vmem:[%s14105_s3 + $0x350] sm:$0xff] }
 0xb13   :  { %v7194_v46 = vmul.f32 -1.442695, %v10003_v8  ;;  %v7280_v8 = vld [vmem:[%s14105_s3 + $0x280] sm:$0xff]  ;;  %v7310_v44 = vld [vmem:[%s14105_s3 + $0x370] sm:$0xff] }
 0xb14   :  { %v7195_v42 = vmul.f32 -1.442695, %v10004_v16  ;;  %v7196_v10 = vmul.f32 -1.442695, %v10020_v7  ;;  %v12491_v16 = vpack.c.bf16 %v7284_v62, %v7280_v8  ;;  %v7313_v8 = vld [vmem:[%s14105_s3 + $0x388] sm:$0xff]  ;;  %v12611_v62 = vpack.c.bf16 %v7310_v44, %v7306_v5 }
 0xb15   :  { %10291 = vpow2.f32 %v7194_v46  ;;  %v7282_v46 = vld [vmem:[%s14105_s3 + $0x290] sm:$0xff] }
 0xb16   :  { %10293 = vpow2.f32 %v7195_v42  ;;  %v7286_v42 = vld [vmem:[%s14105_s3 + $0x2b0] sm:$0xff] }
 0xb17   :  { %10295 = vpow2.f32 %v7196_v10  ;;  %v12500_v7 = vpack.c.bf16 %v7286_v42, %v7282_v46  ;;  %v7289_v10 = vld [vmem:[%s14105_s3 + $0x2c8] sm:$0xff]  ;;  %v7315_v42 = vld [vmem:[%s14105_s3 + $0x398] sm:$0xff] }
 0xb18   :  { %10297 = vtanh.f32 %v10019_v52  ;;  %v7293_v52 = vld [vmem:[%s14105_s3 + $0x2e8] sm:$0xff] }
 0xb19   :  { %v7317_v46 = vld [vmem:[%s14105_s3 + $0x3a8] sm:$0xff] }
 0xb1f   :  { %v10292_v38 = vpop.eup %10291 }
 0xb20   :  { %v10294_v50 = vpop.eup %10293  ;;  %v3201_v33 = vadd.f32 1.0, %v10292_v38  ;;  %v7291_v38 = vld [vmem:[%s14105_s3 + $0x2d8] sm:$0xff] }
 0xb21   :  { %v3207_v45 = vadd.f32 1.0, %v10294_v50  ;;  %v10296_v1 = vpop.eup %10295  ;;  %v12514_v50 = vpack.c.bf16 %v7293_v52, %v7289_v10  ;;  %v7319_v10 = vld [vmem:[%s14105_s3 + $0x3b8] sm:$0xff]  ;;  %v12623_v52 = vpack.c.bf16 %v7317_v46, %v7313_v8 }
 0xb22   :  { %10299 = vrcp.f32 %v3201_v33  ;;  %v10298_v43 = vpop.eup %10297  ;;  %v3214_v32 = vadd.f32 1.0, %v10296_v1  ;;  %v7295_v33 = vld [vmem:[%s14105_s3 + $0x2f8] sm:$0xff]  ;;  %v7292_v1 = vld [vmem:[%s14105_s3 + $0x2e0] sm:$0xff] }
 0xb23   :  { %10301 = vrcp.f32 %v3207_v45  ;;  %v7288_v45 = vld [vmem:[%s14105_s3 + $0x2c0] sm:$0xff] }
 0xb24   :  { %10303 = vrcp.f32 %v3214_v32 }
 0xb2c   :  { %v10300_v26 = vpop.eup %10299 }
 0xb2d   :  { %v10302_v12 = vpop.eup %10301  ;;  %v3218_v3 = vmul.f32 %v10300_v26, %v10298_v43  ;;  %v12525_v43 = vpack.c.bf16 %v7295_v33, %v7291_v38  ;;  %v12527_v26 = vpack.c.bf16 %v7292_v1, %v7288_v45  ;;  %v12625_v38 = vpack.c.bf16 %v7319_v10, %v7315_v42  ;;  %v7312_v33 = vld [vmem:[%s14105_s3 + $0x380] sm:$0xff]  ;;  %v7314_v1 = vld [vmem:[%s14105_s3 + $0x390] sm:$0xff] }
 0xb2e   :  { %v3217_v9 = vmul.f32 %v10302_v12, %v12344_v40  ;;  %v10304_v36 = vpop.eup %10303  ;;  %v7281_v40 = vld [vmem:[%s14105_s3 + $0x288] sm:$0xff]  ;;  %v7290_v12 = vld [vmem:[%s14105_s3 + $0x2d0] sm:$0xff]  ;;  %v7316_v45 = vld [vmem:[%s14105_s3 + $0x3a0] sm:$0xff] }
 0xb2f   :  { %v12478_v2 = vpack.c.bf16 %v7285_v63, %v7281_v40  ;;  %v12597_v40 = vpack.c.bf16 %v7311_v55, %v7307_v31  ;;  %v12599_v63 = vpack.c.bf16 %v7308_v19, %v7304_v49  ;;  %v7326_v31 = vld [vmem:[%s14105_s3 + $0x3f0] sm:$0xff]  ;;  %v12676_v55 = vpack.c.bf16 %v7324_v29, %v7320_v25 }
 0xb30   :  { %v12388_v28 = vadd.f32 %v3218_v3, %v3217_v9  ;;  %v7294_v3 = vld [vmem:[%s14105_s3 + $0x2f0] sm:$0xff]  ;;  %v7297_v9 = vld [vmem:[%s14105_s3 + $0x308] sm:$0xff]  ;;  %v12680_v49 = vpack.c.bf16 %v7326_v31, %v7322_v22 }
 0xb31   :  { %v12536_v32 = vpack.c.bf16 %v7294_v3, %v7290_v12  ;;  %v12637_v12 = vpack.c.bf16 %v7316_v45, %v7312_v33  ;;  %v7318_v3 = vld [vmem:[%s14105_s3 + $0x3b0] sm:$0xff] }
 0xb32   :  { %10305 = vtanh.f32 %v12388_v28 }
 0xb3c   :  { %v10306_v57 = vpop.eup %10305 }
 0xb3d   :  { %v12391_v59 = vmul.f32 %v10306_v57, %v10304_v36  ;;  %v7301_v36 = vld [vmem:[%s14105_s3 + $0x328] sm:$0xff]  ;;  %v7299_v57 = vld [vmem:[%s14105_s3 + $0x318] sm:$0xff] }
 0xb3e   :  { %v12550_v20 = vpack.c.bf16 %v7301_v36, %v7297_v9  ;;  %v12561_v11 = vpack.c.bf16 %v7303_v24, %v7299_v57  ;;  %v7321_v9 = vld [vmem:[%s14105_s3 + $0x3c8] sm:$0xff]  ;;  %v12650_v57 = vpack.c.bf16 %v7318_v3, %v7314_v1 }
 0xb3f   :  { %3356 = vmatmul.mubr.f32.vlgmr.msra.gmra.mrb[22].mxu0 %v12391_v59  ;;  %3427 = vmatmul.mubr.f32.vlgmr.msra.gmra.mrb[22].mxu1 %v12391_v59  ;;  %v7325_v36 = vld [vmem:[%s14105_s3 + $0x3e8] sm:$0xff] }
 0xb40   :  { %3590 = vmatprep.mubr.f32.mxu0 %v14133_v60  ;;  %3661 = vmatprep.mubr.f32.mxu1 %v14133_v60  ;;  %v12652_v24 = vpack.c.bf16 %v7325_v36, %v7321_v9 }
 0xb41   :  { %9106 = vmatpush1.bf16.msra.mxu0 %v12419_v48  ;;  %9138 = vmatpush1.bf16.msra.mxu1 %v12428_v41 }
 0xb42   :  { %9108 = vmatprep.subr.bf16.mxu0 %v12442_v39  ;;  %9140 = vmatprep.subr.bf16.mxu1 %v12453_v51 }
 0xb45   :  { %9110 = vmatpush1.bf16.msra.mxu0 %v12455_v35  ;;  %9142 = vmatpush1.bf16.msra.mxu1 %v12464_v23 }
 0xb46   :  { %9112 = vmatprep.subr.bf16.mxu0 %v12478_v2  ;;  %9144 = vmatprep.subr.bf16.mxu1 %v12489_v37 }
 0xb49   :  { %9114 = vmatpush1.bf16.msra.mxu0 %v12491_v16  ;;  %9146 = vmatpush1.bf16.msra.mxu1 %v12500_v7 }
 0xb4a   :  { %9116 = vmatprep.subr.bf16.mxu0 %v12514_v50  ;;  %9148 = vmatprep.subr.bf16.mxu1 %v12525_v43 }
 0xb4d   :  { %9118 = vmatpush1.bf16.msra.mxu0 %v12527_v26  ;;  %9150 = vmatpush1.bf16.msra.mxu1 %v12536_v32 }
 0xb4e   :  { %9120 = vmatprep.subr.bf16.mxu0 %v12550_v20  ;;  %9152 = vmatprep.subr.bf16.mxu1 %v12561_v11 }
 0xb51   :  { %9122 = vmatpush1.bf16.msra.mxu0 %v12563_v13  ;;  %9154 = vmatpush1.bf16.msra.mxu1 %v12572_v30 }
 0xb52   :  { %9124 = vmatprep.subr.bf16.mxu0 %v12585_v18  ;;  %9156 = vmatprep.subr.bf16.mxu1 %v12597_v40 }
 0xb55   :  { %9126 = vmatpush1.bf16.msra.mxu0 %v12599_v63  ;;  %9158 = vmatpush1.bf16.msra.mxu1 %v12611_v62 }
 0xb56   :  { %9128 = vmatprep.subr.bf16.mxu0 %v12623_v52  ;;  %9160 = vmatprep.subr.bf16.mxu1 %v12625_v38 }
 0xb59   :  { %9130 = vmatpush1.bf16.msra.mxu0 %v12637_v12  ;;  %9162 = vmatpush1.bf16.msra.mxu1 %v12650_v57 }
 0xb5a   :  { %9132 = vmatprep.subr.bf16.mxu0 %v12652_v24  ;;  %9164 = vmatprep.subr.bf16.mxu1 %v12664_v6 }
 0xb5d   :  { %9134 = vmatpush1.bf16.msra.mxu0 %v12676_v55  ;;  %9166 = vmatpush1.bf16.msra.mxu1 %v12680_v49 }
 0xb5e   :  { %9168 = vmatprep.subr.bf16.mxu0 %v12406_v56  ;;  %9200 = vmatprep.subr.bf16.mxu1 %v12417_v15 }
 0xc12   :  { %v3357_v19 = vpop.f32.mrb[22].mxu0  ;;  %v3428_v5 = vpop.f32.mrb[22].mxu1 }
 0xc13   :  { %v10005_v44 = vadd.f32 %v3357_v19, %v12280_v58  ;;  %v3359_v8 = vpop.f32.mrb[23].mxu0  ;;  %v3430_v46 = vpop.f32.mrb[23].mxu1  ;;  %v10021_v3 = vadd.f32 %v3428_v5, %v12292_v27 }
 0xc14   :  { %v10006_v42 = vadd.f32 %v3359_v8, %v12283_v4  ;;  %v10022_v45 = vadd.f32 %v3430_v46, %v12288_v47 }
 0xc15   :  { %v7261_v10 = vmul.f32 -1.442695, %v10005_v44 }
 0xc16   :  { %v7262_v33 = vmul.f32 -1.442695, %v10006_v42  ;;  %v7263_v1 = vmul.f32 -1.442695, %v10022_v45 }
 0xc17   :  { %10307 = vpow2.f32 %v7261_v10 }
 0xc18   :  { %10309 = vpow2.f32 %v7262_v33 }
 0xc19   :  { %10311 = vpow2.f32 %v7263_v1 }
 0xc1a   :  { %10313 = vtanh.f32 %v10021_v3 }
 0xc21   :  { %v10308_v9 = vpop.eup %10307 }
 0xc22   :  { %v10310_v36 = vpop.eup %10309  ;;  %v3436_v54 = vadd.f32 1.0, %v10308_v9 }
 0xc23   :  { %v3442_v34 = vadd.f32 1.0, %v10310_v36  ;;  %v10312_v25 = vpop.eup %10311 }
 0xc24   :  { %10315 = vrcp.f32 %v3436_v54  ;;  %v10314_v29 = vpop.eup %10313  ;;  %v3449_v44 = vadd.f32 1.0, %v10312_v25 }
 0xc25   :  { %10317 = vrcp.f32 %v3442_v34 }
 0xc26   :  { %10319 = vrcp.f32 %v3449_v44 }
 0xc2e   :  { %v10316_v22 = vpop.eup %10315 }
 0xc2f   :  { %v10318_v31 = vpop.eup %10317  ;;  %v3453_v19 = vmul.f32 %v10316_v22, %v10314_v29 }
 0xc30   :  { %v3452_v8 = vmul.f32 %v10318_v31, %v12388_v28  ;;  %v10320_v5 = vpop.eup %10319 }
 0xc32   :  { %v12692_v46 = vadd.f32 %v3453_v19, %v3452_v8 }
 0xc34   :  { %10321 = vtanh.f32 %v12692_v46 }
 0xc3e   :  { %v10322_v42 = vpop.eup %10321 }
 0xc3f   :  { %v12695_v10 = vmul.f32 %v10322_v42, %v10320_v5 }
 0xc41   :  { %3591 = vmatmul.mubr.f32.vlgmr.msra.gmra.mrb[24].mxu0 %v12695_v10  ;;  %3662 = vmatmul.mubr.f32.vlgmr.msra.gmra.mrb[24].mxu1 %v12695_v10 }
 0xc42   :  { %9170 = vmatpush1.bf16.msra.mxu0 %v12419_v48  ;;  %9202 = vmatpush1.bf16.msra.mxu1 %v12428_v41 }
 0xc43   :  { %9172 = vmatprep.subr.bf16.mxu0 %v12442_v39  ;;  %9204 = vmatprep.subr.bf16.mxu1 %v12453_v51 }
 0xc44   :  { %3825 = vmatprep.mubr.f32.mxu0 %v14133_v60  ;;  %3896 = vmatprep.mubr.f32.mxu1 %v14133_v60 }
 0xc46   :  { %9174 = vmatpush1.bf16.msra.mxu0 %v12455_v35  ;;  %9206 = vmatpush1.bf16.msra.mxu1 %v12464_v23 }
 0xc47   :  { %9176 = vmatprep.subr.bf16.mxu0 %v12478_v2  ;;  %9208 = vmatprep.subr.bf16.mxu1 %v12489_v37 }
 0xc4a   :  { %9178 = vmatpush1.bf16.msra.mxu0 %v12491_v16  ;;  %9210 = vmatpush1.bf16.msra.mxu1 %v12500_v7 }
 0xc4b   :  { %9180 = vmatprep.subr.bf16.mxu0 %v12514_v50  ;;  %9212 = vmatprep.subr.bf16.mxu1 %v12525_v43 }
 0xc4e   :  { %9182 = vmatpush1.bf16.msra.mxu0 %v12527_v26  ;;  %9214 = vmatpush1.bf16.msra.mxu1 %v12536_v32 }
 0xc4f   :  { %9184 = vmatprep.subr.bf16.mxu0 %v12550_v20  ;;  %9216 = vmatprep.subr.bf16.mxu1 %v12561_v11 }
 0xc52   :  { %9186 = vmatpush1.bf16.msra.mxu0 %v12563_v13  ;;  %9218 = vmatpush1.bf16.msra.mxu1 %v12572_v30 }
 0xc53   :  { %9188 = vmatprep.subr.bf16.mxu0 %v12585_v18  ;;  %9220 = vmatprep.subr.bf16.mxu1 %v12597_v40 }
 0xc56   :  { %9190 = vmatpush1.bf16.msra.mxu0 %v12599_v63  ;;  %9222 = vmatpush1.bf16.msra.mxu1 %v12611_v62 }
 0xc57   :  { %9192 = vmatprep.subr.bf16.mxu0 %v12623_v52  ;;  %9224 = vmatprep.subr.bf16.mxu1 %v12625_v38 }
 0xc5a   :  { %9194 = vmatpush1.bf16.msra.mxu0 %v12637_v12  ;;  %9226 = vmatpush1.bf16.msra.mxu1 %v12650_v57 }
 0xc5b   :  { %9196 = vmatprep.subr.bf16.mxu0 %v12652_v24  ;;  %9228 = vmatprep.subr.bf16.mxu1 %v12664_v6 }
 0xc5e   :  { %9198 = vmatpush1.bf16.msra.mxu0 %v12676_v55  ;;  %9230 = vmatpush1.bf16.msra.mxu1 %v12680_v49 }
 0xc5f   :  { %9232 = vmatprep.subr.bf16.mxu0 %v12406_v56  ;;  %9264 = vmatprep.subr.bf16.mxu1 %v12417_v15 }
 0xd14   :  { %v3592_v28 = vpop.f32.mrb[24].mxu0  ;;  %v3663_v33 = vpop.f32.mrb[24].mxu1 }
 0xd15   :  { %v10007_v45 = vadd.f32 %v3592_v28, %v12280_v58  ;;  %v3594_v1 = vpop.f32.mrb[25].mxu0  ;;  %v3665_v3 = vpop.f32.mrb[25].mxu1  ;;  %v10023_v29 = vadd.f32 %v3663_v33, %v12292_v27 }
 0xd16   :  { %v10008_v9 = vadd.f32 %v3594_v1, %v12283_v4  ;;  %v10024_v34 = vadd.f32 %v3665_v3, %v12288_v47 }
 0xd17   :  { %v7328_v36 = vmul.f32 -1.442695, %v10007_v45 }
 0xd18   :  { %v7329_v54 = vmul.f32 -1.442695, %v10008_v9  ;;  %v7330_v25 = vmul.f32 -1.442695, %v10024_v34 }
 0xd19   :  { %10323 = vpow2.f32 %v7328_v36 }
 0xd1a   :  { %10325 = vpow2.f32 %v7329_v54 }
 0xd1b   :  { %10327 = vpow2.f32 %v7330_v25 }
 0xd1c   :  { %10329 = vtanh.f32 %v10023_v29 }
 0xd23   :  { %v10324_v22 = vpop.eup %10323 }
 0xd24   :  { %v10326_v31 = vpop.eup %10325  ;;  %v3671_v19 = vadd.f32 1.0, %v10324_v22 }
 0xd25   :  { %v3677_v44 = vadd.f32 1.0, %v10326_v31  ;;  %v10328_v8 = vpop.eup %10327 }
 0xd26   :  { %10331 = vrcp.f32 %v3671_v19  ;;  %v10330_v5 = vpop.eup %10329  ;;  %v3684_v1 = vadd.f32 1.0, %v10328_v8 }
 0xd27   :  { %10333 = vrcp.f32 %v3677_v44 }
 0xd28   :  { %10335 = vrcp.f32 %v3684_v1 }
 0xd30   :  { %v10332_v42 = vpop.eup %10331 }
 0xd31   :  { %v10334_v28 = vpop.eup %10333  ;;  %v3688_v45 = vmul.f32 %v10332_v42, %v10330_v5 }
 0xd32   :  { %v3687_v9 = vmul.f32 %v10334_v28, %v12692_v46  ;;  %v10336_v33 = vpop.eup %10335 }
 0xd34   :  { %v12738_v3 = vadd.f32 %v3688_v45, %v3687_v9 }
 0xd36   :  { %10337 = vtanh.f32 %v12738_v3 }
 0xd40   :  { %v10338_v36 = vpop.eup %10337 }
 0xd41   :  { %v12741_v54 = vmul.f32 %v10338_v36, %v10336_v33 }
 0xd43   :  { %3826 = vmatmul.mubr.f32.vlgmr.msra.gmra.mrb[26].mxu0 %v12741_v54  ;;  %3897 = vmatmul.mubr.f32.vlgmr.msra.gmra.mrb[26].mxu1 %v12741_v54 }
 0xd44   :  { %9234 = vmatpush1.bf16.msra.mxu0 %v12419_v48  ;;  %9266 = vmatpush1.bf16.msra.mxu1 %v12428_v41 }
 0xd45   :  { %9236 = vmatprep.subr.bf16.mxu0 %v12442_v39  ;;  %9268 = vmatprep.subr.bf16.mxu1 %v12453_v51 }
 0xd46   :  { %4060 = vmatprep.mubr.f32.mxu0 %v14133_v60  ;;  %4131 = vmatprep.mubr.f32.mxu1 %v14133_v60 }
 0xd48   :  { %9238 = vmatpush1.bf16.msra.mxu0 %v12455_v35  ;;  %9270 = vmatpush1.bf16.msra.mxu1 %v12464_v23 }
 0xd49   :  { %9240 = vmatprep.subr.bf16.mxu0 %v12478_v2  ;;  %9272 = vmatprep.subr.bf16.mxu1 %v12489_v37 }
 0xd4c   :  { %9242 = vmatpush1.bf16.msra.mxu0 %v12491_v16  ;;  %9274 = vmatpush1.bf16.msra.mxu1 %v12500_v7 }
 0xd4d   :  { %9244 = vmatprep.subr.bf16.mxu0 %v12514_v50  ;;  %9276 = vmatprep.subr.bf16.mxu1 %v12525_v43 }
 0xd50   :  { %9246 = vmatpush1.bf16.msra.mxu0 %v12527_v26  ;;  %9278 = vmatpush1.bf16.msra.mxu1 %v12536_v32 }
 0xd51   :  { %9248 = vmatprep.subr.bf16.mxu0 %v12550_v20  ;;  %9280 = vmatprep.subr.bf16.mxu1 %v12561_v11 }
 0xd54   :  { %9250 = vmatpush1.bf16.msra.mxu0 %v12563_v13  ;;  %9282 = vmatpush1.bf16.msra.mxu1 %v12572_v30 }
 0xd55   :  { %9252 = vmatprep.subr.bf16.mxu0 %v12585_v18  ;;  %9284 = vmatprep.subr.bf16.mxu1 %v12597_v40 }
 0xd58   :  { %9254 = vmatpush1.bf16.msra.mxu0 %v12599_v63  ;;  %9286 = vmatpush1.bf16.msra.mxu1 %v12611_v62 }
 0xd59   :  { %9256 = vmatprep.subr.bf16.mxu0 %v12623_v52  ;;  %9288 = vmatprep.subr.bf16.mxu1 %v12625_v38 }
 0xd5c   :  { %9258 = vmatpush1.bf16.msra.mxu0 %v12637_v12  ;;  %9290 = vmatpush1.bf16.msra.mxu1 %v12650_v57 }
 0xd5d   :  { %9260 = vmatprep.subr.bf16.mxu0 %v12652_v24  ;;  %9292 = vmatprep.subr.bf16.mxu1 %v12664_v6 }
 0xd60   :  { %9262 = vmatpush1.bf16.msra.mxu0 %v12676_v55  ;;  %9294 = vmatpush1.bf16.msra.mxu1 %v12680_v49 }
 0xd61   :  { %9296 = vmatprep.subr.bf16.mxu0 %v12406_v56  ;;  %9328 = vmatprep.subr.bf16.mxu1 %v12417_v15 }
 0xe16   :  { %v3827_v46 = vpop.f32.mrb[26].mxu0  ;;  %v3898_v34 = vpop.f32.mrb[26].mxu1 }
 0xe17   :  { %v10009_v25 = vadd.f32 %v3827_v46, %v12280_v58  ;;  %v3829_v29 = vpop.f32.mrb[27].mxu0  ;;  %v3900_v22 = vpop.f32.mrb[27].mxu1  ;;  %v10025_v42 = vadd.f32 %v3898_v34, %v12292_v27 }
 0xe18   :  { %v10010_v31 = vadd.f32 %v3829_v29, %v12283_v4  ;;  %v10026_v8 = vadd.f32 %v3900_v22, %v12288_v47 }
 0xe19   :  { %v7395_v19 = vmul.f32 -1.442695, %v10009_v25 }
 0xe1a   :  { %v7396_v44 = vmul.f32 -1.442695, %v10010_v31  ;;  %v7397_v5 = vmul.f32 -1.442695, %v10026_v8  ;;  %v7538_v8 = vld [vmem:[%s14111_s2 + $0x230] sm:$0xff] }
 0xe1b   :  { %10339 = vpow2.f32 %v7395_v19 }
 0xe1c   :  { %10341 = vpow2.f32 %v7396_v44  ;;  %v7534_v44 = vld [vmem:[%s14111_s2 + $0x210] sm:$0xff] }
 0xe1d   :  { %10343 = vpow2.f32 %v7397_v5  ;;  %v7541_v5 = vld [vmem:[%s14111_s2 + $0x248] sm:$0xff] }
 0xe1e   :  { %10345 = vtanh.f32 %v10025_v42  ;;  %v7545_v42 = vld [vmem:[%s14111_s2 + $0x268] sm:$0xff] }
 0xe25   :  { %v10340_v56 = vpop.eup %10339 }
 0xe26   :  { %v10342_v28 = vpop.eup %10341  ;;  %v3906_v15 = vadd.f32 1.0, %v10340_v56  ;;  %v7543_v56 = vld [vmem:[%s14111_s2 + $0x258] sm:$0xff] }
 0xe27   :  { %v3912_v45 = vadd.f32 1.0, %v10342_v28  ;;  %v10344_v1 = vpop.eup %10343  ;;  %v7547_v28 = vld [vmem:[%s14111_s2 + $0x278] sm:$0xff] }
 0xe28   :  { %10347 = vrcp.f32 %v3906_v15  ;;  %v10346_v9 = vpop.eup %10345  ;;  %v3919_v25 = vadd.f32 1.0, %v10344_v1 }
 0xe29   :  { %10349 = vrcp.f32 %v3912_v45 }
 0xe2a   :  { %10351 = vrcp.f32 %v3919_v25  ;;  %v9363_v25 = vpack.c.bf16 %v7545_v42, %v7541_v5  ;;  %v7566_v42 = vld [vmem:[%s14111_s2 + $0x310] sm:$0xff] }
 0xe32   :  { %v10348_v33 = vpop.eup %10347 }
 0xe33   :  { %v10350_v36 = vpop.eup %10349  ;;  %v3923_v46 = vmul.f32 %v10348_v33, %v10346_v9  ;;  %v9393_v9 = vpack.c.bf16 %v7538_v8, %v7534_v44  ;;  %v7540_v33 = vld [vmem:[%s14111_s2 + $0x240] sm:$0xff] }
 0xe34   :  { %v3922_v29 = vmul.f32 %v10350_v36, %v12738_v3  ;;  %v10352_v34 = vpop.eup %10351  ;;  %v7536_v3 = vld [vmem:[%s14111_s2 + $0x220] sm:$0xff] }
 0xe35   :  { %v7544_v36 = vld [vmem:[%s14111_s2 + $0x260] sm:$0xff] }
 0xe36   :  { %v12784_v22 = vadd.f32 %v3923_v46, %v3922_v29  ;;  %v9395_v29 = vpack.c.bf16 %v7547_v28, %v7543_v56  ;;  %v7568_v44 = vld [vmem:[%s14111_s2 + $0x320] sm:$0xff]  ;;  %v7570_v56 = vld [vmem:[%s14111_s2 + $0x330] sm:$0xff]  ;;  %v7573_v28 = vld [vmem:[%s14111_s2 + $0x348] sm:$0xff] }
 0xe38   :  { %10353 = vtanh.f32 %v12784_v22 }
 0xe42   :  { %v10354_v31 = vpop.eup %10353 }
 0xe43   :  { %v12787_v19 = vmul.f32 %v10354_v31, %v10352_v34  ;;  %v7546_v34 = vld [vmem:[%s14111_s2 + $0x270] sm:$0xff]  ;;  %v7549_v31 = vld [vmem:[%s14111_s2 + $0x288] sm:$0xff] }
 0xe45   :  { %4061 = vmatmul.mubr.f32.vlgmr.msra.gmra.mrb[28].mxu0 %v12787_v19  ;;  %4132 = vmatmul.mubr.f32.vlgmr.msra.gmra.mrb[28].mxu1 %v12787_v19 }
 0xe46   :  { %9298 = vmatpush1.bf16.msra.mxu0 %v12419_v48  ;;  %9330 = vmatpush1.bf16.msra.mxu1 %v12428_v41  ;;  %v7533_v48 = vld [vmem:[%s14111_s2 + $0x208] sm:$0xff] }
 0xe47   :  { %9300 = vmatprep.subr.bf16.mxu0 %v12442_v39  ;;  %9332 = vmatprep.subr.bf16.mxu1 %v12453_v51  ;;  %v7537_v41 = vld [vmem:[%s14111_s2 + $0x228] sm:$0xff]  ;;  %v7535_v39 = vld [vmem:[%s14111_s2 + $0x218] sm:$0xff] }
 0xe48   :  { %4295 = vmatprep.mubr.f32.mxu0 %v14133_v60  ;;  %4366 = vmatprep.mubr.f32.mxu1 %v14133_v60  ;;  %v9359_v51 = vpack.c.bf16 %v7537_v41, %v7533_v48  ;;  %v7553_v48 = vld [vmem:[%s14111_s2 + $0x2a8] sm:$0xff]  ;;  %v7551_v41 = vld [vmem:[%s14111_s2 + $0x298] sm:$0xff] }
 0xe4a   :  { %9302 = vmatpush1.bf16.msra.mxu0 %v12455_v35  ;;  %9334 = vmatpush1.bf16.msra.mxu1 %v12464_v23  ;;  %v7539_v35 = vld [vmem:[%s14111_s2 + $0x238] sm:$0xff] }
 0xe4b   :  { %9304 = vmatprep.subr.bf16.mxu0 %v12478_v2  ;;  %9336 = vmatprep.subr.bf16.mxu1 %v12489_v37  ;;  %v9391_v23 = vpack.c.bf16 %v7539_v35, %v7535_v39  ;;  %v7555_v39 = vld [vmem:[%s14111_s2 + $0x2b8] sm:$0xff] }
 0xe4e   :  { %9306 = vmatpush1.bf16.msra.mxu0 %v12491_v16  ;;  %9338 = vmatpush1.bf16.msra.mxu1 %v12500_v7 }
 0xe4f   :  { %9308 = vmatprep.subr.bf16.mxu0 %v12514_v50  ;;  %9340 = vmatprep.subr.bf16.mxu1 %v12525_v43 }
 0xe52   :  { %9310 = vmatpush1.bf16.msra.mxu0 %v12527_v26  ;;  %9342 = vmatpush1.bf16.msra.mxu1 %v12536_v32 }
 0xe53   :  { %9312 = vmatprep.subr.bf16.mxu0 %v12550_v20  ;;  %9344 = vmatprep.subr.bf16.mxu1 %v12561_v11 }
 0xe56   :  { %9314 = vmatpush1.bf16.msra.mxu0 %v12563_v13  ;;  %9346 = vmatpush1.bf16.msra.mxu1 %v12572_v30 }
 0xe57   :  { %9316 = vmatprep.subr.bf16.mxu0 %v12585_v18  ;;  %9348 = vmatprep.subr.bf16.mxu1 %v12597_v40 }
 0xe5a   :  { %9318 = vmatpush1.bf16.msra.mxu0 %v12599_v63  ;;  %9350 = vmatpush1.bf16.msra.mxu1 %v12611_v62 }
 0xe5b   :  { %9320 = vmatprep.subr.bf16.mxu0 %v12623_v52  ;;  %9352 = vmatprep.subr.bf16.mxu1 %v12625_v38 }
 0xe5e   :  { %9322 = vmatpush1.bf16.msra.mxu0 %v12637_v12  ;;  %9354 = vmatpush1.bf16.msra.mxu1 %v12650_v57 }
 0xe5f   :  { %9324 = vmatprep.subr.bf16.mxu0 %v12652_v24  ;;  %9356 = vmatprep.subr.bf16.mxu1 %v12664_v6 }
 0xe62   :  { %9326 = vmatpush1.bf16.msra.mxu0 %v12676_v55  ;;  %9358 = vmatpush1.bf16.msra.mxu1 %v12680_v49  ;;  %v7532_v49 = vld [vmem:[%s14111_s2 + $0x200] sm:$0xff] }
 0xe63   :  { %9360 = vmatprep.subr.bf16.mxu0 %v9359_v51  ;;  %9392 = vmatprep.subr.bf16.mxu1 %v9391_v23  ;;  %v9361_v1 = vpack.c.bf16 %v7536_v3, %v7532_v49  ;;  %v9365_v51 = vpack.c.bf16 %v7544_v36, %v7540_v33  ;;  %v7548_v23 = vld [vmem:[%s14111_s2 + $0x280] sm:$0xff]  ;;  %v9409_v33 = vpack.c.bf16 %v7570_v56, %v7566_v42  ;;  %v7608_v42 = vld [vmem:[%s14105_s3 + $0x458] sm:$0xff] }
 0xe64   :  { %v7564_v3 = vld [vmem:[%s14111_s2 + $0x300] sm:$0xff] }
 0xe65   :  { %v7572_v36 = vld [vmem:[%s14111_s2 + $0x340] sm:$0xff] }
 0xf18   :  { %v4062_v2 = vpop.f32.mrb[28].mxu0  ;;  %v4133_v37 = vpop.f32.mrb[28].mxu1 }
 0xf19   :  { %v10011_v16 = vadd.f32 %v4062_v2, %v12280_v58  ;;  %v4064_v7 = vpop.f32.mrb[29].mxu0  ;;  %v4135_v50 = vpop.f32.mrb[29].mxu1  ;;  %v10027_v13 = vadd.f32 %v4133_v37, %v12292_v27  ;;  %v7552_v2 = vld [vmem:[%s14111_s2 + $0x2a0] sm:$0xff]  ;;  %v9367_v37 = vpack.c.bf16 %v7553_v48, %v7549_v31  ;;  %v7578_v31 = vld [vmem:[%s14111_s2 + $0x370] sm:$0xff]  ;;  %v7581_v48 = vld [vmem:[%s14111_s2 + $0x388] sm:$0xff] }
 0xf1a   :  { %v10012_v43 = vadd.f32 %v4064_v7, %v12283_v4  ;;  %v10028_v20 = vadd.f32 %v4135_v50, %v12288_v47  ;;  %v7550_v7 = vld [vmem:[%s14111_s2 + $0x290] sm:$0xff] }
 0xf1b   :  { %v7462_v26 = vmul.f32 -1.442695, %v10011_v16  ;;  %v9399_v16 = vpack.c.bf16 %v7555_v39, %v7551_v41  ;;  %v7554_v50 = vld [vmem:[%s14111_s2 + $0x2b0] sm:$0xff]  ;;  %v7585_v41 = vld [vmem:[%s14111_s2 + $0x3a8] sm:$0xff]  ;;  %v7583_v39 = vld [vmem:[%s14111_s2 + $0x398] sm:$0xff] }
 0xf1c   :  { %v7463_v32 = vmul.f32 -1.442695, %v10012_v43  ;;  %v7464_v11 = vmul.f32 -1.442695, %v10028_v20  ;;  %v7557_v43 = vld [vmem:[%s14111_s2 + $0x2c8] sm:$0xff]  ;;  %v7563_v20 = vld [vmem:[%s14111_s2 + $0x2f8] sm:$0xff] }
 0xf1d   :  { %10355 = vpow2.f32 %v7462_v26  ;;  %v7561_v26 = vld [vmem:[%s14111_s2 + $0x2e8] sm:$0xff] }
 0xf1e   :  { %10357 = vpow2.f32 %v7463_v32  ;;  %v7559_v32 = vld [vmem:[%s14111_s2 + $0x2d8] sm:$0xff] }
 0xf1f   :  { %10359 = vpow2.f32 %v7464_v11  ;;  %v9369_v11 = vpack.c.bf16 %v7552_v2, %v7548_v23  ;;  %v7580_v2 = vld [vmem:[%s14111_s2 + $0x380] sm:$0xff] }
 0xf20   :  { %10361 = vtanh.f32 %v10027_v13  ;;  %v9401_v13 = vpack.c.bf16 %v7554_v50, %v7550_v7  ;;  %v7582_v50 = vld [vmem:[%s14111_s2 + $0x390] sm:$0xff] }
 0xf27   :  { %v10356_v30 = vpop.eup %10355 }
 0xf28   :  { %v10358_v18 = vpop.eup %10357  ;;  %v4141_v40 = vadd.f32 1.0, %v10356_v30  ;;  %v7556_v30 = vld [vmem:[%s14111_s2 + $0x2c0] sm:$0xff] }
 0xf29   :  { %v4147_v63 = vadd.f32 1.0, %v10358_v18  ;;  %v10360_v62 = vpop.eup %10359  ;;  %v7560_v18 = vld [vmem:[%s14111_s2 + $0x2e0] sm:$0xff] }
 0xf2a   :  { %10363 = vrcp.f32 %v4141_v40  ;;  %v10362_v52 = vpop.eup %10361  ;;  %v4154_v24 = vadd.f32 1.0, %v10360_v62  ;;  %v9371_v40 = vpack.c.bf16 %v7561_v26, %v7557_v43  ;;  %v7558_v62 = vld [vmem:[%s14111_s2 + $0x2d0] sm:$0xff]  ;;  %v7589_v26 = vld [vmem:[%s14111_s2 + $0x3c8] sm:$0xff] }
 0xf2b   :  { %10365 = vrcp.f32 %v4147_v63  ;;  %v9403_v63 = vpack.c.bf16 %v7563_v20, %v7559_v32  ;;  %v7586_v43 = vld [vmem:[%s14111_s2 + $0x3b0] sm:$0xff]  ;;  %v7593_v32 = vld [vmem:[%s14111_s2 + $0x3e8] sm:$0xff]  ;;  %v7591_v20 = vld [vmem:[%s14111_s2 + $0x3d8] sm:$0xff] }
 0xf2c   :  { %10367 = vrcp.f32 %v4154_v24  ;;  %v7571_v24 = vld [vmem:[%s14111_s2 + $0x338] sm:$0xff] }
 0xf34   :  { %v10364_v38 = vpop.eup %10363 }
 0xf35   :  { %v10366_v12 = vpop.eup %10365  ;;  %v4158_v57 = vmul.f32 %v10364_v38, %v10362_v52  ;;  %v7562_v52 = vld [vmem:[%s14111_s2 + $0x2f0] sm:$0xff]  ;;  %v7565_v38 = vld [vmem:[%s14111_s2 + $0x308] sm:$0xff] }
 0xf36   :  { %v4157_v6 = vmul.f32 %v10366_v12, %v12784_v22  ;;  %v10368_v15 = vpop.eup %10367  ;;  %v7542_v22 = vld [vmem:[%s14111_s2 + $0x250] sm:$0xff]  ;;  %v7569_v12 = vld [vmem:[%s14111_s2 + $0x328] sm:$0xff]  ;;  %v9405_v49 = vpack.c.bf16 %v7562_v52, %v7558_v62  ;;  %v7592_v62 = vld [vmem:[%s14111_s2 + $0x3e0] sm:$0xff] }
 0xf37   :  { %v9397_v35 = vpack.c.bf16 %v7546_v34, %v7542_v22  ;;  %v9375_v8 = vpack.c.bf16 %v7569_v12, %v7565_v38  ;;  %v7574_v34 = vld [vmem:[%s14111_s2 + $0x350] sm:$0xff] }
 0xf38   :  { %v12840_v55 = vadd.f32 %v4158_v57, %v4157_v6  ;;  %v7567_v57 = vld [vmem:[%s14111_s2 + $0x318] sm:$0xff]  ;;  %v9373_v6 = vpack.c.bf16 %v7560_v18, %v7556_v30  ;;  %v9413_v23 = vpack.c.bf16 %v7578_v31, %v7574_v34  ;;  %v9417_v30 = vpack.c.bf16 %v7586_v43, %v7582_v50  ;;  %v7588_v18 = vld [vmem:[%s14111_s2 + $0x3c0] sm:$0xff]  ;;  %v7590_v52 = vld [vmem:[%s14111_s2 + $0x3d0] sm:$0xff] }
 0xf39   :  { %v9407_v5 = vpack.c.bf16 %v7571_v24, %v7567_v57  ;;  %v7594_v38 = vld [vmem:[%s14111_s2 + $0x3f0] sm:$0xff]  ;;  %v9389_v12 = vpack.c.bf16 %v7592_v62, %v7588_v18  ;;  %v7616_v34 = vld [vmem:[%s14105_s3 + $0x498] sm:$0xff]  ;;  %v7634_v62 = vld [vmem:[%s14105_s3 + $0x528] sm:$0xff] }
 0xf3a   :  { %10369 = vtanh.f32 %v12840_v55  ;;  %v9421_v57 = vpack.c.bf16 %v7594_v38, %v7590_v52  ;;  %v7624_v50 = vld [vmem:[%s14105_s3 + $0x4d8] sm:$0xff]  ;;  %v7627_v18 = vld [vmem:[%s14105_s3 + $0x4f0] sm:$0xff]  ;;  %v7629_v52 = vld [vmem:[%s14105_s3 + $0x500] sm:$0xff] }
 0xf3b   :  { %v7633_v38 = vld [vmem:[%s14105_s3 + $0x520] sm:$0xff] }
 0xf44   :  { %v10370_v45 = vpop.eup %10369 }
 0xf45   :  { %v12873_v46 = vmul.f32 %v10370_v45, %v10368_v15  ;;  %v7577_v15 = vld [vmem:[%s14111_s2 + $0x368] sm:$0xff]  ;;  %v7575_v45 = vld [vmem:[%s14111_s2 + $0x358] sm:$0xff] }
 0xf47   :  { %4296 = vmatmul.mubr.f32.vlgmr.msra.gmra.mrb[30].mxu0 %v12873_v46  ;;  %4367 = vmatmul.mubr.f32.vlgmr.msra.gmra.mrb[30].mxu1 %v12873_v46 }
 0xf48   :  { %9362 = vmatpush1.bf16.msra.mxu0 %v9361_v1  ;;  %9394 = vmatpush1.bf16.msra.mxu1 %v9393_v9  ;;  %v7579_v1 = vld [vmem:[%s14111_s2 + $0x378] sm:$0xff]  ;;  %v9377_v9 = vpack.c.bf16 %v7568_v44, %v7564_v3  ;;  %v7603_v3 = vld [vmem:[%s14105_s3 + $0x430] sm:$0xff] }
 0xf49   :  { %9364 = vmatprep.subr.bf16.mxu0 %v9363_v25  ;;  %9396 = vmatprep.subr.bf16.mxu1 %v9395_v29  ;;  %v7576_v25 = vld [vmem:[%s14111_s2 + $0x360] sm:$0xff]  ;;  %v9379_v29 = vpack.c.bf16 %v7577_v15, %v7573_v28  ;;  %v9411_v22 = vpack.c.bf16 %v7579_v1, %v7575_v45  ;;  %v7612_v45 = vld [vmem:[%s14105_s3 + $0x478] sm:$0xff] }
 0xf4a   :  { %4560 = vmatprep.mubr.f32.mxu0 %v14133_v60  ;;  %4673 = vmatprep.mubr.f32.mxu1 %v14133_v60  ;;  %v7605_v28 = vld [vmem:[%s14105_s3 + $0x440] sm:$0xff] }
 0xf4b   :  { %v7609_v15 = vld [vmem:[%s14105_s3 + $0x460] sm:$0xff] }
 0xf4c   :  { %9366 = vmatpush1.bf16.msra.mxu0 %v9365_v51  ;;  %9398 = vmatpush1.bf16.msra.mxu1 %v9397_v35  ;;  %v7587_v51 = vld [vmem:[%s14111_s2 + $0x3b8] sm:$0xff]  ;;  %v9381_v35 = vpack.c.bf16 %v7576_v25, %v7572_v36  ;;  %v13113_v1 = vpack.c.bf16 %v7609_v15, %v7605_v28  ;;  %v7611_v36 = vld [vmem:[%s14105_s3 + $0x470] sm:$0xff] }
 0xf4d   :  { %9368 = vmatprep.subr.bf16.mxu0 %v9367_v37  ;;  %9400 = vmatprep.subr.bf16.mxu1 %v9399_v16  ;;  %v7584_v37 = vld [vmem:[%s14111_s2 + $0x3a0] sm:$0xff]  ;;  %v9383_v16 = vpack.c.bf16 %v7585_v41, %v7581_v48  ;;  %v9415_v7 = vpack.c.bf16 %v7587_v51, %v7583_v39  ;;  %v7620_v39 = vld [vmem:[%s14105_s3 + $0x4b8] sm:$0xff] }
 0xf4e   :  { %v7613_v48 = vld [vmem:[%s14105_s3 + $0x480] sm:$0xff]  ;;  %v7640_v28 = vld [vmem:[%s14105_s3 + $0x558] sm:$0xff] }
 0xf4f   :  { %v7617_v41 = vld [vmem:[%s14105_s3 + $0x4a0] sm:$0xff]  ;;  %v7644_v15 = vld [vmem:[%s14105_s3 + $0x578] sm:$0xff] }
 0xf50   :  { %9370 = vmatpush1.bf16.msra.mxu0 %v9369_v11  ;;  %9402 = vmatpush1.bf16.msra.mxu1 %v9401_v13  ;;  %v7595_v11 = vld [vmem:[%s14111_s2 + $0x3f8] sm:$0xff]  ;;  %v9385_v13 = vpack.c.bf16 %v7584_v37, %v7580_v2  ;;  %v13149_v51 = vpack.c.bf16 %v7617_v41, %v7613_v48  ;;  %v7619_v2 = vld [vmem:[%s14105_s3 + $0x4b0] sm:$0xff]  ;;  %v7645_v48 = vld [vmem:[%s14105_s3 + $0x580] sm:$0xff] }
 0xf51   :  { %9372 = vmatprep.subr.bf16.mxu0 %v9371_v40  ;;  %9404 = vmatprep.subr.bf16.mxu1 %v9403_v63  ;;  %v9387_v40 = vpack.c.bf16 %v7593_v32, %v7589_v26  ;;  %v9419_v63 = vpack.c.bf16 %v7595_v11, %v7591_v20  ;;  %v7621_v26 = vld [vmem:[%s14105_s3 + $0x4c0] sm:$0xff]  ;;  %v7628_v20 = vld [vmem:[%s14105_s3 + $0x4f8] sm:$0xff] }
 0xf52   :  { %v7625_v32 = vld [vmem:[%s14105_s3 + $0x4e0] sm:$0xff] }
 0xf53   :  { %v13185_v11 = vpack.c.bf16 %v7625_v32, %v7621_v26  ;;  %v7651_v26 = vld [vmem:[%s14105_s3 + $0x5b0] sm:$0xff]  ;;  %v7654_v32 = vld [vmem:[%s14105_s3 + $0x5c8] sm:$0xff] }
 0xf54   :  { %9374 = vmatpush1.bf16.msra.mxu0 %v9373_v6  ;;  %9406 = vmatpush1.bf16.msra.mxu1 %v9405_v49  ;;  %v7599_v49 = vld [vmem:[%s14105_s3 + $0x410] sm:$0xff] }
 0xf55   :  { %9376 = vmatprep.subr.bf16.mxu0 %v9375_v8  ;;  %9408 = vmatprep.subr.bf16.mxu1 %v9407_v5  ;;  %v13088_v44 = vpack.c.bf16 %v7603_v3, %v7599_v49  ;;  %v7606_v8 = vld [vmem:[%s14105_s3 + $0x448] sm:$0xff] }
 0xf56   :  { %v7610_v5 = vld [vmem:[%s14105_s3 + $0x468] sm:$0xff] }
 0xf57   :  { %v13102_v56 = vpack.c.bf16 %v7610_v5, %v7606_v8  ;;  %v7642_v49 = vld [vmem:[%s14105_s3 + $0x568] sm:$0xff]  ;;  %v7637_v5 = vld [vmem:[%s14105_s3 + $0x540] sm:$0xff] }
 0xf58   :  { %9378 = vmatpush1.bf16.msra.mxu0 %v9377_v9  ;;  %9410 = vmatpush1.bf16.msra.mxu1 %v9409_v33  ;;  %v13115_v9 = vpack.c.bf16 %v7612_v45, %v7608_v42  ;;  %v7607_v33 = vld [vmem:[%s14105_s3 + $0x450] sm:$0xff]  ;;  %v7641_v42 = vld [vmem:[%s14105_s3 + $0x560] sm:$0xff] }
 0xf59   :  { %9380 = vmatprep.subr.bf16.mxu0 %v9379_v29  ;;  %9412 = vmatprep.subr.bf16.mxu1 %v9411_v22  ;;  %v13124_v25 = vpack.c.bf16 %v7611_v36, %v7607_v33  ;;  %v7614_v29 = vld [vmem:[%s14105_s3 + $0x488] sm:$0xff]  ;;  %v7639_v45 = vld [vmem:[%s14105_s3 + $0x550] sm:$0xff]  ;;  %v13262_v36 = vpack.c.bf16 %v7641_v42, %v7637_v5 }
 0xf5a   :  { %v7618_v22 = vld [vmem:[%s14105_s3 + $0x4a8] sm:$0xff]  ;;  %v7643_v33 = vld [vmem:[%s14105_s3 + $0x570] sm:$0xff] }
 0xf5b   :  { %v13138_v31 = vpack.c.bf16 %v7618_v22, %v7614_v29  ;;  %v13264_v29 = vpack.c.bf16 %v7644_v15, %v7640_v28  ;;  %v7646_v22 = vld [vmem:[%s14105_s3 + $0x588] sm:$0xff]  ;;  %v13277_v41 = vpack.c.bf16 %v7643_v33, %v7639_v45 }
 0xf5c   :  { %9382 = vmatpush1.bf16.msra.mxu0 %v9381_v35  ;;  %9414 = vmatpush1.bf16.msra.mxu1 %v9413_v23  ;;  %v13151_v35 = vpack.c.bf16 %v7620_v39, %v7616_v34  ;;  %v7615_v23 = vld [vmem:[%s14105_s3 + $0x490] sm:$0xff]  ;;  %v7650_v34 = vld [vmem:[%s14105_s3 + $0x5a8] sm:$0xff] }
 0xf5d   :  { %9384 = vmatprep.subr.bf16.mxu0 %v9383_v16  ;;  %9416 = vmatprep.subr.bf16.mxu1 %v9415_v7  ;;  %v13160_v37 = vpack.c.bf16 %v7619_v2, %v7615_v23  ;;  %v7622_v16 = vld [vmem:[%s14105_s3 + $0x4c8] sm:$0xff]  ;;  %v13279_v39 = vpack.c.bf16 %v7650_v34, %v7646_v22  ;;  %v7649_v23 = vld [vmem:[%s14105_s3 + $0x5a0] sm:$0xff]  ;;  %v7648_v2 = vld [vmem:[%s14105_s3 + $0x598] sm:$0xff] }
 0xf5e   :  { %v7626_v7 = vld [vmem:[%s14105_s3 + $0x4e8] sm:$0xff] }
 0xf5f   :  { %v13174_v43 = vpack.c.bf16 %v7626_v7, %v7622_v16  ;;  %v7652_v16 = vld [vmem:[%s14105_s3 + $0x5b8] sm:$0xff] }
 0xf60   :  { %9386 = vmatpush1.bf16.msra.mxu0 %v9385_v13  ;;  %9418 = vmatpush1.bf16.msra.mxu1 %v9417_v30  ;;  %v13187_v13 = vpack.c.bf16 %v7628_v20, %v7624_v50  ;;  %v7623_v30 = vld [vmem:[%s14105_s3 + $0x4d0] sm:$0xff]  ;;  %v13291_v7 = vpack.c.bf16 %v7652_v16, %v7648_v2  ;;  %v7658_v20 = vld [vmem:[%s14105_s3 + $0x5e8] sm:$0xff] }
 0xf61   :  { %9388 = vmatprep.subr.bf16.mxu0 %v9387_v40  ;;  %9420 = vmatprep.subr.bf16.mxu1 %v9419_v63  ;;  %v7630_v40 = vld [vmem:[%s14105_s3 + $0x508] sm:$0xff]  ;;  %v13199_v63 = vpack.c.bf16 %v7627_v18, %v7623_v30  ;;  %v7647_v50 = vld [vmem:[%s14105_s3 + $0x590] sm:$0xff]  ;;  %v13306_v30 = vpack.c.bf16 %v7649_v23, %v7645_v48 }
 0xf62   :  { %v13310_v18 = vpack.c.bf16 %v7651_v26, %v7647_v50 }
 0xf64   :  { %9390 = vmatpush1.bf16.msra.mxu0 %v9389_v12  ;;  %9422 = vmatpush1.bf16.msra.mxu1 %v9421_v57  ;;  %v13212_v12 = vpack.c.bf16 %v7634_v62, %v7630_v40  ;;  %v13214_v57 = vpack.c.bf16 %v7633_v38, %v7629_v52  ;;  %v13312_v40 = vpack.c.bf16 %v7658_v20, %v7654_v32  ;;  %v7656_v62 = vld [vmem:[%s14105_s3 + $0x5d8] sm:$0xff]  ;;  %v7653_v38 = vld [vmem:[%s14105_s3 + $0x5c0] sm:$0xff] }
 0xf65   :  { %v7660_v52 = vld [vmem:[%s14105_s3 + $0x5f8] sm:$0xff] }
 0xf67   :  { %4561 = vmatmul.mubr.f32.vlgmr.msra.gmra.mrb[32].mxu0 %v12301_v0  ;;  %4674 = vmatmul.mubr.f32.vlgmr.msra.gmra.mrb[32].mxu1 %v12301_v0  ;;  %v7598_v0 = vld [vmem:[%s14105_s3 + $0x408] sm:$0xff] }
 0xf68   :  { %4566 = vmatprep.mubr.f32.mxu0 %v14133_v60  ;;  %4679 = vmatprep.mubr.f32.mxu1 %v14133_v60 }
 0xf6b   :  { %4567 = vmatmul.mubr.f32.gmra.mrb[34].mxu0 %v12347_v17  ;;  %4680 = vmatmul.mubr.f32.gmra.mrb[34].mxu1 %v12347_v17  ;;  %v7602_v17 = vld [vmem:[%s14105_s3 + $0x428] sm:$0xff] }
 0xf6c   :  { %4572 = vmatprep.mubr.f32.mxu0 %v14133_v60  ;;  %4685 = vmatprep.mubr.f32.mxu1 %v14133_v60 }
 0xf6f   :  { %4573 = vmatmul.mubr.f32.gmra.mrb[36].mxu0 %v12391_v59  ;;  %4686 = vmatmul.mubr.f32.gmra.mrb[36].mxu1 %v12391_v59  ;;  %v7600_v59 = vld [vmem:[%s14105_s3 + $0x418] sm:$0xff] }
 0xf70   :  { %4578 = vmatprep.mubr.f32.mxu0 %v14133_v60  ;;  %4691 = vmatprep.mubr.f32.mxu1 %v14133_v60 }
 0xf73   :  { %4579 = vmatmul.mubr.f32.gmra.mrb[38].mxu0 %v12695_v10  ;;  %4692 = vmatmul.mubr.f32.gmra.mrb[38].mxu1 %v12695_v10  ;;  %v13066_v10 = vpack.c.bf16 %v7602_v17, %v7598_v0  ;;  %v7632_v0 = vld [vmem:[%s14105_s3 + $0x518] sm:$0xff] }
 0xf74   :  { %4584 = vmatprep.mubr.f32.mxu0 %v14133_v60  ;;  %4697 = vmatprep.mubr.f32.mxu1 %v14133_v60  ;;  %v7636_v17 = vld [vmem:[%s14105_s3 + $0x538] sm:$0xff] }
 0xf75   :  { %9424 = vmatprep.subr.bf16.mxu0 %v13066_v10 }
 0xf77   :  { %4585 = vmatmul.mubr.f32.gmra.mrb[40].mxu0 %v12741_v54  ;;  %4698 = vmatmul.mubr.f32.gmra.mrb[40].mxu1 %v12741_v54  ;;  %v7597_v54 = vld [vmem:[%s14105_s3 + $0x400] sm:$0xff] }
 0xf78   :  { %4590 = vmatprep.mubr.f32.mxu0 %v14133_v60  ;;  %4703 = vmatprep.mubr.f32.mxu1 %v14133_v60 }
 0xf7b   :  { %4591 = vmatmul.mubr.f32.gmra.mrb[42].mxu0 %v12787_v19  ;;  %4704 = vmatmul.mubr.f32.gmra.mrb[42].mxu1 %v12787_v19  ;;  %v7601_v19 = vld [vmem:[%s14105_s3 + $0x420] sm:$0xff] }
 0xf7c   :  { %4596 = vmatprep.mubr.f32.mxu0 %v14133_v60  ;;  %4709 = vmatprep.mubr.f32.mxu1 %v14133_v60  ;;  %v13077_v24 = vpack.c.bf16 %v7601_v19, %v7597_v54  ;;  %v13226_v54 = vpack.c.bf16 %v7636_v17, %v7632_v0  ;;  %v7635_v19 = vld [vmem:[%s14105_s3 + $0x530] sm:$0xff]  ;;  %v7657_v0 = vld [vmem:[%s14105_s3 + $0x5e0] sm:$0xff]  ;;  %v13330_v17 = vpack.c.bf16 %v7660_v52, %v7656_v62 }
 0xf7e   :  { %9426 = vmatpush1.bf16.msra.mxu0 %v13077_v24 }
 0xf7f   :  { %4597 = vmatmul.mubr.f32.gmra.mrb[44].mxu0 %v12873_v46  ;;  %4710 = vmatmul.mubr.f32.gmra.mrb[44].mxu1 %v12873_v46  ;;  %v7604_v46 = vld [vmem:[%s14105_s3 + $0x438] sm:$0xff] }
 0xf80   :  { %4602 = vmatprep.mubr.f32.mxu0 %v14133_v60  ;;  %4715 = vmatprep.mubr.f32.mxu1 %v14133_v60  ;;  %v13079_v6 = vpack.c.bf16 %v7604_v46, %v7600_v59  ;;  %v7631_v59 = vld [vmem:[%s14105_s3 + $0x510] sm:$0xff]  ;;  %v7638_v46 = vld [vmem:[%s14105_s3 + $0x548] sm:$0xff] }
 0xf81   :  { %9428 = vmatprep.subr.bf16.mxu0 %v13102_v56  ;;  %v13238_v3 = vpack.c.bf16 %v7635_v19, %v7631_v59  ;;  %v13240_v8 = vpack.c.bf16 %v7642_v49, %v7638_v46  ;;  %v7655_v59 = vld [vmem:[%s14105_s3 + $0x5d0] sm:$0xff]  ;;  %v13335_v19 = vpack.c.bf16 %v7657_v0, %v7653_v38 }
 0xf82   :  { %9456 = vmatprep.subr.bf16.mxu1 %v13079_v6  ;;  %9430 = vmatpush1.bf16.msra.mxu0 %v13113_v1  ;;  %v7659_v46 = vld [vmem:[%s14105_s3 + $0x5f0] sm:$0xff] }
 0xf83   :  { %9458 = vmatpush1.bf16.msra.mxu1 %v13088_v44  ;;  %9432 = vmatprep.subr.bf16.mxu0 %v13138_v31  ;;  %v13341_v49 = vpack.c.bf16 %v7659_v46, %v7655_v59 }
 0xf84   :  { %9460 = vmatprep.subr.bf16.mxu1 %v13115_v9 }
 0xf86   :  { %9434 = vmatpush1.bf16.msra.mxu0 %v13149_v51 }
 0xf87   :  { %9462 = vmatpush1.bf16.msra.mxu1 %v13124_v25  ;;  %9436 = vmatprep.subr.bf16.mxu0 %v13174_v43 }
 0xf88   :  { %9464 = vmatprep.subr.bf16.mxu1 %v13151_v35 }
 0xf8a   :  { %9438 = vmatpush1.bf16.msra.mxu0 %v13185_v11 }
 0xf8b   :  { %9466 = vmatpush1.bf16.msra.mxu1 %v13160_v37  ;;  %9440 = vmatprep.subr.bf16.mxu0 %v13212_v12 }
 0xf8c   :  { %9468 = vmatprep.subr.bf16.mxu1 %v13187_v13 }
 0xf8e   :  { %9442 = vmatpush1.bf16.msra.mxu0 %v13214_v57 }
 0xf8f   :  { %9470 = vmatpush1.bf16.msra.mxu1 %v13199_v63  ;;  %9444 = vmatprep.subr.bf16.mxu0 %v13240_v8 }
 0xf90   :  { %9472 = vmatprep.subr.bf16.mxu1 %v13226_v54 }
 0xf92   :  { %9446 = vmatpush1.bf16.msra.mxu0 %v13262_v36 }
 0xf93   :  { %9474 = vmatpush1.bf16.msra.mxu1 %v13238_v3  ;;  %9448 = vmatprep.subr.bf16.mxu0 %v13279_v39 }
 0xf94   :  { %9476 = vmatprep.subr.bf16.mxu1 %v13264_v29 }
 0xf96   :  { %9450 = vmatpush1.bf16.msra.mxu0 %v13306_v30 }
 0xf97   :  { %9478 = vmatpush1.bf16.msra.mxu1 %v13277_v41  ;;  %9452 = vmatprep.subr.bf16.mxu0 %v13312_v40 }
 0xf98   :  { %9480 = vmatprep.subr.bf16.mxu1 %v13291_v7 }
 0xf9a   :  { %9454 = vmatpush1.bf16.msra.mxu0 %v13335_v19 }
 0xf9b   :  { %9482 = vmatpush1.bf16.msra.mxu1 %v13310_v18  ;;  %9488 = vmatprep.subr.bf16.mxu0 %v13066_v10 }
 0xf9c   :  { %9484 = vmatprep.subr.bf16.mxu1 %v13330_v17 }
 0xf9f   :  { %9486 = vmatpush1.bf16.msra.mxu1 %v13341_v49 }
 0xfa0   :  { %9520 = vmatprep.subr.bf16.mxu1 %v13079_v6 }
0x101a   :  { %v4297_v5 = vpop.f32.mrb[30].mxu0  ;;  %v4368_v42 = vpop.f32.mrb[30].mxu1 }
0x101b   :  { %v10013_v28 = vadd.f32 %v4297_v5, %v12280_v58  ;;  %v4299_v15 = vpop.f32.mrb[31].mxu0  ;;  %v4370_v45 = vpop.f32.mrb[31].mxu1  ;;  %v10029_v2 = vadd.f32 %v4368_v42, %v12292_v27  ;;  %v7596_v5 = vld [vmem:[%s14109_s4 + $0x8] sm:$0xf] }
0x101c   :  { %v10014_v33 = vadd.f32 %v4299_v15, %v12283_v4  ;;  %v10030_v48 = vadd.f32 %v4370_v45, %v12288_v47  ;;  %v13401_v42 = vrot.slane %v7596_v5, %v14134_v53 }
0x101d   :  { %v7529_v22 = vmul.f32 -1.442695, %v10013_v28  ;;  %v13404_v28 = vrot.slane %v7596_v5, %v14135_v61  ;;  %v13413_v61 = vrot.slane %v7596_v5, %v14137_v14 }
0x101e   :  { %v7530_v34 = vmul.f32 -1.442695, %v10014_v33  ;;  %v7531_v23 = vmul.f32 -1.442695, %v10030_v48 }
0x101f   :  { %10371 = vpow2.f32 %v7529_v22 }
0x1020   :  { %10373 = vpow2.f32 %v7530_v34 }
0x1021   :  { %10375 = vpow2.f32 %v7531_v23 }
0x1022   :  { %10377 = vtanh.f32 %v10029_v2 }
0x1029   :  { %v10372_v16 = vpop.eup %10371 }
0x102a   :  { %v10374_v50 = vpop.eup %10373  ;;  %v4376_v26 = vadd.f32 1.0, %v10372_v16  ;;  %v13409_v16 = vrot.slane %v7596_v5, %v14136_v21 }
0x102b   :  { %v4382_v32 = vadd.f32 1.0, %v10374_v50  ;;  %v10376_v58 = vpop.eup %10375 }
0x102c   :  { %10379 = vrcp.f32 %v4376_v26  ;;  %v10378_v20 = vpop.eup %10377  ;;  %v4389_v38 = vadd.f32 1.0, %v10376_v58 }
0x102d   :  { %10381 = vrcp.f32 %v4382_v32 }
0x102e   :  { %10383 = vrcp.f32 %v4389_v38 }
0x1036   :  { %v10380_v4 = vpop.eup %10379 }
0x1037   :  { %v10382_v62 = vpop.eup %10381  ;;  %v4393_v52 = vmul.f32 %v10380_v4, %v10378_v20 }
0x1038   :  { %v4392_v0 = vmul.f32 %v10382_v62, %v12840_v55  ;;  %v10384_v27 = vpop.eup %10383  ;;  %v47_v55 = vld [vmem:[%s14107_s9 + $0x10] sm:$0xff] }
0x103a   :  { %v4394_v47 = vadd.f32 %v4393_v52, %v4392_v0  ;;  %v53_v52 = vld [vmem:[%s14110_s10 + $0x10] sm:$0xff] }
0x103c   :  { %10385 = vtanh.f32 %v4394_v47  ;;  %6950 = vst [vmem:[%s14112_s13 + $0x8] sm:$0xff] %v4394_v47 }
0x1046   :  { %v10386_v59 = vpop.eup %10385 }
0x1047   :  { %v4396_v46 = vmul.f32 %v10386_v59, %v10384_v27 }
0x1049   :  { %4603 = vmatmul.mubr.f32.gmra.mrb[46].mxu0 %v4396_v46  ;;  %4716 = vmatmul.mubr.f32.gmra.mrb[46].mxu1 %v4396_v46  ;;  %6944 = vst [vmem:[%s14113_s12 + $0x8] sm:$0xff] %v4396_v46 }
0x104a   :  { %4891 = vmatprep.mubr.f32.mxu0 %v14133_v60  ;;  %4962 = vmatprep.mubr.f32.mxu1 %v14133_v60 }
0x104d   :  { %4892 = vmatmul.mubr.f32.vlgmr.msra.gmra.mrb[32].mxu0 %v47_v55  ;;  %4963 = vmatmul.mubr.f32.vlgmr.msra.gmra.mrb[32].mxu1 %v47_v55 }
0x104e   :  { %9490 = vmatpush1.bf16.msra.mxu0 %v13077_v24  ;;  %9522 = vmatpush1.bf16.msra.mxu1 %v13088_v44 }
0x104f   :  { %9492 = vmatprep.subr.bf16.mxu0 %v13102_v56  ;;  %9524 = vmatprep.subr.bf16.mxu1 %v13115_v9 }
0x1050   :  { %5126 = vmatprep.mubr.f32.mxu0 %v14133_v60  ;;  %5197 = vmatprep.mubr.f32.mxu1 %v14133_v60 }
0x1052   :  { %9494 = vmatpush1.bf16.msra.mxu0 %v13113_v1  ;;  %9526 = vmatpush1.bf16.msra.mxu1 %v13124_v25 }
0x1053   :  { %9496 = vmatprep.subr.bf16.mxu0 %v13138_v31  ;;  %9528 = vmatprep.subr.bf16.mxu1 %v13151_v35 }
0x1056   :  { %9498 = vmatpush1.bf16.msra.mxu0 %v13149_v51  ;;  %9530 = vmatpush1.bf16.msra.mxu1 %v13160_v37 }
0x1057   :  { %9500 = vmatprep.subr.bf16.mxu0 %v13174_v43  ;;  %9532 = vmatprep.subr.bf16.mxu1 %v13187_v13 }
0x105a   :  { %9502 = vmatpush1.bf16.msra.mxu0 %v13185_v11  ;;  %9534 = vmatpush1.bf16.msra.mxu1 %v13199_v63 }
0x105b   :  { %9504 = vmatprep.subr.bf16.mxu0 %v13212_v12  ;;  %9536 = vmatprep.subr.bf16.mxu1 %v13226_v54 }
0x105e   :  { %9506 = vmatpush1.bf16.msra.mxu0 %v13214_v57  ;;  %9538 = vmatpush1.bf16.msra.mxu1 %v13238_v3 }
0x105f   :  { %9508 = vmatprep.subr.bf16.mxu0 %v13240_v8  ;;  %9540 = vmatprep.subr.bf16.mxu1 %v13264_v29 }
0x1062   :  { %9510 = vmatpush1.bf16.msra.mxu0 %v13262_v36  ;;  %9542 = vmatpush1.bf16.msra.mxu1 %v13277_v41 }
0x1063   :  { %9512 = vmatprep.subr.bf16.mxu0 %v13279_v39  ;;  %9544 = vmatprep.subr.bf16.mxu1 %v13291_v7 }
0x1066   :  { %9514 = vmatpush1.bf16.msra.mxu0 %v13306_v30  ;;  %9546 = vmatpush1.bf16.msra.mxu1 %v13310_v18 }
0x1067   :  { %9516 = vmatprep.subr.bf16.mxu0 %v13312_v40  ;;  %9548 = vmatprep.subr.bf16.mxu1 %v13330_v17 }
0x106a   :  { %9518 = vmatpush1.bf16.msra.mxu0 %v13335_v19  ;;  %9550 = vmatpush1.bf16.msra.mxu1 %v13341_v49 }
0x106b   :  { %9552 = vmatprep.subr.bf16.mxu0 %v13066_v10  ;;  %9584 = vmatprep.subr.bf16.mxu1 %v13079_v6 }
0x1120   :  { %v4893_v15 = vpop.f32.mrb[32].mxu0  ;;  %v4964_v45 = vpop.f32.mrb[32].mxu1 }
0x1121   :  { %v10031_v33 = vadd.f32 %v4893_v15, %v13401_v42  ;;  %v4895_v22 = vpop.f32.mrb[33].mxu0  ;;  %v4966_v34 = vpop.f32.mrb[33].mxu1  ;;  %v10047_v26 = vadd.f32 %v4964_v45, %v13413_v61 }
0x1122   :  { %v10032_v48 = vadd.f32 %v4895_v22, %v13404_v28  ;;  %v10048_v53 = vadd.f32 %v4966_v34, %v13409_v16 }
0x1123   :  { %v7661_v23 = vmul.f32 -1.442695, %v10031_v33 }
0x1124   :  { %v7662_v2 = vmul.f32 -1.442695, %v10032_v48  ;;  %v7663_v50 = vmul.f32 -1.442695, %v10048_v53 }
0x1125   :  { %10387 = vpow2.f32 %v7661_v23 }
0x1126   :  { %10389 = vpow2.f32 %v7662_v2 }
0x1127   :  { %10391 = vpow2.f32 %v7663_v50 }
0x1128   :  { %10393 = vtanh.f32 %v10047_v26 }
0x112f   :  { %v10388_v32 = vpop.eup %10387 }
0x1130   :  { %v10390_v58 = vpop.eup %10389  ;;  %v4972_v20 = vadd.f32 1.0, %v10388_v32 }
0x1131   :  { %v4978_v4 = vadd.f32 1.0, %v10390_v58  ;;  %v10392_v21 = vpop.eup %10391 }
0x1132   :  { %10395 = vrcp.f32 %v4972_v20  ;;  %v10394_v62 = vpop.eup %10393  ;;  %v4985_v47 = vadd.f32 1.0, %v10392_v21 }
0x1133   :  { %10397 = vrcp.f32 %v4978_v4 }
0x1134   :  { %10399 = vrcp.f32 %v4985_v47 }
0x113c   :  { %v10396_v38 = vpop.eup %10395 }
0x113d   :  { %v10398_v14 = vpop.eup %10397  ;;  %v4989_v0 = vmul.f32 %v10396_v38, %v10394_v62 }
0x113e   :  { %v4988_v27 = vmul.f32 %v10398_v14, %v53_v52  ;;  %v10400_v46 = vpop.eup %10399 }
0x1140   :  { %v13419_v59 = vadd.f32 %v4989_v0, %v4988_v27 }
0x1142   :  { %10401 = vtanh.f32 %v13419_v59 }
0x114c   :  { %v10402_v55 = vpop.eup %10401 }
0x114d   :  { %v13422_v5 = vmul.f32 %v10402_v55, %v10400_v46  ;;  %v7865_v55 = vld [vmem:[%s14105_s3 + $0x400] sm:$0xff] }
0x114f   :  { %5127 = vmatmul.mubr.f32.vlgmr.msra.gmra.mrb[34].mxu0 %v13422_v5  ;;  %5198 = vmatmul.mubr.f32.vlgmr.msra.gmra.mrb[34].mxu1 %v13422_v5 }
0x1150   :  { %9554 = vmatpush1.bf16.msra.mxu0 %v13077_v24  ;;  %9586 = vmatpush1.bf16.msra.mxu1 %v13088_v44 }
0x1151   :  { %9556 = vmatprep.subr.bf16.mxu0 %v13102_v56  ;;  %9588 = vmatprep.subr.bf16.mxu1 %v13115_v9 }
0x1152   :  { %5361 = vmatprep.mubr.f32.mxu0 %v14133_v60  ;;  %5432 = vmatprep.mubr.f32.mxu1 %v14133_v60 }
0x1154   :  { %9558 = vmatpush1.bf16.msra.mxu0 %v13113_v1  ;;  %9590 = vmatpush1.bf16.msra.mxu1 %v13124_v25 }
0x1155   :  { %9560 = vmatprep.subr.bf16.mxu0 %v13138_v31  ;;  %9592 = vmatprep.subr.bf16.mxu1 %v13151_v35 }
0x1158   :  { %9562 = vmatpush1.bf16.msra.mxu0 %v13149_v51  ;;  %9594 = vmatpush1.bf16.msra.mxu1 %v13160_v37 }
0x1159   :  { %9564 = vmatprep.subr.bf16.mxu0 %v13174_v43  ;;  %9596 = vmatprep.subr.bf16.mxu1 %v13187_v13 }
0x115c   :  { %9566 = vmatpush1.bf16.msra.mxu0 %v13185_v11  ;;  %9598 = vmatpush1.bf16.msra.mxu1 %v13199_v63 }
0x115d   :  { %9568 = vmatprep.subr.bf16.mxu0 %v13212_v12  ;;  %9600 = vmatprep.subr.bf16.mxu1 %v13226_v54 }
0x1160   :  { %9570 = vmatpush1.bf16.msra.mxu0 %v13214_v57  ;;  %9602 = vmatpush1.bf16.msra.mxu1 %v13238_v3 }
0x1161   :  { %9572 = vmatprep.subr.bf16.mxu0 %v13240_v8  ;;  %9604 = vmatprep.subr.bf16.mxu1 %v13264_v29 }
0x1164   :  { %9574 = vmatpush1.bf16.msra.mxu0 %v13262_v36  ;;  %9606 = vmatpush1.bf16.msra.mxu1 %v13277_v41 }
0x1165   :  { %9576 = vmatprep.subr.bf16.mxu0 %v13279_v39  ;;  %9608 = vmatprep.subr.bf16.mxu1 %v13291_v7 }
0x1168   :  { %9578 = vmatpush1.bf16.msra.mxu0 %v13306_v30  ;;  %9610 = vmatpush1.bf16.msra.mxu1 %v13310_v18 }
0x1169   :  { %9580 = vmatprep.subr.bf16.mxu0 %v13312_v40  ;;  %9612 = vmatprep.subr.bf16.mxu1 %v13330_v17 }
0x116c   :  { %9582 = vmatpush1.bf16.msra.mxu0 %v13335_v19  ;;  %9614 = vmatpush1.bf16.msra.mxu1 %v13341_v49 }
0x116d   :  { %9616 = vmatprep.subr.bf16.mxu0 %v13066_v10  ;;  %9648 = vmatprep.subr.bf16.mxu1 %v13079_v6 }
0x1222   :  { %v5128_v15 = vpop.f32.mrb[34].mxu0  ;;  %v5199_v45 = vpop.f32.mrb[34].mxu1 }
0x1223   :  { %v10033_v33 = vadd.f32 %v5128_v15, %v13401_v42  ;;  %v5130_v22 = vpop.f32.mrb[35].mxu0  ;;  %v5201_v34 = vpop.f32.mrb[35].mxu1  ;;  %v10049_v26 = vadd.f32 %v5199_v45, %v13413_v61  ;;  %v7869_v15 = vld [vmem:[%s14105_s3 + $0x420] sm:$0xff] }
0x1224   :  { %v10034_v48 = vadd.f32 %v5130_v22, %v13404_v28  ;;  %v10050_v53 = vadd.f32 %v5201_v34, %v13409_v16  ;;  %v7867_v22 = vld [vmem:[%s14105_s3 + $0x410] sm:$0xff] }
0x1225   :  { %v7728_v23 = vmul.f32 -1.442695, %v10033_v33  ;;  %v13540_v33 = vpack.c.bf16 %v7869_v15, %v7865_v55  ;;  %v7871_v34 = vld [vmem:[%s14105_s3 + $0x430] sm:$0xff]  ;;  %v7906_v15 = vld [vmem:[%s14105_s3 + $0x548] sm:$0xff] }
0x1226   :  { %v7729_v2 = vmul.f32 -1.442695, %v10034_v48  ;;  %v7730_v50 = vmul.f32 -1.442695, %v10050_v53  ;;  %v13549_v48 = vpack.c.bf16 %v7871_v34, %v7867_v22  ;;  %v7876_v53 = vld [vmem:[%s14105_s3 + $0x458] sm:$0xff]  ;;  %v7910_v22 = vld [vmem:[%s14105_s3 + $0x568] sm:$0xff] }
0x1227   :  { %10403 = vpow2.f32 %v7728_v23  ;;  %v7874_v23 = vld [vmem:[%s14105_s3 + $0x448] sm:$0xff]  ;;  %v7908_v34 = vld [vmem:[%s14105_s3 + $0x558] sm:$0xff] }
0x1228   :  { %10405 = vpow2.f32 %v7729_v2  ;;  %v7878_v2 = vld [vmem:[%s14105_s3 + $0x468] sm:$0xff] }
0x1229   :  { %10407 = vpow2.f32 %v7730_v50  ;;  %v13563_v50 = vpack.c.bf16 %v7878_v2, %v7874_v23  ;;  %v13706_v23 = vpack.c.bf16 %v7910_v22, %v7906_v15  ;;  %v7912_v2 = vld [vmem:[%s14105_s3 + $0x578] sm:$0xff] }
0x122a   :  { %10409 = vtanh.f32 %v10049_v26  ;;  %v7880_v26 = vld [vmem:[%s14105_s3 + $0x478] sm:$0xff] }
0x1231   :  { %v10404_v10 = vpop.eup %10403 }
0x1232   :  { %v10406_v32 = vpop.eup %10405  ;;  %v5207_v6 = vadd.f32 1.0, %v10404_v10  ;;  %v7873_v10 = vld [vmem:[%s14105_s3 + $0x440] sm:$0xff] }
0x1233   :  { %v5213_v58 = vadd.f32 1.0, %v10406_v32  ;;  %v10408_v20 = vpop.eup %10407  ;;  %v7877_v32 = vld [vmem:[%s14105_s3 + $0x460] sm:$0xff] }
0x1234   :  { %10411 = vrcp.f32 %v5207_v6  ;;  %v10410_v4 = vpop.eup %10409  ;;  %v5220_v38 = vadd.f32 1.0, %v10408_v20  ;;  %v13574_v6 = vpack.c.bf16 %v7880_v26, %v7876_v53  ;;  %v7875_v20 = vld [vmem:[%s14105_s3 + $0x450] sm:$0xff]  ;;  %v7905_v53 = vld [vmem:[%s14105_s3 + $0x540] sm:$0xff] }
0x1235   :  { %10413 = vrcp.f32 %v5213_v58  ;;  %v13576_v58 = vpack.c.bf16 %v7877_v32, %v7873_v10  ;;  %v7909_v26 = vld [vmem:[%s14105_s3 + $0x560] sm:$0xff]  ;;  %v13718_v10 = vpack.c.bf16 %v7912_v2, %v7908_v34 }
0x1236   :  { %10415 = vrcp.f32 %v5220_v38  ;;  %v7884_v38 = vld [vmem:[%s14105_s3 + $0x498] sm:$0xff]  ;;  %v13720_v32 = vpack.c.bf16 %v7909_v26, %v7905_v53 }
0x123e   :  { %v10412_v21 = vpop.eup %10411 }
0x123f   :  { %v10414_v62 = vpop.eup %10413  ;;  %v5224_v52 = vmul.f32 %v10412_v21, %v10410_v4  ;;  %v7879_v4 = vld [vmem:[%s14105_s3 + $0x470] sm:$0xff] }
0x1240   :  { %v5223_v14 = vmul.f32 %v10414_v62, %v13419_v59  ;;  %v10416_v47 = vpop.eup %10415  ;;  %v7872_v59 = vld [vmem:[%s14105_s3 + $0x438] sm:$0xff]  ;;  %v13585_v21 = vpack.c.bf16 %v7879_v4, %v7875_v20  ;;  %v7882_v62 = vld [vmem:[%s14105_s3 + $0x488] sm:$0xff]  ;;  %v7907_v20 = vld [vmem:[%s14105_s3 + $0x550] sm:$0xff] }
0x1241   :  { %v7911_v4 = vld [vmem:[%s14105_s3 + $0x570] sm:$0xff] }
0x1242   :  { %v13465_v0 = vadd.f32 %v5224_v52, %v5223_v14  ;;  %v7886_v52 = vld [vmem:[%s14105_s3 + $0x4a8] sm:$0xff] }
0x1243   :  { %v13599_v14 = vpack.c.bf16 %v7886_v52, %v7882_v62  ;;  %v7914_v62 = vld [vmem:[%s14105_s3 + $0x588] sm:$0xff]  ;;  %v13732_v52 = vpack.c.bf16 %v7911_v4, %v7907_v20 }
0x1244   :  { %10417 = vtanh.f32 %v13465_v0 }
0x124e   :  { %v10418_v27 = vpop.eup %10417 }
0x124f   :  { %v13468_v46 = vmul.f32 %v10418_v27, %v10416_v47  ;;  %v7881_v47 = vld [vmem:[%s14105_s3 + $0x480] sm:$0xff] }
0x1250   :  { %v7885_v27 = vld [vmem:[%s14105_s3 + $0x4a0] sm:$0xff] }
0x1251   :  { %5362 = vmatmul.mubr.f32.vlgmr.msra.gmra.mrb[36].mxu0 %v13468_v46  ;;  %5433 = vmatmul.mubr.f32.vlgmr.msra.gmra.mrb[36].mxu1 %v13468_v46 }
0x1252   :  { %9618 = vmatpush1.bf16.msra.mxu0 %v13077_v24  ;;  %9650 = vmatpush1.bf16.msra.mxu1 %v13088_v44 }
0x1253   :  { %9620 = vmatprep.subr.bf16.mxu0 %v13102_v56  ;;  %9652 = vmatprep.subr.bf16.mxu1 %v13115_v9 }
0x1254   :  { %5596 = vmatprep.mubr.f32.mxu0 %v14133_v60  ;;  %5667 = vmatprep.mubr.f32.mxu1 %v14133_v60 }
0x1256   :  { %9622 = vmatpush1.bf16.msra.mxu0 %v13113_v1  ;;  %9654 = vmatpush1.bf16.msra.mxu1 %v13124_v25 }
0x1257   :  { %9624 = vmatprep.subr.bf16.mxu0 %v13138_v31  ;;  %9656 = vmatprep.subr.bf16.mxu1 %v13151_v35 }
0x125a   :  { %9626 = vmatpush1.bf16.msra.mxu0 %v13149_v51  ;;  %9658 = vmatpush1.bf16.msra.mxu1 %v13160_v37 }
0x125b   :  { %9628 = vmatprep.subr.bf16.mxu0 %v13174_v43  ;;  %9660 = vmatprep.subr.bf16.mxu1 %v13187_v13 }
0x125e   :  { %9630 = vmatpush1.bf16.msra.mxu0 %v13185_v11  ;;  %9662 = vmatpush1.bf16.msra.mxu1 %v13199_v63 }
0x125f   :  { %9632 = vmatprep.subr.bf16.mxu0 %v13212_v12  ;;  %9664 = vmatprep.subr.bf16.mxu1 %v13226_v54 }
0x1262   :  { %9634 = vmatpush1.bf16.msra.mxu0 %v13214_v57  ;;  %9666 = vmatpush1.bf16.msra.mxu1 %v13238_v3 }
0x1263   :  { %9636 = vmatprep.subr.bf16.mxu0 %v13240_v8  ;;  %9668 = vmatprep.subr.bf16.mxu1 %v13264_v29 }
0x1266   :  { %9638 = vmatpush1.bf16.msra.mxu0 %v13262_v36  ;;  %9670 = vmatpush1.bf16.msra.mxu1 %v13277_v41 }
0x1267   :  { %9640 = vmatprep.subr.bf16.mxu0 %v13279_v39  ;;  %9672 = vmatprep.subr.bf16.mxu1 %v13291_v7 }
0x126a   :  { %9642 = vmatpush1.bf16.msra.mxu0 %v13306_v30  ;;  %9674 = vmatpush1.bf16.msra.mxu1 %v13310_v18 }
0x126b   :  { %9644 = vmatprep.subr.bf16.mxu0 %v13312_v40  ;;  %9676 = vmatprep.subr.bf16.mxu1 %v13330_v17  ;;  %v7866_v40 = vld [vmem:[%s14105_s3 + $0x408] sm:$0xff] }
0x126c   :  { %v7870_v17 = vld [vmem:[%s14105_s3 + $0x428] sm:$0xff] }
0x126e   :  { %9646 = vmatpush1.bf16.msra.mxu0 %v13335_v19  ;;  %9678 = vmatpush1.bf16.msra.mxu1 %v13341_v49  ;;  %v7868_v19 = vld [vmem:[%s14105_s3 + $0x418] sm:$0xff]  ;;  %v13527_v49 = vpack.c.bf16 %v7870_v17, %v7866_v40 }
0x126f   :  { %v13538_v45 = vpack.c.bf16 %v7872_v59, %v7868_v19  ;;  %v7899_v19 = vld [vmem:[%s14105_s3 + $0x510] sm:$0xff] }
0x1270   :  { %9680 = vmatprep.subr.bf16.mxu0 %v13527_v49  ;;  %v7903_v59 = vld [vmem:[%s14105_s3 + $0x530] sm:$0xff] }
0x1271   :  { %9712 = vmatprep.subr.bf16.mxu1 %v13538_v45  ;;  %v13693_v55 = vpack.c.bf16 %v7903_v59, %v7899_v19  ;;  %v7927_v19 = vld [vmem:[%s14105_s3 + $0x5f0] sm:$0xff] }
0x1324   :  { %v5363_v24 = vpop.f32.mrb[36].mxu0  ;;  %v5434_v44 = vpop.f32.mrb[36].mxu1 }
0x1325   :  { %v10035_v56 = vadd.f32 %v5363_v24, %v13401_v42  ;;  %v5365_v1 = vpop.f32.mrb[37].mxu0  ;;  %v5436_v9 = vpop.f32.mrb[37].mxu1  ;;  %v10051_v43 = vadd.f32 %v5434_v44, %v13413_v61  ;;  %v13612_v44 = vpack.c.bf16 %v7885_v27, %v7881_v47  ;;  %v7920_v47 = vld [vmem:[%s14105_s3 + $0x5b8] sm:$0xff] }
0x1326   :  { %v10036_v25 = vadd.f32 %v5365_v1, %v13404_v28  ;;  %v10052_v35 = vadd.f32 %v5436_v9, %v13409_v16  ;;  %v7887_v1 = vld [vmem:[%s14105_s3 + $0x4b0] sm:$0xff] }
0x1327   :  { %v7795_v31 = vmul.f32 -1.442695, %v10035_v56  ;;  %v7883_v56 = vld [vmem:[%s14105_s3 + $0x490] sm:$0xff] }
0x1328   :  { %v7796_v51 = vmul.f32 -1.442695, %v10036_v25  ;;  %v7797_v37 = vmul.f32 -1.442695, %v10052_v35  ;;  %v13621_v9 = vpack.c.bf16 %v7887_v1, %v7883_v56  ;;  %v7890_v25 = vld [vmem:[%s14105_s3 + $0x4c8] sm:$0xff]  ;;  %v7913_v1 = vld [vmem:[%s14105_s3 + $0x580] sm:$0xff] }
0x1329   :  { %10419 = vpow2.f32 %v7795_v31  ;;  %v7894_v31 = vld [vmem:[%s14105_s3 + $0x4e8] sm:$0xff] }
0x132a   :  { %10421 = vpow2.f32 %v7796_v51  ;;  %v7892_v51 = vld [vmem:[%s14105_s3 + $0x4d8] sm:$0xff]  ;;  %v13635_v35 = vpack.c.bf16 %v7894_v31, %v7890_v25  ;;  %v7917_v25 = vld [vmem:[%s14105_s3 + $0x5a0] sm:$0xff]  ;;  %v7915_v31 = vld [vmem:[%s14105_s3 + $0x590] sm:$0xff] }
0x132b   :  { %10423 = vpow2.f32 %v7797_v37  ;;  %v7896_v37 = vld [vmem:[%s14105_s3 + $0x4f8] sm:$0xff] }
0x132c   :  { %10425 = vtanh.f32 %v10051_v43  ;;  %v7889_v43 = vld [vmem:[%s14105_s3 + $0x4c0] sm:$0xff] }
0x1333   :  { %v10420_v11 = vpop.eup %10419 }
0x1334   :  { %v10422_v13 = vpop.eup %10421  ;;  %v5442_v63 = vadd.f32 1.0, %v10420_v11  ;;  %v7893_v11 = vld [vmem:[%s14105_s3 + $0x4e0] sm:$0xff] }
0x1335   :  { %v5448_v12 = vadd.f32 1.0, %v10422_v13  ;;  %v10424_v57 = vpop.eup %10423  ;;  %v13646_v13 = vpack.c.bf16 %v7896_v37, %v7892_v51  ;;  %v13758_v51 = vpack.c.bf16 %v7917_v25, %v7913_v1  ;;  %v7919_v37 = vld [vmem:[%s14105_s3 + $0x5b0] sm:$0xff] }
0x1336   :  { %10427 = vrcp.f32 %v5442_v63  ;;  %v10426_v54 = vpop.eup %10425  ;;  %v5455_v29 = vadd.f32 1.0, %v10424_v57  ;;  %v13648_v63 = vpack.c.bf16 %v7893_v11, %v7889_v43  ;;  %v7895_v57 = vld [vmem:[%s14105_s3 + $0x4f0] sm:$0xff]  ;;  %v7922_v43 = vld [vmem:[%s14105_s3 + $0x5c8] sm:$0xff] }
0x1337   :  { %10429 = vrcp.f32 %v5448_v12  ;;  %v7891_v12 = vld [vmem:[%s14105_s3 + $0x4d0] sm:$0xff]  ;;  %v7926_v11 = vld [vmem:[%s14105_s3 + $0x5e8] sm:$0xff] }
0x1338   :  { %10431 = vrcp.f32 %v5455_v29 }
0x1340   :  { %v10428_v3 = vpop.eup %10427 }
0x1341   :  { %v10430_v8 = vpop.eup %10429  ;;  %v5459_v36 = vmul.f32 %v10428_v3, %v10426_v54  ;;  %v13657_v54 = vpack.c.bf16 %v7895_v57, %v7891_v12  ;;  %v7898_v3 = vld [vmem:[%s14105_s3 + $0x508] sm:$0xff]  ;;  %v13771_v12 = vpack.c.bf16 %v7919_v37, %v7915_v31  ;;  %v13773_v57 = vpack.c.bf16 %v7926_v11, %v7922_v43 }
0x1342   :  { %v5458_v41 = vmul.f32 %v10430_v8, %v13465_v0  ;;  %v10432_v7 = vpop.eup %10431  ;;  %v7888_v0 = vld [vmem:[%s14105_s3 + $0x4b8] sm:$0xff]  ;;  %v7902_v8 = vld [vmem:[%s14105_s3 + $0x528] sm:$0xff] }
0x1343   :  { %v13610_v24 = vpack.c.bf16 %v7888_v0, %v7884_v38  ;;  %v13671_v29 = vpack.c.bf16 %v7902_v8, %v7898_v3  ;;  %v7918_v38 = vld [vmem:[%s14105_s3 + $0x5a8] sm:$0xff]  ;;  %v7916_v0 = vld [vmem:[%s14105_s3 + $0x598] sm:$0xff] }
0x1344   :  { %v13509_v39 = vadd.f32 %v5459_v36, %v5458_v41  ;;  %v7900_v36 = vld [vmem:[%s14105_s3 + $0x518] sm:$0xff]  ;;  %v13744_v27 = vpack.c.bf16 %v7918_v38, %v7914_v62  ;;  %v13746_v56 = vpack.c.bf16 %v7920_v47, %v7916_v0 }
0x1345   :  { %v7904_v41 = vld [vmem:[%s14105_s3 + $0x538] sm:$0xff] }
0x1346   :  { %10433 = vtanh.f32 %v13509_v39  ;;  %v13682_v40 = vpack.c.bf16 %v7904_v41, %v7900_v36  ;;  %v7924_v3 = vld [vmem:[%s14105_s3 + $0x5d8] sm:$0xff]  ;;  %v7921_v36 = vld [vmem:[%s14105_s3 + $0x5c0] sm:$0xff] }
0x1347   :  { %v7928_v8 = vld [vmem:[%s14105_s3 + $0x5f8] sm:$0xff] }
0x1348   :  { %v13785_v41 = vpack.c.bf16 %v7928_v8, %v7924_v3 }
0x1350   :  { %v10434_v30 = vpop.eup %10433 }
0x1351   :  { %v13512_v18 = vmul.f32 %v10434_v30, %v10432_v7  ;;  %v7897_v7 = vld [vmem:[%s14105_s3 + $0x500] sm:$0xff] }
0x1352   :  { %v7901_v30 = vld [vmem:[%s14105_s3 + $0x520] sm:$0xff] }
0x1353   :  { %5597 = vmatmul.mubr.f32.vlgmr.msra.gmra.mrb[38].mxu0 %v13512_v18  ;;  %5668 = vmatmul.mubr.f32.vlgmr.msra.gmra.mrb[38].mxu1 %v13512_v18  ;;  %v13684_v17 = vpack.c.bf16 %v7901_v30, %v7897_v7  ;;  %v7925_v7 = vld [vmem:[%s14105_s3 + $0x5e0] sm:$0xff]  ;;  %v7923_v30 = vld [vmem:[%s14105_s3 + $0x5d0] sm:$0xff] }
0x1354   :  { %5831 = vmatprep.mubr.f32.mxu0 %v14133_v60  ;;  %5902 = vmatprep.mubr.f32.mxu1 %v14133_v60  ;;  %v13797_v59 = vpack.c.bf16 %v7925_v7, %v7921_v36  ;;  %v13801_v15 = vpack.c.bf16 %v7927_v19, %v7923_v30 }
0x1355   :  { %9682 = vmatpush1.bf16.msra.mxu0 %v13540_v33  ;;  %9714 = vmatpush1.bf16.msra.mxu1 %v13549_v48 }
0x1356   :  { %9684 = vmatprep.subr.bf16.mxu0 %v13563_v50  ;;  %9716 = vmatprep.subr.bf16.mxu1 %v13574_v6 }
0x1359   :  { %9686 = vmatpush1.bf16.msra.mxu0 %v13576_v58  ;;  %9718 = vmatpush1.bf16.msra.mxu1 %v13585_v21 }
0x135a   :  { %9688 = vmatprep.subr.bf16.mxu0 %v13599_v14  ;;  %9720 = vmatprep.subr.bf16.mxu1 %v13610_v24 }
0x135d   :  { %9690 = vmatpush1.bf16.msra.mxu0 %v13612_v44  ;;  %9722 = vmatpush1.bf16.msra.mxu1 %v13621_v9 }
0x135e   :  { %9692 = vmatprep.subr.bf16.mxu0 %v13635_v35  ;;  %9724 = vmatprep.subr.bf16.mxu1 %v13646_v13 }
0x1361   :  { %9694 = vmatpush1.bf16.msra.mxu0 %v13648_v63  ;;  %9726 = vmatpush1.bf16.msra.mxu1 %v13657_v54 }
0x1362   :  { %9696 = vmatprep.subr.bf16.mxu0 %v13671_v29  ;;  %9728 = vmatprep.subr.bf16.mxu1 %v13682_v40 }
0x1365   :  { %9698 = vmatpush1.bf16.msra.mxu0 %v13684_v17  ;;  %9730 = vmatpush1.bf16.msra.mxu1 %v13693_v55 }
0x1366   :  { %9700 = vmatprep.subr.bf16.mxu0 %v13706_v23  ;;  %9732 = vmatprep.subr.bf16.mxu1 %v13718_v10 }
0x1369   :  { %9702 = vmatpush1.bf16.msra.mxu0 %v13720_v32  ;;  %9734 = vmatpush1.bf16.msra.mxu1 %v13732_v52 }
0x136a   :  { %9704 = vmatprep.subr.bf16.mxu0 %v13744_v27  ;;  %9736 = vmatprep.subr.bf16.mxu1 %v13746_v56 }
0x136d   :  { %9706 = vmatpush1.bf16.msra.mxu0 %v13758_v51  ;;  %9738 = vmatpush1.bf16.msra.mxu1 %v13771_v12 }
0x136e   :  { %9708 = vmatprep.subr.bf16.mxu0 %v13773_v57  ;;  %9740 = vmatprep.subr.bf16.mxu1 %v13785_v41 }
0x1371   :  { %9710 = vmatpush1.bf16.msra.mxu0 %v13797_v59  ;;  %9742 = vmatpush1.bf16.msra.mxu1 %v13801_v15 }
0x1372   :  { %9744 = vmatprep.subr.bf16.mxu0 %v13527_v49  ;;  %9776 = vmatprep.subr.bf16.mxu1 %v13538_v45 }
0x1426   :  { %v5598_v22 = vpop.f32.mrb[38].mxu0  ;;  %v5669_v34 = vpop.f32.mrb[38].mxu1 }
0x1427   :  { %v10037_v2 = vadd.f32 %v5598_v22, %v13401_v42  ;;  %v5600_v53 = vpop.f32.mrb[39].mxu0  ;;  %v5671_v26 = vpop.f32.mrb[39].mxu1  ;;  %v10053_v47 = vadd.f32 %v5669_v34, %v13413_v61 }
0x1428   :  { %v10038_v20 = vadd.f32 %v5600_v53, %v13404_v28  ;;  %v10054_v38 = vadd.f32 %v5671_v26, %v13409_v16 }
0x1429   :  { %v7862_v4 = vmul.f32 -1.442695, %v10037_v2 }
0x142a   :  { %v7863_v62 = vmul.f32 -1.442695, %v10038_v20  ;;  %v7864_v0 = vmul.f32 -1.442695, %v10054_v38 }
0x142b   :  { %10435 = vpow2.f32 %v7862_v4 }
0x142c   :  { %10437 = vpow2.f32 %v7863_v62 }
0x142d   :  { %10439 = vpow2.f32 %v7864_v0 }
0x142e   :  { %10441 = vtanh.f32 %v10053_v47 }
0x1435   :  { %v10436_v1 = vpop.eup %10435 }
0x1436   :  { %v10438_v25 = vpop.eup %10437  ;;  %v5677_v31 = vadd.f32 1.0, %v10436_v1 }
0x1437   :  { %v5683_v37 = vadd.f32 1.0, %v10438_v25  ;;  %v10440_v43 = vpop.eup %10439 }
0x1438   :  { %10443 = vrcp.f32 %v5677_v31  ;;  %v10442_v11 = vpop.eup %10441  ;;  %v5690_v7 = vadd.f32 1.0, %v10440_v43 }
0x1439   :  { %10445 = vrcp.f32 %v5683_v37 }
0x143a   :  { %10447 = vrcp.f32 %v5690_v7 }
0x1442   :  { %v10444_v3 = vpop.eup %10443 }
0x1443   :  { %v10446_v8 = vpop.eup %10445  ;;  %v5694_v36 = vmul.f32 %v10444_v3, %v10442_v11 }
0x1444   :  { %v5693_v30 = vmul.f32 %v10446_v8, %v13509_v39  ;;  %v10448_v22 = vpop.eup %10447 }
0x1446   :  { %v13813_v19 = vadd.f32 %v5694_v36, %v5693_v30 }
0x1448   :  { %10449 = vtanh.f32 %v13813_v19 }
0x1452   :  { %v10450_v34 = vpop.eup %10449 }
0x1453   :  { %v13816_v2 = vmul.f32 %v10450_v34, %v10448_v22 }
0x1455   :  { %5832 = vmatmul.mubr.f32.vlgmr.msra.gmra.mrb[40].mxu0 %v13816_v2  ;;  %5903 = vmatmul.mubr.f32.vlgmr.msra.gmra.mrb[40].mxu1 %v13816_v2 }
0x1456   :  { %9746 = vmatpush1.bf16.msra.mxu0 %v13540_v33  ;;  %9778 = vmatpush1.bf16.msra.mxu1 %v13549_v48 }
0x1457   :  { %9748 = vmatprep.subr.bf16.mxu0 %v13563_v50  ;;  %9780 = vmatprep.subr.bf16.mxu1 %v13574_v6 }
0x1458   :  { %6066 = vmatprep.mubr.f32.mxu0 %v14133_v60  ;;  %6137 = vmatprep.mubr.f32.mxu1 %v14133_v60 }
0x145a   :  { %9750 = vmatpush1.bf16.msra.mxu0 %v13576_v58  ;;  %9782 = vmatpush1.bf16.msra.mxu1 %v13585_v21 }
0x145b   :  { %9752 = vmatprep.subr.bf16.mxu0 %v13599_v14  ;;  %9784 = vmatprep.subr.bf16.mxu1 %v13610_v24 }
0x145e   :  { %9754 = vmatpush1.bf16.msra.mxu0 %v13612_v44  ;;  %9786 = vmatpush1.bf16.msra.mxu1 %v13621_v9 }
0x145f   :  { %9756 = vmatprep.subr.bf16.mxu0 %v13635_v35  ;;  %9788 = vmatprep.subr.bf16.mxu1 %v13646_v13 }
0x1462   :  { %9758 = vmatpush1.bf16.msra.mxu0 %v13648_v63  ;;  %9790 = vmatpush1.bf16.msra.mxu1 %v13657_v54 }
0x1463   :  { %9760 = vmatprep.subr.bf16.mxu0 %v13671_v29  ;;  %9792 = vmatprep.subr.bf16.mxu1 %v13682_v40 }
0x1466   :  { %9762 = vmatpush1.bf16.msra.mxu0 %v13684_v17  ;;  %9794 = vmatpush1.bf16.msra.mxu1 %v13693_v55 }
0x1467   :  { %9764 = vmatprep.subr.bf16.mxu0 %v13706_v23  ;;  %9796 = vmatprep.subr.bf16.mxu1 %v13718_v10 }
0x146a   :  { %9766 = vmatpush1.bf16.msra.mxu0 %v13720_v32  ;;  %9798 = vmatpush1.bf16.msra.mxu1 %v13732_v52 }
0x146b   :  { %9768 = vmatprep.subr.bf16.mxu0 %v13744_v27  ;;  %9800 = vmatprep.subr.bf16.mxu1 %v13746_v56 }
0x146e   :  { %9770 = vmatpush1.bf16.msra.mxu0 %v13758_v51  ;;  %9802 = vmatpush1.bf16.msra.mxu1 %v13771_v12 }
0x146f   :  { %9772 = vmatprep.subr.bf16.mxu0 %v13773_v57  ;;  %9804 = vmatprep.subr.bf16.mxu1 %v13785_v41 }
0x1472   :  { %9774 = vmatpush1.bf16.msra.mxu0 %v13797_v59  ;;  %9806 = vmatpush1.bf16.msra.mxu1 %v13801_v15 }
0x1473   :  { %9808 = vmatprep.subr.bf16.mxu0 %v13527_v49  ;;  %9840 = vmatprep.subr.bf16.mxu1 %v13538_v45 }
0x1528   :  { %v5833_v39 = vpop.f32.mrb[40].mxu0  ;;  %v5904_v53 = vpop.f32.mrb[40].mxu1 }
0x1529   :  { %v10039_v26 = vadd.f32 %v5833_v39, %v13401_v42  ;;  %v5835_v20 = vpop.f32.mrb[41].mxu0  ;;  %v5906_v4 = vpop.f32.mrb[41].mxu1  ;;  %v10055_v25 = vadd.f32 %v5904_v53, %v13413_v61 }
0x152a   :  { %v10040_v62 = vadd.f32 %v5835_v20, %v13404_v28  ;;  %v10056_v47 = vadd.f32 %v5906_v4, %v13409_v16 }
0x152b   :  { %v7929_v38 = vmul.f32 -1.442695, %v10039_v26 }
0x152c   :  { %v7930_v0 = vmul.f32 -1.442695, %v10040_v62  ;;  %v7931_v1 = vmul.f32 -1.442695, %v10056_v47 }
0x152d   :  { %10451 = vpow2.f32 %v7929_v38 }
0x152e   :  { %10453 = vpow2.f32 %v7930_v0 }
0x152f   :  { %10455 = vpow2.f32 %v7931_v1 }
0x1530   :  { %10457 = vtanh.f32 %v10055_v25 }
0x1537   :  { %v10452_v31 = vpop.eup %10451 }
0x1538   :  { %v10454_v37 = vpop.eup %10453  ;;  %v5912_v43 = vadd.f32 1.0, %v10452_v31 }
0x1539   :  { %v5918_v11 = vadd.f32 1.0, %v10454_v37  ;;  %v10456_v3 = vpop.eup %10455 }
0x153a   :  { %10459 = vrcp.f32 %v5912_v43  ;;  %v10458_v8 = vpop.eup %10457  ;;  %v5925_v22 = vadd.f32 1.0, %v10456_v3 }
0x153b   :  { %10461 = vrcp.f32 %v5918_v11 }
0x153c   :  { %10463 = vrcp.f32 %v5925_v22 }
0x1544   :  { %v10460_v36 = vpop.eup %10459 }
0x1545   :  { %v10462_v7 = vpop.eup %10461  ;;  %v5929_v30 = vmul.f32 %v10460_v36, %v10458_v8 }
0x1546   :  { %v5928_v34 = vmul.f32 %v10462_v7, %v13813_v19  ;;  %v10464_v53 = vpop.eup %10463 }
0x1548   :  { %v13859_v39 = vadd.f32 %v5929_v30, %v5928_v34 }
0x154a   :  { %10465 = vtanh.f32 %v13859_v39 }
0x1554   :  { %v10466_v26 = vpop.eup %10465 }
0x1555   :  { %v13862_v20 = vmul.f32 %v10466_v26, %v10464_v53 }
0x1557   :  { %6067 = vmatmul.mubr.f32.vlgmr.msra.gmra.mrb[42].mxu0 %v13862_v20  ;;  %6138 = vmatmul.mubr.f32.vlgmr.msra.gmra.mrb[42].mxu1 %v13862_v20 }
0x1558   :  { %9810 = vmatpush1.bf16.msra.mxu0 %v13540_v33  ;;  %9842 = vmatpush1.bf16.msra.mxu1 %v13549_v48 }
0x1559   :  { %9812 = vmatprep.subr.bf16.mxu0 %v13563_v50  ;;  %9844 = vmatprep.subr.bf16.mxu1 %v13574_v6 }
0x155a   :  { %6301 = vmatprep.mubr.f32.mxu0 %v14133_v60  ;;  %6372 = vmatprep.mubr.f32.mxu1 %v14133_v60 }
0x155c   :  { %9814 = vmatpush1.bf16.msra.mxu0 %v13576_v58  ;;  %9846 = vmatpush1.bf16.msra.mxu1 %v13585_v21 }
0x155d   :  { %9816 = vmatprep.subr.bf16.mxu0 %v13599_v14  ;;  %9848 = vmatprep.subr.bf16.mxu1 %v13610_v24 }
0x1560   :  { %9818 = vmatpush1.bf16.msra.mxu0 %v13612_v44  ;;  %9850 = vmatpush1.bf16.msra.mxu1 %v13621_v9 }
0x1561   :  { %9820 = vmatprep.subr.bf16.mxu0 %v13635_v35  ;;  %9852 = vmatprep.subr.bf16.mxu1 %v13646_v13 }
0x1564   :  { %9822 = vmatpush1.bf16.msra.mxu0 %v13648_v63  ;;  %9854 = vmatpush1.bf16.msra.mxu1 %v13657_v54 }
0x1565   :  { %9824 = vmatprep.subr.bf16.mxu0 %v13671_v29  ;;  %9856 = vmatprep.subr.bf16.mxu1 %v13682_v40 }
0x1568   :  { %9826 = vmatpush1.bf16.msra.mxu0 %v13684_v17  ;;  %9858 = vmatpush1.bf16.msra.mxu1 %v13693_v55 }
0x1569   :  { %9828 = vmatprep.subr.bf16.mxu0 %v13706_v23  ;;  %9860 = vmatprep.subr.bf16.mxu1 %v13718_v10 }
0x156c   :  { %9830 = vmatpush1.bf16.msra.mxu0 %v13720_v32  ;;  %9862 = vmatpush1.bf16.msra.mxu1 %v13732_v52 }
0x156d   :  { %9832 = vmatprep.subr.bf16.mxu0 %v13744_v27  ;;  %9864 = vmatprep.subr.bf16.mxu1 %v13746_v56 }
0x1570   :  { %9834 = vmatpush1.bf16.msra.mxu0 %v13758_v51  ;;  %9866 = vmatpush1.bf16.msra.mxu1 %v13771_v12 }
0x1571   :  { %9836 = vmatprep.subr.bf16.mxu0 %v13773_v57  ;;  %9868 = vmatprep.subr.bf16.mxu1 %v13785_v41 }
0x1574   :  { %9838 = vmatpush1.bf16.msra.mxu0 %v13797_v59  ;;  %9870 = vmatpush1.bf16.msra.mxu1 %v13801_v15 }
0x1575   :  { %9872 = vmatprep.subr.bf16.mxu0 %v13527_v49  ;;  %9904 = vmatprep.subr.bf16.mxu1 %v13538_v45 }
0x162a   :  { %v6068_v19 = vpop.f32.mrb[42].mxu0  ;;  %v6139_v4 = vpop.f32.mrb[42].mxu1 }
0x162b   :  { %v10041_v62 = vadd.f32 %v6068_v19, %v13401_v42  ;;  %v6070_v38 = vpop.f32.mrb[43].mxu0  ;;  %v6141_v0 = vpop.f32.mrb[43].mxu1  ;;  %v10057_v43 = vadd.f32 %v6139_v4, %v13413_v61 }
0x162c   :  { %v10042_v47 = vadd.f32 %v6070_v38, %v13404_v28  ;;  %v10058_v31 = vadd.f32 %v6141_v0, %v13409_v16  ;;  %v6653_v38 = vld [vmem:[%s14114_s5 + $0x20] sm:$0xff]  ;;  %v6654_v0 = vld [vmem:[%s14114_s5 + $0x28] sm:$0xff] }
0x162d   :  { %v7996_v1 = vmul.f32 -1.442695, %v10041_v62 }
0x162e   :  { %v7997_v25 = vmul.f32 -1.442695, %v10042_v47  ;;  %v7998_v37 = vmul.f32 -1.442695, %v10058_v31  ;;  %v9943_v47 = vpack.c.bf16 %v6654_v0, %v6653_v38 }
0x162f   :  { %10467 = vpow2.f32 %v7996_v1  ;;  %v6655_v1 = vld [vmem:[%s14114_s5 + $0x30] sm:$0xff] }
0x1630   :  { %10469 = vpow2.f32 %v7997_v25  ;;  %v6656_v25 = vld [vmem:[%s14114_s5 + $0x38] sm:$0xff] }
0x1631   :  { %10471 = vpow2.f32 %v7998_v37  ;;  %v9947_v31 = vpack.c.bf16 %v6656_v25, %v6655_v1  ;;  %v6657_v37 = vld [vmem:[%s14114_s5 + $0x40] sm:$0xff] }
0x1632   :  { %10473 = vtanh.f32 %v10057_v43 }
0x1639   :  { %v10468_v49 = vpop.eup %10467 }
0x163a   :  { %v10470_v11 = vpop.eup %10469  ;;  %v6147_v45 = vadd.f32 1.0, %v10468_v49  ;;  %v6659_v49 = vld [vmem:[%s14114_s5 + $0x50] sm:$0xff] }
0x163b   :  { %v6153_v3 = vadd.f32 1.0, %v10470_v11  ;;  %v10472_v8 = vpop.eup %10471  ;;  %v6660_v11 = vld [vmem:[%s14114_s5 + $0x58] sm:$0xff] }
0x163c   :  { %10475 = vrcp.f32 %v6147_v45  ;;  %v10474_v36 = vpop.eup %10473  ;;  %v6160_v34 = vadd.f32 1.0, %v10472_v8  ;;  %v9955_v45 = vpack.c.bf16 %v6660_v11, %v6659_v49  ;;  %v6662_v8 = vld [vmem:[%s14114_s5 + $0x68] sm:$0xff] }
0x163d   :  { %10477 = vrcp.f32 %v6153_v3  ;;  %v6661_v3 = vld [vmem:[%s14114_s5 + $0x60] sm:$0xff] }
0x163e   :  { %10479 = vrcp.f32 %v6160_v34  ;;  %v6801_v34 = vld [vmem:[%s14115_s7] sm:$0xff] }
0x1646   :  { %v10476_v7 = vpop.eup %10475 }
0x1647   :  { %v10478_v30 = vpop.eup %10477  ;;  %v6164_v22 = vmul.f32 %v10476_v7, %v10474_v36  ;;  %v9959_v36 = vpack.c.bf16 %v6662_v8, %v6661_v3  ;;  %v6663_v7 = vld [vmem:[%s14114_s5 + $0x70] sm:$0xff] }
0x1648   :  { %v6163_v53 = vmul.f32 %v10478_v30, %v13859_v39  ;;  %v10480_v19 = vpop.eup %10479  ;;  %v6664_v30 = vld [vmem:[%s14114_s5 + $0x78] sm:$0xff] }
0x164a   :  { %v13905_v26 = vadd.f32 %v6164_v22, %v6163_v53  ;;  %v9963_v22 = vpack.c.bf16 %v6664_v30, %v6663_v7  ;;  %v6802_v53 = vld [vmem:[%s14115_s7 + $0x8] sm:$0xff] }
0x164c   :  { %10481 = vtanh.f32 %v13905_v26 }
0x1656   :  { %v10482_v4 = vpop.eup %10481 }
0x1657   :  { %v13908_v62 = vmul.f32 %v10482_v4, %v10480_v19  ;;  %v6806_v19 = vld [vmem:[%s14115_s7 + $0x28] sm:$0xff] }
0x1659   :  { %6302 = vmatmul.mubr.f32.vlgmr.msra.gmra.mrb[44].mxu0 %v13908_v62  ;;  %6373 = vmatmul.mubr.f32.vlgmr.msra.gmra.mrb[44].mxu1 %v13908_v62 }
0x165a   :  { %9874 = vmatpush1.bf16.msra.mxu0 %v13540_v33  ;;  %9906 = vmatpush1.bf16.msra.mxu1 %v13549_v48  ;;  %v6650_v33 = vld [vmem:[%s14114_s5 + $0x8] sm:$0xff] }
0x165b   :  { %9876 = vmatprep.subr.bf16.mxu0 %v13563_v50  ;;  %9908 = vmatprep.subr.bf16.mxu1 %v13574_v6 }
0x165c   :  { %6536 = vmatprep.mubr.f32.mxu0 %v14133_v60  ;;  %6607 = vmatprep.mubr.f32.mxu1 %v14133_v60  ;;  %v6649_v60 = vld [vmem:[%s14114_s5] sm:$0xff] }
0x165d   :  { %v9935_v48 = vpack.c.bf16 %v6650_v33, %v6649_v60  ;;  %v6808_v60 = vld [vmem:[%s14115_s7 + $0x38] sm:$0xff] }
0x165e   :  { %9878 = vmatpush1.bf16.msra.mxu0 %v13576_v58  ;;  %9910 = vmatpush1.bf16.msra.mxu1 %v13585_v21 }
0x165f   :  { %9880 = vmatprep.subr.bf16.mxu0 %v13599_v14  ;;  %9912 = vmatprep.subr.bf16.mxu1 %v13610_v24 }
0x1662   :  { %9882 = vmatpush1.bf16.msra.mxu0 %v13612_v44  ;;  %9914 = vmatpush1.bf16.msra.mxu1 %v13621_v9 }
0x1663   :  { %9884 = vmatprep.subr.bf16.mxu0 %v13635_v35  ;;  %9916 = vmatprep.subr.bf16.mxu1 %v13646_v13 }
0x1666   :  { %9886 = vmatpush1.bf16.msra.mxu0 %v13648_v63  ;;  %9918 = vmatpush1.bf16.msra.mxu1 %v13657_v54 }
0x1667   :  { %9888 = vmatprep.subr.bf16.mxu0 %v13671_v29  ;;  %9920 = vmatprep.subr.bf16.mxu1 %v13682_v40 }
0x166a   :  { %9890 = vmatpush1.bf16.msra.mxu0 %v13684_v17  ;;  %9922 = vmatpush1.bf16.msra.mxu1 %v13693_v55 }
0x166b   :  { %9892 = vmatprep.subr.bf16.mxu0 %v13706_v23  ;;  %9924 = vmatprep.subr.bf16.mxu1 %v13718_v10 }
0x166e   :  { %9894 = vmatpush1.bf16.msra.mxu0 %v13720_v32  ;;  %9926 = vmatpush1.bf16.msra.mxu1 %v13732_v52 }
0x166f   :  { %9896 = vmatprep.subr.bf16.mxu0 %v13744_v27  ;;  %9928 = vmatprep.subr.bf16.mxu1 %v13746_v56 }
0x1672   :  { %9898 = vmatpush1.bf16.msra.mxu0 %v13758_v51  ;;  %9930 = vmatpush1.bf16.msra.mxu1 %v13771_v12  ;;  %v6651_v12 = vld [vmem:[%s14114_s5 + $0x10] sm:$0xff] }
0x1673   :  { %9900 = vmatprep.subr.bf16.mxu0 %v13773_v57  ;;  %9932 = vmatprep.subr.bf16.mxu1 %v13785_v41  ;;  %v6652_v57 = vld [vmem:[%s14114_s5 + $0x18] sm:$0xff] }
0x1674   :  { %v9939_v39 = vpack.c.bf16 %v6652_v57, %v6651_v12 }
0x1676   :  { %9902 = vmatpush1.bf16.msra.mxu0 %v13797_v59  ;;  %9934 = vmatpush1.bf16.msra.mxu1 %v13801_v15 }
0x1677   :  { %9936 = vmatprep.subr.bf16.mxu0 %v9935_v48 }
0x172c   :  { %v6303_v50 = vpop.f32.mrb[44].mxu0  ;;  %v6374_v6 = vpop.f32.mrb[44].mxu1 }
0x172d   :  { %v10043_v58 = vadd.f32 %v6303_v50, %v13401_v42  ;;  %v6305_v21 = vpop.f32.mrb[45].mxu0  ;;  %v6376_v14 = vpop.f32.mrb[45].mxu1  ;;  %v10059_v63 = vadd.f32 %v6374_v6, %v13413_v61  ;;  %v6810_v50 = vld [vmem:[%s14115_s7 + $0x48] sm:$0xff] }
0x172e   :  { %v10044_v24 = vadd.f32 %v6305_v21, %v13404_v28  ;;  %v10060_v35 = vadd.f32 %v6376_v14, %v13409_v16  ;;  %v6812_v21 = vld [vmem:[%s14115_s7 + $0x58] sm:$0xff] }
0x172f   :  { %v8063_v44 = vmul.f32 -1.442695, %v10043_v58  ;;  %v6811_v58 = vld [vmem:[%s14115_s7 + $0x50] sm:$0xff] }
0x1730   :  { %v8064_v9 = vmul.f32 -1.442695, %v10044_v24  ;;  %v8065_v13 = vmul.f32 -1.442695, %v10060_v35  ;;  %v9987_v14 = vpack.c.bf16 %v6812_v21, %v6811_v58  ;;  %v6813_v24 = vld [vmem:[%s14115_s7 + $0x60] sm:$0xff]  ;;  %v6815_v35 = vld [vmem:[%s14115_s7 + $0x70] sm:$0xff] }
0x1731   :  { %10483 = vpow2.f32 %v8063_v44  ;;  %v6814_v44 = vld [vmem:[%s14115_s7 + $0x68] sm:$0xff] }
0x1732   :  { %10485 = vpow2.f32 %v8064_v9  ;;  %v9991_v9 = vpack.c.bf16 %v6814_v44, %v6813_v24 }
0x1733   :  { %10487 = vpow2.f32 %v8065_v13  ;;  %v6816_v13 = vld [vmem:[%s14115_s7 + $0x78] sm:$0xff] }
0x1734   :  { %10489 = vtanh.f32 %v10059_v63  ;;  %v9995_v63 = vpack.c.bf16 %v6816_v13, %v6815_v35 }
0x173b   :  { %v10484_v54 = vpop.eup %10483 }
0x173c   :  { %v10486_v29 = vpop.eup %10485  ;;  %v6382_v40 = vadd.f32 1.0, %v10484_v54 }
0x173d   :  { %v6388_v17 = vadd.f32 1.0, %v10486_v29  ;;  %v10488_v55 = vpop.eup %10487 }
0x173e   :  { %10491 = vrcp.f32 %v6382_v40  ;;  %v10490_v23 = vpop.eup %10489  ;;  %v6395_v27 = vadd.f32 1.0, %v10488_v55 }
0x173f   :  { %10493 = vrcp.f32 %v6388_v17 }
0x1740   :  { %10495 = vrcp.f32 %v6395_v27 }
0x1748   :  { %v10492_v10 = vpop.eup %10491 }
0x1749   :  { %v10494_v32 = vpop.eup %10493  ;;  %v6399_v52 = vmul.f32 %v10492_v10, %v10490_v23 }
0x174a   :  { %v6398_v56 = vmul.f32 %v10494_v32, %v13905_v26  ;;  %v10496_v41 = vpop.eup %10495  ;;  %v9967_v26 = vpack.c.bf16 %v6802_v53, %v6801_v34 }
0x174c   :  { %v13955_v51 = vadd.f32 %v6399_v52, %v6398_v56  ;;  %9968 = vmatprep.subr.bf16.mxu1 %v9967_v26 }
0x174e   :  { %10497 = vtanh.f32 %v13955_v51 }
0x1758   :  { %v10498_v59 = vpop.eup %10497 }
0x1759   :  { %v6402_v15 = vmul.f32 %v10498_v59, %v10496_v41 }
0x175b   :  { %6537 = vmatmul.mubr.f32.vlgmr.msra.gmra.mrb[46].mxu0 %v6402_v15  ;;  %6608 = vmatmul.mubr.f32.vlgmr.msra.gmra.mrb[46].mxu1 %v6402_v15 }
0x175c   :  { %9938 = vmatpush3.bf16.msra.mxu0 %v9935_v48  ;;  %8215 = vmatprep.mubr.f32.mxu0 %v13422_v5  ;;  %v6658_v5 = vld [vmem:[%s14114_s5 + $0x48] sm:$0xff]  ;;  %v6809_v48 = vld [vmem:[%s14115_s7 + $0x40] sm:$0xff] }
0x175d   :  { %9940 = vmatprep.subr.bf16.mxu0 %v9939_v39  ;;  %v9951_v43 = vpack.c.bf16 %v6658_v5, %v6657_v37  ;;  %9970 = vmatpush3.bf16.msra.mxu1 %v9967_v26  ;;  %v9983_v6 = vpack.c.bf16 %v6810_v50, %v6809_v48 }
0x1760   :  { %9942 = vmatpush3.bf16.msra.mxu0 %v9939_v39 }
0x1761   :  { %9944 = vmatprep.subr.bf16.mxu0 %v9943_v47 }
0x1764   :  { %9946 = vmatpush3.bf16.msra.mxu0 %v9943_v47 }
0x1765   :  { %9948 = vmatprep.subr.bf16.mxu0 %v9947_v31 }
0x1768   :  { %9950 = vmatpush3.bf16.msra.mxu0 %v9947_v31 }
0x1769   :  { %9952 = vmatprep.subr.bf16.mxu0 %v9951_v43 }
0x176c   :  { %9954 = vmatpush3.bf16.msra.mxu0 %v9951_v43 }
0x176d   :  { %9956 = vmatprep.subr.bf16.mxu0 %v9955_v45 }
0x1770   :  { %9958 = vmatpush3.bf16.msra.mxu0 %v9955_v45 }
0x1771   :  { %9960 = vmatprep.subr.bf16.mxu0 %v9959_v36 }
0x1774   :  { %9962 = vmatpush3.bf16.msra.mxu0 %v9959_v36 }
0x1775   :  { %9964 = vmatprep.subr.bf16.mxu0 %v9963_v22 }
0x1778   :  { %9966 = vmatpush3.bf16.msra.mxu0 %v9963_v22 }
0x177b   :  { %8216 = vmatmul.mubr.f32.vlgmr.msra.gmra.mrb[48].mxu0 %v13468_v46  ;;  %v6803_v46 = vld [vmem:[%s14115_s7 + $0x10] sm:$0xff] }
0x177c   :  { %8218 = vmatprep.mubr.f32.mxu0 %v13512_v18  ;;  %v6804_v18 = vld [vmem:[%s14115_s7 + $0x18] sm:$0xff] }
0x177f   :  { %8219 = vmatmul.mubr.f32.gmra.mrb[50].mxu0 %v13816_v2  ;;  %v9971_v2 = vpack.c.bf16 %v6804_v18, %v6803_v46 }
0x1780   :  { %8221 = vmatprep.mubr.f32.mxu0 %v13862_v20  ;;  %v6805_v20 = vld [vmem:[%s14115_s7 + $0x20] sm:$0xff] }
0x1781   :  { %9972 = vmatprep.subr.bf16.mxu1 %v9971_v2  ;;  %v9975_v4 = vpack.c.bf16 %v6806_v19, %v6805_v20 }
0x1782   :  { %9974 = vmatpush3.bf16.msra.mxu1 %v9971_v2 }
0x1783   :  { %8222 = vmatmul.mubr.f32.gmra.mrb[52].mxu0 %v13908_v62  ;;  %9976 = vmatprep.subr.bf16.mxu1 %v9975_v4  ;;  %v6807_v62 = vld [vmem:[%s14115_s7 + $0x30] sm:$0xff] }
0x1784   :  { %8224 = vmatprep.mubr.f32.mxu0 %v6402_v15  ;;  %v9979_v33 = vpack.c.bf16 %v6808_v60, %v6807_v62 }
0x1786   :  { %9978 = vmatpush3.bf16.msra.mxu1 %v9975_v4 }
0x1787   :  { %9980 = vmatprep.subr.bf16.mxu1 %v9979_v33 }
0x178a   :  { %9982 = vmatpush3.bf16.msra.mxu1 %v9979_v33  ;;  %v8134_v33 = vld [vmem:[%s14117_s8] ss:$0 sm:$0xff] }
0x178b   :  { %9984 = vmatprep.subr.bf16.mxu1 %v9983_v6 }
0x178e   :  { %9986 = vmatpush3.bf16.msra.mxu1 %v9983_v6 }
0x178f   :  { %9988 = vmatprep.subr.bf16.mxu1 %v9987_v14 }
0x1792   :  { %9990 = vmatpush3.bf16.msra.mxu1 %v9987_v14 }
0x1793   :  { %9992 = vmatprep.subr.bf16.mxu1 %v9991_v9 }
0x1796   :  { %9994 = vmatpush3.bf16.msra.mxu1 %v9991_v9 }
0x1797   :  { %9996 = vmatprep.subr.bf16.mxu1 %v9995_v63 }
0x179a   :  { %9998 = vmatpush3.bf16.msra.mxu1 %v9995_v63 }
0x182e   :  { %v6538_v54 = vpop.f32.mrb[46].mxu0  ;;  %v6609_v29 = vpop.f32.mrb[46].mxu1 }
0x182f   :  { %v10045_v40 = vadd.f32 %v6538_v54, %v13401_v42  ;;  %v6540_v17 = vpop.f32.mrb[47].mxu0  ;;  %v6611_v55 = vpop.f32.mrb[47].mxu1  ;;  %v10061_v56 = vadd.f32 %v6609_v29, %v13413_v61 }
0x1830   :  { %v10046_v23 = vadd.f32 %v6540_v17, %v13404_v28  ;;  %v10062_v52 = vadd.f32 %v6611_v55, %v13409_v16  ;;  %v14062_v16 = vld [vmem:[%s14116_s6] ss:$0 sm:$0xff] }
0x1831   :  { %v8130_v10 = vmul.f32 -1.442695, %v10045_v40 }
0x1832   :  { %v8131_v32 = vmul.f32 -1.442695, %v10046_v23  ;;  %v8132_v27 = vmul.f32 -1.442695, %v10062_v52 }
0x1833   :  { %10499 = vpow2.f32 %v8130_v10 }
0x1834   :  { %10501 = vpow2.f32 %v8131_v32 }
0x1835   :  { %10503 = vpow2.f32 %v8132_v27 }
0x1836   :  { %10505 = vtanh.f32 %v10061_v56 }
0x183d   :  { %v10500_v12 = vpop.eup %10499 }
0x183e   :  { %v10502_v57 = vpop.eup %10501  ;;  %v6617_v41 = vadd.f32 1.0, %v10500_v12 }
0x183f   :  { %v6623_v59 = vadd.f32 1.0, %v10502_v57  ;;  %v10504_v42 = vpop.eup %10503 }
0x1840   :  { %10507 = vrcp.f32 %v6617_v41  ;;  %v10506_v15 = vpop.eup %10505  ;;  %v6630_v0 = vadd.f32 1.0, %v10504_v42 }
0x1841   :  { %10509 = vrcp.f32 %v6623_v59 }
0x1842   :  { %10511 = vrcp.f32 %v6630_v0 }
0x184a   :  { %v10508_v28 = vpop.eup %10507 }
0x184b   :  { %v10510_v39 = vpop.eup %10509  ;;  %v6634_v38 = vmul.f32 %v10508_v28, %v10506_v15 }
0x184c   :  { %v6633_v47 = vmul.f32 %v10510_v39, %v13955_v51  ;;  %v10512_v46 = vpop.eup %10511 }
0x184e   :  { %v8217_v61 = vpop.f32.mrb[48].mxu0  ;;  %v6635_v1 = vadd.f32 %v6634_v38, %v6633_v47 }
0x184f   :  { %v6744_v25 = vadd.f32 %v8217_v61, %v14062_v16  ;;  %v6738_v31 = vpop.f32.mrb[49].mxu0 }
0x1850   :  { %v6739_v37 = vadd.f32 %v14062_v16, %v6738_v31  ;;  %10513 = vtanh.f32 %v6635_v1  ;;  %6951 = vst [vmem:[%s14112_s13 + $0x10] sm:$0xff] %v6635_v1 }
0x1851   :  { %v6786_v5 = vmul.f32 0.01, %v6744_v25  ;;  %vm6778_vm0 = vcmp.ge.f32.partialorder %v6744_v25, 0.0 }
0x1852   :  { %v6785_v51 = vmul.f32 0.01, %v6739_v37  ;;  %v8220_v43 = vpop.f32.mrb[50].mxu0  ;;  %vm6777_vm1 = vcmp.ge.f32.partialorder %v6739_v37, 0.0 }
0x1853   :  { %v6754_v49 = vadd.f32 %v8220_v43, %v14062_v16  ;;  %v6748_v11 = vpop.f32.mrb[51].mxu0  ;;  %v6794_v36 = vsel %vm6778_vm0, %v6744_v25, %v6786_v5 }
0x1854   :  { %v6749_v45 = vadd.f32 %v14062_v16, %v6748_v11  ;;  %v6793_v3 = vsel %vm6777_vm1, %v6739_v37, %v6785_v51 }
0x1855   :  { %v6788_v8 = vmul.f32 0.01, %v6754_v49  ;;  %8259 = vmatprep.mubr.f32.mxu1 %v6793_v3  ;;  %vm6780_vm3 = vcmp.ge.f32.partialorder %v6754_v49, 0.0 }
0x1856   :  { %v6787_v7 = vmul.f32 0.01, %v6749_v45  ;;  %v8223_v30 = vpop.f32.mrb[52].mxu0  ;;  %8260 = vmatmul.mubr.f32.vlgmr.msra.gmra.mrb[48].mxu1 %v6794_v36  ;;  %vm6779_vm2 = vcmp.ge.f32.partialorder %v6749_v45, 0.0 }
0x1857   :  { %v6764_v22 = vadd.f32 %v8223_v30, %v14062_v16  ;;  %v6758_v34 = vpop.f32.mrb[53].mxu0  ;;  %v6796_v2 = vsel %vm6780_vm3, %v6754_v49, %v6788_v8 }
0x1858   :  { %v6759_v53 = vadd.f32 %v14062_v16, %v6758_v34  ;;  %v6795_v26 = vsel %vm6779_vm2, %v6749_v45, %v6787_v7 }
0x1859   :  { %v6790_v18 = vmul.f32 0.01, %v6764_v22  ;;  %8262 = vmatprep.mubr.f32.mxu1 %v6795_v26  ;;  %vm6782_vm5 = vcmp.ge.f32.partialorder %v6764_v22, 0.0 }
0x185a   :  { %v10514_v20 = vpop.eup %10513  ;;  %v6789_v19 = vmul.f32 0.01, %v6759_v53  ;;  %8263 = vmatmul.mubr.f32.gmra.mrb[50].mxu1 %v6796_v2  ;;  %vm6781_vm4 = vcmp.ge.f32.partialorder %v6759_v53, 0.0 }
0x185b   :  { %v6637_v4 = vmul.f32 %v10514_v20, %v10512_v46  ;;  %v6798_v60 = vsel %vm6782_vm5, %v6764_v22, %v6790_v18 }
0x185c   :  { %v6797_v62 = vsel %vm6781_vm4, %v6759_v53, %v6789_v19 }
0x185d   :  { %8265 = vmatprep.mubr.f32.mxu1 %v6797_v62  ;;  %8225 = vmatmul.mubr.f32.gmra.mrb[54].mxu0 %v6637_v4  ;;  %6945 = vst [vmem:[%s14113_s12 + $0x10] sm:$0xff] %v6637_v4 }
0x185e   :  { %8266 = vmatmul.mubr.f32.gmra.mrb[52].mxu1 %v6798_v60 }
0x1929   :  { %v8261_v48 = vpop.f32.mrb[48].mxu1 }
0x192a   :  { %v6896_v50 = vadd.f32 %v8261_v48, %v8134_v33  ;;  %v6890_v6 = vpop.f32.mrb[49].mxu1 }
0x192b   :  { %v6891_v58 = vadd.f32 %v8134_v33, %v6890_v6 }
0x192c   :  { %6930 = vst [vmem:[%s14118_s11 + $0x8] sm:$0xff] %v6896_v50 }
0x192d   :  { %6929 = vst [vmem:[%s14118_s11] sm:$0xff] %v6891_v58  ;;  %v8264_v21 = vpop.f32.mrb[50].mxu1 }
0x192e   :  { %v6906_v14 = vadd.f32 %v8264_v21, %v8134_v33  ;;  %v6900_v24 = vpop.f32.mrb[51].mxu1 }
0x192f   :  { %v6901_v44 = vadd.f32 %v8134_v33, %v6900_v24 }
0x1930   :  { %6932 = vst [vmem:[%s14118_s11 + $0x18] sm:$0xff] %v6906_v14  ;;  %v8226_v9 = vpop.f32.mrb[54].mxu0 }
0x1931   :  { %6931 = vst [vmem:[%s14118_s11 + $0x10] sm:$0xff] %v6901_v44  ;;  %v6774_v35 = vadd.f32 %v8226_v9, %v14062_v16  ;;  %v8267_v13 = vpop.f32.mrb[52].mxu1  ;;  %v6768_v63 = vpop.f32.mrb[55].mxu0 }
0x1932   :  { %v6916_v54 = vadd.f32 %v8267_v13, %v8134_v33  ;;  %v6769_v29 = vadd.f32 %v14062_v16, %v6768_v63  ;;  %v6910_v40 = vpop.f32.mrb[53].mxu1 }
0x1933   :  { %v6792_v17 = vmul.f32 0.01, %v6774_v35  ;;  %v6911_v55 = vadd.f32 %v8134_v33, %v6910_v40  ;;  %vm6784_vm7 = vcmp.ge.f32.partialorder %v6774_v35, 0.0 }
0x1934   :  { %6934 = vst [vmem:[%s14118_s11 + $0x28] sm:$0xff] %v6916_v54  ;;  %v6791_v23 = vmul.f32 0.01, %v6769_v29  ;;  %vm6783_vm6 = vcmp.ge.f32.partialorder %v6769_v29, 0.0 }
0x1935   :  { %6933 = vst [vmem:[%s14118_s11 + $0x20] sm:$0xff] %v6911_v55  ;;  %v6800_v32 = vsel %vm6784_vm7, %v6774_v35, %v6792_v17 }
0x1936   :  { %v6799_v10 = vsel %vm6783_vm6, %v6769_v29, %v6791_v23 }
0x1937   :  { %8268 = vmatprep.mubr.f32.mxu1 %v6799_v10 }
0x1938   :  { %8269 = vmatmul.mubr.f32.gmra.mrb[54].mxu1 %v6800_v32 }
0x1a0b   :  { %v8270_v52 = vpop.f32.mrb[54].mxu1 }
0x1a0c   :  { %v6926_v27 = vadd.f32 %v8270_v52, %v8134_v33  ;;  %v6920_v56 = vpop.f32.mrb[55].mxu1 }
0x1a0d   :  { %v6921_v12 = vadd.f32 %v8134_v33, %v6920_v56 }
0x1a0e   :  { %6936 = vst [vmem:[%s14118_s11 + $0x38] sm:$0xff] %v6926_v27 }
0x1a0f   :  { %6935 = vst [vmem:[%s14118_s11 + $0x30] sm:$0xff] %v6921_v12 }

</bundles_post_ra>
